<compile_context>
chip_gen: v7x
topology: tpu7x:2x2x1
jax: 0.10.0
libtpu: 0.0.40
codegen_flags: <defaults>
</compile_context>

<pallas_src>
import math
import functools

import jax
import jax.numpy as jnp
from jax import lax
from jax.experimental import pallas as pl
from jax.experimental.pallas import tpu as pltpu

# ----- model hyper-parameters (small, consistent with the module) -----
D_MODEL = 32
N_HEAD = 8
D_HEAD = D_MODEL // N_HEAD
D_FF = 64
N_LAYERS = 2
VOCAB = 50
EPS_CUSTOM = 1e-6          # custom LayerNorm inside attention / FFN
EPS_TORCH = 1e-5           # nn.LayerNorm before the layer stack
VEC_W = max(D_MODEL, D_FF)  # row width of the packed vector bank
N_VEC_PER_LAYER = 10        # slf_bo,slf_lg,slf_lb, enc_bo,enc_lg,enc_lb, ffn_b1,ffn_b2,ffn_lg,ffn_lb


# ---------------------------------------------------------------------------
# In-kernel helpers
# ---------------------------------------------------------------------------
def _expand_heads(a, batch):
    """(H, ...) -> (batch*H, ...): replicate over a new leading batch axis (g = b*H + h)."""
    return jnp.broadcast_to(a[None], (batch,) + a.shape).reshape(
        (batch * a.shape[0],) + a.shape[1:])


def _group_batch_heads(x, n_head):
    """(B, S, D) -> (B*H, S, D): replicate activations over heads (g = b*H + h)."""
    b, s, d = x.shape
    return jnp.broadcast_to(x[:, None], (b, n_head, s, d)).reshape(b * n_head, s, d)


def _custom_layernorm(x, g, b, eps=EPS_CUSTOM):
    # PyTorch custom LayerNorm: a_2 * (x - mean) / (std + eps) + b_2,
    # std uses Bessel correction (divide by N-1), eps added to std (not var).
    d = x.shape[-1]
    mean = jnp.mean(x, axis=-1, keepdims=True)
    var = jnp.sum((x - mean) ** 2, axis=-1, keepdims=True) * (1.0 / (d - 1))
    std = jnp.sqrt(var)
    return g * (x - mean) / (std + eps) + b


def _attention_block(xq, xkv, wq, wk, wv, bq, bk, bv, wo, bo, lg, lb, *, n_head):
    """Multi-head attention with (batch, head) as a single leading group axis.

    xq: (B, Sq, D) query-side input (also the residual);  xkv: (B, Sk, D)
    wq/wk/wv/wo: (H, d_head, D)   bq/bk/bv: (H, 1, d_head)   bo/lg/lb: (1, D)
    The 1/sqrt(d_head) scale is pre-folded into wq / bq at pack time.
    """
    batch, sq, d_model = xq.shape

    qg = _group_batch_heads(xq, n_head)       # (G, Sq, D)
    kg = _group_batch_heads(xkv, n_head)      # (G, Sk, D)

    wq_g = _expand_heads(wq, batch)           # (G, dh, D)
    wk_g = _expand_heads(wk, batch)
    wv_g = _expand_heads(wv, batch)
    wo_g = _expand_heads(wo, batch)
    bq_g = _expand_heads(bq, batch)           # (G, 1, dh)
    bk_g = _expand_heads(bk, batch)
    bv_g = _expand_heads(bv, batch)

    # Per-(batch, head) projections: one batched matmul each.
    q = jnp.einsum('gsd,ged->gse', qg, wq_g, preferred_element_type=jnp.float32) + bq_g
    k = jnp.einsum('gsd,ged->gse', kg, wk_g, preferred_element_type=jnp.float32) + bk_g
    v = jnp.einsum('gsd,ged->gse', kg, wv_g, preferred_element_type=jnp.float32) + bv_g

    # Scores + softmax for ALL (batch, head) groups in one shot.
    s = jnp.einsum('gqe,gke->gqk', q, k, preferred_element_type=jnp.float32)
    s = s - jnp.max(s, axis=-1, keepdims=True)
    p = jnp.exp(s)
    p = p / jnp.sum(p, axis=-1, keepdims=True)

    ctx = jnp.einsum('gqk,gke->gqe', p, v, preferred_element_type=jnp.float32)
    # Output projection: per-head slice of W_o in one batched matmul, then reduce heads.
    proj = jnp.einsum('gqe,ged->gqd', ctx, wo_g, preferred_element_type=jnp.float32)
    out = proj.reshape(batch, n_head, sq, d_model).sum(axis=1) + bo + xq
    return _custom_layernorm(out, lg, lb)


# ---------------------------------------------------------------------------
# Fused decoder-stack kernel (whole batch + whole stack in one invocation)
# ---------------------------------------------------------------------------
def decoder_stack_kernel(x_ref, enc_ref,
                         slf_wqkv_ref, slf_bqkv_ref, slf_wo_ref,
                         enc_wqkv_ref, enc_bqkv_ref, enc_wo_ref,
                         ffn_w1_ref, ffn_w2_ref, vecs_ref,
                         o_ref, *, n_head, n_layers):
    x = x_ref[...]            # (B, S, D)
    enc = enc_ref[...]        # (B, Se, D)
    d_model = x.shape[-1]
    vecs = vecs_ref[...]      # (2 + 10*L, VEC_W) packed bias / LN vectors

    def vrow(idx, width=d_model):
        return vecs[idx:idx + 1, :width]        # (1, width) — broadcasts over (B, S, width)

    # ---- initial nn.LayerNorm (biased variance, eps inside the sqrt) ----
    mean = jnp.mean(x, axis=-1, keepdims=True)
    var = jnp.mean((x - mean) ** 2, axis=-1, keepdims=True)
    x = (x - mean) * lax.rsqrt(var + EPS_TORCH) * vrow(0) + vrow(1)

    for l in range(n_layers):                   # static unroll; weights stay in VMEM
        r = 2 + l * N_VEC_PER_LAYER

        # ---- self-attention (mask is None in this example) ----
        x = _attention_block(
            x, x,
            slf_wqkv_ref[3 * l + 0], slf_wqkv_ref[3 * l + 1], slf_wqkv_ref[3 * l + 2],
            slf_bqkv_ref[3 * l + 0], slf_bqkv_ref[3 * l + 1], slf_bqkv_ref[3 * l + 2],
            slf_wo_ref[l], vrow(r + 0), vrow(r + 1), vrow(r + 2),
            n_head=n_head)

        # ---- encoder-decoder attention: Q from x, K/V from encoder memory ----
        x = _attention_block(
            x, enc,
            enc_wqkv_ref[3 * l + 0], enc_wqkv_ref[3 * l + 1], enc_wqkv_ref[3 * l + 2],
            enc_bqkv_ref[3 * l + 0], enc_bqkv_ref[3 * l + 1], enc_bqkv_ref[3 * l + 2],
            enc_wo_ref[l], vrow(r + 3), vrow(r + 4), vrow(r + 5),
            n_head=n_head)

        # ---- position-wise FFN ----
        w1 = ffn_w1_ref[l]                      # (D, F)
        w2 = ffn_w2_ref[l]                      # (F, D)
        d_ff = w1.shape[-1]
        h = jnp.einsum('bsd,df->bsf', x, w1,
                       preferred_element_type=jnp.float32) + vrow(r + 6, d_ff)
        h = jnp.maximum(h, 0.0)
        y = jnp.einsum('bsf,fd->bsd', h, w2,
                       preferred_element_type=jnp.float32) + vrow(r + 7) + x
        x = _custom_layernorm(y, vrow(r + 8), vrow(r + 9))

    o_ref[...] = x


# ---------------------------------------------------------------------------
# pallas_call wrapper: NO grid (single step, whole batch); every operand is a
# whole-array VMEM block (no per-step DMA / pipelining overhead).
# ---------------------------------------------------------------------------
def decoder_stack(x, enc_output, packed):
    B, S, D = x.shape
    operands = (x, enc_output,
                packed['slf_wqkv'], packed['slf_bqkv'], packed['slf_wo'],
                packed['enc_wqkv'], packed['enc_bqkv'], packed['enc_wo'],
                packed['ffn_w1'], packed['ffn_w2'], packed['vecs'])

    vmem_spec = pl.BlockSpec(memory_space=pltpu.MemorySpace.VMEM)
    kernel = functools.partial(decoder_stack_kernel, n_head=N_HEAD, n_layers=N_LAYERS)

    return pl.pallas_call(
        kernel,
        out_shape=jax.ShapeDtypeStruct((B, S, D), jnp.float32),
        in_specs=[vmem_spec] * len(operands),
        out_specs=vmem_spec,
        cost_estimate=pl.CostEstimate(                 # rough, advisory only
            flops=900_000, transcendentals=4_500, bytes_accessed=120_000),
    )(*operands)


# ---------------------------------------------------------------------------
# Parameters (deterministic synthetic init mirroring the torch module) + packing
# ---------------------------------------------------------------------------
def make_pe(max_len, d_model):
    position = jnp.arange(max_len, dtype=jnp.float32)[:, None]
    div_term = jnp.exp(jnp.arange(0, d_model, 2, dtype=jnp.float32)
                       * (-math.log(10000.0) / d_model))
    pe = jnp.zeros((max_len, d_model), jnp.float32)
    pe = pe.at[:, 0::2].set(jnp.sin(position * div_term))
    pe = pe.at[:, 1::2].set(jnp.cos(position * div_term))
    return pe


def init_params(key):
    """Logical parameters, laid out like the PyTorch module (math convention y = x @ W + b)."""
    keys = iter(jax.random.split(key, 256))
    nk = lambda: next(keys)

    def w(din, dout):
        return jax.random.normal(nk(), (din, dout), jnp.float32) * (1.0 / math.sqrt(din))

    def b(dout):
        return jax.random.normal(nk(), (dout,), jnp.float32) * 0.01

    params = {
        'emb': jax.random.normal(nk(), (VOCAB, D_MODEL), jnp.float32),
        'pe': make_pe(64, D_MODEL),
        'ln0_g': jnp.ones((D_MODEL,), jnp.float32),
        'ln0_b': jnp.zeros((D_MODEL,), jnp.float32),
        'layers': [],
    }
    for _ in range(N_LAYERS):
        layer = {}
        for blk in ('slf', 'enc'):
            layer[blk] = dict(
                wq=w(D_MODEL, D_MODEL), bq=b(D_MODEL),
                wk=w(D_MODEL, D_MODEL), bk=b(D_MODEL),
                wv=w(D_MODEL, D_MODEL), bv=b(D_MODEL),
                wo=w(D_MODEL, D_MODEL), bo=b(D_MODEL),
                lg=jnp.ones((D_MODEL,), jnp.float32),
                lb=jnp.zeros((D_MODEL,), jnp.float32))
        layer['ffn'] = dict(
            w1=w(D_MODEL, D_FF), b1=b(D_FF),
            w2=w(D_FF, D_MODEL), b2=b(D_MODEL),
            lg=jnp.ones((D_MODEL,), jnp.float32),
            lb=jnp.zeros((D_MODEL,), jnp.float32))
        params['layers'].append(layer)
    return params


def pack_params(params):
    """Re-layout logical weights into the consolidated kernel operand set.

    Projection weights become (H, d_head, D) "output-major" per-head slabs (the attention
    scale is folded into the Q weights/biases); all small vectors go into one vector bank.
    """
    scale = 1.0 / math.sqrt(D_HEAD)

    def head_major(wmat):   # (D, D) -> (H, dh, D): out[h, e, d] = wmat[d, h*dh + e]
        return wmat.T.reshape(N_HEAD, D_HEAD, D_MODEL)

    def head_bias(bvec):    # (D,) -> (H, 1, dh)
        return bvec.reshape(N_HEAD, 1, D_HEAD)

    def pad_row(v):         # (n,) -> (VEC_W,)
        return jnp.pad(v, (0, VEC_W - v.shape[0]))

    slf_wqkv, slf_bqkv, slf_wo = [], [], []
    enc_wqkv, enc_bqkv, enc_wo = [], [], []
    ffn_w1, ffn_w2 = [], []
    vec_rows = [pad_row(params['ln0_g']), pad_row(params['ln0_b'])]

    for layer in params['layers']:
        for blk, wlist, blist, olist in (('slf', slf_wqkv, slf_bqkv, slf_wo),
                                         ('enc', enc_wqkv, enc_bqkv, enc_wo)):
            p = layer[blk]
            wlist += [head_major(p['wq'] * scale), head_major(p['wk']), head_major(p['wv'])]
            blist += [head_bias(p['bq'] * scale), head_bias(p['bk']), head_bias(p['bv'])]
            olist.append(p['wo'].reshape(N_HEAD, D_HEAD, D_MODEL))
        f = layer['ffn']
        ffn_w1.append(f['w1'])
        ffn_w2.append(f['w2'])
        s, e = layer['slf'], layer['enc']
        vec_rows += [pad_row(s['bo']), pad_row(s['lg']), pad_row(s['lb']),
                     pad_row(e['bo']), pad_row(e['lg']), pad_row(e['lb']),
                     pad_row(f['b1']), pad_row(f['b2']), pad_row(f['lg']), pad_row(f['lb'])]

    return {
        'slf_wqkv': jnp.stack(slf_wqkv),   # (3L, H, dh, D)
        'slf_bqkv': jnp.stack(slf_bqkv),   # (3L, H, 1, dh)
        'slf_wo':   jnp.stack(slf_wo),     # (L, H, dh, D)
        'enc_wqkv': jnp.stack(enc_wqkv),
        'enc_bqkv': jnp.stack(enc_bqkv),
        'enc_wo':   jnp.stack(enc_wo),
        'ffn_w1':   jnp.stack(ffn_w1),     # (L, D, F)
        'ffn_w2':   jnp.stack(ffn_w2),     # (L, F, D)
        'vecs':     jnp.stack(vec_rows),   # (2 + 10L, VEC_W)
    }


# ---------------------------------------------------------------------------
# Plain-JAX glue: embedding gather + positional encoding, then the fused kernel.
# ---------------------------------------------------------------------------
def decoder_forward(packed, emb, pe, tokens, enc_output):
    S = tokens.shape[1]
    x = emb[tokens] * math.sqrt(D_MODEL)          # (B, S, D); dropout = identity
    x = x + pe[None, :S, :]
    return decoder_stack(x, enc_output, packed)


if __name__ == "__main__":
    key = jax.random.PRNGKey(0)
    kp, kt, ke = jax.random.split(key, 3)

    params = init_params(kp)
    packed = pack_params(params)

    B, S, S_ENC = 2, 8, 8
    tokens = jax.random.randint(kt, (B, S), 0, VOCAB)                      # int token ids
    enc_output = jax.random.normal(ke, (B, S_ENC, D_MODEL), jnp.float32)   # encoder memory

    out = jax.jit(decoder_forward)(packed, params['emb'], params['pe'], tokens, enc_output)
    out = jax.block_until_ready(out)

    assert out.shape == (B, S, D_MODEL), out.shape
    assert jnp.all(jnp.isfinite(out))
    print("KERNEL_OK")
</pallas_src>

<mosaic_0001>
module attributes {stable_mosaic.version = 11 : i64} {
  func.func @decoder_stack_kernel(%arg0: memref<2x8x32xf32, #tpu.memory_space<vmem>>, %arg1: memref<2x8x32xf32, #tpu.memory_space<vmem>>, %arg2: memref<6x8x4x32xf32, #tpu.memory_space<vmem>>, %arg3: memref<6x8x1x4xf32, #tpu.memory_space<vmem>>, %arg4: memref<2x8x4x32xf32, #tpu.memory_space<vmem>>, %arg5: memref<6x8x4x32xf32, #tpu.memory_space<vmem>>, %arg6: memref<6x8x1x4xf32, #tpu.memory_space<vmem>>, %arg7: memref<2x8x4x32xf32, #tpu.memory_space<vmem>>, %arg8: memref<2x32x64xf32, #tpu.memory_space<vmem>>, %arg9: memref<2x64x32xf32, #tpu.memory_space<vmem>>, %arg10: memref<22x64xf32, #tpu.memory_space<vmem>>, %arg11: memref<2x8x32xf32, #tpu.memory_space<vmem>>) attributes {dimension_semantics = [], scalar_prefetch = 0 : i64, scratch_operands = 0 : i64, tpu.core_type = #tpu.core_type<tc>} {
    %c0 = arith.constant 0 : index
    %c0_0 = arith.constant 0 : index
    %c0_1 = arith.constant 0 : index
    %0 = vector.load %arg0[%c0, %c0_0, %c0_1] : memref<2x8x32xf32, #tpu.memory_space<vmem>>, vector<2x8x32xf32>
    %c0_2 = arith.constant 0 : index
    %c0_3 = arith.constant 0 : index
    %c0_4 = arith.constant 0 : index
    %1 = vector.load %arg1[%c0_2, %c0_3, %c0_4] : memref<2x8x32xf32, #tpu.memory_space<vmem>>, vector<2x8x32xf32>
    %c0_5 = arith.constant 0 : index
    %c0_6 = arith.constant 0 : index
    %2 = vector.load %arg10[%c0_5, %c0_6] : memref<22x64xf32, #tpu.memory_space<vmem>>, vector<22x64xf32>
    %cst = arith.constant dense<0.000000e+00> : vector<2x8xf32>
    %3 = vector.multi_reduction <add>, %0, %cst [2] : vector<2x8x32xf32> to vector<2x8xf32>
    %4 = vector.shape_cast %3 : vector<2x8xf32> to vector<2x8x1xf32>
    %cst_7 = arith.constant 3.200000e+01 : f32
    %5 = vector.broadcast %cst_7 : f32 to vector<2x8x1xf32>
    %6 = arith.divf %4, %5 : vector<2x8x1xf32>
    %7 = vector.broadcast %6 : vector<2x8x1xf32> to vector<2x8x32xf32>
    %8 = arith.subf %0, %7 : vector<2x8x32xf32>
    %9 = arith.mulf %8, %8 : vector<2x8x32xf32>
    %cst_8 = arith.constant dense<0.000000e+00> : vector<2x8xf32>
    %10 = vector.multi_reduction <add>, %9, %cst_8 [2] : vector<2x8x32xf32> to vector<2x8xf32>
    %11 = vector.shape_cast %10 : vector<2x8xf32> to vector<2x8x1xf32>
    %cst_9 = arith.constant 3.200000e+01 : f32
    %12 = vector.broadcast %cst_9 : f32 to vector<2x8x1xf32>
    %13 = arith.divf %11, %12 : vector<2x8x1xf32>
    %14 = vector.broadcast %6 : vector<2x8x1xf32> to vector<2x8x32xf32>
    %15 = arith.subf %0, %14 : vector<2x8x32xf32>
    %cst_10 = arith.constant 9.99999974E-6 : f32
    %16 = vector.broadcast %cst_10 : f32 to vector<2x8x1xf32>
    %17 = arith.addf %13, %16 : vector<2x8x1xf32>
    %18 = math.rsqrt %17 : vector<2x8x1xf32>
    %19 = vector.broadcast %18 : vector<2x8x1xf32> to vector<2x8x32xf32>
    %20 = arith.mulf %15, %19 : vector<2x8x32xf32>
    %21 = vector.extract_strided_slice %2 {offsets = [0, 0], sizes = [1, 32], strides = [1, 1]} : vector<22x64xf32> to vector<1x32xf32>
    %22 = vector.shape_cast %21 : vector<1x32xf32> to vector<1x1x32xf32>
    %23 = vector.broadcast %22 : vector<1x1x32xf32> to vector<2x8x32xf32>
    %24 = arith.mulf %20, %23 : vector<2x8x32xf32>
    %25 = vector.extract_strided_slice %2 {offsets = [1, 0], sizes = [1, 32], strides = [1, 1]} : vector<22x64xf32> to vector<1x32xf32>
    %26 = vector.shape_cast %25 : vector<1x32xf32> to vector<1x1x32xf32>
    %27 = vector.broadcast %26 : vector<1x1x32xf32> to vector<2x8x32xf32>
    %28 = arith.addf %24, %27 : vector<2x8x32xf32>
    %c0_11 = arith.constant 0 : index
    %c0_12 = arith.constant 0 : index
    %c0_13 = arith.constant 0 : index
    %c0_14 = arith.constant 0 : index
    %29 = vector.load %arg2[%c0_11, %c0_12, %c0_13, %c0_14] : memref<6x8x4x32xf32, #tpu.memory_space<vmem>>, vector<1x8x4x32xf32>
    %30 = vector.shape_cast %29 : vector<1x8x4x32xf32> to vector<8x4x32xf32>
    %c1 = arith.constant 1 : index
    %c0_15 = arith.constant 0 : index
    %c0_16 = arith.constant 0 : index
    %c0_17 = arith.constant 0 : index
    %31 = vector.load %arg2[%c1, %c0_15, %c0_16, %c0_17] : memref<6x8x4x32xf32, #tpu.memory_space<vmem>>, vector<1x8x4x32xf32>
    %32 = vector.shape_cast %31 : vector<1x8x4x32xf32> to vector<8x4x32xf32>
    %c2 = arith.constant 2 : index
    %c0_18 = arith.constant 0 : index
    %c0_19 = arith.constant 0 : index
    %c0_20 = arith.constant 0 : index
    %33 = vector.load %arg2[%c2, %c0_18, %c0_19, %c0_20] : memref<6x8x4x32xf32, #tpu.memory_space<vmem>>, vector<1x8x4x32xf32>
    %34 = vector.shape_cast %33 : vector<1x8x4x32xf32> to vector<8x4x32xf32>
    %c0_21 = arith.constant 0 : index
    %c0_22 = arith.constant 0 : index
    %c0_23 = arith.constant 0 : index
    %c0_24 = arith.constant 0 : index
    %35 = vector.load %arg3[%c0_21, %c0_22, %c0_23, %c0_24] : memref<6x8x1x4xf32, #tpu.memory_space<vmem>>, vector<1x8x1x4xf32>
    %36 = vector.shape_cast %35 : vector<1x8x1x4xf32> to vector<8x1x4xf32>
    %c1_25 = arith.constant 1 : index
    %c0_26 = arith.constant 0 : index
    %c0_27 = arith.constant 0 : index
    %c0_28 = arith.constant 0 : index
    %37 = vector.load %arg3[%c1_25, %c0_26, %c0_27, %c0_28] : memref<6x8x1x4xf32, #tpu.memory_space<vmem>>, vector<1x8x1x4xf32>
    %38 = vector.shape_cast %37 : vector<1x8x1x4xf32> to vector<8x1x4xf32>
    %c2_29 = arith.constant 2 : index
    %c0_30 = arith.constant 0 : index
    %c0_31 = arith.constant 0 : index
    %c0_32 = arith.constant 0 : index
    %39 = vector.load %arg3[%c2_29, %c0_30, %c0_31, %c0_32] : memref<6x8x1x4xf32, #tpu.memory_space<vmem>>, vector<1x8x1x4xf32>
    %40 = vector.shape_cast %39 : vector<1x8x1x4xf32> to vector<8x1x4xf32>
    %c0_33 = arith.constant 0 : index
    %c0_34 = arith.constant 0 : index
    %c0_35 = arith.constant 0 : index
    %c0_36 = arith.constant 0 : index
    %41 = vector.load %arg4[%c0_33, %c0_34, %c0_35, %c0_36] : memref<2x8x4x32xf32, #tpu.memory_space<vmem>>, vector<1x8x4x32xf32>
    %42 = vector.shape_cast %41 : vector<1x8x4x32xf32> to vector<8x4x32xf32>
    %43 = vector.extract_strided_slice %2 {offsets = [2, 0], sizes = [1, 32], strides = [1, 1]} : vector<22x64xf32> to vector<1x32xf32>
    %44 = vector.extract_strided_slice %2 {offsets = [3, 0], sizes = [1, 32], strides = [1, 1]} : vector<22x64xf32> to vector<1x32xf32>
    %45 = vector.extract_strided_slice %2 {offsets = [4, 0], sizes = [1, 32], strides = [1, 1]} : vector<22x64xf32> to vector<1x32xf32>
    %46 = vector.shape_cast %28 : vector<2x8x32xf32> to vector<2x1x8x32xf32>
    %47 = vector.shape_cast %46 : vector<2x1x8x32xf32> to vector<2x1x8x32xf32>
    %48 = vector.broadcast %47 : vector<2x1x8x32xf32> to vector<2x8x8x32xf32>
    %49 = vector.shape_cast %48 : vector<2x8x8x32xf32> to vector<16x8x32xf32>
    %50 = vector.shape_cast %28 : vector<2x8x32xf32> to vector<2x1x8x32xf32>
    %51 = vector.shape_cast %50 : vector<2x1x8x32xf32> to vector<2x1x8x32xf32>
    %52 = vector.broadcast %51 : vector<2x1x8x32xf32> to vector<2x8x8x32xf32>
    %53 = vector.shape_cast %52 : vector<2x8x8x32xf32> to vector<16x8x32xf32>
    %54 = vector.shape_cast %30 : vector<8x4x32xf32> to vector<1x8x4x32xf32>
    %55 = vector.shape_cast %54 : vector<1x8x4x32xf32> to vector<1x8x4x32xf32>
    %56 = vector.broadcast %55 : vector<1x8x4x32xf32> to vector<2x8x4x32xf32>
    %57 = vector.shape_cast %56 : vector<2x8x4x32xf32> to vector<16x4x32xf32>
    %58 = vector.shape_cast %32 : vector<8x4x32xf32> to vector<1x8x4x32xf32>
    %59 = vector.shape_cast %58 : vector<1x8x4x32xf32> to vector<1x8x4x32xf32>
    %60 = vector.broadcast %59 : vector<1x8x4x32xf32> to vector<2x8x4x32xf32>
    %61 = vector.shape_cast %60 : vector<2x8x4x32xf32> to vector<16x4x32xf32>
    %62 = vector.shape_cast %34 : vector<8x4x32xf32> to vector<1x8x4x32xf32>
    %63 = vector.shape_cast %62 : vector<1x8x4x32xf32> to vector<1x8x4x32xf32>
    %64 = vector.broadcast %63 : vector<1x8x4x32xf32> to vector<2x8x4x32xf32>
    %65 = vector.shape_cast %64 : vector<2x8x4x32xf32> to vector<16x4x32xf32>
    %66 = vector.shape_cast %42 : vector<8x4x32xf32> to vector<1x8x4x32xf32>
    %67 = vector.shape_cast %66 : vector<1x8x4x32xf32> to vector<1x8x4x32xf32>
    %68 = vector.broadcast %67 : vector<1x8x4x32xf32> to vector<2x8x4x32xf32>
    %69 = vector.shape_cast %68 : vector<2x8x4x32xf32> to vector<16x4x32xf32>
    %70 = vector.shape_cast %36 : vector<8x1x4xf32> to vector<1x8x1x4xf32>
    %71 = vector.shape_cast %70 : vector<1x8x1x4xf32> to vector<1x8x1x4xf32>
    %72 = vector.broadcast %71 : vector<1x8x1x4xf32> to vector<2x8x1x4xf32>
    %73 = vector.shape_cast %72 : vector<2x8x1x4xf32> to vector<16x1x4xf32>
    %74 = vector.shape_cast %38 : vector<8x1x4xf32> to vector<1x8x1x4xf32>
    %75 = vector.shape_cast %74 : vector<1x8x1x4xf32> to vector<1x8x1x4xf32>
    %76 = vector.broadcast %75 : vector<1x8x1x4xf32> to vector<2x8x1x4xf32>
    %77 = vector.shape_cast %76 : vector<2x8x1x4xf32> to vector<16x1x4xf32>
    %78 = vector.shape_cast %40 : vector<8x1x4xf32> to vector<1x8x1x4xf32>
    %79 = vector.shape_cast %78 : vector<1x8x1x4xf32> to vector<1x8x1x4xf32>
    %80 = vector.broadcast %79 : vector<1x8x1x4xf32> to vector<2x8x1x4xf32>
    %81 = vector.shape_cast %80 : vector<2x8x1x4xf32> to vector<16x1x4xf32>
    "tpu.trace_start"() <{level = 10 : i32, message = "gsd,ged->gse"}> : () -> ()
    %cst_37 = arith.constant dense<0.000000e+00> : vector<16x8x4xf32>
    %82 = tpu.matmul %49, %57, %cst_37 {dimension_numbers = #tpu.dot_dimension_numbers<[2], [2], [1], [1], [0, 0, 0, 1, 1, 1], [0], [0]>} : vector<16x8x32xf32>, vector<16x4x32xf32>, vector<16x8x4xf32> -> vector<16x8x4xf32>
    "tpu.trace_stop"() : () -> ()
    %83 = vector.broadcast %73 : vector<16x1x4xf32> to vector<16x8x4xf32>
    %84 = arith.addf %82, %83 : vector<16x8x4xf32>
    "tpu.trace_start"() <{level = 10 : i32, message = "gsd,ged->gse"}> : () -> ()
    %cst_38 = arith.constant dense<0.000000e+00> : vector<16x8x4xf32>
    %85 = tpu.matmul %53, %61, %cst_38 {dimension_numbers = #tpu.dot_dimension_numbers<[2], [2], [1], [1], [0, 0, 0, 1, 1, 1], [0], [0]>} : vector<16x8x32xf32>, vector<16x4x32xf32>, vector<16x8x4xf32> -> vector<16x8x4xf32>
    "tpu.trace_stop"() : () -> ()
    %86 = vector.broadcast %77 : vector<16x1x4xf32> to vector<16x8x4xf32>
    %87 = arith.addf %85, %86 : vector<16x8x4xf32>
    "tpu.trace_start"() <{level = 10 : i32, message = "gsd,ged->gse"}> : () -> ()
    %cst_39 = arith.constant dense<0.000000e+00> : vector<16x8x4xf32>
    %88 = tpu.matmul %53, %65, %cst_39 {dimension_numbers = #tpu.dot_dimension_numbers<[2], [2], [1], [1], [0, 0, 0, 1, 1, 1], [0], [0]>} : vector<16x8x32xf32>, vector<16x4x32xf32>, vector<16x8x4xf32> -> vector<16x8x4xf32>
    "tpu.trace_stop"() : () -> ()
    %89 = vector.broadcast %81 : vector<16x1x4xf32> to vector<16x8x4xf32>
    %90 = arith.addf %88, %89 : vector<16x8x4xf32>
    "tpu.trace_start"() <{level = 10 : i32, message = "gqe,gke->gqk"}> : () -> ()
    %cst_40 = arith.constant dense<0.000000e+00> : vector<16x8x8xf32>
    %91 = tpu.matmul %84, %87, %cst_40 {dimension_numbers = #tpu.dot_dimension_numbers<[2], [2], [1], [1], [0, 0, 0, 1, 1, 1], [0], [0]>} : vector<16x8x4xf32>, vector<16x8x4xf32>, vector<16x8x8xf32> -> vector<16x8x8xf32>
    "tpu.trace_stop"() : () -> ()
    %cst_41 = arith.constant dense<0xFF800000> : vector<16x8xf32>
    %92 = vector.multi_reduction <maximumf>, %91, %cst_41 [2] : vector<16x8x8xf32> to vector<16x8xf32>
    %93 = vector.shape_cast %92 : vector<16x8xf32> to vector<16x8x1xf32>
    %94 = vector.broadcast %93 : vector<16x8x1xf32> to vector<16x8x8xf32>
    %95 = arith.subf %91, %94 : vector<16x8x8xf32>
    %96 = math.exp %95 : vector<16x8x8xf32>
    %cst_42 = arith.constant dense<0.000000e+00> : vector<16x8xf32>
    %97 = vector.multi_reduction <add>, %96, %cst_42 [2] : vector<16x8x8xf32> to vector<16x8xf32>
    %98 = vector.shape_cast %97 : vector<16x8xf32> to vector<16x8x1xf32>
    %99 = vector.broadcast %98 : vector<16x8x1xf32> to vector<16x8x8xf32>
    %100 = arith.divf %96, %99 : vector<16x8x8xf32>
    "tpu.trace_start"() <{level = 10 : i32, message = "gqk,gke->gqe"}> : () -> ()
    %cst_43 = arith.constant dense<0.000000e+00> : vector<16x8x4xf32>
    %101 = tpu.matmul %100, %90, %cst_43 {dimension_numbers = #tpu.dot_dimension_numbers<[2], [1], [1], [2], [0, 0, 0, 1, 1, 2], [0], [0]>} : vector<16x8x8xf32>, vector<16x8x4xf32>, vector<16x8x4xf32> -> vector<16x8x4xf32>
    "tpu.trace_stop"() : () -> ()
    "tpu.trace_start"() <{level = 10 : i32, message = "gqe,ged->gqd"}> : () -> ()
    %cst_44 = arith.constant dense<0.000000e+00> : vector<16x8x32xf32>
    %102 = tpu.matmul %101, %69, %cst_44 {dimension_numbers = #tpu.dot_dimension_numbers<[2], [1], [1], [2], [0, 0, 0, 1, 1, 2], [0], [0]>} : vector<16x8x4xf32>, vector<16x4x32xf32>, vector<16x8x32xf32> -> vector<16x8x32xf32>
    "tpu.trace_stop"() : () -> ()
    %103 = vector.shape_cast %102 : vector<16x8x32xf32> to vector<2x8x8x32xf32>
    %cst_45 = arith.constant dense<0.000000e+00> : vector<2x8x32xf32>
    %104 = vector.multi_reduction <add>, %103, %cst_45 [1] : vector<2x8x8x32xf32> to vector<2x8x32xf32>
    %105 = vector.shape_cast %43 : vector<1x32xf32> to vector<1x1x32xf32>
    %106 = vector.broadcast %105 : vector<1x1x32xf32> to vector<2x8x32xf32>
    %107 = arith.addf %104, %106 : vector<2x8x32xf32>
    %108 = arith.addf %107, %28 : vector<2x8x32xf32>
    %cst_46 = arith.constant dense<0.000000e+00> : vector<2x8xf32>
    %109 = vector.multi_reduction <add>, %108, %cst_46 [2] : vector<2x8x32xf32> to vector<2x8xf32>
    %110 = vector.shape_cast %109 : vector<2x8xf32> to vector<2x8x1xf32>
    %cst_47 = arith.constant 3.200000e+01 : f32
    %111 = vector.broadcast %cst_47 : f32 to vector<2x8x1xf32>
    %112 = arith.divf %110, %111 : vector<2x8x1xf32>
    %113 = vector.broadcast %112 : vector<2x8x1xf32> to vector<2x8x32xf32>
    %114 = arith.subf %108, %113 : vector<2x8x32xf32>
    %115 = arith.mulf %114, %114 : vector<2x8x32xf32>
    %cst_48 = arith.constant dense<0.000000e+00> : vector<2x8xf32>
    %116 = vector.multi_reduction <add>, %115, %cst_48 [2] : vector<2x8x32xf32> to vector<2x8xf32>
    %117 = vector.shape_cast %116 : vector<2x8xf32> to vector<2x8x1xf32>
    %cst_49 = arith.constant 0.0322580636 : f32
    %118 = vector.broadcast %cst_49 : f32 to vector<2x8x1xf32>
    %119 = arith.mulf %117, %118 : vector<2x8x1xf32>
    %120 = math.sqrt %119 : vector<2x8x1xf32>
    %121 = vector.broadcast %112 : vector<2x8x1xf32> to vector<2x8x32xf32>
    %122 = arith.subf %108, %121 : vector<2x8x32xf32>
    %123 = vector.shape_cast %44 : vector<1x32xf32> to vector<1x1x32xf32>
    %124 = vector.broadcast %123 : vector<1x1x32xf32> to vector<2x8x32xf32>
    %125 = arith.mulf %124, %122 : vector<2x8x32xf32>
    %cst_50 = arith.constant 9.99999997E-7 : f32
    %126 = vector.broadcast %cst_50 : f32 to vector<2x8x1xf32>
    %127 = arith.addf %120, %126 : vector<2x8x1xf32>
    %128 = vector.broadcast %127 : vector<2x8x1xf32> to vector<2x8x32xf32>
    %129 = arith.divf %125, %128 : vector<2x8x32xf32>
    %130 = vector.shape_cast %45 : vector<1x32xf32> to vector<1x1x32xf32>
    %131 = vector.broadcast %130 : vector<1x1x32xf32> to vector<2x8x32xf32>
    %132 = arith.addf %129, %131 : vector<2x8x32xf32>
    %c0_51 = arith.constant 0 : index
    %c0_52 = arith.constant 0 : index
    %c0_53 = arith.constant 0 : index
    %c0_54 = arith.constant 0 : index
    %133 = vector.load %arg5[%c0_51, %c0_52, %c0_53, %c0_54] : memref<6x8x4x32xf32, #tpu.memory_space<vmem>>, vector<1x8x4x32xf32>
    %134 = vector.shape_cast %133 : vector<1x8x4x32xf32> to vector<8x4x32xf32>
    %c1_55 = arith.constant 1 : index
    %c0_56 = arith.constant 0 : index
    %c0_57 = arith.constant 0 : index
    %c0_58 = arith.constant 0 : index
    %135 = vector.load %arg5[%c1_55, %c0_56, %c0_57, %c0_58] : memref<6x8x4x32xf32, #tpu.memory_space<vmem>>, vector<1x8x4x32xf32>
    %136 = vector.shape_cast %135 : vector<1x8x4x32xf32> to vector<8x4x32xf32>
    %c2_59 = arith.constant 2 : index
    %c0_60 = arith.constant 0 : index
    %c0_61 = arith.constant 0 : index
    %c0_62 = arith.constant 0 : index
    %137 = vector.load %arg5[%c2_59, %c0_60, %c0_61, %c0_62] : memref<6x8x4x32xf32, #tpu.memory_space<vmem>>, vector<1x8x4x32xf32>
    %138 = vector.shape_cast %137 : vector<1x8x4x32xf32> to vector<8x4x32xf32>
    %c0_63 = arith.constant 0 : index
    %c0_64 = arith.constant 0 : index
    %c0_65 = arith.constant 0 : index
    %c0_66 = arith.constant 0 : index
    %139 = vector.load %arg6[%c0_63, %c0_64, %c0_65, %c0_66] : memref<6x8x1x4xf32, #tpu.memory_space<vmem>>, vector<1x8x1x4xf32>
    %140 = vector.shape_cast %139 : vector<1x8x1x4xf32> to vector<8x1x4xf32>
    %c1_67 = arith.constant 1 : index
    %c0_68 = arith.constant 0 : index
    %c0_69 = arith.constant 0 : index
    %c0_70 = arith.constant 0 : index
    %141 = vector.load %arg6[%c1_67, %c0_68, %c0_69, %c0_70] : memref<6x8x1x4xf32, #tpu.memory_space<vmem>>, vector<1x8x1x4xf32>
    %142 = vector.shape_cast %141 : vector<1x8x1x4xf32> to vector<8x1x4xf32>
    %c2_71 = arith.constant 2 : index
    %c0_72 = arith.constant 0 : index
    %c0_73 = arith.constant 0 : index
    %c0_74 = arith.constant 0 : index
    %143 = vector.load %arg6[%c2_71, %c0_72, %c0_73, %c0_74] : memref<6x8x1x4xf32, #tpu.memory_space<vmem>>, vector<1x8x1x4xf32>
    %144 = vector.shape_cast %143 : vector<1x8x1x4xf32> to vector<8x1x4xf32>
    %c0_75 = arith.constant 0 : index
    %c0_76 = arith.constant 0 : index
    %c0_77 = arith.constant 0 : index
    %c0_78 = arith.constant 0 : index
    %145 = vector.load %arg7[%c0_75, %c0_76, %c0_77, %c0_78] : memref<2x8x4x32xf32, #tpu.memory_space<vmem>>, vector<1x8x4x32xf32>
    %146 = vector.shape_cast %145 : vector<1x8x4x32xf32> to vector<8x4x32xf32>
    %147 = vector.extract_strided_slice %2 {offsets = [5, 0], sizes = [1, 32], strides = [1, 1]} : vector<22x64xf32> to vector<1x32xf32>
    %148 = vector.extract_strided_slice %2 {offsets = [6, 0], sizes = [1, 32], strides = [1, 1]} : vector<22x64xf32> to vector<1x32xf32>
    %149 = vector.extract_strided_slice %2 {offsets = [7, 0], sizes = [1, 32], strides = [1, 1]} : vector<22x64xf32> to vector<1x32xf32>
    %150 = vector.shape_cast %132 : vector<2x8x32xf32> to vector<2x1x8x32xf32>
    %151 = vector.shape_cast %150 : vector<2x1x8x32xf32> to vector<2x1x8x32xf32>
    %152 = vector.broadcast %151 : vector<2x1x8x32xf32> to vector<2x8x8x32xf32>
    %153 = vector.shape_cast %152 : vector<2x8x8x32xf32> to vector<16x8x32xf32>
    %154 = vector.shape_cast %1 : vector<2x8x32xf32> to vector<2x1x8x32xf32>
    %155 = vector.shape_cast %154 : vector<2x1x8x32xf32> to vector<2x1x8x32xf32>
    %156 = vector.broadcast %155 : vector<2x1x8x32xf32> to vector<2x8x8x32xf32>
    %157 = vector.shape_cast %156 : vector<2x8x8x32xf32> to vector<16x8x32xf32>
    %158 = vector.shape_cast %134 : vector<8x4x32xf32> to vector<1x8x4x32xf32>
    %159 = vector.shape_cast %158 : vector<1x8x4x32xf32> to vector<1x8x4x32xf32>
    %160 = vector.broadcast %159 : vector<1x8x4x32xf32> to vector<2x8x4x32xf32>
    %161 = vector.shape_cast %160 : vector<2x8x4x32xf32> to vector<16x4x32xf32>
    %162 = vector.shape_cast %136 : vector<8x4x32xf32> to vector<1x8x4x32xf32>
    %163 = vector.shape_cast %162 : vector<1x8x4x32xf32> to vector<1x8x4x32xf32>
    %164 = vector.broadcast %163 : vector<1x8x4x32xf32> to vector<2x8x4x32xf32>
    %165 = vector.shape_cast %164 : vector<2x8x4x32xf32> to vector<16x4x32xf32>
    %166 = vector.shape_cast %138 : vector<8x4x32xf32> to vector<1x8x4x32xf32>
    %167 = vector.shape_cast %166 : vector<1x8x4x32xf32> to vector<1x8x4x32xf32>
    %168 = vector.broadcast %167 : vector<1x8x4x32xf32> to vector<2x8x4x32xf32>
    %169 = vector.shape_cast %168 : vector<2x8x4x32xf32> to vector<16x4x32xf32>
    %170 = vector.shape_cast %146 : vector<8x4x32xf32> to vector<1x8x4x32xf32>
    %171 = vector.shape_cast %170 : vector<1x8x4x32xf32> to vector<1x8x4x32xf32>
    %172 = vector.broadcast %171 : vector<1x8x4x32xf32> to vector<2x8x4x32xf32>
    %173 = vector.shape_cast %172 : vector<2x8x4x32xf32> to vector<16x4x32xf32>
    %174 = vector.shape_cast %140 : vector<8x1x4xf32> to vector<1x8x1x4xf32>
    %175 = vector.shape_cast %174 : vector<1x8x1x4xf32> to vector<1x8x1x4xf32>
    %176 = vector.broadcast %175 : vector<1x8x1x4xf32> to vector<2x8x1x4xf32>
    %177 = vector.shape_cast %176 : vector<2x8x1x4xf32> to vector<16x1x4xf32>
    %178 = vector.shape_cast %142 : vector<8x1x4xf32> to vector<1x8x1x4xf32>
    %179 = vector.shape_cast %178 : vector<1x8x1x4xf32> to vector<1x8x1x4xf32>
    %180 = vector.broadcast %179 : vector<1x8x1x4xf32> to vector<2x8x1x4xf32>
    %181 = vector.shape_cast %180 : vector<2x8x1x4xf32> to vector<16x1x4xf32>
    %182 = vector.shape_cast %144 : vector<8x1x4xf32> to vector<1x8x1x4xf32>
    %183 = vector.shape_cast %182 : vector<1x8x1x4xf32> to vector<1x8x1x4xf32>
    %184 = vector.broadcast %183 : vector<1x8x1x4xf32> to vector<2x8x1x4xf32>
    %185 = vector.shape_cast %184 : vector<2x8x1x4xf32> to vector<16x1x4xf32>
    "tpu.trace_start"() <{level = 10 : i32, message = "gsd,ged->gse"}> : () -> ()
    %cst_79 = arith.constant dense<0.000000e+00> : vector<16x8x4xf32>
    %186 = tpu.matmul %153, %161, %cst_79 {dimension_numbers = #tpu.dot_dimension_numbers<[2], [2], [1], [1], [0, 0, 0, 1, 1, 1], [0], [0]>} : vector<16x8x32xf32>, vector<16x4x32xf32>, vector<16x8x4xf32> -> vector<16x8x4xf32>
    "tpu.trace_stop"() : () -> ()
    %187 = vector.broadcast %177 : vector<16x1x4xf32> to vector<16x8x4xf32>
    %188 = arith.addf %186, %187 : vector<16x8x4xf32>
    "tpu.trace_start"() <{level = 10 : i32, message = "gsd,ged->gse"}> : () -> ()
    %cst_80 = arith.constant dense<0.000000e+00> : vector<16x8x4xf32>
    %189 = tpu.matmul %157, %165, %cst_80 {dimension_numbers = #tpu.dot_dimension_numbers<[2], [2], [1], [1], [0, 0, 0, 1, 1, 1], [0], [0]>} : vector<16x8x32xf32>, vector<16x4x32xf32>, vector<16x8x4xf32> -> vector<16x8x4xf32>
    "tpu.trace_stop"() : () -> ()
    %190 = vector.broadcast %181 : vector<16x1x4xf32> to vector<16x8x4xf32>
    %191 = arith.addf %189, %190 : vector<16x8x4xf32>
    "tpu.trace_start"() <{level = 10 : i32, message = "gsd,ged->gse"}> : () -> ()
    %cst_81 = arith.constant dense<0.000000e+00> : vector<16x8x4xf32>
    %192 = tpu.matmul %157, %169, %cst_81 {dimension_numbers = #tpu.dot_dimension_numbers<[2], [2], [1], [1], [0, 0, 0, 1, 1, 1], [0], [0]>} : vector<16x8x32xf32>, vector<16x4x32xf32>, vector<16x8x4xf32> -> vector<16x8x4xf32>
    "tpu.trace_stop"() : () -> ()
    %193 = vector.broadcast %185 : vector<16x1x4xf32> to vector<16x8x4xf32>
    %194 = arith.addf %192, %193 : vector<16x8x4xf32>
    "tpu.trace_start"() <{level = 10 : i32, message = "gqe,gke->gqk"}> : () -> ()
    %cst_82 = arith.constant dense<0.000000e+00> : vector<16x8x8xf32>
    %195 = tpu.matmul %188, %191, %cst_82 {dimension_numbers = #tpu.dot_dimension_numbers<[2], [2], [1], [1], [0, 0, 0, 1, 1, 1], [0], [0]>} : vector<16x8x4xf32>, vector<16x8x4xf32>, vector<16x8x8xf32> -> vector<16x8x8xf32>
    "tpu.trace_stop"() : () -> ()
    %cst_83 = arith.constant dense<0xFF800000> : vector<16x8xf32>
    %196 = vector.multi_reduction <maximumf>, %195, %cst_83 [2] : vector<16x8x8xf32> to vector<16x8xf32>
    %197 = vector.shape_cast %196 : vector<16x8xf32> to vector<16x8x1xf32>
    %198 = vector.broadcast %197 : vector<16x8x1xf32> to vector<16x8x8xf32>
    %199 = arith.subf %195, %198 : vector<16x8x8xf32>
    %200 = math.exp %199 : vector<16x8x8xf32>
    %cst_84 = arith.constant dense<0.000000e+00> : vector<16x8xf32>
    %201 = vector.multi_reduction <add>, %200, %cst_84 [2] : vector<16x8x8xf32> to vector<16x8xf32>
    %202 = vector.shape_cast %201 : vector<16x8xf32> to vector<16x8x1xf32>
    %203 = vector.broadcast %202 : vector<16x8x1xf32> to vector<16x8x8xf32>
    %204 = arith.divf %200, %203 : vector<16x8x8xf32>
    "tpu.trace_start"() <{level = 10 : i32, message = "gqk,gke->gqe"}> : () -> ()
    %cst_85 = arith.constant dense<0.000000e+00> : vector<16x8x4xf32>
    %205 = tpu.matmul %204, %194, %cst_85 {dimension_numbers = #tpu.dot_dimension_numbers<[2], [1], [1], [2], [0, 0, 0, 1, 1, 2], [0], [0]>} : vector<16x8x8xf32>, vector<16x8x4xf32>, vector<16x8x4xf32> -> vector<16x8x4xf32>
    "tpu.trace_stop"() : () -> ()
    "tpu.trace_start"() <{level = 10 : i32, message = "gqe,ged->gqd"}> : () -> ()
    %cst_86 = arith.constant dense<0.000000e+00> : vector<16x8x32xf32>
    %206 = tpu.matmul %205, %173, %cst_86 {dimension_numbers = #tpu.dot_dimension_numbers<[2], [1], [1], [2], [0, 0, 0, 1, 1, 2], [0], [0]>} : vector<16x8x4xf32>, vector<16x4x32xf32>, vector<16x8x32xf32> -> vector<16x8x32xf32>
    "tpu.trace_stop"() : () -> ()
    %207 = vector.shape_cast %206 : vector<16x8x32xf32> to vector<2x8x8x32xf32>
    %cst_87 = arith.constant dense<0.000000e+00> : vector<2x8x32xf32>
    %208 = vector.multi_reduction <add>, %207, %cst_87 [1] : vector<2x8x8x32xf32> to vector<2x8x32xf32>
    %209 = vector.shape_cast %147 : vector<1x32xf32> to vector<1x1x32xf32>
    %210 = vector.broadcast %209 : vector<1x1x32xf32> to vector<2x8x32xf32>
    %211 = arith.addf %208, %210 : vector<2x8x32xf32>
    %212 = arith.addf %211, %132 : vector<2x8x32xf32>
    %cst_88 = arith.constant dense<0.000000e+00> : vector<2x8xf32>
    %213 = vector.multi_reduction <add>, %212, %cst_88 [2] : vector<2x8x32xf32> to vector<2x8xf32>
    %214 = vector.shape_cast %213 : vector<2x8xf32> to vector<2x8x1xf32>
    %cst_89 = arith.constant 3.200000e+01 : f32
    %215 = vector.broadcast %cst_89 : f32 to vector<2x8x1xf32>
    %216 = arith.divf %214, %215 : vector<2x8x1xf32>
    %217 = vector.broadcast %216 : vector<2x8x1xf32> to vector<2x8x32xf32>
    %218 = arith.subf %212, %217 : vector<2x8x32xf32>
    %219 = arith.mulf %218, %218 : vector<2x8x32xf32>
    %cst_90 = arith.constant dense<0.000000e+00> : vector<2x8xf32>
    %220 = vector.multi_reduction <add>, %219, %cst_90 [2] : vector<2x8x32xf32> to vector<2x8xf32>
    %221 = vector.shape_cast %220 : vector<2x8xf32> to vector<2x8x1xf32>
    %cst_91 = arith.constant 0.0322580636 : f32
    %222 = vector.broadcast %cst_91 : f32 to vector<2x8x1xf32>
    %223 = arith.mulf %221, %222 : vector<2x8x1xf32>
    %224 = math.sqrt %223 : vector<2x8x1xf32>
    %225 = vector.broadcast %216 : vector<2x8x1xf32> to vector<2x8x32xf32>
    %226 = arith.subf %212, %225 : vector<2x8x32xf32>
    %227 = vector.shape_cast %148 : vector<1x32xf32> to vector<1x1x32xf32>
    %228 = vector.broadcast %227 : vector<1x1x32xf32> to vector<2x8x32xf32>
    %229 = arith.mulf %228, %226 : vector<2x8x32xf32>
    %cst_92 = arith.constant 9.99999997E-7 : f32
    %230 = vector.broadcast %cst_92 : f32 to vector<2x8x1xf32>
    %231 = arith.addf %224, %230 : vector<2x8x1xf32>
    %232 = vector.broadcast %231 : vector<2x8x1xf32> to vector<2x8x32xf32>
    %233 = arith.divf %229, %232 : vector<2x8x32xf32>
    %234 = vector.shape_cast %149 : vector<1x32xf32> to vector<1x1x32xf32>
    %235 = vector.broadcast %234 : vector<1x1x32xf32> to vector<2x8x32xf32>
    %236 = arith.addf %233, %235 : vector<2x8x32xf32>
    %c0_93 = arith.constant 0 : index
    %c0_94 = arith.constant 0 : index
    %c0_95 = arith.constant 0 : index
    %237 = vector.load %arg8[%c0_93, %c0_94, %c0_95] : memref<2x32x64xf32, #tpu.memory_space<vmem>>, vector<1x32x64xf32>
    %238 = vector.shape_cast %237 : vector<1x32x64xf32> to vector<32x64xf32>
    %c0_96 = arith.constant 0 : index
    %c0_97 = arith.constant 0 : index
    %c0_98 = arith.constant 0 : index
    %239 = vector.load %arg9[%c0_96, %c0_97, %c0_98] : memref<2x64x32xf32, #tpu.memory_space<vmem>>, vector<1x64x32xf32>
    %240 = vector.shape_cast %239 : vector<1x64x32xf32> to vector<64x32xf32>
    "tpu.trace_start"() <{level = 10 : i32, message = "bsd,df->bsf"}> : () -> ()
    %cst_99 = arith.constant dense<0.000000e+00> : vector<2x8x64xf32>
    %241 = tpu.matmul %236, %238, %cst_99 {dimension_numbers = #tpu.dot_dimension_numbers<[2], [0], [0, 1], [1], [0, 0, 0, 1, 1, 1], [], []>} : vector<2x8x32xf32>, vector<32x64xf32>, vector<2x8x64xf32> -> vector<2x8x64xf32>
    "tpu.trace_stop"() : () -> ()
    %242 = vector.extract_strided_slice %2 {offsets = [8, 0], sizes = [1, 64], strides = [1, 1]} : vector<22x64xf32> to vector<1x64xf32>
    %243 = vector.shape_cast %242 : vector<1x64xf32> to vector<1x1x64xf32>
    %244 = vector.broadcast %243 : vector<1x1x64xf32> to vector<2x8x64xf32>
    %245 = arith.addf %241, %244 : vector<2x8x64xf32>
    %cst_100 = arith.constant 0.000000e+00 : f32
    %246 = vector.broadcast %cst_100 : f32 to vector<2x8x64xf32>
    %247 = arith.maximumf %245, %246 : vector<2x8x64xf32>
    "tpu.trace_start"() <{level = 10 : i32, message = "bsf,fd->bsd"}> : () -> ()
    %cst_101 = arith.constant dense<0.000000e+00> : vector<2x8x32xf32>
    %248 = tpu.matmul %247, %240, %cst_101 {dimension_numbers = #tpu.dot_dimension_numbers<[2], [0], [0, 1], [1], [0, 0, 0, 1, 1, 1], [], []>} : vector<2x8x64xf32>, vector<64x32xf32>, vector<2x8x32xf32> -> vector<2x8x32xf32>
    "tpu.trace_stop"() : () -> ()
    %249 = vector.extract_strided_slice %2 {offsets = [9, 0], sizes = [1, 32], strides = [1, 1]} : vector<22x64xf32> to vector<1x32xf32>
    %250 = vector.shape_cast %249 : vector<1x32xf32> to vector<1x1x32xf32>
    %251 = vector.broadcast %250 : vector<1x1x32xf32> to vector<2x8x32xf32>
    %252 = arith.addf %248, %251 : vector<2x8x32xf32>
    %253 = arith.addf %252, %236 : vector<2x8x32xf32>
    %254 = vector.extract_strided_slice %2 {offsets = [10, 0], sizes = [1, 32], strides = [1, 1]} : vector<22x64xf32> to vector<1x32xf32>
    %255 = vector.extract_strided_slice %2 {offsets = [11, 0], sizes = [1, 32], strides = [1, 1]} : vector<22x64xf32> to vector<1x32xf32>
    %cst_102 = arith.constant dense<0.000000e+00> : vector<2x8xf32>
    %256 = vector.multi_reduction <add>, %253, %cst_102 [2] : vector<2x8x32xf32> to vector<2x8xf32>
    %257 = vector.shape_cast %256 : vector<2x8xf32> to vector<2x8x1xf32>
    %cst_103 = arith.constant 3.200000e+01 : f32
    %258 = vector.broadcast %cst_103 : f32 to vector<2x8x1xf32>
    %259 = arith.divf %257, %258 : vector<2x8x1xf32>
    %260 = vector.broadcast %259 : vector<2x8x1xf32> to vector<2x8x32xf32>
    %261 = arith.subf %253, %260 : vector<2x8x32xf32>
    %262 = arith.mulf %261, %261 : vector<2x8x32xf32>
    %cst_104 = arith.constant dense<0.000000e+00> : vector<2x8xf32>
    %263 = vector.multi_reduction <add>, %262, %cst_104 [2] : vector<2x8x32xf32> to vector<2x8xf32>
    %264 = vector.shape_cast %263 : vector<2x8xf32> to vector<2x8x1xf32>
    %cst_105 = arith.constant 0.0322580636 : f32
    %265 = vector.broadcast %cst_105 : f32 to vector<2x8x1xf32>
    %266 = arith.mulf %264, %265 : vector<2x8x1xf32>
    %267 = math.sqrt %266 : vector<2x8x1xf32>
    %268 = vector.broadcast %259 : vector<2x8x1xf32> to vector<2x8x32xf32>
    %269 = arith.subf %253, %268 : vector<2x8x32xf32>
    %270 = vector.shape_cast %254 : vector<1x32xf32> to vector<1x1x32xf32>
    %271 = vector.broadcast %270 : vector<1x1x32xf32> to vector<2x8x32xf32>
    %272 = arith.mulf %271, %269 : vector<2x8x32xf32>
    %cst_106 = arith.constant 9.99999997E-7 : f32
    %273 = vector.broadcast %cst_106 : f32 to vector<2x8x1xf32>
    %274 = arith.addf %267, %273 : vector<2x8x1xf32>
    %275 = vector.broadcast %274 : vector<2x8x1xf32> to vector<2x8x32xf32>
    %276 = arith.divf %272, %275 : vector<2x8x32xf32>
    %277 = vector.shape_cast %255 : vector<1x32xf32> to vector<1x1x32xf32>
    %278 = vector.broadcast %277 : vector<1x1x32xf32> to vector<2x8x32xf32>
    %279 = arith.addf %276, %278 : vector<2x8x32xf32>
    %c3 = arith.constant 3 : index
    %c0_107 = arith.constant 0 : index
    %c0_108 = arith.constant 0 : index
    %c0_109 = arith.constant 0 : index
    %280 = vector.load %arg2[%c3, %c0_107, %c0_108, %c0_109] : memref<6x8x4x32xf32, #tpu.memory_space<vmem>>, vector<1x8x4x32xf32>
    %281 = vector.shape_cast %280 : vector<1x8x4x32xf32> to vector<8x4x32xf32>
    %c4 = arith.constant 4 : index
    %c0_110 = arith.constant 0 : index
    %c0_111 = arith.constant 0 : index
    %c0_112 = arith.constant 0 : index
    %282 = vector.load %arg2[%c4, %c0_110, %c0_111, %c0_112] : memref<6x8x4x32xf32, #tpu.memory_space<vmem>>, vector<1x8x4x32xf32>
    %283 = vector.shape_cast %282 : vector<1x8x4x32xf32> to vector<8x4x32xf32>
    %c5 = arith.constant 5 : index
    %c0_113 = arith.constant 0 : index
    %c0_114 = arith.constant 0 : index
    %c0_115 = arith.constant 0 : index
    %284 = vector.load %arg2[%c5, %c0_113, %c0_114, %c0_115] : memref<6x8x4x32xf32, #tpu.memory_space<vmem>>, vector<1x8x4x32xf32>
    %285 = vector.shape_cast %284 : vector<1x8x4x32xf32> to vector<8x4x32xf32>
    %c3_116 = arith.constant 3 : index
    %c0_117 = arith.constant 0 : index
    %c0_118 = arith.constant 0 : index
    %c0_119 = arith.constant 0 : index
    %286 = vector.load %arg3[%c3_116, %c0_117, %c0_118, %c0_119] : memref<6x8x1x4xf32, #tpu.memory_space<vmem>>, vector<1x8x1x4xf32>
    %287 = vector.shape_cast %286 : vector<1x8x1x4xf32> to vector<8x1x4xf32>
    %c4_120 = arith.constant 4 : index
    %c0_121 = arith.constant 0 : index
    %c0_122 = arith.constant 0 : index
    %c0_123 = arith.constant 0 : index
    %288 = vector.load %arg3[%c4_120, %c0_121, %c0_122, %c0_123] : memref<6x8x1x4xf32, #tpu.memory_space<vmem>>, vector<1x8x1x4xf32>
    %289 = vector.shape_cast %288 : vector<1x8x1x4xf32> to vector<8x1x4xf32>
    %c5_124 = arith.constant 5 : index
    %c0_125 = arith.constant 0 : index
    %c0_126 = arith.constant 0 : index
    %c0_127 = arith.constant 0 : index
    %290 = vector.load %arg3[%c5_124, %c0_125, %c0_126, %c0_127] : memref<6x8x1x4xf32, #tpu.memory_space<vmem>>, vector<1x8x1x4xf32>
    %291 = vector.shape_cast %290 : vector<1x8x1x4xf32> to vector<8x1x4xf32>
    %c1_128 = arith.constant 1 : index
    %c0_129 = arith.constant 0 : index
    %c0_130 = arith.constant 0 : index
    %c0_131 = arith.constant 0 : index
    %292 = vector.load %arg4[%c1_128, %c0_129, %c0_130, %c0_131] : memref<2x8x4x32xf32, #tpu.memory_space<vmem>>, vector<1x8x4x32xf32>
    %293 = vector.shape_cast %292 : vector<1x8x4x32xf32> to vector<8x4x32xf32>
    %294 = vector.extract_strided_slice %2 {offsets = [12, 0], sizes = [1, 32], strides = [1, 1]} : vector<22x64xf32> to vector<1x32xf32>
    %295 = vector.extract_strided_slice %2 {offsets = [13, 0], sizes = [1, 32], strides = [1, 1]} : vector<22x64xf32> to vector<1x32xf32>
    %296 = vector.extract_strided_slice %2 {offsets = [14, 0], sizes = [1, 32], strides = [1, 1]} : vector<22x64xf32> to vector<1x32xf32>
    %297 = vector.shape_cast %279 : vector<2x8x32xf32> to vector<2x1x8x32xf32>
    %298 = vector.shape_cast %297 : vector<2x1x8x32xf32> to vector<2x1x8x32xf32>
    %299 = vector.broadcast %298 : vector<2x1x8x32xf32> to vector<2x8x8x32xf32>
    %300 = vector.shape_cast %299 : vector<2x8x8x32xf32> to vector<16x8x32xf32>
    %301 = vector.shape_cast %279 : vector<2x8x32xf32> to vector<2x1x8x32xf32>
    %302 = vector.shape_cast %301 : vector<2x1x8x32xf32> to vector<2x1x8x32xf32>
    %303 = vector.broadcast %302 : vector<2x1x8x32xf32> to vector<2x8x8x32xf32>
    %304 = vector.shape_cast %303 : vector<2x8x8x32xf32> to vector<16x8x32xf32>
    %305 = vector.shape_cast %281 : vector<8x4x32xf32> to vector<1x8x4x32xf32>
    %306 = vector.shape_cast %305 : vector<1x8x4x32xf32> to vector<1x8x4x32xf32>
    %307 = vector.broadcast %306 : vector<1x8x4x32xf32> to vector<2x8x4x32xf32>
    %308 = vector.shape_cast %307 : vector<2x8x4x32xf32> to vector<16x4x32xf32>
    %309 = vector.shape_cast %283 : vector<8x4x32xf32> to vector<1x8x4x32xf32>
    %310 = vector.shape_cast %309 : vector<1x8x4x32xf32> to vector<1x8x4x32xf32>
    %311 = vector.broadcast %310 : vector<1x8x4x32xf32> to vector<2x8x4x32xf32>
    %312 = vector.shape_cast %311 : vector<2x8x4x32xf32> to vector<16x4x32xf32>
    %313 = vector.shape_cast %285 : vector<8x4x32xf32> to vector<1x8x4x32xf32>
    %314 = vector.shape_cast %313 : vector<1x8x4x32xf32> to vector<1x8x4x32xf32>
    %315 = vector.broadcast %314 : vector<1x8x4x32xf32> to vector<2x8x4x32xf32>
    %316 = vector.shape_cast %315 : vector<2x8x4x32xf32> to vector<16x4x32xf32>
    %317 = vector.shape_cast %293 : vector<8x4x32xf32> to vector<1x8x4x32xf32>
    %318 = vector.shape_cast %317 : vector<1x8x4x32xf32> to vector<1x8x4x32xf32>
    %319 = vector.broadcast %318 : vector<1x8x4x32xf32> to vector<2x8x4x32xf32>
    %320 = vector.shape_cast %319 : vector<2x8x4x32xf32> to vector<16x4x32xf32>
    %321 = vector.shape_cast %287 : vector<8x1x4xf32> to vector<1x8x1x4xf32>
    %322 = vector.shape_cast %321 : vector<1x8x1x4xf32> to vector<1x8x1x4xf32>
    %323 = vector.broadcast %322 : vector<1x8x1x4xf32> to vector<2x8x1x4xf32>
    %324 = vector.shape_cast %323 : vector<2x8x1x4xf32> to vector<16x1x4xf32>
    %325 = vector.shape_cast %289 : vector<8x1x4xf32> to vector<1x8x1x4xf32>
    %326 = vector.shape_cast %325 : vector<1x8x1x4xf32> to vector<1x8x1x4xf32>
    %327 = vector.broadcast %326 : vector<1x8x1x4xf32> to vector<2x8x1x4xf32>
    %328 = vector.shape_cast %327 : vector<2x8x1x4xf32> to vector<16x1x4xf32>
    %329 = vector.shape_cast %291 : vector<8x1x4xf32> to vector<1x8x1x4xf32>
    %330 = vector.shape_cast %329 : vector<1x8x1x4xf32> to vector<1x8x1x4xf32>
    %331 = vector.broadcast %330 : vector<1x8x1x4xf32> to vector<2x8x1x4xf32>
    %332 = vector.shape_cast %331 : vector<2x8x1x4xf32> to vector<16x1x4xf32>
    "tpu.trace_start"() <{level = 10 : i32, message = "gsd,ged->gse"}> : () -> ()
    %cst_132 = arith.constant dense<0.000000e+00> : vector<16x8x4xf32>
    %333 = tpu.matmul %300, %308, %cst_132 {dimension_numbers = #tpu.dot_dimension_numbers<[2], [2], [1], [1], [0, 0, 0, 1, 1, 1], [0], [0]>} : vector<16x8x32xf32>, vector<16x4x32xf32>, vector<16x8x4xf32> -> vector<16x8x4xf32>
    "tpu.trace_stop"() : () -> ()
    %334 = vector.broadcast %324 : vector<16x1x4xf32> to vector<16x8x4xf32>
    %335 = arith.addf %333, %334 : vector<16x8x4xf32>
    "tpu.trace_start"() <{level = 10 : i32, message = "gsd,ged->gse"}> : () -> ()
    %cst_133 = arith.constant dense<0.000000e+00> : vector<16x8x4xf32>
    %336 = tpu.matmul %304, %312, %cst_133 {dimension_numbers = #tpu.dot_dimension_numbers<[2], [2], [1], [1], [0, 0, 0, 1, 1, 1], [0], [0]>} : vector<16x8x32xf32>, vector<16x4x32xf32>, vector<16x8x4xf32> -> vector<16x8x4xf32>
    "tpu.trace_stop"() : () -> ()
    %337 = vector.broadcast %328 : vector<16x1x4xf32> to vector<16x8x4xf32>
    %338 = arith.addf %336, %337 : vector<16x8x4xf32>
    "tpu.trace_start"() <{level = 10 : i32, message = "gsd,ged->gse"}> : () -> ()
    %cst_134 = arith.constant dense<0.000000e+00> : vector<16x8x4xf32>
    %339 = tpu.matmul %304, %316, %cst_134 {dimension_numbers = #tpu.dot_dimension_numbers<[2], [2], [1], [1], [0, 0, 0, 1, 1, 1], [0], [0]>} : vector<16x8x32xf32>, vector<16x4x32xf32>, vector<16x8x4xf32> -> vector<16x8x4xf32>
    "tpu.trace_stop"() : () -> ()
    %340 = vector.broadcast %332 : vector<16x1x4xf32> to vector<16x8x4xf32>
    %341 = arith.addf %339, %340 : vector<16x8x4xf32>
    "tpu.trace_start"() <{level = 10 : i32, message = "gqe,gke->gqk"}> : () -> ()
    %cst_135 = arith.constant dense<0.000000e+00> : vector<16x8x8xf32>
    %342 = tpu.matmul %335, %338, %cst_135 {dimension_numbers = #tpu.dot_dimension_numbers<[2], [2], [1], [1], [0, 0, 0, 1, 1, 1], [0], [0]>} : vector<16x8x4xf32>, vector<16x8x4xf32>, vector<16x8x8xf32> -> vector<16x8x8xf32>
    "tpu.trace_stop"() : () -> ()
    %cst_136 = arith.constant dense<0xFF800000> : vector<16x8xf32>
    %343 = vector.multi_reduction <maximumf>, %342, %cst_136 [2] : vector<16x8x8xf32> to vector<16x8xf32>
    %344 = vector.shape_cast %343 : vector<16x8xf32> to vector<16x8x1xf32>
    %345 = vector.broadcast %344 : vector<16x8x1xf32> to vector<16x8x8xf32>
    %346 = arith.subf %342, %345 : vector<16x8x8xf32>
    %347 = math.exp %346 : vector<16x8x8xf32>
    %cst_137 = arith.constant dense<0.000000e+00> : vector<16x8xf32>
    %348 = vector.multi_reduction <add>, %347, %cst_137 [2] : vector<16x8x8xf32> to vector<16x8xf32>
    %349 = vector.shape_cast %348 : vector<16x8xf32> to vector<16x8x1xf32>
    %350 = vector.broadcast %349 : vector<16x8x1xf32> to vector<16x8x8xf32>
    %351 = arith.divf %347, %350 : vector<16x8x8xf32>
    "tpu.trace_start"() <{level = 10 : i32, message = "gqk,gke->gqe"}> : () -> ()
    %cst_138 = arith.constant dense<0.000000e+00> : vector<16x8x4xf32>
    %352 = tpu.matmul %351, %341, %cst_138 {dimension_numbers = #tpu.dot_dimension_numbers<[2], [1], [1], [2], [0, 0, 0, 1, 1, 2], [0], [0]>} : vector<16x8x8xf32>, vector<16x8x4xf32>, vector<16x8x4xf32> -> vector<16x8x4xf32>
    "tpu.trace_stop"() : () -> ()
    "tpu.trace_start"() <{level = 10 : i32, message = "gqe,ged->gqd"}> : () -> ()
    %cst_139 = arith.constant dense<0.000000e+00> : vector<16x8x32xf32>
    %353 = tpu.matmul %352, %320, %cst_139 {dimension_numbers = #tpu.dot_dimension_numbers<[2], [1], [1], [2], [0, 0, 0, 1, 1, 2], [0], [0]>} : vector<16x8x4xf32>, vector<16x4x32xf32>, vector<16x8x32xf32> -> vector<16x8x32xf32>
    "tpu.trace_stop"() : () -> ()
    %354 = vector.shape_cast %353 : vector<16x8x32xf32> to vector<2x8x8x32xf32>
    %cst_140 = arith.constant dense<0.000000e+00> : vector<2x8x32xf32>
    %355 = vector.multi_reduction <add>, %354, %cst_140 [1] : vector<2x8x8x32xf32> to vector<2x8x32xf32>
    %356 = vector.shape_cast %294 : vector<1x32xf32> to vector<1x1x32xf32>
    %357 = vector.broadcast %356 : vector<1x1x32xf32> to vector<2x8x32xf32>
    %358 = arith.addf %355, %357 : vector<2x8x32xf32>
    %359 = arith.addf %358, %279 : vector<2x8x32xf32>
    %cst_141 = arith.constant dense<0.000000e+00> : vector<2x8xf32>
    %360 = vector.multi_reduction <add>, %359, %cst_141 [2] : vector<2x8x32xf32> to vector<2x8xf32>
    %361 = vector.shape_cast %360 : vector<2x8xf32> to vector<2x8x1xf32>
    %cst_142 = arith.constant 3.200000e+01 : f32
    %362 = vector.broadcast %cst_142 : f32 to vector<2x8x1xf32>
    %363 = arith.divf %361, %362 : vector<2x8x1xf32>
    %364 = vector.broadcast %363 : vector<2x8x1xf32> to vector<2x8x32xf32>
    %365 = arith.subf %359, %364 : vector<2x8x32xf32>
    %366 = arith.mulf %365, %365 : vector<2x8x32xf32>
    %cst_143 = arith.constant dense<0.000000e+00> : vector<2x8xf32>
    %367 = vector.multi_reduction <add>, %366, %cst_143 [2] : vector<2x8x32xf32> to vector<2x8xf32>
    %368 = vector.shape_cast %367 : vector<2x8xf32> to vector<2x8x1xf32>
    %cst_144 = arith.constant 0.0322580636 : f32
    %369 = vector.broadcast %cst_144 : f32 to vector<2x8x1xf32>
    %370 = arith.mulf %368, %369 : vector<2x8x1xf32>
    %371 = math.sqrt %370 : vector<2x8x1xf32>
    %372 = vector.broadcast %363 : vector<2x8x1xf32> to vector<2x8x32xf32>
    %373 = arith.subf %359, %372 : vector<2x8x32xf32>
    %374 = vector.shape_cast %295 : vector<1x32xf32> to vector<1x1x32xf32>
    %375 = vector.broadcast %374 : vector<1x1x32xf32> to vector<2x8x32xf32>
    %376 = arith.mulf %375, %373 : vector<2x8x32xf32>
    %cst_145 = arith.constant 9.99999997E-7 : f32
    %377 = vector.broadcast %cst_145 : f32 to vector<2x8x1xf32>
    %378 = arith.addf %371, %377 : vector<2x8x1xf32>
    %379 = vector.broadcast %378 : vector<2x8x1xf32> to vector<2x8x32xf32>
    %380 = arith.divf %376, %379 : vector<2x8x32xf32>
    %381 = vector.shape_cast %296 : vector<1x32xf32> to vector<1x1x32xf32>
    %382 = vector.broadcast %381 : vector<1x1x32xf32> to vector<2x8x32xf32>
    %383 = arith.addf %380, %382 : vector<2x8x32xf32>
    %c3_146 = arith.constant 3 : index
    %c0_147 = arith.constant 0 : index
    %c0_148 = arith.constant 0 : index
    %c0_149 = arith.constant 0 : index
    %384 = vector.load %arg5[%c3_146, %c0_147, %c0_148, %c0_149] : memref<6x8x4x32xf32, #tpu.memory_space<vmem>>, vector<1x8x4x32xf32>
    %385 = vector.shape_cast %384 : vector<1x8x4x32xf32> to vector<8x4x32xf32>
    %c4_150 = arith.constant 4 : index
    %c0_151 = arith.constant 0 : index
    %c0_152 = arith.constant 0 : index
    %c0_153 = arith.constant 0 : index
    %386 = vector.load %arg5[%c4_150, %c0_151, %c0_152, %c0_153] : memref<6x8x4x32xf32, #tpu.memory_space<vmem>>, vector<1x8x4x32xf32>
    %387 = vector.shape_cast %386 : vector<1x8x4x32xf32> to vector<8x4x32xf32>
    %c5_154 = arith.constant 5 : index
    %c0_155 = arith.constant 0 : index
    %c0_156 = arith.constant 0 : index
    %c0_157 = arith.constant 0 : index
    %388 = vector.load %arg5[%c5_154, %c0_155, %c0_156, %c0_157] : memref<6x8x4x32xf32, #tpu.memory_space<vmem>>, vector<1x8x4x32xf32>
    %389 = vector.shape_cast %388 : vector<1x8x4x32xf32> to vector<8x4x32xf32>
    %c3_158 = arith.constant 3 : index
    %c0_159 = arith.constant 0 : index
    %c0_160 = arith.constant 0 : index
    %c0_161 = arith.constant 0 : index
    %390 = vector.load %arg6[%c3_158, %c0_159, %c0_160, %c0_161] : memref<6x8x1x4xf32, #tpu.memory_space<vmem>>, vector<1x8x1x4xf32>
    %391 = vector.shape_cast %390 : vector<1x8x1x4xf32> to vector<8x1x4xf32>
    %c4_162 = arith.constant 4 : index
    %c0_163 = arith.constant 0 : index
    %c0_164 = arith.constant 0 : index
    %c0_165 = arith.constant 0 : index
    %392 = vector.load %arg6[%c4_162, %c0_163, %c0_164, %c0_165] : memref<6x8x1x4xf32, #tpu.memory_space<vmem>>, vector<1x8x1x4xf32>
    %393 = vector.shape_cast %392 : vector<1x8x1x4xf32> to vector<8x1x4xf32>
    %c5_166 = arith.constant 5 : index
    %c0_167 = arith.constant 0 : index
    %c0_168 = arith.constant 0 : index
    %c0_169 = arith.constant 0 : index
    %394 = vector.load %arg6[%c5_166, %c0_167, %c0_168, %c0_169] : memref<6x8x1x4xf32, #tpu.memory_space<vmem>>, vector<1x8x1x4xf32>
    %395 = vector.shape_cast %394 : vector<1x8x1x4xf32> to vector<8x1x4xf32>
    %c1_170 = arith.constant 1 : index
    %c0_171 = arith.constant 0 : index
    %c0_172 = arith.constant 0 : index
    %c0_173 = arith.constant 0 : index
    %396 = vector.load %arg7[%c1_170, %c0_171, %c0_172, %c0_173] : memref<2x8x4x32xf32, #tpu.memory_space<vmem>>, vector<1x8x4x32xf32>
    %397 = vector.shape_cast %396 : vector<1x8x4x32xf32> to vector<8x4x32xf32>
    %398 = vector.extract_strided_slice %2 {offsets = [15, 0], sizes = [1, 32], strides = [1, 1]} : vector<22x64xf32> to vector<1x32xf32>
    %399 = vector.extract_strided_slice %2 {offsets = [16, 0], sizes = [1, 32], strides = [1, 1]} : vector<22x64xf32> to vector<1x32xf32>
    %400 = vector.extract_strided_slice %2 {offsets = [17, 0], sizes = [1, 32], strides = [1, 1]} : vector<22x64xf32> to vector<1x32xf32>
    %401 = vector.shape_cast %383 : vector<2x8x32xf32> to vector<2x1x8x32xf32>
    %402 = vector.shape_cast %401 : vector<2x1x8x32xf32> to vector<2x1x8x32xf32>
    %403 = vector.broadcast %402 : vector<2x1x8x32xf32> to vector<2x8x8x32xf32>
    %404 = vector.shape_cast %403 : vector<2x8x8x32xf32> to vector<16x8x32xf32>
    %405 = vector.shape_cast %1 : vector<2x8x32xf32> to vector<2x1x8x32xf32>
    %406 = vector.shape_cast %405 : vector<2x1x8x32xf32> to vector<2x1x8x32xf32>
    %407 = vector.broadcast %406 : vector<2x1x8x32xf32> to vector<2x8x8x32xf32>
    %408 = vector.shape_cast %407 : vector<2x8x8x32xf32> to vector<16x8x32xf32>
    %409 = vector.shape_cast %385 : vector<8x4x32xf32> to vector<1x8x4x32xf32>
    %410 = vector.shape_cast %409 : vector<1x8x4x32xf32> to vector<1x8x4x32xf32>
    %411 = vector.broadcast %410 : vector<1x8x4x32xf32> to vector<2x8x4x32xf32>
    %412 = vector.shape_cast %411 : vector<2x8x4x32xf32> to vector<16x4x32xf32>
    %413 = vector.shape_cast %387 : vector<8x4x32xf32> to vector<1x8x4x32xf32>
    %414 = vector.shape_cast %413 : vector<1x8x4x32xf32> to vector<1x8x4x32xf32>
    %415 = vector.broadcast %414 : vector<1x8x4x32xf32> to vector<2x8x4x32xf32>
    %416 = vector.shape_cast %415 : vector<2x8x4x32xf32> to vector<16x4x32xf32>
    %417 = vector.shape_cast %389 : vector<8x4x32xf32> to vector<1x8x4x32xf32>
    %418 = vector.shape_cast %417 : vector<1x8x4x32xf32> to vector<1x8x4x32xf32>
    %419 = vector.broadcast %418 : vector<1x8x4x32xf32> to vector<2x8x4x32xf32>
    %420 = vector.shape_cast %419 : vector<2x8x4x32xf32> to vector<16x4x32xf32>
    %421 = vector.shape_cast %397 : vector<8x4x32xf32> to vector<1x8x4x32xf32>
    %422 = vector.shape_cast %421 : vector<1x8x4x32xf32> to vector<1x8x4x32xf32>
    %423 = vector.broadcast %422 : vector<1x8x4x32xf32> to vector<2x8x4x32xf32>
    %424 = vector.shape_cast %423 : vector<2x8x4x32xf32> to vector<16x4x32xf32>
    %425 = vector.shape_cast %391 : vector<8x1x4xf32> to vector<1x8x1x4xf32>
    %426 = vector.shape_cast %425 : vector<1x8x1x4xf32> to vector<1x8x1x4xf32>
    %427 = vector.broadcast %426 : vector<1x8x1x4xf32> to vector<2x8x1x4xf32>
    %428 = vector.shape_cast %427 : vector<2x8x1x4xf32> to vector<16x1x4xf32>
    %429 = vector.shape_cast %393 : vector<8x1x4xf32> to vector<1x8x1x4xf32>
    %430 = vector.shape_cast %429 : vector<1x8x1x4xf32> to vector<1x8x1x4xf32>
    %431 = vector.broadcast %430 : vector<1x8x1x4xf32> to vector<2x8x1x4xf32>
    %432 = vector.shape_cast %431 : vector<2x8x1x4xf32> to vector<16x1x4xf32>
    %433 = vector.shape_cast %395 : vector<8x1x4xf32> to vector<1x8x1x4xf32>
    %434 = vector.shape_cast %433 : vector<1x8x1x4xf32> to vector<1x8x1x4xf32>
    %435 = vector.broadcast %434 : vector<1x8x1x4xf32> to vector<2x8x1x4xf32>
    %436 = vector.shape_cast %435 : vector<2x8x1x4xf32> to vector<16x1x4xf32>
    "tpu.trace_start"() <{level = 10 : i32, message = "gsd,ged->gse"}> : () -> ()
    %cst_174 = arith.constant dense<0.000000e+00> : vector<16x8x4xf32>
    %437 = tpu.matmul %404, %412, %cst_174 {dimension_numbers = #tpu.dot_dimension_numbers<[2], [2], [1], [1], [0, 0, 0, 1, 1, 1], [0], [0]>} : vector<16x8x32xf32>, vector<16x4x32xf32>, vector<16x8x4xf32> -> vector<16x8x4xf32>
    "tpu.trace_stop"() : () -> ()
    %438 = vector.broadcast %428 : vector<16x1x4xf32> to vector<16x8x4xf32>
    %439 = arith.addf %437, %438 : vector<16x8x4xf32>
    "tpu.trace_start"() <{level = 10 : i32, message = "gsd,ged->gse"}> : () -> ()
    %cst_175 = arith.constant dense<0.000000e+00> : vector<16x8x4xf32>
    %440 = tpu.matmul %408, %416, %cst_175 {dimension_numbers = #tpu.dot_dimension_numbers<[2], [2], [1], [1], [0, 0, 0, 1, 1, 1], [0], [0]>} : vector<16x8x32xf32>, vector<16x4x32xf32>, vector<16x8x4xf32> -> vector<16x8x4xf32>
    "tpu.trace_stop"() : () -> ()
    %441 = vector.broadcast %432 : vector<16x1x4xf32> to vector<16x8x4xf32>
    %442 = arith.addf %440, %441 : vector<16x8x4xf32>
    "tpu.trace_start"() <{level = 10 : i32, message = "gsd,ged->gse"}> : () -> ()
    %cst_176 = arith.constant dense<0.000000e+00> : vector<16x8x4xf32>
    %443 = tpu.matmul %408, %420, %cst_176 {dimension_numbers = #tpu.dot_dimension_numbers<[2], [2], [1], [1], [0, 0, 0, 1, 1, 1], [0], [0]>} : vector<16x8x32xf32>, vector<16x4x32xf32>, vector<16x8x4xf32> -> vector<16x8x4xf32>
    "tpu.trace_stop"() : () -> ()
    %444 = vector.broadcast %436 : vector<16x1x4xf32> to vector<16x8x4xf32>
    %445 = arith.addf %443, %444 : vector<16x8x4xf32>
    "tpu.trace_start"() <{level = 10 : i32, message = "gqe,gke->gqk"}> : () -> ()
    %cst_177 = arith.constant dense<0.000000e+00> : vector<16x8x8xf32>
    %446 = tpu.matmul %439, %442, %cst_177 {dimension_numbers = #tpu.dot_dimension_numbers<[2], [2], [1], [1], [0, 0, 0, 1, 1, 1], [0], [0]>} : vector<16x8x4xf32>, vector<16x8x4xf32>, vector<16x8x8xf32> -> vector<16x8x8xf32>
    "tpu.trace_stop"() : () -> ()
    %cst_178 = arith.constant dense<0xFF800000> : vector<16x8xf32>
    %447 = vector.multi_reduction <maximumf>, %446, %cst_178 [2] : vector<16x8x8xf32> to vector<16x8xf32>
    %448 = vector.shape_cast %447 : vector<16x8xf32> to vector<16x8x1xf32>
    %449 = vector.broadcast %448 : vector<16x8x1xf32> to vector<16x8x8xf32>
    %450 = arith.subf %446, %449 : vector<16x8x8xf32>
    %451 = math.exp %450 : vector<16x8x8xf32>
    %cst_179 = arith.constant dense<0.000000e+00> : vector<16x8xf32>
    %452 = vector.multi_reduction <add>, %451, %cst_179 [2] : vector<16x8x8xf32> to vector<16x8xf32>
    %453 = vector.shape_cast %452 : vector<16x8xf32> to vector<16x8x1xf32>
    %454 = vector.broadcast %453 : vector<16x8x1xf32> to vector<16x8x8xf32>
    %455 = arith.divf %451, %454 : vector<16x8x8xf32>
    "tpu.trace_start"() <{level = 10 : i32, message = "gqk,gke->gqe"}> : () -> ()
    %cst_180 = arith.constant dense<0.000000e+00> : vector<16x8x4xf32>
    %456 = tpu.matmul %455, %445, %cst_180 {dimension_numbers = #tpu.dot_dimension_numbers<[2], [1], [1], [2], [0, 0, 0, 1, 1, 2], [0], [0]>} : vector<16x8x8xf32>, vector<16x8x4xf32>, vector<16x8x4xf32> -> vector<16x8x4xf32>
    "tpu.trace_stop"() : () -> ()
    "tpu.trace_start"() <{level = 10 : i32, message = "gqe,ged->gqd"}> : () -> ()
    %cst_181 = arith.constant dense<0.000000e+00> : vector<16x8x32xf32>
    %457 = tpu.matmul %456, %424, %cst_181 {dimension_numbers = #tpu.dot_dimension_numbers<[2], [1], [1], [2], [0, 0, 0, 1, 1, 2], [0], [0]>} : vector<16x8x4xf32>, vector<16x4x32xf32>, vector<16x8x32xf32> -> vector<16x8x32xf32>
    "tpu.trace_stop"() : () -> ()
    %458 = vector.shape_cast %457 : vector<16x8x32xf32> to vector<2x8x8x32xf32>
    %cst_182 = arith.constant dense<0.000000e+00> : vector<2x8x32xf32>
    %459 = vector.multi_reduction <add>, %458, %cst_182 [1] : vector<2x8x8x32xf32> to vector<2x8x32xf32>
    %460 = vector.shape_cast %398 : vector<1x32xf32> to vector<1x1x32xf32>
    %461 = vector.broadcast %460 : vector<1x1x32xf32> to vector<2x8x32xf32>
    %462 = arith.addf %459, %461 : vector<2x8x32xf32>
    %463 = arith.addf %462, %383 : vector<2x8x32xf32>
    %cst_183 = arith.constant dense<0.000000e+00> : vector<2x8xf32>
    %464 = vector.multi_reduction <add>, %463, %cst_183 [2] : vector<2x8x32xf32> to vector<2x8xf32>
    %465 = vector.shape_cast %464 : vector<2x8xf32> to vector<2x8x1xf32>
    %cst_184 = arith.constant 3.200000e+01 : f32
    %466 = vector.broadcast %cst_184 : f32 to vector<2x8x1xf32>
    %467 = arith.divf %465, %466 : vector<2x8x1xf32>
    %468 = vector.broadcast %467 : vector<2x8x1xf32> to vector<2x8x32xf32>
    %469 = arith.subf %463, %468 : vector<2x8x32xf32>
    %470 = arith.mulf %469, %469 : vector<2x8x32xf32>
    %cst_185 = arith.constant dense<0.000000e+00> : vector<2x8xf32>
    %471 = vector.multi_reduction <add>, %470, %cst_185 [2] : vector<2x8x32xf32> to vector<2x8xf32>
    %472 = vector.shape_cast %471 : vector<2x8xf32> to vector<2x8x1xf32>
    %cst_186 = arith.constant 0.0322580636 : f32
    %473 = vector.broadcast %cst_186 : f32 to vector<2x8x1xf32>
    %474 = arith.mulf %472, %473 : vector<2x8x1xf32>
    %475 = math.sqrt %474 : vector<2x8x1xf32>
    %476 = vector.broadcast %467 : vector<2x8x1xf32> to vector<2x8x32xf32>
    %477 = arith.subf %463, %476 : vector<2x8x32xf32>
    %478 = vector.shape_cast %399 : vector<1x32xf32> to vector<1x1x32xf32>
    %479 = vector.broadcast %478 : vector<1x1x32xf32> to vector<2x8x32xf32>
    %480 = arith.mulf %479, %477 : vector<2x8x32xf32>
    %cst_187 = arith.constant 9.99999997E-7 : f32
    %481 = vector.broadcast %cst_187 : f32 to vector<2x8x1xf32>
    %482 = arith.addf %475, %481 : vector<2x8x1xf32>
    %483 = vector.broadcast %482 : vector<2x8x1xf32> to vector<2x8x32xf32>
    %484 = arith.divf %480, %483 : vector<2x8x32xf32>
    %485 = vector.shape_cast %400 : vector<1x32xf32> to vector<1x1x32xf32>
    %486 = vector.broadcast %485 : vector<1x1x32xf32> to vector<2x8x32xf32>
    %487 = arith.addf %484, %486 : vector<2x8x32xf32>
    %c1_188 = arith.constant 1 : index
    %c0_189 = arith.constant 0 : index
    %c0_190 = arith.constant 0 : index
    %488 = vector.load %arg8[%c1_188, %c0_189, %c0_190] : memref<2x32x64xf32, #tpu.memory_space<vmem>>, vector<1x32x64xf32>
    %489 = vector.shape_cast %488 : vector<1x32x64xf32> to vector<32x64xf32>
    %c1_191 = arith.constant 1 : index
    %c0_192 = arith.constant 0 : index
    %c0_193 = arith.constant 0 : index
    %490 = vector.load %arg9[%c1_191, %c0_192, %c0_193] : memref<2x64x32xf32, #tpu.memory_space<vmem>>, vector<1x64x32xf32>
    %491 = vector.shape_cast %490 : vector<1x64x32xf32> to vector<64x32xf32>
    "tpu.trace_start"() <{level = 10 : i32, message = "bsd,df->bsf"}> : () -> ()
    %cst_194 = arith.constant dense<0.000000e+00> : vector<2x8x64xf32>
    %492 = tpu.matmul %487, %489, %cst_194 {dimension_numbers = #tpu.dot_dimension_numbers<[2], [0], [0, 1], [1], [0, 0, 0, 1, 1, 1], [], []>} : vector<2x8x32xf32>, vector<32x64xf32>, vector<2x8x64xf32> -> vector<2x8x64xf32>
    "tpu.trace_stop"() : () -> ()
    %493 = vector.extract_strided_slice %2 {offsets = [18, 0], sizes = [1, 64], strides = [1, 1]} : vector<22x64xf32> to vector<1x64xf32>
    %494 = vector.shape_cast %493 : vector<1x64xf32> to vector<1x1x64xf32>
    %495 = vector.broadcast %494 : vector<1x1x64xf32> to vector<2x8x64xf32>
    %496 = arith.addf %492, %495 : vector<2x8x64xf32>
    %cst_195 = arith.constant 0.000000e+00 : f32
    %497 = vector.broadcast %cst_195 : f32 to vector<2x8x64xf32>
    %498 = arith.maximumf %496, %497 : vector<2x8x64xf32>
    "tpu.trace_start"() <{level = 10 : i32, message = "bsf,fd->bsd"}> : () -> ()
    %cst_196 = arith.constant dense<0.000000e+00> : vector<2x8x32xf32>
    %499 = tpu.matmul %498, %491, %cst_196 {dimension_numbers = #tpu.dot_dimension_numbers<[2], [0], [0, 1], [1], [0, 0, 0, 1, 1, 1], [], []>} : vector<2x8x64xf32>, vector<64x32xf32>, vector<2x8x32xf32> -> vector<2x8x32xf32>
    "tpu.trace_stop"() : () -> ()
    %500 = vector.extract_strided_slice %2 {offsets = [19, 0], sizes = [1, 32], strides = [1, 1]} : vector<22x64xf32> to vector<1x32xf32>
    %501 = vector.shape_cast %500 : vector<1x32xf32> to vector<1x1x32xf32>
    %502 = vector.broadcast %501 : vector<1x1x32xf32> to vector<2x8x32xf32>
    %503 = arith.addf %499, %502 : vector<2x8x32xf32>
    %504 = arith.addf %503, %487 : vector<2x8x32xf32>
    %505 = vector.extract_strided_slice %2 {offsets = [20, 0], sizes = [1, 32], strides = [1, 1]} : vector<22x64xf32> to vector<1x32xf32>
    %506 = vector.extract_strided_slice %2 {offsets = [21, 0], sizes = [1, 32], strides = [1, 1]} : vector<22x64xf32> to vector<1x32xf32>
    %cst_197 = arith.constant dense<0.000000e+00> : vector<2x8xf32>
    %507 = vector.multi_reduction <add>, %504, %cst_197 [2] : vector<2x8x32xf32> to vector<2x8xf32>
    %508 = vector.shape_cast %507 : vector<2x8xf32> to vector<2x8x1xf32>
    %cst_198 = arith.constant 3.200000e+01 : f32
    %509 = vector.broadcast %cst_198 : f32 to vector<2x8x1xf32>
    %510 = arith.divf %508, %509 : vector<2x8x1xf32>
    %511 = vector.broadcast %510 : vector<2x8x1xf32> to vector<2x8x32xf32>
    %512 = arith.subf %504, %511 : vector<2x8x32xf32>
    %513 = arith.mulf %512, %512 : vector<2x8x32xf32>
    %cst_199 = arith.constant dense<0.000000e+00> : vector<2x8xf32>
    %514 = vector.multi_reduction <add>, %513, %cst_199 [2] : vector<2x8x32xf32> to vector<2x8xf32>
    %515 = vector.shape_cast %514 : vector<2x8xf32> to vector<2x8x1xf32>
    %cst_200 = arith.constant 0.0322580636 : f32
    %516 = vector.broadcast %cst_200 : f32 to vector<2x8x1xf32>
    %517 = arith.mulf %515, %516 : vector<2x8x1xf32>
    %518 = math.sqrt %517 : vector<2x8x1xf32>
    %519 = vector.broadcast %510 : vector<2x8x1xf32> to vector<2x8x32xf32>
    %520 = arith.subf %504, %519 : vector<2x8x32xf32>
    %521 = vector.shape_cast %505 : vector<1x32xf32> to vector<1x1x32xf32>
    %522 = vector.broadcast %521 : vector<1x1x32xf32> to vector<2x8x32xf32>
    %523 = arith.mulf %522, %520 : vector<2x8x32xf32>
    %cst_201 = arith.constant 9.99999997E-7 : f32
    %524 = vector.broadcast %cst_201 : f32 to vector<2x8x1xf32>
    %525 = arith.addf %518, %524 : vector<2x8x1xf32>
    %526 = vector.broadcast %525 : vector<2x8x1xf32> to vector<2x8x32xf32>
    %527 = arith.divf %523, %526 : vector<2x8x32xf32>
    %528 = vector.shape_cast %506 : vector<1x32xf32> to vector<1x1x32xf32>
    %529 = vector.broadcast %528 : vector<1x1x32xf32> to vector<2x8x32xf32>
    %530 = arith.addf %527, %529 : vector<2x8x32xf32>
    %c0_202 = arith.constant 0 : index
    %c0_203 = arith.constant 0 : index
    %c0_204 = arith.constant 0 : index
    %531 = vector.load %arg11[%c0_202, %c0_203, %c0_204] : memref<2x8x32xf32, #tpu.memory_space<vmem>>, vector<2x8x32xf32>
    tpu.vector_store %arg11[%c0_202, %c0_203, %c0_204], %530 {strides = array<i32>} : memref<2x8x32xf32, #tpu.memory_space<vmem>>, vector<2x8x32xf32>,
    return
  }
}

</mosaic_0001>

<bundles_post_ra>
// kernel: decoder_forward.1
= control target key start
LH: loop header
LB: loop body
LE: loop exit
PB: predicated region body
PF: predicated region fallthrough
CT: control target
= control target key end

     0   :  { %16 = vsyncpa [#allocation3], 0  ;;  %s39267_s0 = inlined_call_operand.vmem [shape: f32[2,8,32], index: 0, kind: input, shape index: {}]   ;;  %s39268_s1 = inlined_call_operand.hbm [shape: f32[2,8,32], index: 1, kind: input, shape index: {}]   ;;  %s39269_s2 = inlined_call_operand.vmem [shape: f32[6,8,4,32], index: 2, kind: input, shape index: {}]   ;;  %s39270_s3 = inlined_call_operand.vmem [shape: f32[6,8,1,4], index: 3, kind: input, shape index: {}]   ;;  %s39271_s4 = inlined_call_operand.vmem [shape: f32[2,8,4,32], index: 4, kind: input, shape index: {}]   ;;  %s39272_s5 = inlined_call_operand.vmem [shape: f32[6,8,4,32], index: 5, kind: input, shape index: {}]   ;;  %s39273_s6 = inlined_call_operand.vmem [shape: f32[6,8,1,4], index: 6, kind: input, shape index: {}]   ;;  %s39274_s7 = inlined_call_operand.vmem [shape: f32[2,8,4,32], index: 7, kind: input, shape index: {}]   ;;  %s39275_s8 = inlined_call_operand.vmem [shape: f32[2,32,64], index: 8, kind: input, shape index: {}]   ;;  %s39276_s9 = inlined_call_operand.vmem [shape: f32[2,64,32], index: 9, kind: input, shape index: {}]   ;;  %s39277_s10 = inlined_call_operand.hbm [shape: f32[22,64], index: 10, kind: input, shape index: {}]   ;;  %s39278_s11 = inlined_call_operand.hbm [shape: f32[2,8,32], index: 11, kind: output, shape index: {}]  }
   0x1   :  { %17 = vsyncpa [#allocation6], 0 }
   0x2   :  { %18 = vsyncpa [#allocation4], 0  ;;  %s34781_s17 = smov [#allocation2]   ;;  %s34709_s21 = scalar_lea.hbm %s39268_s1, 256 }
   0x3   :  { %s26_s18 = sshll.u32 %s34781_s17, 4  ;;  %p34710_p0 = scmp.ne.s32.totalorder %s39268_s1, %s34709_s21  ;;  %s27_s18 = int_to_ptr.vmem [resolvable:$true] %s26_s18 }
   0x4   :  { %p34713_p1 = scmp.lt.u32.totalorder %s34709_s21, %s39268_s1 }
   0x6   :  { %p34715_p2 = pnand %p34713_p1, %p34710_p0 }
   0x8   :  { %34718 = shalt.err (!%p34715_p2)
}
   0x9   :  { %s34719_s26 = scalar_lea.vmem %s27_s18, 256  ;;  %p34724_p4 = scmp.lt.s32.totalorder %s27_s18, %s27_s18 }
   0xa   :  { %p34720_p3 = scmp.ne.s32.totalorder %s27_s18, %s34719_s26  ;;  %p34725_p5 = scmp.lt.s32.totalorder %s34719_s26, %s34719_s26 }
   0xc   :  { %p34726_p6 = por %p34725_p5, %p34724_p4 }
   0xe   :  { %p34727_p7 = pnand %p34726_p6, %p34720_p3 }
  0x10   :  { %34730 = shalt.err (!%p34727_p7)
}
  0x11   :  { %s34782_s27 = smov 128   ;;  %s34783_s28 = smov 8  }
  0x12   :  { %32 = dma.hbm_to_vmem [thread:$0]  %s39268_s1, 256, %s27_s18, [#allocation3], %s34782_s27, %s34782_s27, %s34783_s28  }
  0x13   :  { %s34784_s12 = smov [#allocation5]   ;;  %s34731_s16 = scalar_lea.hbm %s39277_s10, 384 }
  0x14   :  { %s54_s13 = sshll.u32 %s34784_s12, 4  ;;  %p34732_p8 = scmp.ne.s32.totalorder %s39277_s10, %s34731_s16  ;;  %s55_s13 = int_to_ptr.vmem [resolvable:$true] %s54_s13 }
  0x15   :  { %p34735_p9 = scmp.lt.u32.totalorder %s34731_s16, %s39277_s10 }
  0x17   :  { %p34737_p10 = pnand %p34735_p9, %p34732_p8 }
  0x19   :  { %34740 = shalt.err (!%p34737_p10)
}
  0x1a   :  { %s34741_s22 = scalar_lea.vmem %s55_s13, 384  ;;  %p34746_p12 = scmp.lt.s32.totalorder %s55_s13, %s55_s13 }
  0x1b   :  { %p34742_p11 = scmp.ne.s32.totalorder %s55_s13, %s34741_s22  ;;  %p34747_p13 = scmp.lt.s32.totalorder %s34741_s22, %s34741_s22 }
  0x1d   :  { %p34748_p0 = por %p34747_p13, %p34746_p12 }
  0x1f   :  { %p34749_p1 = pnand %p34748_p0, %p34742_p11 }
  0x21   :  { %34752 = shalt.err (!%p34749_p1)
}
  0x22   :  { %60 = dma.hbm_to_vmem [thread:$0]  %s39277_s10, 384, %s55_s13, [#allocation6], %s34782_s27, %s34782_s27, %s34783_s28  }
  0x23   :  { %34775 = dma.done.wait [#allocation3], 256  }
  0x24   :  { %34776 = vsyncadd [#allocation3], 4294967040 }
  0x25   :  { %34777 = dma.done.wait [#allocation6], 384  }
  0x26   :  { %34778 = vsyncadd [#allocation6], 4294966912  ;;  %vm74_vm0 = vcmask 261120   ;;  %v67_v0 = vld [vmem:[%s39267_s0] sm:$0xff]  ;;  %v68_v1 = vld [vmem:[%s39267_s0 + $0x8] sm:$0xff]  ;;  %v34785_v14 = vmov 0.0   ;;  %v102_v19 = vlaneseq }
  0x27   :  { %v75_v2 = vsel %vm74_vm0, %v67_v0, 0.0  ;;  %v78_v3 = vsel %vm74_vm0, %v68_v1, 0.0  ;;  %32360 = vmatprep.subr.mxu0 %v34785_v14  ;;  %32375 = vmatprep.subr.mxu1 %v34785_v14  ;;  %v34893_v15 = vld [vmem:[%s39269_s2] sm:$0xf]  ;;  %v34898_v16 = vld [vmem:[%s39269_s2 + $0xc] sm:$0xf] }
  0x28   :  { %76 = vadd.xlane.f32.xlu0 %v75_v2  ;;  %32361 = vmatpush3.xpose.msk.msra.mxu0 %vm74_vm0, %v34893_v15  ;;  %vm34786_vm1 = vmmov 0   ;;  %v34910_v23 = vshrl.u32 %v102_v19, 7  ;;  %v71_v26 = vld [vmem:[#allocation5] sm:$0xff]  ;;  %v115_v34 = vld [vmem:[%s39269_s2 + $0x4] sm:$0xf]  ;;  %vm3756_vm2 = vcmask 31744  }
  0x29   :  { %32376 = vmatpush3.xpose.msk.msra.mxu1 %vm74_vm0, %v34898_v16  ;;  %32365 = vmatprep.subr.mxu0 %v34785_v14  ;;  %v119_v35 = vld [vmem:[%s39269_s2 + $0x14] sm:$0xf]  ;;  %v116_v38 = vld [vmem:[%s39269_s2 + $0x8] sm:$0xf]  ;;  %v121_v39 = vld [vmem:[%s39269_s2 + $0x1c] sm:$0xf] }
  0x2a   :  { %32385 = vmatprep.subr.mxu1 %v34785_v14  ;;  %32362 = vmatprep.mubr.msk.f32.mxu0 %vm34786_vm1, %v34785_v14  ;;  %v34913_v25 = vsub.s32 0, %v34910_v23  ;;  %v34916_v27 = vsub.s32 1, %v34910_v23  ;;  %v118_v41 = vld [vmem:[%s39269_s2 + $0x10] sm:$0xf]  ;;  %v120_v43 = vld [vmem:[%s39269_s2 + $0x18] sm:$0xf] }
  0x2b   :  { %32377 = vmatprep.mubr.msk.f32.mxu1 %vm34786_vm1, %v34785_v14  ;;  %v30565_v44 = vld [vmem:[%s39269_s2 + $0x24] sm:$0xf]  ;;  %v30567_v45 = vld [vmem:[%s39269_s2 + $0x2c] sm:$0xf]  ;;  %v30564_v46 = vld [vmem:[%s39269_s2 + $0x20] sm:$0xf] }
  0x2c   :  { %79 = vadd.xlane.f32.xlu0 %v78_v3  ;;  %v105_v28 = vrot.slane %v71_v26, %v34913_v25  ;;  %v111_v30 = vrot.slane %v71_v26, %v34916_v27  ;;  %v30569_v47 = vld [vmem:[%s39269_s2 + $0x34] sm:$0xf]  ;;  %v30566_v48 = vld [vmem:[%s39269_s2 + $0x28] sm:$0xf]  ;;  %v30571_v49 = vld [vmem:[%s39269_s2 + $0x3c] sm:$0xf] }
  0x2d   :  { %v30568_v50 = vld [vmem:[%s39269_s2 + $0x30] sm:$0xf]  ;;  %v30570_v51 = vld [vmem:[%s39269_s2 + $0x38] sm:$0xf]  ;;  %v30573_v52 = vld [vmem:[%s39269_s2 + $0x44] sm:$0xf] }
  0x2e   :  { %v30575_v53 = vld [vmem:[%s39269_s2 + $0x4c] sm:$0xf]  ;;  %v30572_v54 = vld [vmem:[%s39269_s2 + $0x40] sm:$0xf]  ;;  %v30577_v55 = vld [vmem:[%s39269_s2 + $0x54] sm:$0xf] }
  0x2f   :  { %v30574_v56 = vld [vmem:[%s39269_s2 + $0x48] sm:$0xf]  ;;  %v30579_v57 = vld [vmem:[%s39269_s2 + $0x5c] sm:$0xf]  ;;  %v30576_v58 = vld [vmem:[%s39269_s2 + $0x50] sm:$0xf] }
  0x30   :  { %v30578_v59 = vld [vmem:[%s39269_s2 + $0x58] sm:$0xf]  ;;  %vm4973_vm3 = vcmask 64512   ;;  %vm6321_vm4 = vcmask 1043456   ;;  %vm15194_vm13 = vcmask 523264  }
  0xb5   :  { %v77_v4 = vpop.xlane.xlu0 %76 }
  0xb6   :  { %v82_v5 = vmul.f32 0.03125, %v77_v4 }
  0xb8   :  { %v84_v6 = vsub.f32 %v67_v0, %v82_v5 }
  0xb9   :  { %v80_v7 = vpop.xlane.xlu0 %79 }
  0xba   :  { %v83_v8 = vmul.f32 0.03125, %v80_v7  ;;  %v86_v9 = vmul.f32 %v84_v6, %v84_v6 }
  0xbc   :  { %v85_v10 = vsub.f32 %v68_v1, %v83_v8  ;;  %v88_v11 = vsel %vm74_vm0, %v86_v9, 0.0 }
  0xbd   :  { %89 = vadd.xlane.f32.xlu1 %v88_v11 }
  0xbe   :  { %v87_v12 = vmul.f32 %v85_v10, %v85_v10 }
  0xc0   :  { %v91_v13 = vsel %vm74_vm0, %v87_v12, 0.0 }
  0xc1   :  { %92 = vadd.xlane.f32.xlu1 %v91_v13 }
 0x14a   :  { %v90_v17 = vpop.xlane.xlu1 %89 }
 0x14b   :  { %v94_v18 = vmul.f32 0.03125, %v90_v17 }
 0x14d   :  { %v96_v20 = vadd.f32 1e-05, %v94_v18 }
 0x14e   :  { %v93_v21 = vpop.xlane.xlu1 %92 }
 0x14f   :  { %34395 = vrsqrt.f32 %v96_v20  ;;  %v95_v22 = vmul.f32 0.03125, %v93_v21 }
 0x151   :  { %v97_v24 = vadd.f32 1e-05, %v95_v22 }
 0x153   :  { %34397 = vrsqrt.f32 %v97_v24 }
 0x159   :  { %v34396_v29 = vpop.eup %34395 }
 0x15a   :  { %v100_v31 = vmul.f32 %v34396_v29, %v84_v6 }
 0x15c   :  { %v106_v32 = vmul.f32 %v105_v28, %v100_v31  ;;  %v35308_v31 = vld [vmem:[%s39270_s3 + $0x1] ss:$0 sm:$0xff] }
 0x15d   :  { %v34398_v36 = vpop.eup %34397 }
 0x15e   :  { %v34920_v33 = vadd.f32 %v111_v30, %v106_v32  ;;  %v101_v37 = vmul.f32 %v34398_v36, %v85_v10  ;;  %v35314_v36 = vld [vmem:[%s39270_s3 + $0xb] ss:$0 sm:$0xff] }
 0x160   :  { %32363 = vmatmul.mubr.msk.f32.vlgmr.msra.gmra.mrb[0].mxu0 %vm74_vm0, %v34920_v33  ;;  %32378 = vmatmul.mubr.msk.f32.vlgmr.msra.gmra.mrb[0].mxu1 %vm74_vm0, %v34920_v33  ;;  %v107_v40 = vmul.f32 %v105_v28, %v101_v37  ;;  %v35301_v28 = vld [vmem:[%s39270_s3 + $0x9] ss:$0 sm:$0xff] }
 0x161   :  { %32366 = vmatpush3.xpose.msk.msra.mxu0 %vm74_vm0, %v115_v34  ;;  %32386 = vmatpush3.xpose.msk.msra.mxu1 %vm74_vm0, %v119_v35 }
 0x162   :  { %32367 = vmatprep.mubr.msk.f32.mxu0 %vm34786_vm1, %v34785_v14  ;;  %32387 = vmatprep.mubr.msk.f32.mxu1 %vm34786_vm1, %v34785_v14  ;;  %v34967_v42 = vadd.f32 %v111_v30, %v107_v40  ;;  %v35324_v40 = vld [vmem:[%s39270_s3 + $0x3] ss:$0 sm:$0xff] }
 0x163   :  { %32370 = vmatprep.subr.mxu0 %v34785_v14  ;;  %32395 = vmatprep.subr.mxu1 %v34785_v14 }
 0x164   :  { %32368 = vmatmul.mubr.msk.f32.vlgmr.msra.gmra.mrb[2].mxu0 %vm74_vm0, %v34920_v33  ;;  %32388 = vmatmul.mubr.msk.f32.vlgmr.msra.gmra.mrb[2].mxu1 %vm74_vm0, %v34920_v33 }
 0x165   :  { %32371 = vmatpush3.xpose.msk.msra.mxu0 %vm74_vm0, %v116_v38  ;;  %32396 = vmatpush3.xpose.msk.msra.mxu1 %vm74_vm0, %v121_v39 }
 0x166   :  { %32372 = vmatprep.mubr.msk.f32.mxu0 %vm34786_vm1, %v34785_v14  ;;  %32397 = vmatprep.mubr.msk.f32.mxu1 %vm34786_vm1, %v34785_v14 }
 0x167   :  { %32380 = vmatprep.subr.mxu0 %v34785_v14  ;;  %32405 = vmatprep.subr.mxu1 %v34785_v14 }
 0x168   :  { %32373 = vmatmul.mubr.msk.f32.vlgmr.msra.gmra.mrb[4].mxu0 %vm74_vm0, %v34920_v33  ;;  %32398 = vmatmul.mubr.msk.f32.vlgmr.msra.gmra.mrb[4].mxu1 %vm74_vm0, %v34920_v33 }
 0x169   :  { %32381 = vmatpush3.xpose.msk.msra.mxu0 %vm74_vm0, %v118_v41  ;;  %32406 = vmatpush3.xpose.msk.msra.mxu1 %vm74_vm0, %v115_v34 }
 0x16a   :  { %32382 = vmatprep.mubr.msk.f32.mxu0 %vm34786_vm1, %v34785_v14  ;;  %32407 = vmatprep.mubr.msk.f32.mxu1 %vm34786_vm1, %v34785_v14 }
 0x16b   :  { %32390 = vmatprep.subr.mxu0 %v34785_v14  ;;  %32415 = vmatprep.subr.mxu1 %v34785_v14 }
 0x16c   :  { %32383 = vmatmul.mubr.msk.f32.vlgmr.msra.gmra.mrb[6].mxu0 %vm74_vm0, %v34920_v33  ;;  %32408 = vmatmul.mubr.msk.f32.vlgmr.msra.gmra.mrb[6].mxu1 %vm74_vm0, %v34967_v42 }
 0x16d   :  { %32391 = vmatpush3.xpose.msk.msra.mxu0 %vm74_vm0, %v120_v43  ;;  %32416 = vmatpush3.xpose.msk.msra.mxu1 %vm74_vm0, %v34898_v16 }
 0x16e   :  { %32392 = vmatprep.mubr.msk.f32.mxu0 %vm34786_vm1, %v34785_v14  ;;  %32417 = vmatprep.mubr.msk.f32.mxu1 %vm34786_vm1, %v34785_v14 }
 0x16f   :  { %32400 = vmatprep.subr.mxu0 %v34785_v14  ;;  %32425 = vmatprep.subr.mxu1 %v34785_v14 }
 0x170   :  { %32393 = vmatmul.mubr.msk.f32.vlgmr.msra.gmra.mrb[8].mxu0 %vm74_vm0, %v34920_v33  ;;  %32418 = vmatmul.mubr.msk.f32.vlgmr.msra.gmra.mrb[8].mxu1 %vm74_vm0, %v34967_v42 }
 0x171   :  { %32401 = vmatpush3.xpose.msk.msra.mxu0 %vm74_vm0, %v34893_v15  ;;  %32426 = vmatpush3.xpose.msk.msra.mxu1 %vm74_vm0, %v119_v35 }
 0x172   :  { %32402 = vmatprep.mubr.msk.f32.mxu0 %vm34786_vm1, %v34785_v14  ;;  %32427 = vmatprep.mubr.msk.f32.mxu1 %vm34786_vm1, %v34785_v14 }
 0x173   :  { %32410 = vmatprep.subr.mxu0 %v34785_v14  ;;  %32435 = vmatprep.subr.mxu1 %v34785_v14 }
 0x174   :  { %32403 = vmatmul.mubr.msk.f32.vlgmr.msra.gmra.mrb[10].mxu0 %vm74_vm0, %v34967_v42  ;;  %32428 = vmatmul.mubr.msk.f32.vlgmr.msra.gmra.mrb[10].mxu1 %vm74_vm0, %v34967_v42 }
 0x175   :  { %32411 = vmatpush3.xpose.msk.msra.mxu0 %vm74_vm0, %v116_v38  ;;  %32436 = vmatpush3.xpose.msk.msra.mxu1 %vm74_vm0, %v121_v39 }
 0x176   :  { %32412 = vmatprep.mubr.msk.f32.mxu0 %vm34786_vm1, %v34785_v14  ;;  %32437 = vmatprep.mubr.msk.f32.mxu1 %vm34786_vm1, %v34785_v14 }
 0x177   :  { %32420 = vmatprep.subr.mxu0 %v34785_v14  ;;  %32445 = vmatprep.subr.mxu1 %v34785_v14 }
 0x178   :  { %32413 = vmatmul.mubr.msk.f32.vlgmr.msra.gmra.mrb[12].mxu0 %vm74_vm0, %v34967_v42  ;;  %32438 = vmatmul.mubr.msk.f32.vlgmr.msra.gmra.mrb[12].mxu1 %vm74_vm0, %v34967_v42 }
 0x179   :  { %32421 = vmatpush3.xpose.msk.msra.mxu0 %vm74_vm0, %v118_v41  ;;  %32446 = vmatpush3.xpose.msk.msra.mxu1 %vm74_vm0, %v30565_v44 }
 0x17a   :  { %32422 = vmatprep.mubr.msk.f32.mxu0 %vm34786_vm1, %v34785_v14  ;;  %32447 = vmatprep.mubr.msk.f32.mxu1 %vm34786_vm1, %v34785_v14 }
 0x17b   :  { %32430 = vmatprep.subr.mxu0 %v34785_v14  ;;  %32455 = vmatprep.subr.mxu1 %v34785_v14 }
 0x17c   :  { %32423 = vmatmul.mubr.msk.f32.vlgmr.msra.gmra.mrb[14].mxu0 %vm74_vm0, %v34967_v42  ;;  %32448 = vmatmul.mubr.msk.f32.vlgmr.msra.gmra.mrb[14].mxu1 %vm74_vm0, %v34920_v33 }
 0x17d   :  { %32431 = vmatpush3.xpose.msk.msra.mxu0 %vm74_vm0, %v120_v43  ;;  %32456 = vmatpush3.xpose.msk.msra.mxu1 %vm74_vm0, %v30567_v45 }
 0x17e   :  { %32432 = vmatprep.mubr.msk.f32.mxu0 %vm34786_vm1, %v34785_v14  ;;  %32457 = vmatprep.mubr.msk.f32.mxu1 %vm34786_vm1, %v34785_v14 }
 0x17f   :  { %32440 = vmatprep.subr.mxu0 %v34785_v14  ;;  %32465 = vmatprep.subr.mxu1 %v34785_v14 }
 0x180   :  { %32433 = vmatmul.mubr.msk.f32.vlgmr.msra.gmra.mrb[16].mxu0 %vm74_vm0, %v34967_v42  ;;  %32458 = vmatmul.mubr.msk.f32.vlgmr.msra.gmra.mrb[16].mxu1 %vm74_vm0, %v34920_v33 }
 0x181   :  { %32441 = vmatpush3.xpose.msk.msra.mxu0 %vm74_vm0, %v30564_v46  ;;  %32466 = vmatpush3.xpose.msk.msra.mxu1 %vm74_vm0, %v30569_v47 }
 0x182   :  { %32442 = vmatprep.mubr.msk.f32.mxu0 %vm34786_vm1, %v34785_v14  ;;  %32467 = vmatprep.mubr.msk.f32.mxu1 %vm34786_vm1, %v34785_v14 }
 0x183   :  { %32450 = vmatprep.subr.mxu0 %v34785_v14  ;;  %32475 = vmatprep.subr.mxu1 %v34785_v14 }
 0x184   :  { %32443 = vmatmul.mubr.msk.f32.vlgmr.msra.gmra.mrb[18].mxu0 %vm74_vm0, %v34920_v33  ;;  %32468 = vmatmul.mubr.msk.f32.vlgmr.msra.gmra.mrb[18].mxu1 %vm74_vm0, %v34920_v33 }
 0x185   :  { %32451 = vmatpush3.xpose.msk.msra.mxu0 %vm74_vm0, %v30566_v48  ;;  %32476 = vmatpush3.xpose.msk.msra.mxu1 %vm74_vm0, %v30571_v49 }
 0x186   :  { %32452 = vmatprep.mubr.msk.f32.mxu0 %vm34786_vm1, %v34785_v14  ;;  %32477 = vmatprep.mubr.msk.f32.mxu1 %vm34786_vm1, %v34785_v14 }
 0x187   :  { %32460 = vmatprep.subr.mxu0 %v34785_v14  ;;  %32485 = vmatprep.subr.mxu1 %v34785_v14 }
 0x188   :  { %32453 = vmatmul.mubr.msk.f32.vlgmr.msra.gmra.mrb[20].mxu0 %vm74_vm0, %v34920_v33  ;;  %32478 = vmatmul.mubr.msk.f32.vlgmr.msra.gmra.mrb[20].mxu1 %vm74_vm0, %v34920_v33 }
 0x189   :  { %32461 = vmatpush3.xpose.msk.msra.mxu0 %vm74_vm0, %v30568_v50  ;;  %32486 = vmatpush3.xpose.msk.msra.mxu1 %vm74_vm0, %v30565_v44 }
 0x18a   :  { %32462 = vmatprep.mubr.msk.f32.mxu0 %vm34786_vm1, %v34785_v14  ;;  %32487 = vmatprep.mubr.msk.f32.mxu1 %vm34786_vm1, %v34785_v14 }
 0x18b   :  { %32470 = vmatprep.subr.mxu0 %v34785_v14  ;;  %32495 = vmatprep.subr.mxu1 %v34785_v14 }
 0x18c   :  { %32463 = vmatmul.mubr.msk.f32.vlgmr.msra.gmra.mrb[22].mxu0 %vm74_vm0, %v34920_v33  ;;  %32488 = vmatmul.mubr.msk.f32.vlgmr.msra.gmra.mrb[22].mxu1 %vm74_vm0, %v34967_v42 }
 0x18d   :  { %32471 = vmatpush3.xpose.msk.msra.mxu0 %vm74_vm0, %v30570_v51  ;;  %32496 = vmatpush3.xpose.msk.msra.mxu1 %vm74_vm0, %v30567_v45  ;;  %v35331_v45 = vld [vmem:[%s39270_s3 + $0x8] ss:$0 sm:$0xff] }
 0x18e   :  { %32472 = vmatprep.mubr.msk.f32.mxu0 %vm34786_vm1, %v34785_v14  ;;  %32497 = vmatprep.mubr.msk.f32.mxu1 %vm34786_vm1, %v34785_v14 }
 0x18f   :  { %32480 = vmatprep.subr.mxu0 %v34785_v14  ;;  %32505 = vmatprep.subr.mxu1 %v34785_v14 }
 0x190   :  { %32473 = vmatmul.mubr.msk.f32.vlgmr.msra.gmra.mrb[24].mxu0 %vm74_vm0, %v34920_v33  ;;  %32498 = vmatmul.mubr.msk.f32.vlgmr.msra.gmra.mrb[24].mxu1 %vm74_vm0, %v34967_v42 }
 0x191   :  { %32481 = vmatpush3.xpose.msk.msra.mxu0 %vm74_vm0, %v30564_v46  ;;  %32506 = vmatpush3.xpose.msk.msra.mxu1 %vm74_vm0, %v30569_v47  ;;  %v35336_v46 = vld [vmem:[%s39270_s3 + $0xd] ss:$0 sm:$0xff] }
 0x192   :  { %32482 = vmatprep.mubr.msk.f32.mxu0 %vm34786_vm1, %v34785_v14  ;;  %32507 = vmatprep.mubr.msk.f32.mxu1 %vm34786_vm1, %v34785_v14 }
 0x193   :  { %32490 = vmatprep.subr.mxu0 %v34785_v14  ;;  %32515 = vmatprep.subr.mxu1 %v34785_v14 }
 0x194   :  { %32483 = vmatmul.mubr.msk.f32.vlgmr.msra.gmra.mrb[26].mxu0 %vm74_vm0, %v34967_v42  ;;  %32508 = vmatmul.mubr.msk.f32.vlgmr.msra.gmra.mrb[26].mxu1 %vm74_vm0, %v34967_v42 }
 0x195   :  { %32491 = vmatpush3.xpose.msk.msra.mxu0 %vm74_vm0, %v30566_v48  ;;  %32516 = vmatpush3.xpose.msk.msra.mxu1 %vm74_vm0, %v30571_v49 }
 0x196   :  { %32492 = vmatprep.mubr.msk.f32.mxu0 %vm34786_vm1, %v34785_v14  ;;  %32517 = vmatprep.mubr.msk.f32.mxu1 %vm34786_vm1, %v34785_v14 }
 0x197   :  { %32500 = vmatprep.subr.mxu0 %v34785_v14  ;;  %32525 = vmatprep.subr.mxu1 %v34785_v14 }
 0x198   :  { %32493 = vmatmul.mubr.msk.f32.vlgmr.msra.gmra.mrb[28].mxu0 %vm74_vm0, %v34967_v42  ;;  %32518 = vmatmul.mubr.msk.f32.vlgmr.msra.gmra.mrb[28].mxu1 %vm74_vm0, %v34967_v42 }
 0x199   :  { %32501 = vmatpush3.xpose.msk.msra.mxu0 %vm74_vm0, %v30568_v50  ;;  %32526 = vmatpush3.xpose.msk.msra.mxu1 %vm74_vm0, %v30573_v52  ;;  %v35346_v50 = vld [vmem:[%s39270_s3] ss:$0 sm:$0xff] }
 0x19a   :  { %32502 = vmatprep.mubr.msk.f32.mxu0 %vm34786_vm1, %v34785_v14  ;;  %32527 = vmatprep.mubr.msk.f32.mxu1 %vm34786_vm1, %v34785_v14 }
 0x19b   :  { %32510 = vmatprep.subr.mxu0 %v34785_v14  ;;  %32535 = vmatprep.subr.mxu1 %v34785_v14 }
 0x19c   :  { %32503 = vmatmul.mubr.msk.f32.vlgmr.msra.gmra.mrb[30].mxu0 %vm74_vm0, %v34967_v42  ;;  %32528 = vmatmul.mubr.msk.f32.vlgmr.msra.gmra.mrb[30].mxu1 %vm74_vm0, %v34920_v33 }
 0x19d   :  { %32511 = vmatpush3.xpose.msk.msra.mxu0 %vm74_vm0, %v30570_v51  ;;  %32536 = vmatpush3.xpose.msk.msra.mxu1 %vm74_vm0, %v30575_v53  ;;  %v35351_v51 = vld [vmem:[%s39270_s3 + $0x5] ss:$0 sm:$0xff] }
 0x19e   :  { %32512 = vmatprep.mubr.msk.f32.mxu0 %vm34786_vm1, %v34785_v14  ;;  %32537 = vmatprep.mubr.msk.f32.mxu1 %vm34786_vm1, %v34785_v14 }
 0x19f   :  { %32520 = vmatprep.subr.mxu0 %v34785_v14  ;;  %32545 = vmatprep.subr.mxu1 %v34785_v14 }
 0x1a0   :  { %32513 = vmatmul.mubr.msk.f32.vlgmr.msra.gmra.mrb[32].mxu0 %vm74_vm0, %v34967_v42  ;;  %32538 = vmatmul.mubr.msk.f32.vlgmr.msra.gmra.mrb[32].mxu1 %vm74_vm0, %v34920_v33 }
 0x1a1   :  { %32521 = vmatpush3.xpose.msk.msra.mxu0 %vm74_vm0, %v30572_v54  ;;  %32546 = vmatpush3.xpose.msk.msra.mxu1 %vm74_vm0, %v30577_v55 }
 0x1a2   :  { %32522 = vmatprep.mubr.msk.f32.mxu0 %vm34786_vm1, %v34785_v14  ;;  %32547 = vmatprep.mubr.msk.f32.mxu1 %vm34786_vm1, %v34785_v14 }
 0x1a3   :  { %32530 = vmatprep.subr.mxu0 %v34785_v14  ;;  %32555 = vmatprep.subr.mxu1 %v34785_v14 }
 0x1a4   :  { %32523 = vmatmul.mubr.msk.f32.vlgmr.msra.gmra.mrb[34].mxu0 %vm74_vm0, %v34920_v33  ;;  %32548 = vmatmul.mubr.msk.f32.vlgmr.msra.gmra.mrb[34].mxu1 %vm74_vm0, %v34920_v33 }
 0x1a5   :  { %32531 = vmatpush3.xpose.msk.msra.mxu0 %vm74_vm0, %v30574_v56  ;;  %32556 = vmatpush3.xpose.msk.msra.mxu1 %vm74_vm0, %v30579_v57 }
 0x1a6   :  { %32532 = vmatprep.mubr.msk.f32.mxu0 %vm34786_vm1, %v34785_v14  ;;  %32557 = vmatprep.mubr.msk.f32.mxu1 %vm34786_vm1, %v34785_v14 }
 0x1a7   :  { %32540 = vmatprep.subr.mxu0 %v34785_v14  ;;  %32565 = vmatprep.subr.mxu1 %v34785_v14 }
 0x1a8   :  { %32533 = vmatmul.mubr.msk.f32.vlgmr.msra.gmra.mrb[36].mxu0 %vm74_vm0, %v34920_v33  ;;  %32558 = vmatmul.mubr.msk.f32.vlgmr.msra.gmra.mrb[36].mxu1 %vm74_vm0, %v34920_v33 }
 0x1a9   :  { %32541 = vmatpush3.xpose.msk.msra.mxu0 %vm74_vm0, %v30576_v58  ;;  %32566 = vmatpush3.xpose.msk.msra.mxu1 %vm74_vm0, %v30573_v52 }
 0x1aa   :  { %32542 = vmatprep.mubr.msk.f32.mxu0 %vm34786_vm1, %v34785_v14  ;;  %32567 = vmatprep.mubr.msk.f32.mxu1 %vm34786_vm1, %v34785_v14 }
 0x1ab   :  { %32550 = vmatprep.subr.mxu0 %v34785_v14  ;;  %32575 = vmatprep.subr.mxu1 %v34785_v14 }
 0x1ac   :  { %32543 = vmatmul.mubr.msk.f32.vlgmr.msra.gmra.mrb[38].mxu0 %vm74_vm0, %v34920_v33  ;;  %32568 = vmatmul.mubr.msk.f32.vlgmr.msra.gmra.mrb[38].mxu1 %vm74_vm0, %v34967_v42 }
 0x1ad   :  { %32551 = vmatpush3.xpose.msk.msra.mxu0 %vm74_vm0, %v30578_v59  ;;  %32576 = vmatpush3.xpose.msk.msra.mxu1 %vm74_vm0, %v30575_v53 }
 0x1ae   :  { %32552 = vmatprep.mubr.msk.f32.mxu0 %vm34786_vm1, %v34785_v14  ;;  %32577 = vmatprep.mubr.msk.f32.mxu1 %vm34786_vm1, %v34785_v14 }
 0x1af   :  { %32560 = vmatprep.subr.mxu0 %v34785_v14  ;;  %32585 = vmatprep.subr.mxu1 %v34785_v14 }
 0x1b0   :  { %32553 = vmatmul.mubr.msk.f32.vlgmr.msra.gmra.mrb[40].mxu0 %vm74_vm0, %v34920_v33  ;;  %32578 = vmatmul.mubr.msk.f32.vlgmr.msra.gmra.mrb[40].mxu1 %vm74_vm0, %v34967_v42 }
 0x1b1   :  { %32561 = vmatpush3.xpose.msk.msra.mxu0 %vm74_vm0, %v30572_v54  ;;  %32586 = vmatpush3.xpose.msk.msra.mxu1 %vm74_vm0, %v30577_v55 }
 0x1b2   :  { %32562 = vmatprep.mubr.msk.f32.mxu0 %vm34786_vm1, %v34785_v14  ;;  %32587 = vmatprep.mubr.msk.f32.mxu1 %vm34786_vm1, %v34785_v14 }
 0x1b3   :  { %32570 = vmatprep.subr.mxu0 %v34785_v14  ;;  %32595 = vmatprep.subr.mxu1 %v34785_v14 }
 0x1b4   :  { %32563 = vmatmul.mubr.msk.f32.vlgmr.msra.gmra.mrb[42].mxu0 %vm74_vm0, %v34967_v42  ;;  %32588 = vmatmul.mubr.msk.f32.vlgmr.msra.gmra.mrb[42].mxu1 %vm74_vm0, %v34967_v42 }
 0x1b5   :  { %32571 = vmatpush3.xpose.msk.msra.mxu0 %vm74_vm0, %v30574_v56  ;;  %32596 = vmatpush3.xpose.msk.msra.mxu1 %vm74_vm0, %v30579_v57  ;;  %v35359_v56 = vld [vmem:[%s39270_s3 + $0xa] ss:$0 sm:$0xff]  ;;  %v35364_v57 = vld [vmem:[%s39270_s3 + $0xf] ss:$0 sm:$0xff] }
 0x1b6   :  { %32572 = vmatprep.mubr.msk.f32.mxu0 %vm34786_vm1, %v34785_v14  ;;  %32597 = vmatprep.mubr.msk.f32.mxu1 %vm34786_vm1, %v34785_v14 }
 0x1b7   :  { %32580 = vmatprep.subr.mxu0 %v34785_v14  ;;  %32605 = vmatprep.subr.mxu1 %v34785_v14 }
 0x1b8   :  { %32573 = vmatmul.mubr.msk.f32.vlgmr.msra.gmra.mrb[44].mxu0 %vm74_vm0, %v34967_v42  ;;  %32598 = vmatmul.mubr.msk.f32.vlgmr.msra.gmra.mrb[44].mxu1 %vm74_vm0, %v34967_v42 }
 0x1b9   :  { %32581 = vmatpush3.xpose.msk.msra.mxu0 %vm74_vm0, %v30576_v58  ;;  %32582 = vmatprep.mubr.msk.f32.mxu0 %vm34786_vm1, %v34785_v14 }
 0x1ba   :  { %32590 = vmatprep.subr.mxu0 %v34785_v14  ;;  %32607 = vmatprep.mubr.msk.f32.mxu1 %vm34786_vm1, %v34785_v14 }
 0x1bc   :  { %32583 = vmatmul.mubr.msk.f32.vlgmr.msra.gmra.mrb[46].mxu0 %vm74_vm0, %v34967_v42 }
 0x1bd   :  { %32591 = vmatpush3.xpose.msk.msra.mxu0 %vm74_vm0, %v30578_v59  ;;  %32592 = vmatprep.mubr.msk.f32.mxu0 %vm34786_vm1, %v34785_v14 }
 0x1be   :  { %32600 = vmatprep.subr.mxu0 %v34785_v14 }
 0x1c0   :  { %32593 = vmatmul.mubr.msk.f32.vlgmr.msra.gmra.mrb[48].mxu0 %vm74_vm0, %v34967_v42 }
 0x1c1   :  { %32602 = vmatprep.mubr.msk.f32.mxu0 %vm34786_vm1, %v34785_v14 }
 0x233   :  { %v35276_v60 = vpop.f32.mrb[0].mxu0  ;;  %v513_v61 = vpop.f32.mrb[0].mxu1 }
 0x234   :  { %v32364_v62 = vpop.f32.mrb[1].mxu0  ;;  %v32379_v63 = vpop.f32.mrb[1].mxu1  ;;  %v514_v47 = vadd.f32 %v35324_v40, %v513_v61  ;;  %v295_v58 = vadd.f32 %v35346_v50, %v35276_v60 }
 0x235   :  { %v35377_v63 = vld [vmem:[%s39270_s3 + $0x2] ss:$0 sm:$0xff] }
 0x237   :  { %v367_v0 = vpop.f32.mrb[2].mxu0  ;;  %v659_v1 = vpop.f32.mrb[2].mxu1 }
 0x238   :  { %v32369_v2 = vpop.f32.mrb[3].mxu0  ;;  %v32389_v3 = vpop.f32.mrb[3].mxu1  ;;  %v368_v37 = vadd.f32 %v35308_v31, %v367_v0  ;;  %v660_v59 = vadd.f32 %v35351_v51, %v659_v1  ;;  %v35382_v0 = vld [vmem:[%s39270_s3 + $0x7] ss:$0 sm:$0xff] }
 0x23b   :  { %v35278_v4 = vpop.f32.mrb[4].mxu0  ;;  %v35280_v5 = vpop.f32.mrb[4].mxu1 }
 0x23c   :  { %v32374_v6 = vpop.f32.mrb[5].mxu0  ;;  %v32399_v7 = vpop.f32.mrb[5].mxu1 }
 0x23d   :  { %v35392_v6 = vld [vmem:[%s39270_s3 + $0xc] ss:$0 sm:$0xff]  ;;  %v441_v7 = vadd.f32 %v35377_v63, %v35278_v4 }
 0x23f   :  { %v35282_v8 = vpop.f32.mrb[6].mxu0  ;;  %v35284_v9 = vpop.f32.mrb[6].mxu1 }
 0x240   :  { %v32384_v10 = vpop.f32.mrb[7].mxu0  ;;  %v32409_v11 = vpop.f32.mrb[7].mxu1 }
 0x241   :  { %v806_v10 = vadd.f32 %v35382_v0, %v35280_v5  ;;  %v35418_v5 = vld [vmem:[%s39270_s3 + $0xe] ss:$0 sm:$0xff] }
 0x243   :  { %v35286_v12 = vpop.f32.mrb[8].mxu0  ;;  %v35288_v13 = vpop.f32.mrb[8].mxu1 }
 0x244   :  { %v32394_v15 = vpop.f32.mrb[9].mxu0  ;;  %v32419_v16 = vpop.f32.mrb[9].mxu1 }
 0x245   :  { %v35407_v16 = vld [vmem:[%s39270_s3 + $0x4] ss:$0 sm:$0xff] }
 0x247   :  { %v35290_v17 = vpop.f32.mrb[10].mxu0  ;;  %v35292_v18 = vpop.f32.mrb[10].mxu1 }
 0x248   :  { %v32404_v19 = vpop.f32.mrb[11].mxu0  ;;  %v32429_v20 = vpop.f32.mrb[11].mxu1 }
 0x24b   :  { %v35294_v21 = vpop.f32.mrb[12].mxu0  ;;  %v35296_v22 = vpop.f32.mrb[12].mxu1 }
 0x24c   :  { %v32414_v24 = vpop.f32.mrb[13].mxu0  ;;  %v32439_v26 = vpop.f32.mrb[13].mxu1 }
 0x24d   :  { %v587_v26 = vadd.f32 %v35407_v16, %v35282_v8 }
 0x24f   :  { %v35303_v29 = vpop.f32.mrb[14].mxu0  ;;  %v1562_v30 = vpop.f32.mrb[14].mxu1 }
 0x250   :  { %v1563_v32 = vadd.f32 %v35301_v28, %v1562_v30  ;;  %v32424_v34 = vpop.f32.mrb[15].mxu0  ;;  %v32449_v35 = vpop.f32.mrb[15].mxu1 }
 0x251   :  { %v35433_v34 = vld [vmem:[%s39270_s3 + $0x6] ss:$0 sm:$0xff] }
 0x252   :  { %32606 = vmatpush3.xpose.msk.msra.mxu1 %vm3756_vm2, %v1563_v32 }
 0x253   :  { %v35318_v38 = vpop.f32.mrb[16].mxu0  ;;  %v1708_v39 = vpop.f32.mrb[16].mxu1  ;;  %32615 = vmatprep.subr.mxu1 %v34785_v14 }
 0x254   :  { %v1709_v41 = vadd.f32 %v35314_v36, %v1708_v39  ;;  %v32434_v43 = vpop.f32.mrb[17].mxu0  ;;  %v32459_v44 = vpop.f32.mrb[17].mxu1 }
 0x255   :  { %32608 = vmatmul.mubr.msk.f32.vlgmr.msra.gmra.mrb[46].mxu1 %vm3756_vm2, %v368_v37 }
 0x256   :  { %32616 = vmatpush3.xpose.msk.msra.mxu1 %vm3756_vm2, %v1709_v41  ;;  %32617 = vmatprep.mubr.msk.f32.mxu1 %vm34786_vm1, %v34785_v14 }
 0x257   :  { %v1489_v48 = vpop.f32.mrb[18].mxu0  ;;  %v1854_v49 = vpop.f32.mrb[18].mxu1  ;;  %32625 = vmatprep.subr.mxu1 %v34785_v14 }
 0x258   :  { %v1490_v52 = vadd.f32 %v35331_v45, %v1489_v48  ;;  %v1855_v53 = vadd.f32 %v35336_v46, %v1854_v49  ;;  %v32444_v54 = vpop.f32.mrb[19].mxu0  ;;  %v32469_v55 = vpop.f32.mrb[19].mxu1 }
 0x259   :  { %32618 = vmatmul.mubr.msk.f32.vlgmr.msra.gmra.mrb[48].mxu1 %vm3756_vm2, %v514_v47 }
 0x25a   :  { %32601 = vmatpush3.xpose.msk.msra.mxu0 %vm3756_vm2, %v1490_v52  ;;  %32626 = vmatpush3.xpose.msk.msra.mxu1 %vm3756_vm2, %v1855_v53 }
 0x25b   :  { %v1635_v61 = vpop.f32.mrb[20].mxu0  ;;  %v2000_v62 = vpop.f32.mrb[20].mxu1  ;;  %32627 = vmatprep.mubr.msk.f32.mxu1 %vm34786_vm1, %v34785_v14  ;;  %32610 = vmatprep.subr.mxu0 %v34785_v14 }
 0x25c   :  { %v1636_v60 = vadd.f32 %v35359_v56, %v1635_v61  ;;  %v2001_v1 = vadd.f32 %v35364_v57, %v2000_v62  ;;  %v32454_v2 = vpop.f32.mrb[21].mxu0  ;;  %v32479_v3 = vpop.f32.mrb[21].mxu1  ;;  %32635 = vmatprep.subr.mxu1 %v34785_v14 }
 0x25d   :  { %32603 = vmatmul.mubr.msk.f32.vlgmr.msra.gmra.mrb[50].mxu0 %vm3756_vm2, %v295_v58  ;;  %32628 = vmatmul.mubr.msk.f32.vlgmr.msra.gmra.mrb[50].mxu1 %vm3756_vm2, %v660_v59 }
 0x25e   :  { %32611 = vmatpush3.xpose.msk.msra.mxu0 %vm3756_vm2, %v1636_v60  ;;  %32636 = vmatpush3.xpose.msk.msra.mxu1 %vm3756_vm2, %v2001_v1 }
 0x25f   :  { %v1781_v11 = vpop.f32.mrb[22].mxu0  ;;  %v2140_v15 = vpop.f32.mrb[22].mxu1  ;;  %32612 = vmatprep.mubr.msk.f32.mxu0 %vm34786_vm1, %v34785_v14  ;;  %32637 = vmatprep.mubr.msk.f32.mxu1 %vm34786_vm1, %v34785_v14 }
 0x260   :  { %v1782_v19 = vadd.f32 %v35392_v6, %v1781_v11  ;;  %v2141_v4 = vadd.f32 %v35301_v28, %v2140_v15  ;;  %v32464_v20 = vpop.f32.mrb[23].mxu0  ;;  %v32489_v24 = vpop.f32.mrb[23].mxu1  ;;  %32620 = vmatprep.subr.mxu0 %v34785_v14  ;;  %32645 = vmatprep.subr.mxu1 %v34785_v14  ;;  %v949_v28 = vadd.f32 %v35308_v31, %v35284_v9 }
 0x261   :  { %32613 = vmatmul.mubr.msk.f32.vlgmr.msra.gmra.mrb[52].mxu0 %vm3756_vm2, %v441_v7  ;;  %32638 = vmatmul.mubr.msk.f32.vlgmr.msra.gmra.mrb[52].mxu1 %vm3756_vm2, %v806_v10  ;;  %v733_v9 = vadd.f32 %v35433_v34, %v35286_v12  ;;  %v1089_v31 = vadd.f32 %v35324_v40, %v35288_v13  ;;  %v879_v12 = vadd.f32 %v35346_v50, %v35290_v17  ;;  %v30677_v17 = vld [vmem:[%s39270_s3 + $0x11] ss:$0 sm:$0xff] }
 0x262   :  { %32621 = vmatpush3.xpose.msk.msra.mxu0 %vm3756_vm2, %v1782_v19  ;;  %32646 = vmatpush3.xpose.msk.msra.mxu1 %vm3756_vm2, %v2141_v4  ;;  %v1229_v13 = vadd.f32 %v35351_v51, %v35292_v18  ;;  %v1019_v18 = vadd.f32 %v35377_v63, %v35294_v21  ;;  %v1369_v50 = vadd.f32 %v35382_v0, %v35296_v22 }
 0x263   :  { %v1927_v30 = vpop.f32.mrb[24].mxu0  ;;  %v2280_v32 = vpop.f32.mrb[24].mxu1  ;;  %32622 = vmatprep.mubr.msk.f32.mxu0 %vm34786_vm1, %v34785_v14  ;;  %32647 = vmatprep.mubr.msk.f32.mxu1 %vm34786_vm1, %v34785_v14  ;;  %v1159_v21 = vadd.f32 %v35407_v16, %v35303_v29  ;;  %v30676_v29 = vld [vmem:[%s39270_s3 + $0x10] ss:$0 sm:$0xff]  ;;  %v1299_v0 = vadd.f32 %v35433_v34, %v35318_v38 }
 0x264   :  { %v1928_v35 = vadd.f32 %v35418_v5, %v1927_v30  ;;  %v2281_v8 = vadd.f32 %v35314_v36, %v2280_v32  ;;  %v32474_v37 = vpop.f32.mrb[25].mxu0  ;;  %v32499_v39 = vpop.f32.mrb[25].mxu1  ;;  %32630 = vmatprep.subr.mxu0 %v34785_v14  ;;  %32655 = vmatprep.subr.mxu1 %v34785_v14 }
 0x265   :  { %32623 = vmatmul.mubr.msk.f32.vlgmr.msra.gmra.mrb[54].mxu0 %vm3756_vm2, %v587_v26  ;;  %32648 = vmatmul.mubr.msk.f32.vlgmr.msra.gmra.mrb[54].mxu1 %vm3756_vm2, %v949_v28 }
 0x266   :  { %32631 = vmatpush3.xpose.msk.msra.mxu0 %vm3756_vm2, %v1928_v35  ;;  %32656 = vmatpush3.xpose.msk.msra.mxu1 %vm3756_vm2, %v2281_v8 }
 0x267   :  { %v2070_v36 = vpop.f32.mrb[26].mxu0  ;;  %v2420_v41 = vpop.f32.mrb[26].mxu1  ;;  %32632 = vmatprep.mubr.msk.f32.mxu0 %vm34786_vm1, %v34785_v14  ;;  %32657 = vmatprep.mubr.msk.f32.mxu1 %vm34786_vm1, %v34785_v14 }
 0x268   :  { %v2071_v43 = vadd.f32 %v35331_v45, %v2070_v36  ;;  %v2421_v44 = vadd.f32 %v35336_v46, %v2420_v41  ;;  %v32484_v47 = vpop.f32.mrb[27].mxu0  ;;  %v32509_v48 = vpop.f32.mrb[27].mxu1  ;;  %32640 = vmatprep.subr.mxu0 %v34785_v14  ;;  %32665 = vmatprep.subr.mxu1 %v34785_v14 }
 0x269   :  { %32633 = vmatmul.mubr.msk.f32.vlgmr.msra.gmra.mrb[56].mxu0 %vm3756_vm2, %v733_v9  ;;  %32658 = vmatmul.mubr.msk.f32.vlgmr.msra.gmra.mrb[56].mxu1 %vm3756_vm2, %v1089_v31 }
 0x26a   :  { %32641 = vmatpush3.xpose.msk.msra.mxu0 %vm3756_vm2, %v2071_v43  ;;  %32666 = vmatpush3.xpose.msk.msra.mxu1 %vm3756_vm2, %v2421_v44 }
 0x26b   :  { %v2210_v40 = vpop.f32.mrb[28].mxu0  ;;  %v2560_v45 = vpop.f32.mrb[28].mxu1  ;;  %32642 = vmatprep.mubr.msk.f32.mxu0 %vm34786_vm1, %v34785_v14  ;;  %32667 = vmatprep.mubr.msk.f32.mxu1 %vm34786_vm1, %v34785_v14 }
 0x26c   :  { %v2211_v46 = vadd.f32 %v35359_v56, %v2210_v40  ;;  %v2561_v49 = vadd.f32 %v35364_v57, %v2560_v45  ;;  %v32494_v52 = vpop.f32.mrb[29].mxu0  ;;  %v32519_v53 = vpop.f32.mrb[29].mxu1  ;;  %32650 = vmatprep.subr.mxu0 %v34785_v14  ;;  %32675 = vmatprep.subr.mxu1 %v34785_v14 }
 0x26d   :  { %32643 = vmatmul.mubr.msk.f32.vlgmr.msra.gmra.mrb[58].mxu0 %vm3756_vm2, %v879_v12  ;;  %32668 = vmatmul.mubr.msk.f32.vlgmr.msra.gmra.mrb[58].mxu1 %vm3756_vm2, %v1229_v13 }
 0x26e   :  { %32651 = vmatpush3.xpose.msk.msra.mxu0 %vm3756_vm2, %v2211_v46  ;;  %32676 = vmatpush3.xpose.msk.msra.mxu1 %vm3756_vm2, %v2561_v49 }
 0x26f   :  { %v2350_v51 = vpop.f32.mrb[30].mxu0  ;;  %v2754_v54 = vpop.f32.mrb[30].mxu1  ;;  %32652 = vmatprep.mubr.msk.f32.mxu0 %vm34786_vm1, %v34785_v14  ;;  %32677 = vmatprep.mubr.msk.f32.mxu1 %vm34786_vm1, %v34785_v14 }
 0x270   :  { %v2351_v55 = vadd.f32 %v35392_v6, %v2350_v51  ;;  %v2755_v56 = vadd.f32 %v30677_v17, %v2754_v54  ;;  %v32504_v57 = vpop.f32.mrb[31].mxu0  ;;  %v32529_v58 = vpop.f32.mrb[31].mxu1  ;;  %32660 = vmatprep.subr.mxu0 %v34785_v14  ;;  %32685 = vmatprep.subr.mxu1 %v34785_v14 }
 0x271   :  { %32653 = vmatmul.mubr.msk.f32.vlgmr.msra.gmra.mrb[60].mxu0 %vm3756_vm2, %v1019_v18  ;;  %32678 = vmatmul.mubr.msk.f32.vlgmr.msra.gmra.mrb[60].mxu1 %vm3756_vm2, %v1369_v50 }
 0x272   :  { %32661 = vmatpush3.xpose.msk.msra.mxu0 %vm3756_vm2, %v2351_v55  ;;  %32686 = vmatpush3.msra.mxu1 %v2755_v56 }
 0x273   :  { %v2490_v22 = vpop.f32.mrb[32].mxu0  ;;  %v35494_v59 = vpop.f32.mrb[32].mxu1  ;;  %32662 = vmatprep.mubr.msk.f32.mxu0 %vm34786_vm1, %v34785_v14  ;;  %32670 = vmatprep.subr.mxu0 %v34785_v14 }
 0x274   :  { %v2491_v61 = vadd.f32 %v35418_v5, %v2490_v22  ;;  %v32514_v62 = vpop.f32.mrb[33].mxu0  ;;  %v32539_v63 = vpop.f32.mrb[33].mxu1  ;;  %32687 = vmatprep.mubr.msk.f32.mxu1 %vm34786_vm1, %v34785_v14  ;;  %32695 = vmatprep.subr.mxu1 %v34785_v14 }
 0x275   :  { %32663 = vmatmul.mubr.msk.f32.vlgmr.msra.gmra.mrb[62].mxu0 %vm3756_vm2, %v1159_v21 }
 0x276   :  { %32671 = vmatpush3.xpose.msk.msra.mxu0 %vm3756_vm2, %v2491_v61  ;;  %32672 = vmatprep.mubr.msk.f32.mxu0 %vm34786_vm1, %v34785_v14 }
 0x277   :  { %v2681_v60 = vpop.f32.mrb[34].mxu0  ;;  %v35512_v1 = vpop.f32.mrb[34].mxu1  ;;  %32680 = vmatprep.subr.mxu0 %v34785_v14 }
 0x278   :  { %v2682_v2 = vadd.f32 %v30676_v29, %v2681_v60  ;;  %v32524_v3 = vpop.f32.mrb[35].mxu0  ;;  %v32549_v6 = vpop.f32.mrb[35].mxu1 }
 0x279   :  { %32673 = vmatmul.mubr.msk.f32.vlgmr.msra.gmra.mrb[64].mxu0 %vm3756_vm2, %v1299_v0 }
 0x27a   :  { %32681 = vmatpush3.msra.mxu0 %v2682_v2  ;;  %32682 = vmatprep.mubr.msk.f32.mxu0 %vm34786_vm1, %v34785_v14 }
 0x27b   :  { %v35518_v7 = vpop.f32.mrb[36].mxu0  ;;  %v35520_v10 = vpop.f32.mrb[36].mxu1  ;;  %32690 = vmatprep.subr.mxu0 %v34785_v14 }
 0x27c   :  { %v32534_v38 = vpop.f32.mrb[37].mxu0  ;;  %v32559_v11 = vpop.f32.mrb[37].mxu1 }
 0x27f   :  { %v35523_v15 = vpop.f32.mrb[38].mxu0  ;;  %v3332_v16 = vpop.f32.mrb[38].mxu1 }
 0x280   :  { %v35525_v19 = vadd.f32 %v30677_v17, %v3332_v16  ;;  %v32544_v4 = vpop.f32.mrb[39].mxu0  ;;  %v32569_v20 = vpop.f32.mrb[39].mxu1 }
 0x283   :  { %v35527_v24 = vpop.f32.mrb[40].mxu0  ;;  %v35529_v5 = vpop.f32.mrb[40].mxu1 }
 0x284   :  { %v32554_v26 = vpop.f32.mrb[41].mxu0  ;;  %v32579_v28 = vpop.f32.mrb[41].mxu1 }
 0x287   :  { %v3262_v30 = vpop.f32.mrb[42].mxu0  ;;  %v35531_v32 = vpop.f32.mrb[42].mxu1 }
 0x288   :  { %v35533_v34 = vadd.f32 %v30676_v29, %v3262_v30  ;;  %v32564_v35 = vpop.f32.mrb[43].mxu0  ;;  %v32589_v8 = vpop.f32.mrb[43].mxu1 }
 0x28b   :  { %v35535_v37 = vpop.f32.mrb[44].mxu0  ;;  %v35537_v39 = vpop.f32.mrb[44].mxu1 }
 0x28c   :  { %v32574_v9 = vpop.f32.mrb[45].mxu0  ;;  %v32599_v31 = vpop.f32.mrb[45].mxu1 }
 0x28f   :  { %v35539_v36 = vpop.f32.mrb[46].mxu0 }
 0x290   :  { %v32584_v41 = vpop.f32.mrb[47].mxu0 }
 0x293   :  { %v35541_v43 = vpop.f32.mrb[48].mxu0 }
 0x294   :  { %v32594_v44 = vpop.f32.mrb[49].mxu0 }
 0x328   :  { %v35543_v47 = vpop.f32.mrb[46].mxu1 }
 0x329   :  { %v32609_v48 = vpop.f32.mrb[47].mxu1  ;;  %v4977_v12 = vsel %vm4973_vm3, %v35543_v47, -inf }
 0x32a   :  { %4978 = vmax.xlane.f32.xlu1 %v4977_v12 }
 0x32c   :  { %v35547_v13 = vpop.f32.mrb[48].mxu1 }
 0x32d   :  { %v32619_v40 = vpop.f32.mrb[49].mxu1  ;;  %v4983_v45 = vsel %vm4973_vm3, %v35547_v13, -inf }
 0x32e   :  { %4984 = vmax.xlane.f32.xlu1 %v4983_v45 }
 0x330   :  { %v35551_v46 = vpop.f32.mrb[50].mxu0  ;;  %v35553_v49 = vpop.f32.mrb[50].mxu1 }
 0x331   :  { %v32604_v52 = vpop.f32.mrb[51].mxu0  ;;  %v32629_v53 = vpop.f32.mrb[51].mxu1  ;;  %v4989_v17 = vsel %vm4973_vm3, %v35553_v49, -inf  ;;  %v4974_v18 = vsel %vm4973_vm3, %v35551_v46, -inf }
 0x332   :  { %4990 = vmax.xlane.f32.xlu1 %v4989_v17  ;;  %4975 = vmax.xlane.f32.xlu0 %v4974_v18 }
 0x334   :  { %v35559_v50 = vpop.f32.mrb[52].mxu0  ;;  %v35561_v51 = vpop.f32.mrb[52].mxu1 }
 0x335   :  { %v32614_v54 = vpop.f32.mrb[53].mxu0  ;;  %v32639_v55 = vpop.f32.mrb[53].mxu1  ;;  %v4995_v56 = vsel %vm4973_vm3, %v35561_v51, -inf  ;;  %v4980_v57 = vsel %vm4973_vm3, %v35559_v50, -inf }
 0x336   :  { %4996 = vmax.xlane.f32.xlu1 %v4995_v56  ;;  %4981 = vmax.xlane.f32.xlu0 %v4980_v57 }
 0x338   :  { %v35567_v58 = vpop.f32.mrb[54].mxu0  ;;  %v35569_v21 = vpop.f32.mrb[54].mxu1 }
 0x339   :  { %v32624_v22 = vpop.f32.mrb[55].mxu0  ;;  %v32649_v61 = vpop.f32.mrb[55].mxu1  ;;  %v5001_v62 = vsel %vm4973_vm3, %v35569_v21, -inf  ;;  %v4986_v63 = vsel %vm4973_vm3, %v35567_v58, -inf }
 0x33a   :  { %5002 = vmax.xlane.f32.xlu1 %v5001_v62  ;;  %4987 = vmax.xlane.f32.xlu0 %v4986_v63 }
 0x33c   :  { %v35575_v29 = vpop.f32.mrb[56].mxu0  ;;  %v35577_v0 = vpop.f32.mrb[56].mxu1 }
 0x33d   :  { %v32634_v60 = vpop.f32.mrb[57].mxu0  ;;  %v32659_v2 = vpop.f32.mrb[57].mxu1  ;;  %v5007_v3 = vsel %vm4973_vm3, %v35577_v0, -inf  ;;  %v4992_v6 = vsel %vm4973_vm3, %v35575_v29, -inf }
 0x33e   :  { %5008 = vmax.xlane.f32.xlu1 %v5007_v3  ;;  %4993 = vmax.xlane.f32.xlu0 %v4992_v6 }
 0x340   :  { %v35583_v38 = vpop.f32.mrb[58].mxu0  ;;  %v35585_v11 = vpop.f32.mrb[58].mxu1 }
 0x341   :  { %v32644_v16 = vpop.f32.mrb[59].mxu0  ;;  %v32669_v4 = vpop.f32.mrb[59].mxu1  ;;  %v5013_v20 = vsel %vm4973_vm3, %v35585_v11, -inf  ;;  %v4998_v26 = vsel %vm4973_vm3, %v35583_v38, -inf }
 0x342   :  { %5014 = vmax.xlane.f32.xlu1 %v5013_v20  ;;  %4999 = vmax.xlane.f32.xlu0 %v4998_v26 }
 0x344   :  { %v35591_v28 = vpop.f32.mrb[60].mxu0  ;;  %v35593_v30 = vpop.f32.mrb[60].mxu1 }
 0x345   :  { %v32654_v35 = vpop.f32.mrb[61].mxu0  ;;  %v32679_v8 = vpop.f32.mrb[61].mxu1  ;;  %v5019_v9 = vsel %vm4973_vm3, %v35593_v30, -inf  ;;  %v5004_v31 = vsel %vm4973_vm3, %v35591_v28, -inf }
 0x346   :  { %5020 = vmax.xlane.f32.xlu1 %v5019_v9  ;;  %5005 = vmax.xlane.f32.xlu0 %v5004_v31 }
 0x348   :  { %v35599_v41 = vpop.f32.mrb[62].mxu0 }
 0x349   :  { %v32664_v44 = vpop.f32.mrb[63].mxu0  ;;  %v5010_v48 = vsel %vm4973_vm3, %v35599_v41, -inf }
 0x34a   :  { %5011 = vmax.xlane.f32.xlu0 %v5010_v48 }
 0x34c   :  { %v35603_v12 = vpop.f32.mrb[64].mxu0 }
 0x34d   :  { %v32674_v40 = vpop.f32.mrb[65].mxu0  ;;  %v5016_v45 = vsel %vm4973_vm3, %v35603_v12, -inf }
 0x34e   :  { %5017 = vmax.xlane.f32.xlu0 %v5016_v45 }
 0x3b7   :  { %v4979_v52 = vpop.xlane.xlu1 %4978 }
 0x3b8   :  { %v5023_v53 = vsub.f32 %v35543_v47, %v4979_v52 }
 0x3ba   :  { %v5040_v17 = vmul.f32 1.442695, %v5023_v53 }
 0x3bb   :  { %v4985_v18 = vpop.xlane.xlu1 %4984 }
 0x3bc   :  { %34399 = vpow2.f32 %v5040_v17  ;;  %v5025_v54 = vsub.f32 %v35547_v13, %v4985_v18 }
 0x3be   :  { %v5044_v55 = vmul.f32 1.442695, %v5025_v54 }
 0x3bf   :  { %v4991_v56 = vpop.xlane.xlu1 %4990  ;;  %v4976_v57 = vpop.xlane.xlu0 %4975 }
 0x3c0   :  { %34401 = vpow2.f32 %v5044_v55  ;;  %v5027_v22 = vsub.f32 %v35553_v49, %v4991_v56  ;;  %v5022_v61 = vsub.f32 %v35551_v46, %v4976_v57 }
 0x3c2   :  { %v5048_v62 = vmul.f32 1.442695, %v5027_v22  ;;  %v5038_v63 = vmul.f32 1.442695, %v5022_v61 }
 0x3c3   :  { %v4997_v60 = vpop.xlane.xlu1 %4996  ;;  %v4982_v2 = vpop.xlane.xlu0 %4981 }
 0x3c4   :  { %34403 = vpow2.f32 %v5048_v62  ;;  %v5029_v47 = vsub.f32 %v35561_v51, %v4997_v60  ;;  %v5024_v3 = vsub.f32 %v35559_v50, %v4982_v2 }
 0x3c5   :  { %34405 = vpow2.f32 %v5038_v63 }
 0x3c6   :  { %v35613_v6 = vpop.eup %34399  ;;  %v5052_v13 = vmul.f32 1.442695, %v5029_v47  ;;  %v5042_v16 = vmul.f32 1.442695, %v5024_v3 }
 0x3c7   :  { %v5003_v4 = vpop.xlane.xlu1 %5002  ;;  %v4988_v20 = vpop.xlane.xlu0 %4987  ;;  %v5073_v49 = vsel %vm4973_vm3, %v35613_v6, 0.0 }
 0x3c8   :  { %34407 = vpow2.f32 %v5052_v13  ;;  %v5031_v46 = vsub.f32 %v35569_v21, %v5003_v4  ;;  %v5026_v26 = vsub.f32 %v35567_v58, %v4988_v20  ;;  %5074 = vadd.xlane.f32.xlu1 %v5073_v49 }
 0x3c9   :  { %34409 = vpow2.f32 %v5042_v16 }
 0x3ca   :  { %v35619_v51 = vpop.eup %34401  ;;  %v5056_v50 = vmul.f32 1.442695, %v5031_v46  ;;  %v5046_v35 = vmul.f32 1.442695, %v5026_v26 }
 0x3cb   :  { %v5009_v8 = vpop.xlane.xlu1 %5008  ;;  %v4994_v9 = vpop.xlane.xlu0 %4993  ;;  %v5079_v31 = vsel %vm4973_vm3, %v35619_v51, 0.0 }
 0x3cc   :  { %34411 = vpow2.f32 %v5056_v50  ;;  %v5033_v44 = vsub.f32 %v35577_v0, %v5009_v8  ;;  %v5028_v48 = vsub.f32 %v35575_v29, %v4994_v9  ;;  %5080 = vadd.xlane.f32.xlu1 %v5079_v31 }
 0x3cd   :  { %34413 = vpow2.f32 %v5046_v35 }
 0x3ce   :  { %v35625_v21 = vpop.eup %34403  ;;  %v5060_v58 = vmul.f32 1.442695, %v5033_v44  ;;  %v5050_v40 = vmul.f32 1.442695, %v5028_v48 }
 0x3cf   :  { %v35627_v45 = vpop.eup %34405  ;;  %v5015_v52 = vpop.xlane.xlu1 %5014  ;;  %v5085_v17 = vsel %vm4973_vm3, %v35625_v21, 0.0 }
 0x3d0   :  { %v5000_v53 = vpop.xlane.xlu0 %4999  ;;  %34415 = vpow2.f32 %v5060_v58  ;;  %v5035_v18 = vsub.f32 %v35585_v11, %v5015_v52  ;;  %5086 = vadd.xlane.f32.xlu1 %v5085_v17  ;;  %v5070_v29 = vsel %vm4973_vm3, %v35627_v45, 0.0 }
 0x3d1   :  { %v5030_v0 = vsub.f32 %v35583_v38, %v5000_v53  ;;  %34417 = vpow2.f32 %v5050_v40  ;;  %5071 = vadd.xlane.f32.xlu0 %v5070_v29 }
 0x3d2   :  { %v35635_v54 = vpop.eup %34407  ;;  %v5064_v55 = vmul.f32 1.442695, %v5035_v18 }
 0x3d3   :  { %v5054_v56 = vmul.f32 1.442695, %v5030_v0  ;;  %v35637_v57 = vpop.eup %34409  ;;  %v5021_v22 = vpop.xlane.xlu1 %5020  ;;  %v5091_v62 = vsel %vm4973_vm3, %v35635_v54, 0.0 }
 0x3d4   :  { %v5006_v61 = vpop.xlane.xlu0 %5005  ;;  %34419 = vpow2.f32 %v5064_v55  ;;  %v5037_v38 = vsub.f32 %v35593_v30, %v5021_v22  ;;  %5092 = vadd.xlane.f32.xlu1 %v5091_v62  ;;  %v5076_v63 = vsel %vm4973_vm3, %v35637_v57, 0.0  ;;  %v35690_v22 = vld [vmem:[%s39270_s3 + $0x13] ss:$0 sm:$0xff] }
 0x3d5   :  { %v5032_v11 = vsub.f32 %v35591_v28, %v5006_v61  ;;  %34421 = vpow2.f32 %v5054_v56  ;;  %5077 = vadd.xlane.f32.xlu0 %v5076_v63 }
 0x3d6   :  { %v35645_v60 = vpop.eup %34411  ;;  %v5068_v2 = vmul.f32 1.442695, %v5037_v38 }
 0x3d7   :  { %v5058_v47 = vmul.f32 1.442695, %v5032_v11  ;;  %v35647_v3 = vpop.eup %34413  ;;  %v5097_v16 = vsel %vm4973_vm3, %v35645_v60, 0.0  ;;  %v2901_v11 = vadd.f32 %v35690_v22, %v35494_v59 }
 0x3d8   :  { %v5012_v13 = vpop.xlane.xlu0 %5011  ;;  %34423 = vpow2.f32 %v5068_v2  ;;  %5098 = vadd.xlane.f32.xlu1 %v5097_v16  ;;  %v5082_v28 = vsel %vm4973_vm3, %v35647_v3, 0.0  ;;  %v35698_v2 = vld [vmem:[%s39270_s3 + $0x15] ss:$0 sm:$0xff] }
 0x3d9   :  { %v5034_v30 = vsub.f32 %v35599_v41, %v5012_v13  ;;  %34425 = vpow2.f32 %v5058_v47  ;;  %5083 = vadd.xlane.f32.xlu0 %v5082_v28 }
 0x3da   :  { %v35654_v4 = vpop.eup %34415 }
 0x3db   :  { %v5062_v20 = vmul.f32 1.442695, %v5034_v30  ;;  %v35656_v49 = vpop.eup %34417  ;;  %v5103_v26 = vsel %vm4973_vm3, %v35654_v4, 0.0  ;;  %v35710_v30 = vld [vmem:[%s39270_s3 + $0x17] ss:$0 sm:$0xff] }
 0x3dc   :  { %v5018_v46 = vpop.xlane.xlu0 %5017  ;;  %5104 = vadd.xlane.f32.xlu1 %v5103_v26  ;;  %v5088_v41 = vsel %vm4973_vm3, %v35656_v49, 0.0  ;;  %v3193_v26 = vadd.f32 %v35710_v30, %v35520_v10 }
 0x3dd   :  { %34427 = vpow2.f32 %v5062_v20  ;;  %v5036_v50 = vsub.f32 %v35603_v12, %v5018_v46  ;;  %5089 = vadd.xlane.f32.xlu0 %v5088_v41  ;;  %v35716_v20 = vld [vmem:[%s39270_s3 + $0x12] ss:$0 sm:$0xff] }
 0x3de   :  { %v35663_v35 = vpop.eup %34419 }
 0x3df   :  { %v5066_v8 = vmul.f32 1.442695, %v5036_v50  ;;  %v35665_v9 = vpop.eup %34421  ;;  %v5109_v31 = vsel %vm4973_vm3, %v35663_v35, 0.0 }
 0x3e0   :  { %5110 = vadd.xlane.f32.xlu1 %v5109_v31  ;;  %v5094_v44 = vsel %vm4973_vm3, %v35665_v9, 0.0 }
 0x3e1   :  { %34429 = vpow2.f32 %v5066_v8  ;;  %5095 = vadd.xlane.f32.xlu0 %v5094_v44  ;;  %v2828_v8 = vadd.f32 %v35716_v20, %v35518_v7  ;;  %v35731_v44 = vld [vmem:[%s39270_s3 + $0x14] ss:$0 sm:$0xff] }
 0x3e2   :  { %v35671_v12 = vpop.eup %34423 }
 0x3e3   :  { %v35673_v48 = vpop.eup %34425  ;;  %v5115_v58 = vsel %vm4973_vm3, %v35671_v12, 0.0 }
 0x3e4   :  { %5116 = vadd.xlane.f32.xlu1 %v5115_v58  ;;  %v5100_v40 = vsel %vm4973_vm3, %v35673_v48, 0.0 }
 0x3e5   :  { %5101 = vadd.xlane.f32.xlu0 %v5100_v40  ;;  %v2974_v40 = vadd.f32 %v35731_v44, %v35523_v15 }
 0x3e7   :  { %v35679_v52 = vpop.eup %34427 }
 0x3e8   :  { %v5106_v53 = vsel %vm4973_vm3, %v35679_v52, 0.0 }
 0x3e9   :  { %5107 = vadd.xlane.f32.xlu0 %v5106_v53 }
 0x3eb   :  { %v35683_v17 = vpop.eup %34429 }
 0x3ec   :  { %v5112_v18 = vsel %vm4973_vm3, %v35683_v17, 0.0 }
 0x3ed   :  { %5113 = vadd.xlane.f32.xlu0 %v5112_v18 }
 0x455   :  { %v5075_v0 = vpop.xlane.xlu1 %5074 }
 0x456   :  { %34431 = vrcp.f32 %v5075_v0  ;;  %v3473_v0 = vadd.f32 %v35690_v22, %v35529_v5 }
 0x459   :  { %v5081_v29 = vpop.xlane.xlu1 %5080 }
 0x45a   :  { %34433 = vrcp.f32 %v5081_v29 }
 0x45d   :  { %v5087_v55 = vpop.xlane.xlu1 %5086 }
 0x45e   :  { %34435 = vrcp.f32 %v5087_v55  ;;  %v5072_v56 = vpop.xlane.xlu0 %5071 }
 0x45f   :  { %34437 = vrcp.f32 %v5072_v56 }
 0x460   :  { %v34432_v61 = vpop.eup %34431 }
 0x461   :  { %v5093_v62 = vpop.xlane.xlu1 %5092  ;;  %v5121_v38 = vmul.f32 %v34432_v61, %v35613_v6  ;;  %v3047_v6 = vadd.f32 %v35698_v2, %v35512_v1 }
 0x462   :  { %34439 = vrcp.f32 %v5093_v62  ;;  %v5078_v63 = vpop.xlane.xlu0 %5077 }
 0x463   :  { %34441 = vrcp.f32 %v5078_v63  ;;  %32688 = vmatmul.mubr.msk.f32.vlgmr.msra.gmra.mrb[62].mxu1 %vm4973_vm3, %v5121_v38 }
 0x464   :  { %v34434_v47 = vpop.eup %34433  ;;  %32696 = vmatpush3.msra.mxu1 %v2901_v11  ;;  %32697 = vmatprep.mubr.msk.f32.mxu1 %vm34786_vm1, %v34785_v14  ;;  %v3403_v11 = vadd.f32 %v35716_v20, %v35535_v37  ;;  %v168_v20 = vld [vmem:[%s39271_s4 + $0x8] sm:$0xf] }
 0x465   :  { %v5099_v13 = vpop.xlane.xlu1 %5098  ;;  %32705 = vmatprep.subr.mxu1 %v34785_v14  ;;  %v5125_v59 = vmul.f32 %v34434_v47, %v35619_v51 }
 0x466   :  { %34443 = vrcp.f32 %v5099_v13  ;;  %v5084_v16 = vpop.xlane.xlu0 %5083 }
 0x467   :  { %34445 = vrcp.f32 %v5084_v16  ;;  %32698 = vmatmul.mubr.msk.f32.vlgmr.msra.gmra.mrb[64].mxu1 %vm4973_vm3, %v5125_v59  ;;  %v171_v59 = vld [vmem:[%s39271_s4 + $0x14] sm:$0xf] }
 0x468   :  { %v34436_v28 = vpop.eup %34435  ;;  %32706 = vmatpush3.msra.mxu1 %v3047_v6  ;;  %32707 = vmatprep.mubr.msk.f32.mxu1 %vm34786_vm1, %v34785_v14 }
 0x469   :  { %v34438_v1 = vpop.eup %34437  ;;  %v5105_v51 = vpop.xlane.xlu1 %5104  ;;  %32715 = vmatprep.subr.mxu1 %v34785_v14  ;;  %v5129_v46 = vmul.f32 %v34436_v28, %v35625_v21 }
 0x46a   :  { %34447 = vrcp.f32 %v5105_v51  ;;  %v5090_v50 = vpop.xlane.xlu0 %5089  ;;  %v5119_v41 = vmul.f32 %v34438_v1, %v35627_v45 }
 0x46b   :  { %34449 = vrcp.f32 %v5090_v50  ;;  %32708 = vmatmul.mubr.msk.f32.vlgmr.msra.gmra.mrb[66].mxu1 %vm4973_vm3, %v5129_v46  ;;  %v170_v50 = vld [vmem:[%s39271_s4 + $0x10] sm:$0xf] }
 0x46c   :  { %v34440_v31 = vpop.eup %34439  ;;  %32683 = vmatmul.mubr.msk.f32.vlgmr.msra.gmra.mrb[66].mxu0 %vm4973_vm3, %v5119_v41  ;;  %32716 = vmatpush3.msra.mxu1 %v3193_v26 }
 0x46d   :  { %v34442_v10 = vpop.eup %34441  ;;  %32691 = vmatpush3.msra.mxu0 %v2828_v8  ;;  %v5111_v21 = vpop.xlane.xlu1 %5110  ;;  %32692 = vmatprep.mubr.msk.f32.mxu0 %vm34786_vm1, %v34785_v14  ;;  %v5133_v7 = vmul.f32 %v34440_v31, %v35635_v54  ;;  %v35748_v54 = vld [vmem:[%s39270_s3 + $0x16] ss:$0 sm:$0xff] }
 0x46e   :  { %34451 = vrcp.f32 %v5111_v21  ;;  %v5096_v45 = vpop.xlane.xlu0 %5095  ;;  %32700 = vmatprep.subr.mxu0 %v34785_v14  ;;  %32717 = vmatprep.mubr.msk.f32.mxu1 %vm34786_vm1, %v34785_v14  ;;  %v5123_v58 = vmul.f32 %v34442_v10, %v35637_v57  ;;  %v3120_v55 = vadd.f32 %v35748_v54, %v35527_v24  ;;  %v172_v10 = vld [vmem:[%s39271_s4 + $0x18] sm:$0xf] }
 0x46f   :  { %34453 = vrcp.f32 %v5096_v45  ;;  %32725 = vmatprep.subr.mxu1 %v34785_v14  ;;  %32718 = vmatmul.mubr.msk.f32.vlgmr.msra.gmra.mrb[68].mxu1 %vm4973_vm3, %v5133_v7 }
 0x470   :  { %v34444_v53 = vpop.eup %34443  ;;  %32693 = vmatmul.mubr.msk.f32.vlgmr.msra.gmra.mrb[68].mxu0 %vm4973_vm3, %v5123_v58  ;;  %32726 = vmatpush3.msra.mxu1 %v35525_v19 }
 0x471   :  { %v34446_v18 = vpop.eup %34445  ;;  %32701 = vmatpush3.msra.mxu0 %v2974_v40  ;;  %v5117_v57 = vpop.xlane.xlu1 %5116  ;;  %32702 = vmatprep.mubr.msk.f32.mxu0 %vm34786_vm1, %v34785_v14  ;;  %v5137_v15 = vmul.f32 %v34444_v53, %v35645_v60 }
 0x472   :  { %34455 = vrcp.f32 %v5117_v57  ;;  %v5102_v29 = vpop.xlane.xlu0 %5101  ;;  %32710 = vmatprep.subr.mxu0 %v34785_v14  ;;  %32727 = vmatprep.mubr.msk.f32.mxu1 %vm34786_vm1, %v34785_v14  ;;  %v5127_v19 = vmul.f32 %v34446_v18, %v35647_v3  ;;  %v3613_v3 = vadd.f32 %v35698_v2, %v35531_v32 }
 0x473   :  { %34457 = vrcp.f32 %v5102_v29  ;;  %32735 = vmatprep.subr.mxu1 %v34785_v14  ;;  %32728 = vmatmul.mubr.msk.f32.vlgmr.msra.gmra.mrb[70].mxu1 %vm4973_vm3, %v5137_v15 }
 0x474   :  { %v34448_v60 = vpop.eup %34447  ;;  %32703 = vmatmul.mubr.msk.f32.vlgmr.msra.gmra.mrb[70].mxu0 %vm4973_vm3, %v5127_v19  ;;  %32736 = vmatpush3.msra.mxu1 %v3473_v0 }
 0x475   :  { %v34450_v5 = vpop.eup %34449  ;;  %32711 = vmatpush3.msra.mxu0 %v3120_v55  ;;  %32712 = vmatprep.mubr.msk.f32.mxu0 %vm34786_vm1, %v34785_v14  ;;  %v5141_v56 = vmul.f32 %v34448_v60, %v35654_v4 }
 0x476   :  { %v5108_v24 = vpop.xlane.xlu0 %5107  ;;  %32720 = vmatprep.subr.mxu0 %v34785_v14  ;;  %32737 = vmatprep.mubr.msk.f32.mxu1 %vm34786_vm1, %v34785_v14  ;;  %v5131_v22 = vmul.f32 %v34450_v5, %v35656_v49  ;;  %v3753_v49 = vadd.f32 %v35710_v30, %v35537_v39  ;;  %v173_v30 = vld [vmem:[%s39271_s4 + $0x1c] sm:$0xf] }
 0x477   :  { %34459 = vrcp.f32 %v5108_v24  ;;  %32745 = vmatprep.subr.mxu1 %v34785_v14  ;;  %32738 = vmatmul.mubr.msk.f32.vlgmr.msra.gmra.mrb[72].mxu1 %vm4973_vm3, %v5141_v56 }
 0x478   :  { %v34452_v61 = vpop.eup %34451  ;;  %32713 = vmatmul.mubr.msk.f32.vlgmr.msra.gmra.mrb[72].mxu0 %vm4973_vm3, %v5131_v22  ;;  %32746 = vmatpush3.msra.mxu1 %v3613_v3 }
 0x479   :  { %v34454_v4 = vpop.eup %34453  ;;  %32721 = vmatpush3.msra.mxu0 %v35533_v34  ;;  %32722 = vmatprep.mubr.msk.f32.mxu0 %vm34786_vm1, %v34785_v14  ;;  %v5145_v32 = vmul.f32 %v34452_v61, %v35663_v35 }
 0x47a   :  { %v5114_v62 = vpop.xlane.xlu0 %5113  ;;  %32730 = vmatprep.subr.mxu0 %v34785_v14  ;;  %32747 = vmatprep.mubr.msk.f32.mxu1 %vm34786_vm1, %v34785_v14  ;;  %v5135_v38 = vmul.f32 %v34454_v4, %v35665_v9  ;;  %v3543_v9 = vadd.f32 %v35731_v44, %v35539_v36  ;;  %v3683_v36 = vadd.f32 %v35748_v54, %v35541_v43  ;;  %v167_v43 = vld [vmem:[%s39271_s4 + $0x4] sm:$0xf] }
 0x47b   :  { %34461 = vrcp.f32 %v5114_v62  ;;  %32755 = vmatprep.subr.mxu1 %v34785_v14  ;;  %32748 = vmatmul.mubr.msk.f32.vlgmr.msra.gmra.mrb[74].mxu1 %vm4973_vm3, %v5145_v32 }
 0x47c   :  { %v34456_v34 = vpop.eup %34455  ;;  %32723 = vmatmul.mubr.msk.f32.vlgmr.msra.gmra.mrb[74].mxu0 %vm4973_vm3, %v5135_v38  ;;  %32756 = vmatpush3.msra.mxu1 %v3753_v49 }
 0x47d   :  { %v34458_v39 = vpop.eup %34457  ;;  %32731 = vmatpush3.msra.mxu0 %v3403_v11  ;;  %32732 = vmatprep.mubr.msk.f32.mxu0 %vm34786_vm1, %v34785_v14  ;;  %v5149_v35 = vmul.f32 %v34456_v34, %v35671_v12 }
 0x47e   :  { %32740 = vmatprep.subr.mxu0 %v34785_v14  ;;  %32757 = vmatprep.mubr.msk.f32.mxu1 %vm34786_vm1, %v34785_v14  ;;  %v5139_v37 = vmul.f32 %v34458_v39, %v35673_v48 }
 0x47f   :  { %32758 = vmatmul.mubr.msk.f32.vlgmr.msra.gmra.mrb[76].mxu1 %vm4973_vm3, %v5149_v35  ;;  %32765 = vmatprep.subr.mxu1 %v34785_v14 }
 0x480   :  { %32733 = vmatmul.mubr.msk.f32.vlgmr.msra.gmra.mrb[76].mxu0 %vm4973_vm3, %v5139_v37  ;;  %32767 = vmatprep.mubr.msk.f32.mxu1 %vm34786_vm1, %v34785_v14 }
 0x481   :  { %v34460_v12 = vpop.eup %34459  ;;  %32741 = vmatpush3.msra.mxu0 %v3543_v9  ;;  %32742 = vmatprep.mubr.msk.f32.mxu0 %vm34786_vm1, %v34785_v14 }
 0x482   :  { %32750 = vmatprep.subr.mxu0 %v34785_v14  ;;  %v5143_v48 = vmul.f32 %v34460_v12, %v35679_v52  ;;  %32766 = vmatpush3.msk.msra.mxu1 %vm6321_vm4, %v167_v43  ;;  %v35829_v52 = vld [vmem:[%s39271_s4] sm:$0xf] }
 0x483   :  { %32775 = vmatprep.subr.mxu1 %v34785_v14 }
 0x484   :  { %32743 = vmatmul.mubr.msk.f32.vlgmr.msra.gmra.mrb[78].mxu0 %vm4973_vm3, %v5143_v48 }
 0x485   :  { %v34462_v63 = vpop.eup %34461  ;;  %32751 = vmatpush3.msra.mxu0 %v3683_v36  ;;  %32752 = vmatprep.mubr.msk.f32.mxu0 %vm34786_vm1, %v34785_v14 }
 0x486   :  { %v5147_v2 = vmul.f32 %v34462_v63, %v35683_v17  ;;  %32760 = vmatprep.subr.mxu0 %v34785_v14  ;;  %v169_v17 = vld [vmem:[%s39271_s4 + $0xc] sm:$0xf] }
 0x488   :  { %32753 = vmatmul.mubr.msk.f32.vlgmr.msra.gmra.mrb[80].mxu0 %vm4973_vm3, %v5147_v2 }
 0x489   :  { %32762 = vmatprep.mubr.msk.f32.mxu0 %vm34786_vm1, %v34785_v14  ;;  %32761 = vmatpush3.msk.msra.mxu0 %vm6321_vm4, %v35829_v52 }
 0x48a   :  { %32770 = vmatprep.subr.mxu0 %v34785_v14 }
 0x536   :  { %v5292_v47 = vpop.f32.mrb[62].mxu1 }
 0x537   :  { %v32689_v13 = vpop.f32.mrb[63].mxu1  ;;  %32768 = vmatmul.mubr.msk.f32.vlgmr.msra.gmra.mrb[78].mxu1 %vm3756_vm2, %v5292_v47 }
 0x538   :  { %32776 = vmatpush3.msk.msra.mxu1 %vm6321_vm4, %v169_v17  ;;  %32777 = vmatprep.mubr.msk.f32.mxu1 %vm34786_vm1, %v34785_v14 }
 0x539   :  { %32785 = vmatprep.subr.mxu1 %v34785_v14 }
 0x53a   :  { %v5438_v6 = vpop.f32.mrb[64].mxu1 }
 0x53b   :  { %v32699_v16 = vpop.f32.mrb[65].mxu1  ;;  %32778 = vmatmul.mubr.msk.f32.vlgmr.msra.gmra.mrb[80].mxu1 %vm3756_vm2, %v5438_v6 }
 0x53c   :  { %32786 = vmatpush3.msk.msra.mxu1 %vm6321_vm4, %v171_v59  ;;  %32787 = vmatprep.mubr.msk.f32.mxu1 %vm34786_vm1, %v34785_v14  ;;  %v35935_v16 = vsub.s32 2, %v34910_v23 }
 0x53d   :  { %32795 = vmatprep.subr.mxu1 %v34785_v14 }
 0x53e   :  { %v5584_v28 = vpop.f32.mrb[66].mxu1 }
 0x53f   :  { %v5219_v1 = vpop.f32.mrb[66].mxu0  ;;  %v32709_v51 = vpop.f32.mrb[67].mxu1  ;;  %32788 = vmatmul.mubr.msk.f32.vlgmr.msra.gmra.mrb[82].mxu1 %vm3756_vm2, %v5584_v28 }
 0x540   :  { %v32684_v46 = vpop.f32.mrb[67].mxu0  ;;  %32763 = vmatmul.mubr.msk.f32.vlgmr.msra.gmra.mrb[82].mxu0 %vm3756_vm2, %v5219_v1  ;;  %32796 = vmatpush3.msk.msra.mxu1 %vm6321_vm4, %v173_v30 }
 0x541   :  { %32771 = vmatpush3.msk.msra.mxu0 %vm6321_vm4, %v168_v20  ;;  %32772 = vmatprep.mubr.msk.f32.mxu0 %vm34786_vm1, %v34785_v14 }
 0x542   :  { %v5730_v26 = vpop.f32.mrb[68].mxu1  ;;  %32797 = vmatprep.mubr.msk.f32.mxu1 %vm34786_vm1, %v34785_v14  ;;  %32780 = vmatprep.subr.mxu0 %v34785_v14 }
 0x543   :  { %v5365_v41 = vpop.f32.mrb[68].mxu0  ;;  %v32719_v8 = vpop.f32.mrb[69].mxu1  ;;  %32798 = vmatmul.mubr.msk.f32.vlgmr.msra.gmra.mrb[84].mxu1 %vm3756_vm2, %v5730_v26  ;;  %32805 = vmatprep.subr.mxu1 %v34785_v14 }
 0x544   :  { %v32694_v31 = vpop.f32.mrb[69].mxu0  ;;  %32773 = vmatmul.mubr.msk.f32.vlgmr.msra.gmra.mrb[84].mxu0 %vm3756_vm2, %v5365_v41  ;;  %32806 = vmatpush3.msk.msra.mxu1 %vm6321_vm4, %v167_v43  ;;  %v35939_v41 = vld [vmem:[#allocation5] sm:$0xff] }
 0x545   :  { %32781 = vmatpush3.msk.msra.mxu0 %vm6321_vm4, %v170_v50  ;;  %32782 = vmatprep.mubr.msk.f32.mxu0 %vm34786_vm1, %v34785_v14  ;;  %v7544_v8 = vrot.slane %v35939_v41, %v35935_v16 }
 0x546   :  { %v5876_v44 = vpop.f32.mrb[70].mxu1  ;;  %32807 = vmatprep.mubr.msk.f32.mxu1 %vm34786_vm1, %v34785_v14  ;;  %32790 = vmatprep.subr.mxu0 %v34785_v14 }
 0x547   :  { %v5511_v21 = vpop.f32.mrb[70].mxu0  ;;  %v32729_v7 = vpop.f32.mrb[71].mxu1  ;;  %32808 = vmatmul.mubr.msk.f32.vlgmr.msra.gmra.mrb[86].mxu1 %vm3756_vm2, %v5876_v44  ;;  %32815 = vmatprep.subr.mxu1 %v34785_v14 }
 0x548   :  { %v32704_v45 = vpop.f32.mrb[71].mxu0  ;;  %32783 = vmatmul.mubr.msk.f32.vlgmr.msra.gmra.mrb[86].mxu0 %vm3756_vm2, %v5511_v21  ;;  %32816 = vmatpush3.msk.msra.mxu1 %vm6321_vm4, %v169_v17 }
 0x549   :  { %32791 = vmatpush3.msk.msra.mxu0 %vm6321_vm4, %v172_v10  ;;  %32792 = vmatprep.mubr.msk.f32.mxu0 %vm34786_vm1, %v34785_v14 }
 0x54a   :  { %v6022_v58 = vpop.f32.mrb[72].mxu1  ;;  %32817 = vmatprep.mubr.msk.f32.mxu1 %vm34786_vm1, %v34785_v14  ;;  %32800 = vmatprep.subr.mxu0 %v34785_v14 }
 0x54b   :  { %v5657_v40 = vpop.f32.mrb[72].mxu0  ;;  %v32739_v53 = vpop.f32.mrb[73].mxu1  ;;  %32818 = vmatmul.mubr.msk.f32.vlgmr.msra.gmra.mrb[88].mxu1 %vm3756_vm2, %v6022_v58  ;;  %32825 = vmatprep.subr.mxu1 %v34785_v14 }
 0x54c   :  { %v32714_v54 = vpop.f32.mrb[73].mxu0  ;;  %32793 = vmatmul.mubr.msk.f32.vlgmr.msra.gmra.mrb[88].mxu0 %vm3756_vm2, %v5657_v40  ;;  %32826 = vmatpush3.msk.msra.mxu1 %vm6321_vm4, %v171_v59 }
 0x54d   :  { %32801 = vmatpush3.msk.msra.mxu0 %vm6321_vm4, %v35829_v52  ;;  %32802 = vmatprep.mubr.msk.f32.mxu0 %vm34786_vm1, %v34785_v14 }
 0x54e   :  { %v6168_v18 = vpop.f32.mrb[74].mxu1  ;;  %32827 = vmatprep.mubr.msk.f32.mxu1 %vm34786_vm1, %v34785_v14  ;;  %32810 = vmatprep.subr.mxu0 %v34785_v14 }
 0x54f   :  { %v5803_v57 = vpop.f32.mrb[74].mxu0  ;;  %v32749_v15 = vpop.f32.mrb[75].mxu1  ;;  %32828 = vmatmul.mubr.msk.f32.vlgmr.msra.gmra.mrb[90].mxu1 %vm3756_vm2, %v6168_v18  ;;  %32835 = vmatprep.subr.mxu1 %v34785_v14 }
 0x550   :  { %v32724_v0 = vpop.f32.mrb[75].mxu0  ;;  %32803 = vmatmul.mubr.msk.f32.vlgmr.msra.gmra.mrb[90].mxu0 %vm3756_vm2, %v5803_v57  ;;  %32836 = vmatpush3.msk.msra.mxu1 %vm6321_vm4, %v173_v30 }
 0x551   :  { %32811 = vmatpush3.msk.msra.mxu0 %vm6321_vm4, %v168_v20  ;;  %32812 = vmatprep.mubr.msk.f32.mxu0 %vm34786_vm1, %v34785_v14 }
 0x552   :  { %v6314_v29 = vpop.f32.mrb[76].mxu1  ;;  %32837 = vmatprep.mubr.msk.f32.mxu1 %vm34786_vm1, %v34785_v14  ;;  %32820 = vmatprep.subr.mxu0 %v34785_v14 }
 0x553   :  { %v5949_v19 = vpop.f32.mrb[76].mxu0  ;;  %v32759_v55 = vpop.f32.mrb[77].mxu1  ;;  %32838 = vmatmul.mubr.msk.f32.vlgmr.msra.gmra.mrb[92].mxu1 %vm3756_vm2, %v6314_v29  ;;  %32845 = vmatprep.subr.mxu1 %v34785_v14 }
 0x554   :  { %v32734_v60 = vpop.f32.mrb[77].mxu0  ;;  %32813 = vmatmul.mubr.msk.f32.vlgmr.msra.gmra.mrb[92].mxu0 %vm3756_vm2, %v5949_v19  ;;  %32847 = vmatprep.mubr.msk.f32.mxu1 %vm34786_vm1, %v34785_v14 }
 0x555   :  { %32821 = vmatpush3.msk.msra.mxu0 %vm6321_vm4, %v170_v50  ;;  %32822 = vmatprep.mubr.msk.f32.mxu0 %vm34786_vm1, %v34785_v14 }
 0x556   :  { %32830 = vmatprep.subr.mxu0 %v34785_v14 }
 0x557   :  { %v6095_v5 = vpop.f32.mrb[78].mxu0 }
 0x558   :  { %v32744_v56 = vpop.f32.mrb[79].mxu0  ;;  %32823 = vmatmul.mubr.msk.f32.vlgmr.msra.gmra.mrb[94].mxu0 %vm3756_vm2, %v6095_v5 }
 0x559   :  { %32831 = vmatpush3.msk.msra.mxu0 %vm6321_vm4, %v172_v10  ;;  %32832 = vmatprep.mubr.msk.f32.mxu0 %vm34786_vm1, %v34785_v14 }
 0x55a   :  { %32840 = vmatprep.subr.mxu0 %v34785_v14 }
 0x55b   :  { %v6241_v3 = vpop.f32.mrb[80].mxu0 }
 0x55c   :  { %v32754_v24 = vpop.f32.mrb[81].mxu0  ;;  %32833 = vmatmul.mubr.msk.f32.vlgmr.msra.gmra.mrb[96].mxu0 %vm3756_vm2, %v6241_v3 }
 0x55d   :  { %32842 = vmatprep.mubr.msk.f32.mxu0 %vm34786_vm1, %v34785_v14 }
 0x60a   :  { %v6467_v22 = vpop.f32.mrb[78].mxu1 }
 0x60b   :  { %v32769_v61 = vpop.f32.mrb[79].mxu1  ;;  %v7512_v11 = vsel %vm74_vm0, %v6467_v22, 0.0 }
 0x60e   :  { %v6619_v4 = vpop.f32.mrb[80].mxu1 }
 0x60f   :  { %v32779_v32 = vpop.f32.mrb[81].mxu1  ;;  %v7516_v2 = vsel %vm74_vm0, %v6619_v4, 0.0 }
 0x612   :  { %v6771_v49 = vpop.f32.mrb[82].mxu1 }
 0x613   :  { %v6391_v62 = vpop.f32.mrb[82].mxu0  ;;  %v32789_v38 = vpop.f32.mrb[83].mxu1  ;;  %v7520_v30 = vsel %vm74_vm0, %v6771_v49, 0.0 }
 0x614   :  { %v7511_v34 = vsel %vm74_vm0, %v6391_v62, 0.0  ;;  %v32764_v39 = vpop.f32.mrb[83].mxu0 }
 0x615   :  { %v7513_v35 = vadd.f32 %v7512_v11, %v7511_v34 }
 0x616   :  { %v6923_v37 = vpop.f32.mrb[84].mxu1 }
 0x617   :  { %v6543_v9 = vpop.f32.mrb[84].mxu0  ;;  %v32799_v12 = vpop.f32.mrb[85].mxu1  ;;  %v7524_v31 = vsel %vm74_vm0, %v6923_v37, 0.0 }
 0x618   :  { %v7514_v48 = vsel %vm74_vm0, %v6543_v9, 0.0  ;;  %v32774_v36 = vpop.f32.mrb[85].mxu0 }
 0x619   :  { %v7515_v63 = vadd.f32 %v7514_v48, %v7513_v35 }
 0x61a   :  { %v7069_v43 = vpop.f32.mrb[86].mxu1 }
 0x61b   :  { %v6695_v52 = vpop.f32.mrb[86].mxu0  ;;  %v7517_v17 = vadd.f32 %v7516_v2, %v7515_v63  ;;  %v32809_v47 = vpop.f32.mrb[87].mxu1  ;;  %v7527_v45 = vsel %vm74_vm0, %v7069_v43, 0.0 }
 0x61c   :  { %v7518_v13 = vsel %vm74_vm0, %v6695_v52, 0.0  ;;  %v32784_v59 = vpop.f32.mrb[87].mxu0 }
 0x61d   :  { %v7519_v6 = vadd.f32 %v7518_v13, %v7517_v17  ;;  %v35970_v13 = vld [vmem:[%s39272_s5 + $0x4] sm:$0xf] }
 0x61e   :  { %v7215_v28 = vpop.f32.mrb[88].mxu1  ;;  %32846 = vmatpush3.xpose.msk.msra.mxu1 %vm74_vm0, %v35970_v13 }
 0x61f   :  { %v6847_v20 = vpop.f32.mrb[88].mxu0  ;;  %v7521_v1 = vadd.f32 %v7520_v30, %v7519_v6  ;;  %v32819_v51 = vpop.f32.mrb[89].mxu1  ;;  %v7531_v5 = vsel %vm74_vm0, %v7215_v28, 0.0  ;;  %32855 = vmatprep.subr.mxu1 %v34785_v14 }
 0x620   :  { %v7522_v46 = vsel %vm74_vm0, %v6847_v20, 0.0  ;;  %v32794_v26 = vpop.f32.mrb[89].mxu0 }
 0x621   :  { %v7523_v50 = vadd.f32 %v7522_v46, %v7521_v1 }
 0x622   :  { %v7361_v44 = vpop.f32.mrb[90].mxu1 }
 0x623   :  { %v6996_v10 = vpop.f32.mrb[90].mxu0  ;;  %v32829_v21 = vpop.f32.mrb[91].mxu1  ;;  %v7525_v7 = vadd.f32 %v7524_v31, %v7523_v50  ;;  %v7535_v4 = vsel %vm74_vm0, %v7361_v44, 0.0  ;;  %v35984_v44 = vsub.s32 4, %v34910_v23 }
 0x624   :  { %v7526_v58 = vsel %vm74_vm0, %v6996_v10, 0.0  ;;  %v32804_v40 = vpop.f32.mrb[91].mxu0 }
 0x625   :  { %v7528_v53 = vadd.f32 %v7527_v45, %v7526_v58  ;;  %v7545_v54 = vadd.f32 %v7544_v8, %v7525_v7  ;;  %v7598_v7 = vrot.slane %v35939_v41, %v35984_v44 }
 0x626   :  { %v7507_v18 = vpop.f32.mrb[92].mxu1 }
 0x627   :  { %v7142_v57 = vpop.f32.mrb[92].mxu0  ;;  %v32839_v15 = vpop.f32.mrb[93].mxu1  ;;  %v7547_v0 = vadd.f32 %v7545_v54, %v34920_v33  ;;  %v7539_v11 = vsel %vm74_vm0, %v7507_v18, 0.0 }
 0x628   :  { %v7529_v29 = vsel %vm74_vm0, %v7142_v57, 0.0  ;;  %v32814_v19 = vpop.f32.mrb[93].mxu0  ;;  %v7603_v15 = vld [vmem:[%s39272_s5 + $0x8] sm:$0xf] }
 0x629   :  { %v7530_v55 = vadd.f32 %v7529_v29, %v7528_v53  ;;  %v7549_v60 = vsel %vm74_vm0, %v7547_v0, 0.0  ;;  %v7606_v19 = vld [vmem:[%s39272_s5 + $0x14] sm:$0xf] }
 0x62a   :  { %7550 = vadd.xlane.f32.xlu0 %v7549_v60  ;;  %v7608_v60 = vld [vmem:[%s39272_s5 + $0x1c] sm:$0xf] }
 0x62b   :  { %v7288_v56 = vpop.f32.mrb[94].mxu0  ;;  %v7532_v3 = vadd.f32 %v7531_v5, %v7530_v55  ;;  %v7607_v55 = vld [vmem:[%s39272_s5 + $0x18] sm:$0xf] }
 0x62c   :  { %v7533_v24 = vsel %vm74_vm0, %v7288_v56, 0.0  ;;  %v32824_v22 = vpop.f32.mrb[95].mxu0 }
 0x62d   :  { %v7534_v61 = vadd.f32 %v7533_v24, %v7532_v3  ;;  %v30796_v22 = vld [vmem:[%s39272_s5 + $0x20] sm:$0xf] }
 0x62f   :  { %v7434_v32 = vpop.f32.mrb[96].mxu0  ;;  %v7536_v49 = vadd.f32 %v7535_v4, %v7534_v61  ;;  %v30797_v61 = vld [vmem:[%s39272_s5 + $0x24] sm:$0xf] }
 0x630   :  { %v7537_v33 = vsel %vm74_vm0, %v7434_v32, 0.0  ;;  %v32834_v62 = vpop.f32.mrb[97].mxu0  ;;  %v36109_v4 = vld [vmem:[#allocation2] sm:$0xff]  ;;  %v30798_v32 = vld [vmem:[%s39272_s5 + $0x28] sm:$0xf] }
 0x631   :  { %v7538_v38 = vadd.f32 %v7537_v33, %v7536_v49  ;;  %v30799_v49 = vld [vmem:[%s39272_s5 + $0x2c] sm:$0xf]  ;;  %v30800_v33 = vld [vmem:[%s39272_s5 + $0x30] sm:$0xf]  ;;  %v30801_v62 = vld [vmem:[%s39272_s5 + $0x34] sm:$0xf] }
 0x633   :  { %v7540_v34 = vadd.f32 %v7539_v11, %v7538_v38  ;;  %v30802_v38 = vld [vmem:[%s39272_s5 + $0x38] sm:$0xf]  ;;  %v30803_v11 = vld [vmem:[%s39272_s5 + $0x3c] sm:$0xf] }
 0x635   :  { %v7546_v39 = vadd.f32 %v7544_v8, %v7540_v34  ;;  %v35979_v8 = vsub.s32 3, %v34910_v23  ;;  %v36177_v34 = vld [vmem:[#allocation2 + $0x8] sm:$0xff] }
 0x637   :  { %v7548_v35 = vadd.f32 %v7546_v39, %v34967_v42  ;;  %v35965_v42 = vld [vmem:[%s39272_s5] sm:$0xf]  ;;  %v7586_v31 = vrot.slane %v35939_v41, %v35979_v8  ;;  %v7605_v41 = vld [vmem:[%s39272_s5 + $0x10] sm:$0xf] }
 0x638   :  { %32841 = vmatpush3.xpose.msk.msra.mxu0 %vm74_vm0, %v35965_v42  ;;  %v30804_v39 = vld [vmem:[%s39272_s5 + $0x40] sm:$0xf] }
 0x639   :  { %v7552_v37 = vsel %vm74_vm0, %v7548_v35, 0.0  ;;  %32850 = vmatprep.subr.mxu0 %v34785_v14 }
 0x63a   :  { %7553 = vadd.xlane.f32.xlu1 %v7552_v37  ;;  %v30806_v37 = vld [vmem:[%s39272_s5 + $0x48] sm:$0xf] }
 0x6b7   :  { %v7551_v9 = vpop.xlane.xlu0 %7550 }
 0x6b8   :  { %v7555_v12 = vmul.f32 0.03125, %v7551_v9  ;;  %v30807_v9 = vld [vmem:[%s39272_s5 + $0x4c] sm:$0xf] }
 0x6ba   :  { %v7557_v48 = vsub.f32 %v7547_v0, %v7555_v12  ;;  %v7604_v0 = vld [vmem:[%s39272_s5 + $0xc] sm:$0xf]  ;;  %v30808_v12 = vld [vmem:[%s39272_s5 + $0x50] sm:$0xf] }
 0x6bc   :  { %v7559_v36 = vmul.f32 %v7557_v48, %v7557_v48  ;;  %v7587_v21 = vmul.f32 %v7586_v31, %v7557_v48  ;;  %v30809_v48 = vld [vmem:[%s39272_s5 + $0x54] sm:$0xf] }
 0x6be   :  { %v7561_v63 = vsel %vm74_vm0, %v7559_v36, 0.0  ;;  %v30810_v36 = vld [vmem:[%s39272_s5 + $0x58] sm:$0xf] }
 0x6bf   :  { %7562 = vadd.xlane.f32.xlu0 %v7561_v63  ;;  %v30811_v63 = vld [vmem:[%s39272_s5 + $0x5c] sm:$0xf] }
 0x6c7   :  { %v7554_v2 = vpop.xlane.xlu1 %7553 }
 0x6c8   :  { %v7556_v43 = vmul.f32 0.03125, %v7554_v2 }
 0x6ca   :  { %v35957_v52 = vsub.f32 %v7548_v35, %v7556_v43  ;;  %v30805_v35 = vld [vmem:[%s39272_s5 + $0x44] sm:$0xf] }
 0x6cc   :  { %v7560_v17 = vmul.f32 %v35957_v52, %v35957_v52  ;;  %v7588_v5 = vmul.f32 %v7586_v31, %v35957_v52 }
 0x6ce   :  { %v7564_v47 = vsel %vm74_vm0, %v7560_v17, 0.0 }
 0x6cf   :  { %7565 = vadd.xlane.f32.xlu1 %v7564_v47 }
 0x74c   :  { %v7563_v59 = vpop.xlane.xlu0 %7562 }
 0x74d   :  { %v7567_v6 = vmul.f32 0.032258064, %v7563_v59 }
 0x74f   :  { %34463 = vrsqrt.f32 %v7567_v6  ;;  %vm7571_vm5 = vcmp.eq.f32.partialorder %v7567_v6, inf  ;;  %v7574_v20 = vand.u32 2147483648, %v7567_v6  ;;  %vm7573_vm6 = vcmp.eq.f32.partialorder %v7567_v6, 0.0 }
 0x759   :  { %v34464_v30 = vpop.eup %34463 }
 0x75a   :  { %v7570_v28 = vmul.f32 %v34464_v30, %v7567_v6 }
 0x75c   :  { %v7572_v1 = vsel %vm7571_vm5, %v7567_v6, %v7570_v28  ;;  %v7566_v51 = vpop.xlane.xlu1 %7565 }
 0x75d   :  { %v7575_v46 = vsel %vm7573_vm6, %v7574_v20, %v7572_v1  ;;  %v7568_v26 = vmul.f32 0.032258064, %v7566_v51 }
 0x75e   :  { %v7589_v50 = vadd.f32 1e-06, %v7575_v46 }
 0x75f   :  { %34465 = vrsqrt.f32 %v7568_v26  ;;  %vm7578_vm7 = vcmp.eq.f32.partialorder %v7568_v26, inf  ;;  %v7581_v53 = vand.u32 2147483648, %v7568_v26  ;;  %vm7580_vm8 = vcmp.eq.f32.partialorder %v7568_v26, 0.0 }
 0x760   :  { %34467 = vrcp.f32 %v7589_v50 }
 0x769   :  { %v34466_v10 = vpop.eup %34465 }
 0x76a   :  { %v34468_v45 = vpop.eup %34467  ;;  %v7577_v58 = vmul.f32 %v34466_v10, %v7568_v26 }
 0x76b   :  { %v7592_v40 = vmul.f32 %v34468_v45, %v7587_v21 }
 0x76c   :  { %v7579_v54 = vsel %vm7578_vm7, %v7568_v26, %v7577_v58 }
 0x76d   :  { %v35988_v18 = vadd.f32 %v7598_v7, %v7592_v40  ;;  %v7582_v57 = vsel %vm7580_vm8, %v7581_v53, %v7579_v54 }
 0x76e   :  { %v7590_v29 = vadd.f32 1e-06, %v7582_v57 }
 0x76f   :  { %32843 = vmatmul.mubr.msk.f32.vlgmr.msra.gmra.mrb[98].mxu0 %vm74_vm0, %v35988_v18  ;;  %32848 = vmatmul.mubr.msk.f32.vlgmr.msra.gmra.mrb[94].mxu1 %vm74_vm0, %v35988_v18 }
 0x770   :  { %34469 = vrcp.f32 %v7590_v29  ;;  %32851 = vmatpush3.xpose.msk.msra.mxu0 %vm74_vm0, %v7603_v15  ;;  %32856 = vmatpush3.xpose.msk.msra.mxu1 %vm74_vm0, %v7604_v0 }
 0x771   :  { %32852 = vmatprep.mubr.msk.f32.mxu0 %vm34786_vm1, %v34785_v14  ;;  %32857 = vmatprep.mubr.msk.f32.mxu1 %vm34786_vm1, %v34785_v14 }
 0x772   :  { %32860 = vmatprep.subr.mxu0 %v34785_v14  ;;  %32865 = vmatprep.subr.mxu1 %v34785_v14 }
 0x773   :  { %32853 = vmatmul.mubr.msk.f32.vlgmr.msra.gmra.mrb[100].mxu0 %vm74_vm0, %v35988_v18  ;;  %32858 = vmatmul.mubr.msk.f32.vlgmr.msra.gmra.mrb[96].mxu1 %vm74_vm0, %v35988_v18 }
 0x774   :  { %32861 = vmatpush3.xpose.msk.msra.mxu0 %vm74_vm0, %v7605_v41  ;;  %32866 = vmatpush3.xpose.msk.msra.mxu1 %vm74_vm0, %v7606_v19 }
 0x775   :  { %32862 = vmatprep.mubr.msk.f32.mxu0 %vm34786_vm1, %v34785_v14  ;;  %32867 = vmatprep.mubr.msk.f32.mxu1 %vm34786_vm1, %v34785_v14 }
 0x776   :  { %32870 = vmatprep.subr.mxu0 %v34785_v14  ;;  %32875 = vmatprep.subr.mxu1 %v34785_v14 }
 0x777   :  { %32863 = vmatmul.mubr.msk.f32.vlgmr.msra.gmra.mrb[102].mxu0 %vm74_vm0, %v35988_v18  ;;  %32868 = vmatmul.mubr.msk.f32.vlgmr.msra.gmra.mrb[98].mxu1 %vm74_vm0, %v35988_v18 }
 0x778   :  { %32871 = vmatpush3.xpose.msk.msra.mxu0 %vm74_vm0, %v7607_v55  ;;  %32876 = vmatpush3.xpose.msk.msra.mxu1 %vm74_vm0, %v7608_v60 }
 0x779   :  { %32872 = vmatprep.mubr.msk.f32.mxu0 %vm34786_vm1, %v34785_v14  ;;  %32877 = vmatprep.mubr.msk.f32.mxu1 %vm34786_vm1, %v34785_v14 }
 0x77a   :  { %v34470_v56 = vpop.eup %34469  ;;  %32880 = vmatprep.subr.mxu0 %v34785_v14  ;;  %32885 = vmatprep.subr.mxu1 %v34785_v14 }
 0x77b   :  { %v7594_v3 = vmul.f32 %v34470_v56, %v7588_v5  ;;  %32873 = vmatmul.mubr.msk.f32.vlgmr.msra.gmra.mrb[104].mxu0 %vm74_vm0, %v35988_v18  ;;  %32878 = vmatmul.mubr.msk.f32.vlgmr.msra.gmra.mrb[100].mxu1 %vm74_vm0, %v35988_v18 }
 0x77c   :  { %32881 = vmatpush3.xpose.msk.msra.mxu0 %vm74_vm0, %v35965_v42  ;;  %32886 = vmatpush3.xpose.msk.msra.mxu1 %vm74_vm0, %v35970_v13 }
 0x77d   :  { %v36053_v24 = vadd.f32 %v7598_v7, %v7594_v3  ;;  %32882 = vmatprep.mubr.msk.f32.mxu0 %vm34786_vm1, %v34785_v14  ;;  %32887 = vmatprep.mubr.msk.f32.mxu1 %vm34786_vm1, %v34785_v14  ;;  %v36386_v3 = vld [vmem:[%s39273_s6] ss:$0 sm:$0xff] }
 0x77e   :  { %32890 = vmatprep.subr.mxu0 %v34785_v14  ;;  %32895 = vmatprep.subr.mxu1 %v34785_v14 }
 0x77f   :  { %32883 = vmatmul.mubr.msk.f32.vlgmr.msra.gmra.mrb[106].mxu0 %vm74_vm0, %v36053_v24  ;;  %32888 = vmatmul.mubr.msk.f32.vlgmr.msra.gmra.mrb[102].mxu1 %vm74_vm0, %v36053_v24 }
 0x780   :  { %32891 = vmatpush3.xpose.msk.msra.mxu0 %vm74_vm0, %v7603_v15  ;;  %32896 = vmatpush3.xpose.msk.msra.mxu1 %vm74_vm0, %v7604_v0 }
 0x781   :  { %32892 = vmatprep.mubr.msk.f32.mxu0 %vm34786_vm1, %v34785_v14  ;;  %32897 = vmatprep.mubr.msk.f32.mxu1 %vm34786_vm1, %v34785_v14 }
 0x782   :  { %32900 = vmatprep.subr.mxu0 %v34785_v14  ;;  %32905 = vmatprep.subr.mxu1 %v34785_v14 }
 0x783   :  { %32893 = vmatmul.mubr.msk.f32.vlgmr.msra.gmra.mrb[108].mxu0 %vm74_vm0, %v36053_v24  ;;  %32898 = vmatmul.mubr.msk.f32.vlgmr.msra.gmra.mrb[104].mxu1 %vm74_vm0, %v36053_v24 }
 0x784   :  { %32901 = vmatpush3.xpose.msk.msra.mxu0 %vm74_vm0, %v7605_v41  ;;  %32906 = vmatpush3.xpose.msk.msra.mxu1 %vm74_vm0, %v7606_v19 }
 0x785   :  { %32902 = vmatprep.mubr.msk.f32.mxu0 %vm34786_vm1, %v34785_v14  ;;  %32907 = vmatprep.mubr.msk.f32.mxu1 %vm34786_vm1, %v34785_v14 }
 0x786   :  { %32910 = vmatprep.subr.mxu0 %v34785_v14  ;;  %32915 = vmatprep.subr.mxu1 %v34785_v14 }
 0x787   :  { %32903 = vmatmul.mubr.msk.f32.vlgmr.msra.gmra.mrb[110].mxu0 %vm74_vm0, %v36053_v24  ;;  %32908 = vmatmul.mubr.msk.f32.vlgmr.msra.gmra.mrb[106].mxu1 %vm74_vm0, %v36053_v24 }
 0x788   :  { %32911 = vmatpush3.xpose.msk.msra.mxu0 %vm74_vm0, %v7607_v55  ;;  %32916 = vmatpush3.xpose.msk.msra.mxu1 %vm74_vm0, %v7608_v60  ;;  %v36376_v55 = vld [vmem:[%s39273_s6 + $0x8] ss:$0 sm:$0xff]  ;;  %v36381_v60 = vld [vmem:[%s39273_s6 + $0x9] ss:$0 sm:$0xff] }
 0x789   :  { %32912 = vmatprep.mubr.msk.f32.mxu0 %vm34786_vm1, %v34785_v14  ;;  %32917 = vmatprep.mubr.msk.f32.mxu1 %vm34786_vm1, %v34785_v14 }
 0x78a   :  { %32920 = vmatprep.subr.mxu0 %v34785_v14  ;;  %32925 = vmatprep.subr.mxu1 %v34785_v14 }
 0x78b   :  { %32913 = vmatmul.mubr.msk.f32.vlgmr.msra.gmra.mrb[112].mxu0 %vm74_vm0, %v36053_v24  ;;  %32918 = vmatmul.mubr.msk.f32.vlgmr.msra.gmra.mrb[108].mxu1 %vm74_vm0, %v36053_v24 }
 0x78c   :  { %32921 = vmatpush3.xpose.msk.msra.mxu0 %vm74_vm0, %v30796_v22  ;;  %32926 = vmatpush3.xpose.msk.msra.mxu1 %vm74_vm0, %v30797_v61 }
 0x78d   :  { %32922 = vmatprep.mubr.msk.f32.mxu0 %vm34786_vm1, %v34785_v14  ;;  %32927 = vmatprep.mubr.msk.f32.mxu1 %vm34786_vm1, %v34785_v14 }
 0x78e   :  { %32930 = vmatprep.subr.mxu0 %v34785_v14  ;;  %32935 = vmatprep.subr.mxu1 %v34785_v14 }
 0x78f   :  { %32923 = vmatmul.mubr.msk.f32.vlgmr.msra.gmra.mrb[114].mxu0 %vm74_vm0, %v36109_v4  ;;  %32928 = vmatmul.mubr.msk.f32.vlgmr.msra.gmra.mrb[110].mxu1 %vm74_vm0, %v36109_v4 }
 0x790   :  { %32931 = vmatpush3.xpose.msk.msra.mxu0 %vm74_vm0, %v30798_v32  ;;  %32936 = vmatpush3.xpose.msk.msra.mxu1 %vm74_vm0, %v30799_v49 }
 0x791   :  { %32932 = vmatprep.mubr.msk.f32.mxu0 %vm34786_vm1, %v34785_v14  ;;  %32937 = vmatprep.mubr.msk.f32.mxu1 %vm34786_vm1, %v34785_v14 }
 0x792   :  { %32940 = vmatprep.subr.mxu0 %v34785_v14  ;;  %32945 = vmatprep.subr.mxu1 %v34785_v14 }
 0x793   :  { %32933 = vmatmul.mubr.msk.f32.vlgmr.msra.gmra.mrb[116].mxu0 %vm74_vm0, %v36109_v4  ;;  %32938 = vmatmul.mubr.msk.f32.vlgmr.msra.gmra.mrb[112].mxu1 %vm74_vm0, %v36109_v4 }
 0x794   :  { %32941 = vmatpush3.xpose.msk.msra.mxu0 %vm74_vm0, %v30800_v33  ;;  %32946 = vmatpush3.xpose.msk.msra.mxu1 %vm74_vm0, %v30801_v62 }
 0x795   :  { %32942 = vmatprep.mubr.msk.f32.mxu0 %vm34786_vm1, %v34785_v14  ;;  %32947 = vmatprep.mubr.msk.f32.mxu1 %vm34786_vm1, %v34785_v14 }
 0x796   :  { %32950 = vmatprep.subr.mxu0 %v34785_v14  ;;  %32955 = vmatprep.subr.mxu1 %v34785_v14 }
 0x797   :  { %32943 = vmatmul.mubr.msk.f32.vlgmr.msra.gmra.mrb[118].mxu0 %vm74_vm0, %v36109_v4  ;;  %32948 = vmatmul.mubr.msk.f32.vlgmr.msra.gmra.mrb[114].mxu1 %vm74_vm0, %v36109_v4 }
 0x798   :  { %32951 = vmatpush3.xpose.msk.msra.mxu0 %vm74_vm0, %v30802_v38  ;;  %32956 = vmatpush3.xpose.msk.msra.mxu1 %vm74_vm0, %v30803_v11 }
 0x799   :  { %32952 = vmatprep.mubr.msk.f32.mxu0 %vm34786_vm1, %v34785_v14  ;;  %32957 = vmatprep.mubr.msk.f32.mxu1 %vm34786_vm1, %v34785_v14 }
 0x79a   :  { %32960 = vmatprep.subr.mxu0 %v34785_v14  ;;  %32965 = vmatprep.subr.mxu1 %v34785_v14 }
 0x79b   :  { %32953 = vmatmul.mubr.msk.f32.vlgmr.msra.gmra.mrb[120].mxu0 %vm74_vm0, %v36109_v4  ;;  %32958 = vmatmul.mubr.msk.f32.vlgmr.msra.gmra.mrb[116].mxu1 %vm74_vm0, %v36109_v4 }
 0x79c   :  { %32961 = vmatpush3.xpose.msk.msra.mxu0 %vm74_vm0, %v30796_v22  ;;  %32966 = vmatpush3.xpose.msk.msra.mxu1 %vm74_vm0, %v30797_v61  ;;  %v36391_v22 = vld [vmem:[%s39273_s6 + $0x1] ss:$0 sm:$0xff] }
 0x79d   :  { %32962 = vmatprep.mubr.msk.f32.mxu0 %vm34786_vm1, %v34785_v14  ;;  %32967 = vmatprep.mubr.msk.f32.mxu1 %vm34786_vm1, %v34785_v14 }
 0x79e   :  { %32970 = vmatprep.subr.mxu0 %v34785_v14  ;;  %32975 = vmatprep.subr.mxu1 %v34785_v14 }
 0x79f   :  { %32963 = vmatmul.mubr.msk.f32.vlgmr.msra.gmra.mrb[122].mxu0 %vm74_vm0, %v36177_v34  ;;  %32968 = vmatmul.mubr.msk.f32.vlgmr.msra.gmra.mrb[118].mxu1 %vm74_vm0, %v36177_v34 }
 0x7a0   :  { %32971 = vmatpush3.xpose.msk.msra.mxu0 %vm74_vm0, %v30798_v32  ;;  %32976 = vmatpush3.xpose.msk.msra.mxu1 %vm74_vm0, %v30799_v49 }
 0x7a1   :  { %32972 = vmatprep.mubr.msk.f32.mxu0 %vm34786_vm1, %v34785_v14  ;;  %32977 = vmatprep.mubr.msk.f32.mxu1 %vm34786_vm1, %v34785_v14 }
 0x7a2   :  { %32980 = vmatprep.subr.mxu0 %v34785_v14  ;;  %32985 = vmatprep.subr.mxu1 %v34785_v14 }
 0x7a3   :  { %32973 = vmatmul.mubr.msk.f32.vlgmr.msra.gmra.mrb[124].mxu0 %vm74_vm0, %v36177_v34  ;;  %32978 = vmatmul.mubr.msk.f32.vlgmr.msra.gmra.mrb[120].mxu1 %vm74_vm0, %v36177_v34 }
 0x7a4   :  { %32981 = vmatpush3.xpose.msk.msra.mxu0 %vm74_vm0, %v30800_v33  ;;  %32986 = vmatpush3.xpose.msk.msra.mxu1 %vm74_vm0, %v30801_v62  ;;  %v36398_v33 = vld [vmem:[%s39273_s6 + $0xa] ss:$0 sm:$0xff]  ;;  %v36403_v62 = vld [vmem:[%s39273_s6 + $0xb] ss:$0 sm:$0xff] }
 0x7a5   :  { %32982 = vmatprep.mubr.msk.f32.mxu0 %vm34786_vm1, %v34785_v14  ;;  %32987 = vmatprep.mubr.msk.f32.mxu1 %vm34786_vm1, %v34785_v14 }
 0x7a6   :  { %32990 = vmatprep.subr.mxu0 %v34785_v14  ;;  %32995 = vmatprep.subr.mxu1 %v34785_v14 }
 0x7a7   :  { %32983 = vmatmul.mubr.msk.f32.vlgmr.msra.gmra.mrb[126].mxu0 %vm74_vm0, %v36177_v34  ;;  %32988 = vmatmul.mubr.msk.f32.vlgmr.msra.gmra.mrb[122].mxu1 %vm74_vm0, %v36177_v34 }
 0x7a8   :  { %32991 = vmatpush3.xpose.msk.msra.mxu0 %vm74_vm0, %v30802_v38  ;;  %32996 = vmatpush3.xpose.msk.msra.mxu1 %vm74_vm0, %v30803_v11 }
 0x7a9   :  { %32992 = vmatprep.mubr.msk.f32.mxu0 %vm34786_vm1, %v34785_v14  ;;  %32997 = vmatprep.mubr.msk.f32.mxu1 %vm34786_vm1, %v34785_v14 }
 0x7aa   :  { %33000 = vmatprep.subr.mxu0 %v34785_v14  ;;  %33005 = vmatprep.subr.mxu1 %v34785_v14 }
 0x7ab   :  { %32993 = vmatmul.mubr.msk.f32.vlgmr.msra.gmra.mrb[128].mxu0 %vm74_vm0, %v36177_v34  ;;  %32998 = vmatmul.mubr.msk.f32.vlgmr.msra.gmra.mrb[124].mxu1 %vm74_vm0, %v36177_v34 }
 0x7ac   :  { %33002 = vmatprep.mubr.msk.f32.mxu0 %vm34786_vm1, %v34785_v14  ;;  %33007 = vmatprep.mubr.msk.f32.mxu1 %vm34786_vm1, %v34785_v14 }
 0x7ad   :  { %33001 = vmatpush3.xpose.msk.msra.mxu0 %vm74_vm0, %v30804_v39  ;;  %33006 = vmatpush3.xpose.msk.msra.mxu1 %vm74_vm0, %v30805_v35 }
 0x7ae   :  { %33010 = vmatprep.subr.mxu0 %v34785_v14  ;;  %33015 = vmatprep.subr.mxu1 %v34785_v14 }
 0x7b0   :  { %33003 = vmatmul.mubr.msk.f32.vlgmr.msra.gmra.mrb[130].mxu0 %vm74_vm0, %v36109_v4  ;;  %33008 = vmatmul.mubr.msk.f32.vlgmr.msra.gmra.mrb[126].mxu1 %vm74_vm0, %v36109_v4 }
 0x7b1   :  { %33011 = vmatpush3.xpose.msk.msra.mxu0 %vm74_vm0, %v30806_v37  ;;  %33016 = vmatpush3.xpose.msk.msra.mxu1 %vm74_vm0, %v30807_v9 }
 0x7b2   :  { %33012 = vmatprep.mubr.msk.f32.mxu0 %vm34786_vm1, %v34785_v14  ;;  %33017 = vmatprep.mubr.msk.f32.mxu1 %vm34786_vm1, %v34785_v14 }
 0x7b3   :  { %33020 = vmatprep.subr.mxu0 %v34785_v14  ;;  %33025 = vmatprep.subr.mxu1 %v34785_v14 }
 0x7b4   :  { %33013 = vmatmul.mubr.msk.f32.vlgmr.msra.gmra.mrb[132].mxu0 %vm74_vm0, %v36109_v4  ;;  %33018 = vmatmul.mubr.msk.f32.vlgmr.msra.gmra.mrb[128].mxu1 %vm74_vm0, %v36109_v4 }
 0x7b5   :  { %33021 = vmatpush3.xpose.msk.msra.mxu0 %vm74_vm0, %v30808_v12  ;;  %33026 = vmatpush3.xpose.msk.msra.mxu1 %vm74_vm0, %v30809_v48 }
 0x7b6   :  { %33022 = vmatprep.mubr.msk.f32.mxu0 %vm34786_vm1, %v34785_v14  ;;  %33027 = vmatprep.mubr.msk.f32.mxu1 %vm34786_vm1, %v34785_v14 }
 0x7b7   :  { %33030 = vmatprep.subr.mxu0 %v34785_v14  ;;  %33035 = vmatprep.subr.mxu1 %v34785_v14 }
 0x7b8   :  { %33023 = vmatmul.mubr.msk.f32.vlgmr.msra.gmra.mrb[134].mxu0 %vm74_vm0, %v36109_v4  ;;  %33028 = vmatmul.mubr.msk.f32.vlgmr.msra.gmra.mrb[130].mxu1 %vm74_vm0, %v36109_v4 }
 0x7b9   :  { %33031 = vmatpush3.xpose.msk.msra.mxu0 %vm74_vm0, %v30810_v36  ;;  %33036 = vmatpush3.xpose.msk.msra.mxu1 %vm74_vm0, %v30811_v63 }
 0x7ba   :  { %33032 = vmatprep.mubr.msk.f32.mxu0 %vm34786_vm1, %v34785_v14  ;;  %33037 = vmatprep.mubr.msk.f32.mxu1 %vm34786_vm1, %v34785_v14 }
 0x7bb   :  { %33040 = vmatprep.subr.mxu0 %v34785_v14  ;;  %33045 = vmatprep.subr.mxu1 %v34785_v14 }
 0x7bc   :  { %33033 = vmatmul.mubr.msk.f32.vlgmr.msra.gmra.mrb[136].mxu0 %vm74_vm0, %v36109_v4  ;;  %33038 = vmatmul.mubr.msk.f32.vlgmr.msra.gmra.mrb[132].mxu1 %vm74_vm0, %v36109_v4 }
 0x7bd   :  { %33041 = vmatpush3.xpose.msk.msra.mxu0 %vm74_vm0, %v30804_v39  ;;  %33046 = vmatpush3.xpose.msk.msra.mxu1 %vm74_vm0, %v30805_v35  ;;  %v36414_v35 = vld [vmem:[%s39273_s6 + $0x2] ss:$0 sm:$0xff] }
 0x7be   :  { %33042 = vmatprep.mubr.msk.f32.mxu0 %vm34786_vm1, %v34785_v14  ;;  %33047 = vmatprep.mubr.msk.f32.mxu1 %vm34786_vm1, %v34785_v14 }
 0x7bf   :  { %33050 = vmatprep.subr.mxu0 %v34785_v14  ;;  %33055 = vmatprep.subr.mxu1 %v34785_v14 }
 0x7c0   :  { %33043 = vmatmul.mubr.msk.f32.vlgmr.msra.gmra.mrb[138].mxu0 %vm74_vm0, %v36177_v34  ;;  %33048 = vmatmul.mubr.msk.f32.vlgmr.msra.gmra.mrb[134].mxu1 %vm74_vm0, %v36177_v34 }
 0x7c1   :  { %33051 = vmatpush3.xpose.msk.msra.mxu0 %vm74_vm0, %v30806_v37  ;;  %33056 = vmatpush3.xpose.msk.msra.mxu1 %vm74_vm0, %v30807_v9  ;;  %v36419_v37 = vld [vmem:[%s39273_s6 + $0x3] ss:$0 sm:$0xff] }
 0x7c2   :  { %33052 = vmatprep.mubr.msk.f32.mxu0 %vm34786_vm1, %v34785_v14  ;;  %33057 = vmatprep.mubr.msk.f32.mxu1 %vm34786_vm1, %v34785_v14 }
 0x7c3   :  { %33060 = vmatprep.subr.mxu0 %v34785_v14  ;;  %33065 = vmatprep.subr.mxu1 %v34785_v14 }
 0x7c4   :  { %33053 = vmatmul.mubr.msk.f32.vlgmr.msra.gmra.mrb[140].mxu0 %vm74_vm0, %v36177_v34  ;;  %33058 = vmatmul.mubr.msk.f32.vlgmr.msra.gmra.mrb[136].mxu1 %vm74_vm0, %v36177_v34 }
 0x7c5   :  { %33061 = vmatpush3.xpose.msk.msra.mxu0 %vm74_vm0, %v30808_v12  ;;  %33066 = vmatpush3.xpose.msk.msra.mxu1 %vm74_vm0, %v30809_v48 }
 0x7c6   :  { %33062 = vmatprep.mubr.msk.f32.mxu0 %vm34786_vm1, %v34785_v14  ;;  %33067 = vmatprep.mubr.msk.f32.mxu1 %vm34786_vm1, %v34785_v14 }
 0x7c7   :  { %33070 = vmatprep.subr.mxu0 %v34785_v14  ;;  %33075 = vmatprep.subr.mxu1 %v34785_v14 }
 0x7c8   :  { %33063 = vmatmul.mubr.msk.f32.vlgmr.msra.gmra.mrb[142].mxu0 %vm74_vm0, %v36177_v34  ;;  %33068 = vmatmul.mubr.msk.f32.vlgmr.msra.gmra.mrb[138].mxu1 %vm74_vm0, %v36177_v34 }
 0x7c9   :  { %33071 = vmatpush3.xpose.msk.msra.mxu0 %vm74_vm0, %v30810_v36  ;;  %33076 = vmatpush3.xpose.msk.msra.mxu1 %vm74_vm0, %v30811_v63  ;;  %v36428_v63 = vld [vmem:[%s39273_s6 + $0xc] ss:$0 sm:$0xff] }
 0x7ca   :  { %33072 = vmatprep.mubr.msk.f32.mxu0 %vm34786_vm1, %v34785_v14  ;;  %33077 = vmatprep.mubr.msk.f32.mxu1 %vm34786_vm1, %v34785_v14 }
 0x7cb   :  { %33080 = vmatprep.subr.mxu0 %v34785_v14  ;;  %33085 = vmatprep.subr.mxu1 %v34785_v14 }
 0x7cc   :  { %33073 = vmatmul.mubr.msk.f32.vlgmr.msra.gmra.mrb[144].mxu0 %vm74_vm0, %v36177_v34  ;;  %33078 = vmatmul.mubr.msk.f32.vlgmr.msra.gmra.mrb[140].mxu1 %vm74_vm0, %v36177_v34 }
 0x7cd   :  { %33082 = vmatprep.mubr.msk.f32.mxu0 %vm34786_vm1, %v34785_v14  ;;  %33087 = vmatprep.mubr.msk.f32.mxu1 %vm34786_vm1, %v34785_v14 }
 0x842   :  { %v7781_v2 = vpop.f32.mrb[98].mxu0  ;;  %v7854_v43 = vpop.f32.mrb[94].mxu1 }
 0x843   :  { %v32844_v52 = vpop.f32.mrb[99].mxu0  ;;  %v32849_v17 = vpop.f32.mrb[95].mxu1  ;;  %v7782_v38 = vadd.f32 %v36386_v3, %v7781_v2  ;;  %v7855_v11 = vadd.f32 %v36391_v22, %v7854_v43  ;;  %v36433_v2 = vld [vmem:[%s39273_s6 + $0xd] ss:$0 sm:$0xff] }
 0x846   :  { %v7927_v47 = vpop.f32.mrb[100].mxu0  ;;  %v8000_v42 = vpop.f32.mrb[96].mxu1 }
 0x847   :  { %v32854_v13 = vpop.f32.mrb[101].mxu0  ;;  %v32859_v59 = vpop.f32.mrb[97].mxu1  ;;  %v7928_v43 = vadd.f32 %v36414_v35, %v7927_v47  ;;  %v8001_v52 = vadd.f32 %v36419_v37, %v8000_v42 }
 0x848   :  { %v36446_v59 = vld [vmem:[%s39273_s6 + $0x4] ss:$0 sm:$0xff] }
 0x84a   :  { %v36349_v6 = vpop.f32.mrb[102].mxu0  ;;  %v36351_v30 = vpop.f32.mrb[98].mxu1 }
 0x84b   :  { %v32864_v28 = vpop.f32.mrb[103].mxu0  ;;  %v32869_v20 = vpop.f32.mrb[99].mxu1 }
 0x84c   :  { %v36451_v28 = vld [vmem:[%s39273_s6 + $0x5] ss:$0 sm:$0xff] }
 0x84e   :  { %v36353_v1 = vpop.f32.mrb[104].mxu0  ;;  %v36355_v51 = vpop.f32.mrb[100].mxu1 }
 0x84f   :  { %v32874_v46 = vpop.f32.mrb[105].mxu0  ;;  %v32879_v26 = vpop.f32.mrb[101].mxu1 }
 0x850   :  { %v36462_v26 = vld [vmem:[%s39273_s6 + $0xe] ss:$0 sm:$0xff] }
 0x852   :  { %v36357_v50 = vpop.f32.mrb[106].mxu0  ;;  %v36359_v31 = vpop.f32.mrb[102].mxu1 }
 0x853   :  { %v32884_v10 = vpop.f32.mrb[107].mxu0  ;;  %v32889_v21 = vpop.f32.mrb[103].mxu1 }
 0x854   :  { %v36467_v10 = vld [vmem:[%s39273_s6 + $0xf] ss:$0 sm:$0xff]  ;;  %v8074_v21 = vadd.f32 %v36446_v59, %v36349_v6  ;;  %v36487_v6 = vld [vmem:[%s39273_s6 + $0x7] ss:$0 sm:$0xff] }
 0x856   :  { %v36361_v7 = vpop.f32.mrb[108].mxu0  ;;  %v36363_v45 = vpop.f32.mrb[104].mxu1 }
 0x857   :  { %v32894_v58 = vpop.f32.mrb[109].mxu0  ;;  %v32899_v40 = vpop.f32.mrb[105].mxu1 }
 0x858   :  { %v8147_v58 = vadd.f32 %v36451_v28, %v36351_v30 }
 0x85a   :  { %v36365_v53 = vpop.f32.mrb[110].mxu0  ;;  %v36367_v54 = vpop.f32.mrb[106].mxu1 }
 0x85b   :  { %v32904_v57 = vpop.f32.mrb[111].mxu0  ;;  %v32909_v15 = vpop.f32.mrb[107].mxu1 }
 0x85c   :  { %v36482_v15 = vld [vmem:[%s39273_s6 + $0x6] ss:$0 sm:$0xff] }
 0x85e   :  { %v36369_v0 = vpop.f32.mrb[112].mxu0  ;;  %v36371_v29 = vpop.f32.mrb[108].mxu1 }
 0x85f   :  { %v32914_v41 = vpop.f32.mrb[113].mxu0  ;;  %v32919_v19 = vpop.f32.mrb[109].mxu1 }
 0x862   :  { %v8979_v5 = vpop.f32.mrb[114].mxu0  ;;  %v9052_v56 = vpop.f32.mrb[110].mxu1 }
 0x863   :  { %v8980_v61 = vadd.f32 %v36376_v55, %v8979_v5  ;;  %v9053_v4 = vadd.f32 %v36381_v60, %v9052_v56  ;;  %v32924_v32 = vpop.f32.mrb[115].mxu0  ;;  %v32929_v49 = vpop.f32.mrb[111].mxu1  ;;  %v8220_v56 = vadd.f32 %v36482_v15, %v36353_v1  ;;  %v8366_v1 = vadd.f32 %v36386_v3, %v36357_v50 }
 0x864   :  { %v8506_v50 = vadd.f32 %v36414_v35, %v36361_v7  ;;  %v8646_v7 = vadd.f32 %v36446_v59, %v36365_v53  ;;  %v8786_v53 = vadd.f32 %v36482_v15, %v36369_v0  ;;  %v30908_v0 = vld [vmem:[%s39273_s6 + $0x10] ss:$0 sm:$0xff] }
 0x865   :  { %33081 = vmatpush3.xpose.msk.msra.mxu0 %vm3756_vm2, %v8980_v61  ;;  %33086 = vmatpush3.xpose.msk.msra.mxu1 %vm3756_vm2, %v9053_v4  ;;  %v8293_v61 = vadd.f32 %v36487_v6, %v36355_v51  ;;  %v8436_v51 = vadd.f32 %v36391_v22, %v36359_v31  ;;  %v8576_v31 = vadd.f32 %v36419_v37, %v36363_v45 }
 0x866   :  { %v9125_v34 = vpop.f32.mrb[116].mxu0  ;;  %v9198_v39 = vpop.f32.mrb[112].mxu1  ;;  %33090 = vmatprep.subr.mxu0 %v34785_v14  ;;  %33095 = vmatprep.subr.mxu1 %v34785_v14  ;;  %v8716_v45 = vadd.f32 %v36451_v28, %v36367_v54  ;;  %v8856_v54 = vadd.f32 %v36487_v6, %v36371_v29  ;;  %v30909_v29 = vld [vmem:[%s39273_s6 + $0x11] ss:$0 sm:$0xff] }
 0x867   :  { %v9126_v9 = vadd.f32 %v36398_v33, %v9125_v34  ;;  %v9199_v12 = vadd.f32 %v36403_v62, %v9198_v39  ;;  %v32934_v48 = vpop.f32.mrb[117].mxu0  ;;  %v32939_v36 = vpop.f32.mrb[113].mxu1 }
 0x868   :  { %33083 = vmatmul.mubr.msk.f32.vlgmr.msra.gmra.mrb[146].mxu0 %vm3756_vm2, %v7782_v38  ;;  %33088 = vmatmul.mubr.msk.f32.vlgmr.msra.gmra.mrb[142].mxu1 %vm3756_vm2, %v7855_v11 }
 0x869   :  { %33091 = vmatpush3.xpose.msk.msra.mxu0 %vm3756_vm2, %v9126_v9  ;;  %33096 = vmatpush3.xpose.msk.msra.mxu1 %vm3756_vm2, %v9199_v12 }
 0x86a   :  { %v9271_v17 = vpop.f32.mrb[118].mxu0  ;;  %v9344_v13 = vpop.f32.mrb[114].mxu1  ;;  %33092 = vmatprep.mubr.msk.f32.mxu0 %vm34786_vm1, %v34785_v14  ;;  %33097 = vmatprep.mubr.msk.f32.mxu1 %vm34786_vm1, %v34785_v14 }
 0x86b   :  { %v9272_v47 = vadd.f32 %v36428_v63, %v9271_v17  ;;  %v9345_v42 = vadd.f32 %v36433_v2, %v9344_v13  ;;  %v32944_v20 = vpop.f32.mrb[119].mxu0  ;;  %v32949_v46 = vpop.f32.mrb[115].mxu1  ;;  %33100 = vmatprep.subr.mxu0 %v34785_v14  ;;  %33105 = vmatprep.subr.mxu1 %v34785_v14 }
 0x86c   :  { %33093 = vmatmul.mubr.msk.f32.vlgmr.msra.gmra.mrb[148].mxu0 %vm3756_vm2, %v7928_v43  ;;  %33098 = vmatmul.mubr.msk.f32.vlgmr.msra.gmra.mrb[144].mxu1 %vm3756_vm2, %v8001_v52 }
 0x86d   :  { %33101 = vmatpush3.xpose.msk.msra.mxu0 %vm3756_vm2, %v9272_v47  ;;  %33106 = vmatpush3.xpose.msk.msra.mxu1 %vm3756_vm2, %v9345_v42 }
 0x86e   :  { %v9417_v40 = vpop.f32.mrb[120].mxu0  ;;  %v9490_v57 = vpop.f32.mrb[116].mxu1  ;;  %33102 = vmatprep.mubr.msk.f32.mxu0 %vm34786_vm1, %v34785_v14  ;;  %33107 = vmatprep.mubr.msk.f32.mxu1 %vm34786_vm1, %v34785_v14 }
 0x86f   :  { %v9418_v30 = vadd.f32 %v36462_v26, %v9417_v40  ;;  %v9491_v41 = vadd.f32 %v36467_v10, %v9490_v57  ;;  %v32954_v19 = vpop.f32.mrb[121].mxu0  ;;  %v32959_v5 = vpop.f32.mrb[117].mxu1  ;;  %33110 = vmatprep.subr.mxu0 %v34785_v14  ;;  %33115 = vmatprep.subr.mxu1 %v34785_v14 }
 0x870   :  { %33103 = vmatmul.mubr.msk.f32.vlgmr.msra.gmra.mrb[150].mxu0 %vm3756_vm2, %v8074_v21  ;;  %33108 = vmatmul.mubr.msk.f32.vlgmr.msra.gmra.mrb[146].mxu1 %vm3756_vm2, %v8147_v58 }
 0x871   :  { %33111 = vmatpush3.xpose.msk.msra.mxu0 %vm3756_vm2, %v9418_v30  ;;  %33116 = vmatpush3.xpose.msk.msra.mxu1 %vm3756_vm2, %v9491_v41 }
 0x872   :  { %v9563_v4 = vpop.f32.mrb[122].mxu0  ;;  %v9633_v32 = vpop.f32.mrb[118].mxu1  ;;  %33112 = vmatprep.mubr.msk.f32.mxu0 %vm34786_vm1, %v34785_v14  ;;  %33117 = vmatprep.mubr.msk.f32.mxu1 %vm34786_vm1, %v34785_v14 }
 0x873   :  { %v9564_v49 = vadd.f32 %v36376_v55, %v9563_v4  ;;  %v9634_v38 = vadd.f32 %v36381_v60, %v9633_v32  ;;  %v32964_v11 = vpop.f32.mrb[123].mxu0  ;;  %v32969_v34 = vpop.f32.mrb[119].mxu1  ;;  %33120 = vmatprep.subr.mxu0 %v34785_v14  ;;  %33125 = vmatprep.subr.mxu1 %v34785_v14 }
 0x874   :  { %33113 = vmatmul.mubr.msk.f32.vlgmr.msra.gmra.mrb[152].mxu0 %vm3756_vm2, %v8220_v56  ;;  %33118 = vmatmul.mubr.msk.f32.vlgmr.msra.gmra.mrb[148].mxu1 %vm3756_vm2, %v8293_v61 }
 0x875   :  { %33121 = vmatpush3.xpose.msk.msra.mxu0 %vm3756_vm2, %v9564_v49  ;;  %33126 = vmatpush3.xpose.msk.msra.mxu1 %vm3756_vm2, %v9634_v38 }
 0x876   :  { %v9703_v55 = vpop.f32.mrb[124].mxu0  ;;  %v9773_v60 = vpop.f32.mrb[120].mxu1  ;;  %33122 = vmatprep.mubr.msk.f32.mxu0 %vm34786_vm1, %v34785_v14  ;;  %33127 = vmatprep.mubr.msk.f32.mxu1 %vm34786_vm1, %v34785_v14 }
 0x877   :  { %v9704_v39 = vadd.f32 %v36398_v33, %v9703_v55  ;;  %v9774_v9 = vadd.f32 %v36403_v62, %v9773_v60  ;;  %v32974_v12 = vpop.f32.mrb[125].mxu0  ;;  %v32979_v48 = vpop.f32.mrb[121].mxu1  ;;  %33130 = vmatprep.subr.mxu0 %v34785_v14  ;;  %33135 = vmatprep.subr.mxu1 %v34785_v14 }
 0x878   :  { %33123 = vmatmul.mubr.msk.f32.vlgmr.msra.gmra.mrb[154].mxu0 %vm3756_vm2, %v8366_v1  ;;  %33128 = vmatmul.mubr.msk.f32.vlgmr.msra.gmra.mrb[150].mxu1 %vm3756_vm2, %v8436_v51 }
 0x879   :  { %33131 = vmatpush3.xpose.msk.msra.mxu0 %vm3756_vm2, %v9704_v39  ;;  %33136 = vmatpush3.xpose.msk.msra.mxu1 %vm3756_vm2, %v9774_v9 }
 0x87a   :  { %v9843_v3 = vpop.f32.mrb[126].mxu0  ;;  %v9913_v22 = vpop.f32.mrb[122].mxu1  ;;  %33132 = vmatprep.mubr.msk.f32.mxu0 %vm34786_vm1, %v34785_v14  ;;  %33137 = vmatprep.mubr.msk.f32.mxu1 %vm34786_vm1, %v34785_v14 }
 0x87b   :  { %v9844_v33 = vadd.f32 %v36428_v63, %v9843_v3  ;;  %v9914_v62 = vadd.f32 %v36433_v2, %v9913_v22  ;;  %v32984_v36 = vpop.f32.mrb[127].mxu0  ;;  %v32989_v43 = vpop.f32.mrb[123].mxu1  ;;  %33140 = vmatprep.subr.mxu0 %v34785_v14  ;;  %33145 = vmatprep.subr.mxu1 %v34785_v14 }
 0x87c   :  { %33133 = vmatmul.mubr.msk.f32.vlgmr.msra.gmra.mrb[156].mxu0 %vm3756_vm2, %v8506_v50  ;;  %33138 = vmatmul.mubr.msk.f32.vlgmr.msra.gmra.mrb[152].mxu1 %vm3756_vm2, %v8576_v31 }
 0x87d   :  { %33141 = vmatpush3.xpose.msk.msra.mxu0 %vm3756_vm2, %v9844_v33  ;;  %33146 = vmatpush3.xpose.msk.msra.mxu1 %vm3756_vm2, %v9914_v62 }
 0x87e   :  { %v9983_v35 = vpop.f32.mrb[128].mxu0  ;;  %v10053_v37 = vpop.f32.mrb[124].mxu1  ;;  %33142 = vmatprep.mubr.msk.f32.mxu0 %vm34786_vm1, %v34785_v14  ;;  %33147 = vmatprep.mubr.msk.f32.mxu1 %vm34786_vm1, %v34785_v14 }
 0x87f   :  { %v9984_v63 = vadd.f32 %v36462_v26, %v9983_v35  ;;  %v10054_v2 = vadd.f32 %v36467_v10, %v10053_v37  ;;  %v32994_v52 = vpop.f32.mrb[129].mxu0  ;;  %v32999_v17 = vpop.f32.mrb[125].mxu1  ;;  %33150 = vmatprep.subr.mxu0 %v34785_v14  ;;  %33155 = vmatprep.subr.mxu1 %v34785_v14 }
 0x880   :  { %33143 = vmatmul.mubr.msk.f32.vlgmr.msra.gmra.mrb[158].mxu0 %vm3756_vm2, %v8646_v7  ;;  %33148 = vmatmul.mubr.msk.f32.vlgmr.msra.gmra.mrb[154].mxu1 %vm3756_vm2, %v8716_v45 }
 0x881   :  { %33151 = vmatpush3.xpose.msk.msra.mxu0 %vm3756_vm2, %v9984_v63  ;;  %33156 = vmatpush3.xpose.msk.msra.mxu1 %vm3756_vm2, %v10054_v2 }
 0x882   :  { %33152 = vmatprep.mubr.msk.f32.mxu0 %vm34786_vm1, %v34785_v14  ;;  %33157 = vmatprep.mubr.msk.f32.mxu1 %vm34786_vm1, %v34785_v14 }
 0x883   :  { %33160 = vmatprep.subr.mxu0 %v34785_v14  ;;  %33165 = vmatprep.subr.mxu1 %v34785_v14  ;;  %v10174_v13 = vpop.f32.mrb[130].mxu0  ;;  %v10247_v59 = vpop.f32.mrb[126].mxu1 }
 0x884   :  { %33153 = vmatmul.mubr.msk.f32.vlgmr.msra.gmra.mrb[160].mxu0 %vm3756_vm2, %v8786_v53  ;;  %33158 = vmatmul.mubr.msk.f32.vlgmr.msra.gmra.mrb[156].mxu1 %vm3756_vm2, %v8856_v54  ;;  %v10175_v28 = vadd.f32 %v30908_v0, %v10174_v13  ;;  %v33004_v47 = vpop.f32.mrb[131].mxu0  ;;  %v10248_v42 = vadd.f32 %v30909_v29, %v10247_v59  ;;  %v33009_v20 = vpop.f32.mrb[127].mxu1 }
 0x885   :  { %33162 = vmatprep.mubr.msk.f32.mxu0 %vm34786_vm1, %v34785_v14  ;;  %33167 = vmatprep.mubr.msk.f32.mxu1 %vm34786_vm1, %v34785_v14 }
 0x886   :  { %33161 = vmatpush3.msra.mxu0 %v10175_v28  ;;  %33166 = vmatpush3.msra.mxu1 %v10248_v42 }
 0x887   :  { %v36583_v46 = vpop.f32.mrb[132].mxu0  ;;  %v36585_v26 = vpop.f32.mrb[128].mxu1  ;;  %33170 = vmatprep.subr.mxu0 %v34785_v14  ;;  %33175 = vmatprep.subr.mxu1 %v34785_v14 }
 0x888   :  { %v33014_v10 = vpop.f32.mrb[133].mxu0  ;;  %v33019_v21 = vpop.f32.mrb[129].mxu1 }
 0x88b   :  { %v36589_v58 = vpop.f32.mrb[134].mxu0  ;;  %v36591_v40 = vpop.f32.mrb[130].mxu1 }
 0x88c   :  { %v33024_v57 = vpop.f32.mrb[135].mxu0  ;;  %v33029_v15 = vpop.f32.mrb[131].mxu1 }
 0x88f   :  { %v36593_v6 = vpop.f32.mrb[136].mxu0  ;;  %v36595_v30 = vpop.f32.mrb[132].mxu1 }
 0x890   :  { %v33034_v41 = vpop.f32.mrb[137].mxu0  ;;  %v33039_v19 = vpop.f32.mrb[133].mxu1 }
 0x893   :  { %v10755_v5 = vpop.f32.mrb[138].mxu0  ;;  %v10825_v56 = vpop.f32.mrb[134].mxu1 }
 0x894   :  { %v36597_v61 = vadd.f32 %v30908_v0, %v10755_v5  ;;  %v33044_v4 = vpop.f32.mrb[139].mxu0  ;;  %v36599_v32 = vadd.f32 %v30909_v29, %v10825_v56  ;;  %v33049_v49 = vpop.f32.mrb[135].mxu1 }
 0x897   :  { %v36601_v38 = vpop.f32.mrb[140].mxu0  ;;  %v36603_v11 = vpop.f32.mrb[136].mxu1 }
 0x898   :  { %v33054_v34 = vpop.f32.mrb[141].mxu0  ;;  %v33059_v1 = vpop.f32.mrb[137].mxu1 }
 0x89b   :  { %v36605_v51 = vpop.f32.mrb[142].mxu0  ;;  %v36607_v55 = vpop.f32.mrb[138].mxu1 }
 0x89c   :  { %v33064_v60 = vpop.f32.mrb[143].mxu0  ;;  %v33069_v39 = vpop.f32.mrb[139].mxu1 }
 0x89f   :  { %v36609_v9 = vpop.f32.mrb[144].mxu0  ;;  %v36611_v12 = vpop.f32.mrb[140].mxu1 }
 0x8a0   :  { %v33074_v48 = vpop.f32.mrb[145].mxu0  ;;  %v33079_v50 = vpop.f32.mrb[141].mxu1 }
 0x93b   :  { %v36613_v31 = vpop.f32.mrb[146].mxu0  ;;  %v36615_v3 = vpop.f32.mrb[142].mxu1 }
 0x93c   :  { %v33084_v22 = vpop.f32.mrb[147].mxu0  ;;  %v33089_v33 = vpop.f32.mrb[143].mxu1  ;;  %v12468_v62 = vsel %vm4973_vm3, %v36615_v3, -inf  ;;  %v12465_v36 = vsel %vm4973_vm3, %v36613_v31, -inf }
 0x93d   :  { %12469 = vmax.xlane.f32.xlu1 %v12468_v62  ;;  %12466 = vmax.xlane.f32.xlu0 %v12465_v36 }
 0x93f   :  { %v36621_v43 = vpop.f32.mrb[148].mxu0  ;;  %v36623_v7 = vpop.f32.mrb[144].mxu1 }
 0x940   :  { %v33094_v45 = vpop.f32.mrb[149].mxu0  ;;  %v33099_v35 = vpop.f32.mrb[145].mxu1  ;;  %v12474_v37 = vsel %vm4973_vm3, %v36623_v7, -inf  ;;  %v12471_v63 = vsel %vm4973_vm3, %v36621_v43, -inf }
 0x941   :  { %12475 = vmax.xlane.f32.xlu1 %v12474_v37  ;;  %12472 = vmax.xlane.f32.xlu0 %v12471_v63 }
 0x943   :  { %v36629_v2 = vpop.f32.mrb[150].mxu0  ;;  %v36631_v52 = vpop.f32.mrb[146].mxu1 }
 0x944   :  { %v33104_v17 = vpop.f32.mrb[151].mxu0  ;;  %v33109_v53 = vpop.f32.mrb[147].mxu1  ;;  %v12480_v54 = vsel %vm4973_vm3, %v36631_v52, -inf  ;;  %v12477_v0 = vsel %vm4973_vm3, %v36629_v2, -inf }
 0x945   :  { %12481 = vmax.xlane.f32.xlu1 %v12480_v54  ;;  %12478 = vmax.xlane.f32.xlu0 %v12477_v0 }
 0x947   :  { %v36637_v29 = vpop.f32.mrb[152].mxu0  ;;  %v36639_v13 = vpop.f32.mrb[148].mxu1 }
 0x948   :  { %v33114_v59 = vpop.f32.mrb[153].mxu0  ;;  %v33119_v28 = vpop.f32.mrb[149].mxu1  ;;  %v12486_v47 = vsel %vm4973_vm3, %v36639_v13, -inf  ;;  %v12483_v42 = vsel %vm4973_vm3, %v36637_v29, -inf }
 0x949   :  { %12487 = vmax.xlane.f32.xlu1 %v12486_v47  ;;  %12484 = vmax.xlane.f32.xlu0 %v12483_v42 }
 0x94b   :  { %v36645_v20 = vpop.f32.mrb[154].mxu0  ;;  %v36647_v10 = vpop.f32.mrb[150].mxu1 }
 0x94c   :  { %v33124_v21 = vpop.f32.mrb[155].mxu0  ;;  %v33129_v57 = vpop.f32.mrb[151].mxu1  ;;  %v12492_v15 = vsel %vm4973_vm3, %v36647_v10, -inf  ;;  %v12489_v41 = vsel %vm4973_vm3, %v36645_v20, -inf }
 0x94d   :  { %12493 = vmax.xlane.f32.xlu1 %v12492_v15  ;;  %12490 = vmax.xlane.f32.xlu0 %v12489_v41 }
 0x94f   :  { %v36653_v19 = vpop.f32.mrb[156].mxu0  ;;  %v36655_v5 = vpop.f32.mrb[152].mxu1 }
 0x950   :  { %v33134_v56 = vpop.f32.mrb[157].mxu0  ;;  %v33139_v4 = vpop.f32.mrb[153].mxu1  ;;  %v12498_v49 = vsel %vm4973_vm3, %v36655_v5, -inf  ;;  %v12495_v34 = vsel %vm4973_vm3, %v36653_v19, -inf }
 0x951   :  { %12499 = vmax.xlane.f32.xlu1 %v12498_v49  ;;  %12496 = vmax.xlane.f32.xlu0 %v12495_v34 }
 0x953   :  { %v36661_v1 = vpop.f32.mrb[158].mxu0  ;;  %v36663_v60 = vpop.f32.mrb[154].mxu1 }
 0x954   :  { %v33144_v39 = vpop.f32.mrb[159].mxu0  ;;  %v33149_v48 = vpop.f32.mrb[155].mxu1  ;;  %v12504_v50 = vsel %vm4973_vm3, %v36663_v60, -inf  ;;  %v12501_v22 = vsel %vm4973_vm3, %v36661_v1, -inf }
 0x955   :  { %12505 = vmax.xlane.f32.xlu1 %v12504_v50  ;;  %12502 = vmax.xlane.f32.xlu0 %v12501_v22 }
 0x957   :  { %v36669_v33 = vpop.f32.mrb[160].mxu0  ;;  %v36671_v62 = vpop.f32.mrb[156].mxu1 }
 0x958   :  { %v33154_v36 = vpop.f32.mrb[161].mxu0  ;;  %v33159_v45 = vpop.f32.mrb[157].mxu1  ;;  %v12510_v35 = vsel %vm4973_vm3, %v36671_v62, -inf  ;;  %v12507_v37 = vsel %vm4973_vm3, %v36669_v33, -inf }
 0x959   :  { %12511 = vmax.xlane.f32.xlu1 %v12510_v35  ;;  %12508 = vmax.xlane.f32.xlu0 %v12507_v37 }
 0x9ca   :  { %v12470_v63 = vpop.xlane.xlu1 %12469  ;;  %v12467_v17 = vpop.xlane.xlu0 %12466 }
 0x9cb   :  { %v12514_v53 = vsub.f32 %v36615_v3, %v12470_v63  ;;  %v12513_v54 = vsub.f32 %v36613_v31, %v12467_v17 }
 0x9cd   :  { %v12531_v0 = vmul.f32 1.442695, %v12514_v53  ;;  %v12529_v59 = vmul.f32 1.442695, %v12513_v54 }
 0x9ce   :  { %v12476_v28 = vpop.xlane.xlu1 %12475  ;;  %v12473_v47 = vpop.xlane.xlu0 %12472 }
 0x9cf   :  { %34471 = vpow2.f32 %v12531_v0  ;;  %v12516_v42 = vsub.f32 %v36623_v7, %v12476_v28  ;;  %v12515_v21 = vsub.f32 %v36621_v43, %v12473_v47 }
 0x9d0   :  { %34473 = vpow2.f32 %v12529_v59 }
 0x9d1   :  { %v12535_v57 = vmul.f32 1.442695, %v12516_v42  ;;  %v12533_v15 = vmul.f32 1.442695, %v12515_v21 }
 0x9d2   :  { %v12482_v41 = vpop.xlane.xlu1 %12481  ;;  %v12479_v56 = vpop.xlane.xlu0 %12478 }
 0x9d3   :  { %34475 = vpow2.f32 %v12535_v57  ;;  %v12518_v4 = vsub.f32 %v36631_v52, %v12482_v41  ;;  %v12517_v3 = vsub.f32 %v36629_v2, %v12479_v56 }
 0x9d4   :  { %34477 = vpow2.f32 %v12533_v15 }
 0x9d5   :  { %v12539_v31 = vmul.f32 1.442695, %v12518_v4  ;;  %v12537_v49 = vmul.f32 1.442695, %v12517_v3 }
 0x9d6   :  { %v12488_v34 = vpop.xlane.xlu1 %12487  ;;  %v12485_v39 = vpop.xlane.xlu0 %12484 }
 0x9d7   :  { %34479 = vpow2.f32 %v12539_v31  ;;  %v12520_v7 = vsub.f32 %v36639_v13, %v12488_v34  ;;  %v12519_v43 = vsub.f32 %v36637_v29, %v12485_v39 }
 0x9d8   :  { %34481 = vpow2.f32 %v12537_v49 }
 0x9d9   :  { %v36685_v48 = vpop.eup %34471  ;;  %v12543_v50 = vmul.f32 1.442695, %v12520_v7  ;;  %v12541_v22 = vmul.f32 1.442695, %v12519_v43 }
 0x9da   :  { %v36687_v36 = vpop.eup %34473  ;;  %v12494_v52 = vpop.xlane.xlu1 %12493  ;;  %v12564_v2 = vsel %vm4973_vm3, %v36685_v48, 0.0 }
 0x9db   :  { %v12491_v45 = vpop.xlane.xlu0 %12490  ;;  %34483 = vpow2.f32 %v12543_v50  ;;  %v12522_v35 = vsub.f32 %v36647_v10, %v12494_v52  ;;  %12565 = vadd.xlane.f32.xlu1 %v12564_v2  ;;  %v12561_v29 = vsel %vm4973_vm3, %v36687_v36, 0.0 }
 0x9dc   :  { %v12521_v37 = vsub.f32 %v36645_v20, %v12491_v45  ;;  %34485 = vpow2.f32 %v12541_v22  ;;  %12562 = vadd.xlane.f32.xlu0 %v12561_v29 }
 0x9dd   :  { %v36695_v13 = vpop.eup %34475  ;;  %v12547_v63 = vmul.f32 1.442695, %v12522_v35 }
 0x9de   :  { %v12545_v17 = vmul.f32 1.442695, %v12521_v37  ;;  %v36697_v53 = vpop.eup %34477  ;;  %v12500_v54 = vpop.xlane.xlu1 %12499  ;;  %v12570_v59 = vsel %vm4973_vm3, %v36695_v13, 0.0 }
 0x9df   :  { %v12497_v0 = vpop.xlane.xlu0 %12496  ;;  %34487 = vpow2.f32 %v12547_v63  ;;  %v12524_v20 = vsub.f32 %v36655_v5, %v12500_v54  ;;  %12571 = vadd.xlane.f32.xlu1 %v12570_v59  ;;  %v12567_v28 = vsel %vm4973_vm3, %v36697_v53, 0.0 }
 0x9e0   :  { %v12523_v10 = vsub.f32 %v36653_v19, %v12497_v0  ;;  %34489 = vpow2.f32 %v12545_v17  ;;  %12568 = vadd.xlane.f32.xlu0 %v12567_v28 }
 0x9e1   :  { %v36705_v47 = vpop.eup %34479  ;;  %v12551_v42 = vmul.f32 1.442695, %v12524_v20 }
 0x9e2   :  { %v12549_v21 = vmul.f32 1.442695, %v12523_v10  ;;  %v36707_v57 = vpop.eup %34481  ;;  %v12506_v15 = vpop.xlane.xlu1 %12505  ;;  %v12576_v56 = vsel %vm4973_vm3, %v36705_v47, 0.0 }
 0x9e3   :  { %v12503_v41 = vpop.xlane.xlu0 %12502  ;;  %34491 = vpow2.f32 %v12551_v42  ;;  %v12526_v19 = vsub.f32 %v36663_v60, %v12506_v15  ;;  %12577 = vadd.xlane.f32.xlu1 %v12576_v56  ;;  %v12573_v4 = vsel %vm4973_vm3, %v36707_v57, 0.0 }
 0x9e4   :  { %v12525_v5 = vsub.f32 %v36661_v1, %v12503_v41  ;;  %34493 = vpow2.f32 %v12549_v21  ;;  %12574 = vadd.xlane.f32.xlu0 %v12573_v4  ;;  %v36760_v4 = vld [vmem:[%s39273_s6 + $0x13] ss:$0 sm:$0xff] }
 0x9e5   :  { %v36715_v3 = vpop.eup %34483  ;;  %v12555_v31 = vmul.f32 1.442695, %v12526_v19 }
 0x9e6   :  { %v12553_v49 = vmul.f32 1.442695, %v12525_v5  ;;  %v36717_v34 = vpop.eup %34485  ;;  %v12512_v39 = vpop.xlane.xlu1 %12511  ;;  %v12582_v43 = vsel %vm4973_vm3, %v36715_v3, 0.0 }
 0x9e7   :  { %v12509_v7 = vpop.xlane.xlu0 %12508  ;;  %34495 = vpow2.f32 %v12555_v31  ;;  %v12528_v1 = vsub.f32 %v36671_v62, %v12512_v39  ;;  %12583 = vadd.xlane.f32.xlu1 %v12582_v43  ;;  %v12579_v50 = vsel %vm4973_vm3, %v36717_v34, 0.0 }
 0x9e8   :  { %v12527_v60 = vsub.f32 %v36669_v33, %v12509_v7  ;;  %34497 = vpow2.f32 %v12553_v49  ;;  %12580 = vadd.xlane.f32.xlu0 %v12579_v50  ;;  %v36765_v49 = vld [vmem:[%s39273_s6 + $0x12] ss:$0 sm:$0xff] }
 0x9e9   :  { %v36725_v22 = vpop.eup %34487  ;;  %v12559_v52 = vmul.f32 1.442695, %v12528_v1  ;;  %v10394_v1 = vadd.f32 %v36760_v4, %v36585_v26  ;;  %v36782_v26 = vld [vmem:[%s39273_s6 + $0x14] ss:$0 sm:$0xff] }
 0x9ea   :  { %v12557_v45 = vmul.f32 1.442695, %v12527_v60  ;;  %v36727_v2 = vpop.eup %34489  ;;  %v12588_v35 = vsel %vm4973_vm3, %v36725_v22, 0.0 }
 0x9eb   :  { %34499 = vpow2.f32 %v12559_v52  ;;  %12589 = vadd.xlane.f32.xlu1 %v12588_v35  ;;  %v12585_v33 = vsel %vm4973_vm3, %v36727_v2, 0.0  ;;  %v36774_v52 = vld [vmem:[%s39273_s6 + $0x15] ss:$0 sm:$0xff] }
 0x9ec   :  { %34501 = vpow2.f32 %v12557_v45  ;;  %12586 = vadd.xlane.f32.xlu0 %v12585_v33  ;;  %v10321_v45 = vadd.f32 %v36765_v49, %v36583_v46  ;;  %v10540_v46 = vadd.f32 %v36774_v52, %v36591_v40 }
 0x9ed   :  { %v36733_v62 = vpop.eup %34491 }
 0x9ee   :  { %v36735_v37 = vpop.eup %34493  ;;  %v12594_v29 = vsel %vm4973_vm3, %v36733_v62, 0.0 }
 0x9ef   :  { %12595 = vadd.xlane.f32.xlu1 %v12594_v29  ;;  %v12591_v63 = vsel %vm4973_vm3, %v36735_v37, 0.0 }
 0x9f0   :  { %12592 = vadd.xlane.f32.xlu0 %v12591_v63 }
 0x9f1   :  { %v36741_v17 = vpop.eup %34495 }
 0x9f2   :  { %v36743_v54 = vpop.eup %34497  ;;  %v12600_v0 = vsel %vm4973_vm3, %v36741_v17, 0.0 }
 0x9f3   :  { %12601 = vadd.xlane.f32.xlu1 %v12600_v0  ;;  %v12597_v59 = vsel %vm4973_vm3, %v36743_v54, 0.0  ;;  %v10467_v0 = vadd.f32 %v36782_v26, %v36589_v58 }
 0x9f4   :  { %12598 = vadd.xlane.f32.xlu0 %v12597_v59 }
 0x9f5   :  { %v36749_v20 = vpop.eup %34499 }
 0x9f6   :  { %v36751_v10 = vpop.eup %34501  ;;  %v12606_v28 = vsel %vm4973_vm3, %v36749_v20, 0.0 }
 0x9f7   :  { %12607 = vadd.xlane.f32.xlu1 %v12606_v28  ;;  %v12603_v42 = vsel %vm4973_vm3, %v36751_v10, 0.0 }
 0x9f8   :  { %12604 = vadd.xlane.f32.xlu0 %v12603_v42 }
 0xa68   :  { %v12566_v21 = vpop.xlane.xlu1 %12565 }
 0xa69   :  { %34503 = vrcp.f32 %v12566_v21  ;;  %v12563_v15 = vpop.xlane.xlu0 %12562 }
 0xa6a   :  { %34505 = vrcp.f32 %v12563_v15 }
 0xa6c   :  { %v12572_v41 = vpop.xlane.xlu1 %12571 }
 0xa6d   :  { %34507 = vrcp.f32 %v12572_v41  ;;  %v12569_v56 = vpop.xlane.xlu0 %12568 }
 0xa6e   :  { %34509 = vrcp.f32 %v12569_v56 }
 0xa70   :  { %v12578_v19 = vpop.xlane.xlu1 %12577 }
 0xa71   :  { %34511 = vrcp.f32 %v12578_v19  ;;  %v12575_v5 = vpop.xlane.xlu0 %12574 }
 0xa72   :  { %34513 = vrcp.f32 %v12575_v5 }
 0xa73   :  { %v34504_v31 = vpop.eup %34503 }
 0xa74   :  { %v34506_v39 = vpop.eup %34505  ;;  %v12584_v7 = vpop.xlane.xlu1 %12583  ;;  %v12612_v43 = vmul.f32 %v34504_v31, %v36685_v48 }
 0xa75   :  { %34515 = vrcp.f32 %v12584_v7  ;;  %v12581_v60 = vpop.xlane.xlu0 %12580  ;;  %v12610_v50 = vmul.f32 %v34506_v39, %v36687_v36  ;;  %v10966_v39 = vadd.f32 %v36760_v4, %v36603_v11  ;;  %v11036_v4 = vadd.f32 %v36782_v26, %v36605_v51 }
 0xa76   :  { %34517 = vrcp.f32 %v12581_v60  ;;  %33168 = vmatmul.mubr.msk.f32.vlgmr.msra.gmra.mrb[158].mxu1 %vm4973_vm3, %v12612_v43 }
 0xa77   :  { %v34508_v35 = vpop.eup %34507  ;;  %33163 = vmatmul.mubr.msk.f32.vlgmr.msra.gmra.mrb[162].mxu0 %vm4973_vm3, %v12610_v50  ;;  %33176 = vmatpush3.msra.mxu1 %v10394_v1 }
 0xa78   :  { %v34510_v48 = vpop.eup %34509  ;;  %v12616_v36 = vmul.f32 %v34508_v35, %v36695_v13  ;;  %33171 = vmatpush3.msra.mxu0 %v10321_v45  ;;  %v12590_v33 = vpop.xlane.xlu1 %12589  ;;  %33172 = vmatprep.mubr.msk.f32.mxu0 %vm34786_vm1, %v34785_v14  ;;  %v36797_v13 = vld [vmem:[%s39273_s6 + $0x17] ss:$0 sm:$0xff] }
 0xa79   :  { %v12614_v29 = vmul.f32 %v34510_v48, %v36697_v53  ;;  %34519 = vrcp.f32 %v12590_v33  ;;  %v12587_v63 = vpop.xlane.xlu0 %12586  ;;  %33177 = vmatprep.mubr.msk.f32.mxu1 %vm34786_vm1, %v34785_v14  ;;  %33180 = vmatprep.subr.mxu0 %v34785_v14  ;;  %v36806_v53 = vld [vmem:[%s39273_s6 + $0x16] ss:$0 sm:$0xff]  ;;  %v10686_v58 = vadd.f32 %v36797_v13, %v36595_v30  ;;  %v7657_v33 = vld [vmem:[%s39274_s7 + $0x10] sm:$0xf] }
 0xa7a   :  { %34521 = vrcp.f32 %v12587_v63  ;;  %33185 = vmatprep.subr.mxu1 %v34785_v14  ;;  %33178 = vmatmul.mubr.msk.f32.vlgmr.msra.gmra.mrb[160].mxu1 %vm4973_vm3, %v12616_v36  ;;  %v11176_v1 = vadd.f32 %v36806_v53, %v36609_v9  ;;  %v7653_v9 = vld [vmem:[%s39274_s7] sm:$0xf]  ;;  %v7658_v48 = vld [vmem:[%s39274_s7 + $0x14] sm:$0xf] }
 0xa7b   :  { %v34512_v40 = vpop.eup %34511  ;;  %33173 = vmatmul.mubr.msk.f32.vlgmr.msra.gmra.mrb[164].mxu0 %vm4973_vm3, %v12614_v29  ;;  %33186 = vmatpush3.msra.mxu1 %v10540_v46 }
 0xa7c   :  { %v34514_v59 = vpop.eup %34513  ;;  %v12620_v28 = vmul.f32 %v34512_v40, %v36705_v47  ;;  %33181 = vmatpush3.msra.mxu0 %v10467_v0  ;;  %v12596_v42 = vpop.xlane.xlu1 %12595  ;;  %33182 = vmatprep.mubr.msk.f32.mxu0 %vm34786_vm1, %v34785_v14  ;;  %v10613_v47 = vadd.f32 %v36806_v53, %v36593_v6  ;;  %v7659_v40 = vld [vmem:[%s39274_s7 + $0x18] sm:$0xf] }
 0xa7d   :  { %v12618_v21 = vmul.f32 %v34514_v59, %v36707_v57  ;;  %34523 = vrcp.f32 %v12596_v42  ;;  %v12593_v15 = vpop.xlane.xlu0 %12592  ;;  %33187 = vmatprep.mubr.msk.f32.mxu1 %vm34786_vm1, %v34785_v14  ;;  %33190 = vmatprep.subr.mxu0 %v34785_v14 }
 0xa7e   :  { %34525 = vrcp.f32 %v12593_v15  ;;  %33195 = vmatprep.subr.mxu1 %v34785_v14  ;;  %33188 = vmatmul.mubr.msk.f32.vlgmr.msra.gmra.mrb[162].mxu1 %vm4973_vm3, %v12620_v28 }
 0xa7f   :  { %v34516_v41 = vpop.eup %34515  ;;  %33183 = vmatmul.mubr.msk.f32.vlgmr.msra.gmra.mrb[166].mxu0 %vm4973_vm3, %v12618_v21  ;;  %33196 = vmatpush3.msra.mxu1 %v10686_v58 }
 0xa80   :  { %v34518_v30 = vpop.eup %34517  ;;  %v12624_v57 = vmul.f32 %v34516_v41, %v36715_v3  ;;  %33191 = vmatpush3.msra.mxu0 %v10613_v47  ;;  %v12602_v56 = vpop.xlane.xlu1 %12601  ;;  %33192 = vmatprep.mubr.msk.f32.mxu0 %vm34786_vm1, %v34785_v14 }
 0xa81   :  { %v12622_v19 = vmul.f32 %v34518_v30, %v36717_v34  ;;  %34527 = vrcp.f32 %v12602_v56  ;;  %v12599_v6 = vpop.xlane.xlu0 %12598  ;;  %33197 = vmatprep.mubr.msk.f32.mxu1 %vm34786_vm1, %v34785_v14  ;;  %33200 = vmatprep.subr.mxu0 %v34785_v14 }
 0xa82   :  { %34529 = vrcp.f32 %v12599_v6  ;;  %33205 = vmatprep.subr.mxu1 %v34785_v14  ;;  %33198 = vmatmul.mubr.msk.f32.vlgmr.msra.gmra.mrb[164].mxu1 %vm4973_vm3, %v12624_v57 }
 0xa83   :  { %v34520_v3 = vpop.eup %34519  ;;  %33193 = vmatmul.mubr.msk.f32.vlgmr.msra.gmra.mrb[168].mxu0 %vm4973_vm3, %v12622_v19  ;;  %33206 = vmatpush3.msra.mxu1 %v36599_v32  ;;  %v10896_v32 = vadd.f32 %v36765_v49, %v36601_v38 }
 0xa84   :  { %v34522_v5 = vpop.eup %34521  ;;  %v12628_v34 = vmul.f32 %v34520_v3, %v36725_v22  ;;  %33201 = vmatpush3.msra.mxu0 %v36597_v61  ;;  %v12608_v31 = vpop.xlane.xlu1 %12607  ;;  %33202 = vmatprep.mubr.msk.f32.mxu0 %vm34786_vm1, %v34785_v14 }
 0xa85   :  { %v12626_v7 = vmul.f32 %v34522_v5, %v36727_v2  ;;  %34531 = vrcp.f32 %v12608_v31  ;;  %v12605_v43 = vpop.xlane.xlu0 %12604  ;;  %33207 = vmatprep.mubr.msk.f32.mxu1 %vm34786_vm1, %v34785_v14  ;;  %33210 = vmatprep.subr.mxu0 %v34785_v14  ;;  %v11106_v2 = vadd.f32 %v36774_v52, %v36607_v55  ;;  %v7655_v52 = vld [vmem:[%s39274_s7 + $0x8] sm:$0xf] }
 0xa86   :  { %34533 = vrcp.f32 %v12605_v43  ;;  %33215 = vmatprep.subr.mxu1 %v34785_v14  ;;  %33208 = vmatmul.mubr.msk.f32.vlgmr.msra.gmra.mrb[166].mxu1 %vm4973_vm3, %v12628_v34 }
 0xa87   :  { %v34524_v61 = vpop.eup %34523  ;;  %33203 = vmatmul.mubr.msk.f32.vlgmr.msra.gmra.mrb[170].mxu0 %vm4973_vm3, %v12626_v7  ;;  %33216 = vmatpush3.msra.mxu1 %v10966_v39 }
 0xa88   :  { %v34526_v11 = vpop.eup %34525  ;;  %v12632_v22 = vmul.f32 %v34524_v61, %v36733_v62  ;;  %33211 = vmatpush3.msra.mxu0 %v10896_v32  ;;  %33212 = vmatprep.mubr.msk.f32.mxu0 %vm34786_vm1, %v34785_v14 }
 0xa89   :  { %v12630_v38 = vmul.f32 %v34526_v11, %v36735_v37  ;;  %33217 = vmatprep.mubr.msk.f32.mxu1 %vm34786_vm1, %v34785_v14  ;;  %33220 = vmatprep.subr.mxu0 %v34785_v14  ;;  %v11246_v37 = vadd.f32 %v36797_v13, %v36611_v12  ;;  %v7660_v13 = vld [vmem:[%s39274_s7 + $0x1c] sm:$0xf] }
 0xa8a   :  { %33225 = vmatprep.subr.mxu1 %v34785_v14  ;;  %33218 = vmatmul.mubr.msk.f32.vlgmr.msra.gmra.mrb[168].mxu1 %vm4973_vm3, %v12632_v22 }
 0xa8b   :  { %v34528_v62 = vpop.eup %34527  ;;  %33213 = vmatmul.mubr.msk.f32.vlgmr.msra.gmra.mrb[172].mxu0 %vm4973_vm3, %v12630_v38  ;;  %33226 = vmatpush3.msra.mxu1 %v11106_v2 }
 0xa8c   :  { %v34530_v49 = vpop.eup %34529  ;;  %v12636_v55 = vmul.f32 %v34528_v62, %v36741_v17  ;;  %33221 = vmatpush3.msra.mxu0 %v11036_v4  ;;  %33222 = vmatprep.mubr.msk.f32.mxu0 %vm34786_vm1, %v34785_v14 }
 0xa8d   :  { %v12634_v51 = vmul.f32 %v34530_v49, %v36743_v54  ;;  %33227 = vmatprep.mubr.msk.f32.mxu1 %vm34786_vm1, %v34785_v14  ;;  %33230 = vmatprep.subr.mxu0 %v34785_v14 }
 0xa8e   :  { %33235 = vmatprep.subr.mxu1 %v34785_v14  ;;  %33228 = vmatmul.mubr.msk.f32.vlgmr.msra.gmra.mrb[170].mxu1 %vm4973_vm3, %v12636_v55 }
 0xa8f   :  { %v34532_v17 = vpop.eup %34531  ;;  %33223 = vmatmul.mubr.msk.f32.vlgmr.msra.gmra.mrb[174].mxu0 %vm4973_vm3, %v12634_v51  ;;  %33236 = vmatpush3.msra.mxu1 %v11246_v37 }
 0xa90   :  { %v34534_v60 = vpop.eup %34533  ;;  %v12640_v12 = vmul.f32 %v34532_v17, %v36749_v20  ;;  %33231 = vmatpush3.msra.mxu0 %v11176_v1  ;;  %33232 = vmatprep.mubr.msk.f32.mxu0 %vm34786_vm1, %v34785_v14  ;;  %v7654_v20 = vld [vmem:[%s39274_s7 + $0x4] sm:$0xf] }
 0xa91   :  { %v12638_v54 = vmul.f32 %v34534_v60, %v36751_v10  ;;  %33237 = vmatprep.mubr.msk.f32.mxu1 %vm34786_vm1, %v34785_v14  ;;  %33240 = vmatprep.subr.mxu0 %v34785_v14  ;;  %v7656_v10 = vld [vmem:[%s39274_s7 + $0xc] sm:$0xf] }
 0xa92   :  { %33238 = vmatmul.mubr.msk.f32.vlgmr.msra.gmra.mrb[172].mxu1 %vm4973_vm3, %v12640_v12  ;;  %33245 = vmatprep.subr.mxu1 %v34785_v14 }
 0xa93   :  { %33233 = vmatmul.mubr.msk.f32.vlgmr.msra.gmra.mrb[176].mxu0 %vm4973_vm3, %v12638_v54  ;;  %33247 = vmatprep.mubr.msk.f32.mxu1 %vm34786_vm1, %v34785_v14 }
 0xa94   :  { %33241 = vmatpush3.msk.msra.mxu0 %vm6321_vm4, %v7653_v9  ;;  %33242 = vmatprep.mubr.msk.f32.mxu0 %vm34786_vm1, %v34785_v14 }
 0xa95   :  { %33250 = vmatprep.subr.mxu0 %v34785_v14  ;;  %33246 = vmatpush3.msk.msra.mxu1 %vm6321_vm4, %v7654_v20 }
 0xa96   :  { %33255 = vmatprep.subr.mxu1 %v34785_v14 }
 0xb49   :  { %v12783_v50 = vpop.f32.mrb[158].mxu1 }
 0xb4a   :  { %v12710_v45 = vpop.f32.mrb[162].mxu0  ;;  %v33169_v35 = vpop.f32.mrb[159].mxu1  ;;  %33248 = vmatmul.mubr.msk.f32.vlgmr.msra.gmra.mrb[174].mxu1 %vm3756_vm2, %v12783_v50 }
 0xb4b   :  { %v33164_v26 = vpop.f32.mrb[163].mxu0  ;;  %33243 = vmatmul.mubr.msk.f32.vlgmr.msra.gmra.mrb[178].mxu0 %vm3756_vm2, %v12710_v45  ;;  %33256 = vmatpush3.msk.msra.mxu1 %vm6321_vm4, %v7656_v10  ;;  %v36995_v35 = vsub.s32 5, %v34910_v23 }
 0xb4c   :  { %33251 = vmatpush3.msk.msra.mxu0 %vm6321_vm4, %v7655_v52  ;;  %33252 = vmatprep.mubr.msk.f32.mxu0 %vm34786_vm1, %v34785_v14 }
 0xb4d   :  { %v12929_v36 = vpop.f32.mrb[160].mxu1  ;;  %33257 = vmatprep.mubr.msk.f32.mxu1 %vm34786_vm1, %v34785_v14  ;;  %33260 = vmatprep.subr.mxu0 %v34785_v14 }
 0xb4e   :  { %v12856_v46 = vpop.f32.mrb[164].mxu0  ;;  %v33179_v29 = vpop.f32.mrb[161].mxu1  ;;  %33258 = vmatmul.mubr.msk.f32.vlgmr.msra.gmra.mrb[176].mxu1 %vm3756_vm2, %v12929_v36  ;;  %33265 = vmatprep.subr.mxu1 %v34785_v14 }
 0xb4f   :  { %v33174_v63 = vpop.f32.mrb[165].mxu0  ;;  %33253 = vmatmul.mubr.msk.f32.vlgmr.msra.gmra.mrb[180].mxu0 %vm3756_vm2, %v12856_v46  ;;  %33266 = vmatpush3.msk.msra.mxu1 %vm6321_vm4, %v7658_v48 }
 0xb50   :  { %33261 = vmatpush3.msk.msra.mxu0 %vm6321_vm4, %v7657_v33  ;;  %33262 = vmatprep.mubr.msk.f32.mxu0 %vm34786_vm1, %v34785_v14 }
 0xb51   :  { %v13075_v0 = vpop.f32.mrb[162].mxu1  ;;  %33267 = vmatprep.mubr.msk.f32.mxu1 %vm34786_vm1, %v34785_v14  ;;  %33270 = vmatprep.subr.mxu0 %v34785_v14 }
 0xb52   :  { %v13002_v53 = vpop.f32.mrb[166].mxu0  ;;  %v33189_v59 = vpop.f32.mrb[163].mxu1  ;;  %33268 = vmatmul.mubr.msk.f32.vlgmr.msra.gmra.mrb[178].mxu1 %vm3756_vm2, %v13075_v0  ;;  %33275 = vmatprep.subr.mxu1 %v34785_v14  ;;  %v36999_v0 = vld [vmem:[#allocation5] sm:$0xff] }
 0xb53   :  { %v33184_v28 = vpop.f32.mrb[167].mxu0  ;;  %33263 = vmatmul.mubr.msk.f32.vlgmr.msra.gmra.mrb[182].mxu0 %vm3756_vm2, %v13002_v53  ;;  %33276 = vmatpush3.msk.msra.mxu1 %vm6321_vm4, %v7660_v13 }
 0xb54   :  { %33271 = vmatpush3.msk.msra.mxu0 %vm6321_vm4, %v7659_v40  ;;  %33272 = vmatprep.mubr.msk.f32.mxu0 %vm34786_vm1, %v34785_v14 }
 0xb55   :  { %v13221_v42 = vpop.f32.mrb[164].mxu1  ;;  %33277 = vmatprep.mubr.msk.f32.mxu1 %vm34786_vm1, %v34785_v14  ;;  %33280 = vmatprep.subr.mxu0 %v34785_v14 }
 0xb56   :  { %v13148_v58 = vpop.f32.mrb[168].mxu0  ;;  %v33199_v21 = vpop.f32.mrb[165].mxu1  ;;  %33278 = vmatmul.mubr.msk.f32.vlgmr.msra.gmra.mrb[180].mxu1 %vm3756_vm2, %v13221_v42  ;;  %33285 = vmatprep.subr.mxu1 %v34785_v14 }
 0xb57   :  { %v33194_v15 = vpop.f32.mrb[169].mxu0  ;;  %33273 = vmatmul.mubr.msk.f32.vlgmr.msra.gmra.mrb[184].mxu0 %vm3756_vm2, %v13148_v58  ;;  %33286 = vmatpush3.msk.msra.mxu1 %vm6321_vm4, %v7654_v20 }
 0xb58   :  { %33281 = vmatpush3.msk.msra.mxu0 %vm6321_vm4, %v7653_v9  ;;  %33282 = vmatprep.mubr.msk.f32.mxu0 %vm34786_vm1, %v34785_v14 }
 0xb59   :  { %v13367_v47 = vpop.f32.mrb[166].mxu1  ;;  %33287 = vmatprep.mubr.msk.f32.mxu1 %vm34786_vm1, %v34785_v14  ;;  %33290 = vmatprep.subr.mxu0 %v34785_v14 }
 0xb5a   :  { %v13294_v41 = vpop.f32.mrb[170].mxu0  ;;  %v33209_v30 = vpop.f32.mrb[167].mxu1  ;;  %33288 = vmatmul.mubr.msk.f32.vlgmr.msra.gmra.mrb[182].mxu1 %vm3756_vm2, %v13367_v47  ;;  %33295 = vmatprep.subr.mxu1 %v34785_v14 }
 0xb5b   :  { %v33204_v57 = vpop.f32.mrb[171].mxu0  ;;  %33283 = vmatmul.mubr.msk.f32.vlgmr.msra.gmra.mrb[186].mxu0 %vm3756_vm2, %v13294_v41  ;;  %33296 = vmatpush3.msk.msra.mxu1 %vm6321_vm4, %v7656_v10 }
 0xb5c   :  { %33291 = vmatpush3.msk.msra.mxu0 %vm6321_vm4, %v7655_v52  ;;  %33292 = vmatprep.mubr.msk.f32.mxu0 %vm34786_vm1, %v34785_v14 }
 0xb5d   :  { %v13513_v56 = vpop.f32.mrb[168].mxu1  ;;  %33297 = vmatprep.mubr.msk.f32.mxu1 %vm34786_vm1, %v34785_v14  ;;  %33300 = vmatprep.subr.mxu0 %v34785_v14 }
 0xb5e   :  { %v13440_v19 = vpop.f32.mrb[172].mxu0  ;;  %v33219_v6 = vpop.f32.mrb[169].mxu1  ;;  %33298 = vmatmul.mubr.msk.f32.vlgmr.msra.gmra.mrb[184].mxu1 %vm3756_vm2, %v13513_v56  ;;  %33305 = vmatprep.subr.mxu1 %v34785_v14 }
 0xb5f   :  { %v33214_v3 = vpop.f32.mrb[173].mxu0  ;;  %33293 = vmatmul.mubr.msk.f32.vlgmr.msra.gmra.mrb[188].mxu0 %vm3756_vm2, %v13440_v19  ;;  %33306 = vmatpush3.msk.msra.mxu1 %vm6321_vm4, %v7658_v48 }
 0xb60   :  { %33301 = vmatpush3.msk.msra.mxu0 %vm6321_vm4, %v7657_v33  ;;  %33302 = vmatprep.mubr.msk.f32.mxu0 %vm34786_vm1, %v34785_v14 }
 0xb61   :  { %v13659_v5 = vpop.f32.mrb[170].mxu1  ;;  %33307 = vmatprep.mubr.msk.f32.mxu1 %vm34786_vm1, %v34785_v14  ;;  %33310 = vmatprep.subr.mxu0 %v34785_v14 }
 0xb62   :  { %v13586_v34 = vpop.f32.mrb[174].mxu0  ;;  %v33229_v31 = vpop.f32.mrb[171].mxu1  ;;  %33308 = vmatmul.mubr.msk.f32.vlgmr.msra.gmra.mrb[186].mxu1 %vm3756_vm2, %v13659_v5  ;;  %33315 = vmatprep.subr.mxu1 %v34785_v14 }
 0xb63   :  { %v33224_v39 = vpop.f32.mrb[175].mxu0  ;;  %33303 = vmatmul.mubr.msk.f32.vlgmr.msra.gmra.mrb[190].mxu0 %vm3756_vm2, %v13586_v34  ;;  %33316 = vmatpush3.msk.msra.mxu1 %vm6321_vm4, %v7660_v13 }
 0xb64   :  { %33311 = vmatpush3.msk.msra.mxu0 %vm6321_vm4, %v7659_v40  ;;  %33312 = vmatprep.mubr.msk.f32.mxu0 %vm34786_vm1, %v34785_v14  ;;  %v15034_v40 = vrot.slane %v36999_v0, %v36995_v35 }
 0xb65   :  { %v13805_v7 = vpop.f32.mrb[172].mxu1  ;;  %33317 = vmatprep.mubr.msk.f32.mxu1 %vm34786_vm1, %v34785_v14 }
 0xb66   :  { %v13732_v43 = vpop.f32.mrb[176].mxu0  ;;  %v33239_v32 = vpop.f32.mrb[173].mxu1  ;;  %33318 = vmatmul.mubr.msk.f32.vlgmr.msra.gmra.mrb[188].mxu1 %vm3756_vm2, %v13805_v7 }
 0xb67   :  { %v33234_v61 = vpop.f32.mrb[177].mxu0  ;;  %33313 = vmatmul.mubr.msk.f32.vlgmr.msra.gmra.mrb[192].mxu0 %vm3756_vm2, %v13732_v43 }
 0xc1d   :  { %v13957_v11 = vpop.f32.mrb[174].mxu1 }
 0xc1e   :  { %v13881_v22 = vpop.f32.mrb[178].mxu0  ;;  %v15002_v2 = vsel %vm74_vm0, %v13957_v11, 0.0  ;;  %v33249_v38 = vpop.f32.mrb[175].mxu1 }
 0xc1f   :  { %v15001_v4 = vsel %vm74_vm0, %v13881_v22, 0.0  ;;  %v33244_v62 = vpop.f32.mrb[179].mxu0 }
 0xc20   :  { %v15003_v49 = vadd.f32 %v15002_v2, %v15001_v4 }
 0xc21   :  { %v14109_v55 = vpop.f32.mrb[176].mxu1 }
 0xc22   :  { %v14033_v37 = vpop.f32.mrb[180].mxu0  ;;  %v33259_v51 = vpop.f32.mrb[177].mxu1  ;;  %v15006_v12 = vsel %vm74_vm0, %v14109_v55, 0.0 }
 0xc23   :  { %v15004_v1 = vsel %vm74_vm0, %v14033_v37, 0.0  ;;  %v33254_v17 = vpop.f32.mrb[181].mxu0 }
 0xc24   :  { %v15005_v60 = vadd.f32 %v15004_v1, %v15003_v49 }
 0xc25   :  { %v14261_v54 = vpop.f32.mrb[178].mxu1 }
 0xc26   :  { %v15007_v9 = vadd.f32 %v15006_v12, %v15005_v60  ;;  %v14185_v20 = vpop.f32.mrb[182].mxu0  ;;  %v33269_v10 = vpop.f32.mrb[179].mxu1  ;;  %v15010_v26 = vsel %vm74_vm0, %v14261_v54, 0.0 }
 0xc27   :  { %v15008_v50 = vsel %vm74_vm0, %v14185_v20, 0.0  ;;  %v33264_v52 = vpop.f32.mrb[183].mxu0 }
 0xc28   :  { %v15009_v45 = vadd.f32 %v15008_v50, %v15007_v9 }
 0xc29   :  { %v14413_v48 = vpop.f32.mrb[180].mxu1 }
 0xc2a   :  { %v15011_v36 = vadd.f32 %v15010_v26, %v15009_v45  ;;  %v14337_v33 = vpop.f32.mrb[184].mxu0  ;;  %v33279_v46 = vpop.f32.mrb[181].mxu1  ;;  %v15014_v53 = vsel %vm74_vm0, %v14413_v48, 0.0 }
 0xc2b   :  { %v15012_v29 = vsel %vm74_vm0, %v14337_v33, 0.0  ;;  %v33274_v63 = vpop.f32.mrb[185].mxu0  ;;  %v15092_v46 = vld [vmem:[%s39275_s8 + $0x8] sm:$0xff] }
 0xc2c   :  { %v15013_v13 = vadd.f32 %v15012_v29, %v15011_v36  ;;  %v15093_v63 = vld [vmem:[%s39275_s8 + $0x10] sm:$0xff] }
 0xc2d   :  { %v14559_v59 = vpop.f32.mrb[182].mxu1 }
 0xc2e   :  { %v15015_v28 = vadd.f32 %v15014_v53, %v15013_v13  ;;  %v14486_v42 = vpop.f32.mrb[186].mxu0  ;;  %v15017_v58 = vsel %vm74_vm0, %v14559_v59, 0.0  ;;  %v33289_v21 = vpop.f32.mrb[183].mxu1  ;;  %v15094_v13 = vld [vmem:[%s39275_s8 + $0x18] sm:$0xff]  ;;  %v15095_v53 = vld [vmem:[%s39276_s9] sm:$0xff]  ;;  %v15096_v59 = vld [vmem:[%s39276_s9 + $0x8] sm:$0xff] }
 0xc2f   :  { %v15016_v15 = vsel %vm74_vm0, %v14486_v42, 0.0  ;;  %v33284_v47 = vpop.f32.mrb[187].mxu0  ;;  %v34348_v42 = vpack.c.bf16 %v15096_v59, %v15095_v53 }
 0xc30   :  { %v15035_v41 = vadd.f32 %v15034_v40, %v15015_v28  ;;  %v15018_v30 = vadd.f32 %v15017_v58, %v15016_v15  ;;  %v15097_v28 = vld [vmem:[%s39276_s9 + $0x10] sm:$0xff]  ;;  %v15098_v58 = vld [vmem:[%s39276_s9 + $0x18] sm:$0xff]  ;;  %v15099_v15 = vld [vmem:[%s39276_s9 + $0x20] sm:$0xff] }
 0xc31   :  { %v14705_v57 = vpop.f32.mrb[184].mxu1  ;;  %v34352_v21 = vpack.c.bf16 %v15098_v58, %v15097_v28  ;;  %v15100_v47 = vld [vmem:[%s39276_s9 + $0x28] sm:$0xff]  ;;  %34349 = vmatprep.subr.bf16.mxu1 %v34348_v42 }
 0xc32   :  { %v14632_v56 = vpop.f32.mrb[188].mxu0  ;;  %v33299_v19 = vpop.f32.mrb[185].mxu1  ;;  %v15037_v6 = vadd.f32 %v15035_v41, %v35988_v18  ;;  %v15021_v39 = vsel %vm74_vm0, %v14705_v57, 0.0  ;;  %34351 = vmatpush3.bf16.msra.mxu1 %v34348_v42  ;;  %v34356_v41 = vpack.c.bf16 %v15100_v47, %v15099_v15 }
 0xc33   :  { %v15019_v3 = vsel %vm74_vm0, %v14632_v56, 0.0  ;;  %v33294_v5 = vpop.f32.mrb[189].mxu0  ;;  %34353 = vmatprep.subr.bf16.mxu1 %v34352_v21 }
 0xc34   :  { %v15020_v34 = vadd.f32 %v15019_v3, %v15018_v30  ;;  %v15039_v31 = vsel %vm74_vm0, %v15037_v6, 0.0 }
 0xc35   :  { %15040 = vadd.xlane.f32.xlu0 %v15039_v31  ;;  %v14851_v7 = vpop.f32.mrb[186].mxu1 }
 0xc36   :  { %v15022_v43 = vadd.f32 %v15021_v39, %v15020_v34  ;;  %v14778_v32 = vpop.f32.mrb[190].mxu0  ;;  %v33309_v61 = vpop.f32.mrb[187].mxu1  ;;  %v15025_v38 = vsel %vm74_vm0, %v14851_v7, 0.0  ;;  %34355 = vmatpush3.bf16.msra.mxu1 %v34352_v21  ;;  %v15075_v7 = vsub.s32 6, %v34910_v23 }
 0xc37   :  { %v15023_v11 = vsel %vm74_vm0, %v14778_v32, 0.0  ;;  %v33304_v22 = vpop.f32.mrb[191].mxu0  ;;  %34357 = vmatprep.subr.bf16.mxu1 %v34356_v41  ;;  %v15087_v32 = vsub.s32 7, %v34910_v23 }
 0xc38   :  { %v15024_v2 = vadd.f32 %v15023_v11, %v15022_v43  ;;  %v15076_v43 = vrot.slane %v36999_v0, %v15075_v7 }
 0xc39   :  { %v14997_v18 = vpop.f32.mrb[188].mxu1  ;;  %v15088_v22 = vrot.slane %v36999_v0, %v15087_v32  ;;  %v15101_v0 = vld [vmem:[%s39276_s9 + $0x30] sm:$0xff] }
 0xc3a   :  { %v15026_v4 = vadd.f32 %v15025_v38, %v15024_v2  ;;  %v14924_v62 = vpop.f32.mrb[192].mxu0  ;;  %v33319_v49 = vpop.f32.mrb[189].mxu1  ;;  %v15029_v1 = vsel %vm74_vm0, %v14997_v18, 0.0  ;;  %34359 = vmatpush3.bf16.msra.mxu1 %v34356_v41 }
 0xc3b   :  { %v15027_v55 = vsel %vm74_vm0, %v14924_v62, 0.0  ;;  %v33314_v37 = vpop.f32.mrb[193].mxu0 }
 0xc3c   :  { %v15028_v51 = vadd.f32 %v15027_v55, %v15026_v4 }
 0xc3e   :  { %v15030_v17 = vadd.f32 %v15029_v1, %v15028_v51 }
 0xc40   :  { %v15036_v60 = vadd.f32 %v15034_v40, %v15030_v17  ;;  %v34344_v40 = vpack.c.bf16 %v15094_v13, %v15093_v63 }
 0xc42   :  { %v15038_v12 = vadd.f32 %v15036_v60, %v36053_v24  ;;  %v15091_v24 = vld [vmem:[%s39275_s8] sm:$0xff] }
 0xc43   :  { %v34340_v29 = vpack.c.bf16 %v15092_v46, %v15091_v24 }
 0xc44   :  { %v15042_v54 = vsel %vm74_vm0, %v15038_v12, 0.0 }
 0xc45   :  { %15043 = vadd.xlane.f32.xlu1 %v15042_v54  ;;  %34341 = vmatprep.subr.bf16.mxu0 %v34340_v29 }
 0xc46   :  { %34343 = vmatpush3.bf16.msra.mxu0 %v34340_v29 }
 0xc47   :  { %34345 = vmatprep.subr.bf16.mxu0 %v34344_v40 }
 0xc4a   :  { %34347 = vmatpush3.bf16.msra.mxu0 %v34344_v40 }
 0xc4b   :  { %33350 = vmatprep.subr.mxu0 %v34785_v14 }
 0xcc2   :  { %v15041_v9 = vpop.xlane.xlu0 %15040 }
 0xcc3   :  { %v15045_v20 = vmul.f32 0.03125, %v15041_v9  ;;  %v37073_v9 = vld [vmem:[#allocation5 + $0x8] sm:$0xff] }
 0xcc5   :  { %v15047_v10 = vsub.f32 %v15037_v6, %v15045_v20  ;;  %v15106_v20 = vrot.slane %v37073_v9, %v34913_v25 }
 0xcc7   :  { %v15049_v50 = vmul.f32 %v15047_v10, %v15047_v10  ;;  %v15077_v11 = vmul.f32 %v15076_v43, %v15047_v10 }
 0xcc9   :  { %v15051_v52 = vsel %vm74_vm0, %v15049_v50, 0.0 }
 0xcca   :  { %15052 = vadd.xlane.f32.xlu0 %v15051_v52 }
 0xcd2   :  { %v15044_v45 = vpop.xlane.xlu1 %15043 }
 0xcd3   :  { %v15046_v26 = vmul.f32 0.03125, %v15044_v45 }
 0xcd5   :  { %v37017_v48 = vsub.f32 %v15038_v12, %v15046_v26  ;;  %v15102_v12 = vld [vmem:[%s39276_s9 + $0x38] sm:$0xff] }
 0xcd6   :  { %v34360_v54 = vpack.c.bf16 %v15102_v12, %v15101_v0  ;;  %v31033_v0 = vld [vmem:[%s39269_s2 + $0x64] sm:$0xf]  ;;  %v31037_v12 = vld [vmem:[%s39269_s2 + $0x74] sm:$0xf] }
 0xcd7   :  { %v15050_v36 = vmul.f32 %v37017_v48, %v37017_v48  ;;  %v15078_v51 = vmul.f32 %v15076_v43, %v37017_v48 }
 0xcd8   :  { %34361 = vmatprep.subr.bf16.mxu1 %v34360_v54 }
 0xcd9   :  { %v15054_v33 = vsel %vm74_vm0, %v15050_v36, 0.0  ;;  %34363 = vmatpush3.bf16.msra.mxu1 %v34360_v54  ;;  %v15193_v36 = vrot.slane %v37073_v9, %v34916_v27  ;;  %v31034_v54 = vld [vmem:[%s39269_s2 + $0x68] sm:$0xf] }
 0xcda   :  { %15055 = vadd.xlane.f32.xlu1 %v15054_v33  ;;  %33365 = vmatprep.subr.mxu1 %v34785_v14 }
 0xd57   :  { %v15053_v30 = vpop.xlane.xlu0 %15052 }
 0xd58   :  { %v15057_v57 = vmul.f32 0.032258064, %v15053_v30 }
 0xd5a   :  { %34535 = vrsqrt.f32 %v15057_v57  ;;  %vm15061_vm9 = vcmp.eq.f32.partialorder %v15057_v57, inf  ;;  %v15064_v6 = vand.u32 2147483648, %v15057_v57  ;;  %vm15063_vm10 = vcmp.eq.f32.partialorder %v15057_v57, 0.0 }
 0xd64   :  { %v34536_v56 = vpop.eup %34535 }
 0xd65   :  { %v15060_v19 = vmul.f32 %v34536_v56, %v15057_v57  ;;  %v37090_v56 = vld [vmem:[%s39269_s2 + $0x60] sm:$0xf] }
 0xd67   :  { %v15062_v3 = vsel %vm15061_vm9, %v15057_v57, %v15060_v19  ;;  %v15056_v5 = vpop.xlane.xlu1 %15055  ;;  %v37095_v19 = vld [vmem:[%s39269_s2 + $0x6c] sm:$0xf] }
 0xd68   :  { %v15065_v34 = vsel %vm15063_vm10, %v15064_v6, %v15062_v3  ;;  %v15058_v31 = vmul.f32 0.032258064, %v15056_v5 }
 0xd69   :  { %v15079_v39 = vadd.f32 1e-06, %v15065_v34 }
 0xd6a   :  { %34537 = vrsqrt.f32 %v15058_v31  ;;  %vm15068_vm11 = vcmp.eq.f32.partialorder %v15058_v31, inf  ;;  %v15071_v18 = vand.u32 2147483648, %v15058_v31  ;;  %vm15070_vm12 = vcmp.eq.f32.partialorder %v15058_v31, 0.0 }
 0xd6b   :  { %34539 = vrcp.f32 %v15079_v39 }
 0xd74   :  { %v34538_v61 = vpop.eup %34537 }
 0xd75   :  { %v34540_v2 = vpop.eup %34539  ;;  %v15067_v38 = vmul.f32 %v34538_v61, %v15058_v31 }
 0xd76   :  { %v15082_v4 = vmul.f32 %v34540_v2, %v15077_v11 }
 0xd77   :  { %v15069_v62 = vsel %vm15068_vm11, %v15058_v31, %v15067_v38 }
 0xd78   :  { %v15072_v49 = vsel %vm15070_vm12, %v15071_v18, %v15069_v62  ;;  %v15089_v55 = vadd.f32 %v15088_v22, %v15082_v4 }
 0xd79   :  { %v15080_v37 = vadd.f32 1e-06, %v15072_v49 }
 0xd7a   :  { %33328 = vmatprep.mubr.msk.f32.mxu0 %vm74_vm0, %v15089_v55 }
 0xd7b   :  { %34541 = vrcp.f32 %v15080_v37  ;;  %v15327_v37 = vrot.slane %v37073_v9, %v35979_v8 }
 0xd85   :  { %v34542_v1 = vpop.eup %34541 }
 0xd86   :  { %v15084_v17 = vmul.f32 %v34542_v1, %v15078_v51 }
 0xd88   :  { %v15090_v60 = vadd.f32 %v15088_v22, %v15084_v17 }
 0xd8a   :  { %33329 = vmatmul.mubr.msk.f32.vlgmr.msra.gmra.mrb[194].mxu0 %vm74_vm0, %v15090_v60 }
 0xd8b   :  { %33352 = vmatprep.mubr.msk.f32.mxu0 %vm34786_vm1, %v34785_v14  ;;  %33351 = vmatpush3.xpose.msk.msra.mxu0 %vm74_vm0, %v37090_v56 }
 0xd8c   :  { %33355 = vmatprep.subr.mxu0 %v34785_v14 }
 0xe5d   :  { %v33330_v10 = vpop.f32.mrb[194].mxu0 }
 0xe5e   :  { %v15185_v50 = vadd.f32 %v33330_v10, %v15106_v20  ;;  %v15179_v52 = vpop.f32.mrb[195].mxu0 }
 0xe5f   :  { %v15180_v45 = vadd.f32 %v15179_v52, %v15106_v20  ;;  %v31036_v52 = vld [vmem:[%s39269_s2 + $0x70] sm:$0xf] }
 0xe60   :  { %v15189_v48 = vmax.f32 %v15185_v50, 0.0 }
 0xe61   :  { %v15188_v26 = vmax.f32 %v15180_v45, 0.0 }
 0xe63   :  { %33347 = vmatprep.mubr.msk.f32.mxu1 %vm15194_vm13, %v15188_v26  ;;  %v31038_v26 = vld [vmem:[%s39269_s2 + $0x78] sm:$0xf] }
 0xe64   :  { %33348 = vmatmul.mubr.msk.f32.vlgmr.msra.gmra.mrb[190].mxu1 %vm15194_vm13, %v15189_v48  ;;  %v31041_v48 = vld [vmem:[%s39269_s2 + $0x84] sm:$0xf] }
 0xe65   :  { %33367 = vmatprep.mubr.msk.f32.mxu1 %vm34786_vm1, %v34785_v14  ;;  %33366 = vmatpush3.xpose.msk.msra.mxu1 %vm74_vm0, %v37095_v19 }
 0xe66   :  { %33375 = vmatprep.subr.mxu1 %v34785_v14 }
 0xf37   :  { %v33349_v33 = vpop.f32.mrb[190].mxu1 }
 0xf38   :  { %v15273_v24 = vadd.f32 %v33349_v33, %v15193_v36  ;;  %v15267_v46 = vpop.f32.mrb[191].mxu1  ;;  %v31040_v33 = vld [vmem:[%s39269_s2 + $0x80] sm:$0xf] }
 0xf39   :  { %v15268_v29 = vadd.f32 %v15267_v46, %v15193_v36  ;;  %v31043_v36 = vld [vmem:[%s39269_s2 + $0x8c] sm:$0xf]  ;;  %v31042_v46 = vld [vmem:[%s39269_s2 + $0x88] sm:$0xf] }
 0xf3a   :  { %v15277_v63 = vadd.f32 %v15273_v24, %v15090_v60  ;;  %v31045_v24 = vld [vmem:[%s39269_s2 + $0x94] sm:$0xf] }
 0xf3b   :  { %v15276_v13 = vadd.f32 %v15268_v29, %v15089_v55  ;;  %v15315_v55 = vrot.slane %v37073_v9, %v35935_v16  ;;  %v31039_v9 = vld [vmem:[%s39269_s2 + $0x7c] sm:$0xf] }
 0xf3c   :  { %v15281_v40 = vsel %vm74_vm0, %v15277_v63, 0.0  ;;  %v31047_v29 = vld [vmem:[%s39269_s2 + $0x9c] sm:$0xf] }
 0xf3d   :  { %15282 = vadd.xlane.f32.xlu1 %v15281_v40  ;;  %v15278_v53 = vsel %vm74_vm0, %v15276_v13, 0.0  ;;  %v31049_v40 = vld [vmem:[%s39269_s2 + $0xa4] sm:$0xf] }
 0xf3e   :  { %15279 = vadd.xlane.f32.xlu0 %v15278_v53  ;;  %v31051_v53 = vld [vmem:[%s39269_s2 + $0xac] sm:$0xf] }
 0xfca   :  { %v15283_v59 = vpop.xlane.xlu1 %15282 }
 0xfcb   :  { %v15285_v28 = vmul.f32 0.03125, %v15283_v59  ;;  %v15280_v42 = vpop.xlane.xlu0 %15279  ;;  %v31048_v59 = vld [vmem:[%s39269_s2 + $0xa0] sm:$0xf] }
 0xfcc   :  { %v15284_v58 = vmul.f32 0.03125, %v15280_v42  ;;  %v31050_v42 = vld [vmem:[%s39269_s2 + $0xa8] sm:$0xf] }
 0xfcd   :  { %v15287_v21 = vsub.f32 %v15277_v63, %v15285_v28  ;;  %v31044_v63 = vld [vmem:[%s39269_s2 + $0x90] sm:$0xf]  ;;  %v31053_v28 = vld [vmem:[%s39269_s2 + $0xb4] sm:$0xf] }
 0xfce   :  { %v15286_v15 = vsub.f32 %v15276_v13, %v15284_v58  ;;  %v31046_v13 = vld [vmem:[%s39269_s2 + $0x98] sm:$0xf]  ;;  %v31055_v58 = vld [vmem:[%s39269_s2 + $0xbc] sm:$0xf] }
 0xfcf   :  { %v15289_v47 = vmul.f32 %v15287_v21, %v15287_v21  ;;  %v15317_v10 = vmul.f32 %v15315_v55, %v15287_v21  ;;  %v31052_v21 = vld [vmem:[%s39269_s2 + $0xb0] sm:$0xf] }
 0xfd0   :  { %v15288_v41 = vmul.f32 %v15286_v15, %v15286_v15  ;;  %v15316_v51 = vmul.f32 %v15315_v55, %v15286_v15  ;;  %v31054_v15 = vld [vmem:[%s39269_s2 + $0xb8] sm:$0xf] }
 0xfd1   :  { %v15293_v30 = vsel %vm74_vm0, %v15289_v47, 0.0 }
 0xfd2   :  { %15294 = vadd.xlane.f32.xlu1 %v15293_v30  ;;  %v15290_v57 = vsel %vm74_vm0, %v15288_v41, 0.0 }
 0xfd3   :  { %15291 = vadd.xlane.f32.xlu0 %v15290_v57 }
0x105f   :  { %v15295_v6 = vpop.xlane.xlu1 %15294 }
0x1060   :  { %v15297_v3 = vmul.f32 0.032258064, %v15295_v6  ;;  %v15292_v5 = vpop.xlane.xlu0 %15291 }
0x1061   :  { %v15296_v34 = vmul.f32 0.032258064, %v15292_v5 }
0x1062   :  { %34543 = vrsqrt.f32 %v15297_v3  ;;  %vm15307_vm5 = vcmp.eq.f32.partialorder %v15297_v3, inf  ;;  %v15310_v4 = vand.u32 2147483648, %v15297_v3  ;;  %vm15309_vm6 = vcmp.eq.f32.partialorder %v15297_v3, 0.0 }
0x1063   :  { %34545 = vrsqrt.f32 %v15296_v34  ;;  %vm15300_vm14 = vcmp.eq.f32.partialorder %v15296_v34, inf  ;;  %v15303_v11 = vand.u32 2147483648, %v15296_v34  ;;  %vm15302_vm15 = vcmp.eq.f32.partialorder %v15296_v34, 0.0 }
0x106c   :  { %v34544_v31 = vpop.eup %34543 }
0x106d   :  { %v34546_v39 = vpop.eup %34545  ;;  %v15306_v43 = vmul.f32 %v34544_v31, %v15297_v3 }
0x106e   :  { %v15299_v61 = vmul.f32 %v34546_v39, %v15296_v34 }
0x106f   :  { %v15308_v38 = vsel %vm15307_vm5, %v15297_v3, %v15306_v43 }
0x1070   :  { %v15301_v22 = vsel %vm15300_vm14, %v15296_v34, %v15299_v61  ;;  %v15311_v62 = vsel %vm15309_vm6, %v15310_v4, %v15308_v38 }
0x1071   :  { %v15304_v2 = vsel %vm15302_vm15, %v15303_v11, %v15301_v22  ;;  %v15319_v49 = vadd.f32 1e-06, %v15311_v62 }
0x1072   :  { %v15318_v18 = vadd.f32 1e-06, %v15304_v2 }
0x1074   :  { %34547 = vrcp.f32 %v15318_v18 }
0x1075   :  { %34549 = vrcp.f32 %v15319_v49 }
0x107e   :  { %v34548_v1 = vpop.eup %34547 }
0x107f   :  { %v15321_v17 = vmul.f32 %v34548_v1, %v15316_v51  ;;  %v34550_v20 = vpop.eup %34549 }
0x1080   :  { %v15323_v50 = vmul.f32 %v34550_v20, %v15317_v10  ;;  %v37495_v20 = vld [vmem:[%s39270_s3 + $0x19] ss:$0 sm:$0xff] }
0x1081   :  { %v37107_v60 = vadd.f32 %v15327_v37, %v15321_v17 }
0x1082   :  { %v37154_v45 = vadd.f32 %v15327_v37, %v15323_v50 }
0x1083   :  { %33353 = vmatmul.mubr.msk.f32.vlgmr.msra.gmra.mrb[196].mxu0 %vm74_vm0, %v37107_v60  ;;  %33368 = vmatmul.mubr.msk.f32.vlgmr.msra.gmra.mrb[192].mxu1 %vm74_vm0, %v37107_v60 }
0x1084   :  { %33356 = vmatpush3.xpose.msk.msra.mxu0 %vm74_vm0, %v31033_v0  ;;  %33376 = vmatpush3.xpose.msk.msra.mxu1 %vm74_vm0, %v31037_v12 }
0x1085   :  { %33357 = vmatprep.mubr.msk.f32.mxu0 %vm34786_vm1, %v34785_v14  ;;  %33377 = vmatprep.mubr.msk.f32.mxu1 %vm34786_vm1, %v34785_v14 }
0x1086   :  { %33360 = vmatprep.subr.mxu0 %v34785_v14  ;;  %33385 = vmatprep.subr.mxu1 %v34785_v14 }
0x1087   :  { %33358 = vmatmul.mubr.msk.f32.vlgmr.msra.gmra.mrb[198].mxu0 %vm74_vm0, %v37107_v60  ;;  %33378 = vmatmul.mubr.msk.f32.vlgmr.msra.gmra.mrb[194].mxu1 %vm74_vm0, %v37107_v60 }
0x1088   :  { %33361 = vmatpush3.xpose.msk.msra.mxu0 %vm74_vm0, %v31034_v54  ;;  %33386 = vmatpush3.xpose.msk.msra.mxu1 %vm74_vm0, %v31039_v9 }
0x1089   :  { %33362 = vmatprep.mubr.msk.f32.mxu0 %vm34786_vm1, %v34785_v14  ;;  %33387 = vmatprep.mubr.msk.f32.mxu1 %vm34786_vm1, %v34785_v14 }
0x108a   :  { %33370 = vmatprep.subr.mxu0 %v34785_v14  ;;  %33395 = vmatprep.subr.mxu1 %v34785_v14 }
0x108b   :  { %33363 = vmatmul.mubr.msk.f32.vlgmr.msra.gmra.mrb[200].mxu0 %vm74_vm0, %v37107_v60  ;;  %33388 = vmatmul.mubr.msk.f32.vlgmr.msra.gmra.mrb[196].mxu1 %vm74_vm0, %v37107_v60 }
0x108c   :  { %33371 = vmatpush3.xpose.msk.msra.mxu0 %vm74_vm0, %v31036_v52  ;;  %33396 = vmatpush3.xpose.msk.msra.mxu1 %vm74_vm0, %v31033_v0 }
0x108d   :  { %33372 = vmatprep.mubr.msk.f32.mxu0 %vm34786_vm1, %v34785_v14  ;;  %33397 = vmatprep.mubr.msk.f32.mxu1 %vm34786_vm1, %v34785_v14 }
0x108e   :  { %33380 = vmatprep.subr.mxu0 %v34785_v14  ;;  %33405 = vmatprep.subr.mxu1 %v34785_v14 }
0x108f   :  { %33373 = vmatmul.mubr.msk.f32.vlgmr.msra.gmra.mrb[202].mxu0 %vm74_vm0, %v37107_v60  ;;  %33398 = vmatmul.mubr.msk.f32.vlgmr.msra.gmra.mrb[198].mxu1 %vm74_vm0, %v37154_v45 }
0x1090   :  { %33381 = vmatpush3.xpose.msk.msra.mxu0 %vm74_vm0, %v31038_v26  ;;  %33406 = vmatpush3.xpose.msk.msra.mxu1 %vm74_vm0, %v37095_v19 }
0x1091   :  { %33382 = vmatprep.mubr.msk.f32.mxu0 %vm34786_vm1, %v34785_v14  ;;  %33407 = vmatprep.mubr.msk.f32.mxu1 %vm34786_vm1, %v34785_v14 }
0x1092   :  { %33390 = vmatprep.subr.mxu0 %v34785_v14  ;;  %33415 = vmatprep.subr.mxu1 %v34785_v14 }
0x1093   :  { %33383 = vmatmul.mubr.msk.f32.vlgmr.msra.gmra.mrb[204].mxu0 %vm74_vm0, %v37107_v60  ;;  %33408 = vmatmul.mubr.msk.f32.vlgmr.msra.gmra.mrb[200].mxu1 %vm74_vm0, %v37154_v45 }
0x1094   :  { %33391 = vmatpush3.xpose.msk.msra.mxu0 %vm74_vm0, %v37090_v56  ;;  %33416 = vmatpush3.xpose.msk.msra.mxu1 %vm74_vm0, %v31037_v12  ;;  %v37488_v12 = vld [vmem:[%s39270_s3 + $0x21] ss:$0 sm:$0xff] }
0x1095   :  { %33392 = vmatprep.mubr.msk.f32.mxu0 %vm34786_vm1, %v34785_v14  ;;  %33417 = vmatprep.mubr.msk.f32.mxu1 %vm34786_vm1, %v34785_v14 }
0x1096   :  { %33400 = vmatprep.subr.mxu0 %v34785_v14  ;;  %33425 = vmatprep.subr.mxu1 %v34785_v14 }
0x1097   :  { %33393 = vmatmul.mubr.msk.f32.vlgmr.msra.gmra.mrb[206].mxu0 %vm74_vm0, %v37154_v45  ;;  %33418 = vmatmul.mubr.msk.f32.vlgmr.msra.gmra.mrb[202].mxu1 %vm74_vm0, %v37154_v45 }
0x1098   :  { %33401 = vmatpush3.xpose.msk.msra.mxu0 %vm74_vm0, %v31034_v54  ;;  %33426 = vmatpush3.xpose.msk.msra.mxu1 %vm74_vm0, %v31039_v9 }
0x1099   :  { %33402 = vmatprep.mubr.msk.f32.mxu0 %vm34786_vm1, %v34785_v14  ;;  %33427 = vmatprep.mubr.msk.f32.mxu1 %vm34786_vm1, %v34785_v14 }
0x109a   :  { %33410 = vmatprep.subr.mxu0 %v34785_v14  ;;  %33435 = vmatprep.subr.mxu1 %v34785_v14 }
0x109b   :  { %33403 = vmatmul.mubr.msk.f32.vlgmr.msra.gmra.mrb[208].mxu0 %vm74_vm0, %v37154_v45  ;;  %33428 = vmatmul.mubr.msk.f32.vlgmr.msra.gmra.mrb[204].mxu1 %vm74_vm0, %v37154_v45 }
0x109c   :  { %33411 = vmatpush3.xpose.msk.msra.mxu0 %vm74_vm0, %v31036_v52  ;;  %33436 = vmatpush3.xpose.msk.msra.mxu1 %vm74_vm0, %v31041_v48 }
0x109d   :  { %33412 = vmatprep.mubr.msk.f32.mxu0 %vm34786_vm1, %v34785_v14  ;;  %33437 = vmatprep.mubr.msk.f32.mxu1 %vm34786_vm1, %v34785_v14 }
0x109e   :  { %33420 = vmatprep.subr.mxu0 %v34785_v14  ;;  %33445 = vmatprep.subr.mxu1 %v34785_v14 }
0x109f   :  { %33413 = vmatmul.mubr.msk.f32.vlgmr.msra.gmra.mrb[210].mxu0 %vm74_vm0, %v37154_v45  ;;  %33438 = vmatmul.mubr.msk.f32.vlgmr.msra.gmra.mrb[206].mxu1 %vm74_vm0, %v37107_v60 }
0x10a0   :  { %33421 = vmatpush3.xpose.msk.msra.mxu0 %vm74_vm0, %v31038_v26  ;;  %33446 = vmatpush3.xpose.msk.msra.mxu1 %vm74_vm0, %v31043_v36  ;;  %v37501_v26 = vld [vmem:[%s39270_s3 + $0x23] ss:$0 sm:$0xff] }
0x10a1   :  { %33422 = vmatprep.mubr.msk.f32.mxu0 %vm34786_vm1, %v34785_v14  ;;  %33447 = vmatprep.mubr.msk.f32.mxu1 %vm34786_vm1, %v34785_v14 }
0x10a2   :  { %33430 = vmatprep.subr.mxu0 %v34785_v14  ;;  %33455 = vmatprep.subr.mxu1 %v34785_v14 }
0x10a3   :  { %33423 = vmatmul.mubr.msk.f32.vlgmr.msra.gmra.mrb[212].mxu0 %vm74_vm0, %v37154_v45  ;;  %33448 = vmatmul.mubr.msk.f32.vlgmr.msra.gmra.mrb[208].mxu1 %vm74_vm0, %v37107_v60 }
0x10a4   :  { %33431 = vmatpush3.xpose.msk.msra.mxu0 %vm74_vm0, %v31040_v33  ;;  %33456 = vmatpush3.xpose.msk.msra.mxu1 %vm74_vm0, %v31045_v24 }
0x10a5   :  { %33432 = vmatprep.mubr.msk.f32.mxu0 %vm34786_vm1, %v34785_v14  ;;  %33457 = vmatprep.mubr.msk.f32.mxu1 %vm34786_vm1, %v34785_v14 }
0x10a6   :  { %33440 = vmatprep.subr.mxu0 %v34785_v14  ;;  %33465 = vmatprep.subr.mxu1 %v34785_v14 }
0x10a7   :  { %33433 = vmatmul.mubr.msk.f32.vlgmr.msra.gmra.mrb[214].mxu0 %vm74_vm0, %v37107_v60  ;;  %33458 = vmatmul.mubr.msk.f32.vlgmr.msra.gmra.mrb[210].mxu1 %vm74_vm0, %v37107_v60 }
0x10a8   :  { %33441 = vmatpush3.xpose.msk.msra.mxu0 %vm74_vm0, %v31042_v46  ;;  %33466 = vmatpush3.xpose.msk.msra.mxu1 %vm74_vm0, %v31047_v29 }
0x10a9   :  { %33442 = vmatprep.mubr.msk.f32.mxu0 %vm34786_vm1, %v34785_v14  ;;  %33467 = vmatprep.mubr.msk.f32.mxu1 %vm34786_vm1, %v34785_v14 }
0x10aa   :  { %33450 = vmatprep.subr.mxu0 %v34785_v14  ;;  %33475 = vmatprep.subr.mxu1 %v34785_v14 }
0x10ab   :  { %33443 = vmatmul.mubr.msk.f32.vlgmr.msra.gmra.mrb[216].mxu0 %vm74_vm0, %v37107_v60  ;;  %33468 = vmatmul.mubr.msk.f32.vlgmr.msra.gmra.mrb[212].mxu1 %vm74_vm0, %v37107_v60 }
0x10ac   :  { %33451 = vmatpush3.xpose.msk.msra.mxu0 %vm74_vm0, %v31044_v63  ;;  %33476 = vmatpush3.xpose.msk.msra.mxu1 %vm74_vm0, %v31041_v48 }
0x10ad   :  { %33452 = vmatprep.mubr.msk.f32.mxu0 %vm34786_vm1, %v34785_v14  ;;  %33477 = vmatprep.mubr.msk.f32.mxu1 %vm34786_vm1, %v34785_v14 }
0x10ae   :  { %33460 = vmatprep.subr.mxu0 %v34785_v14  ;;  %33485 = vmatprep.subr.mxu1 %v34785_v14 }
0x10af   :  { %33453 = vmatmul.mubr.msk.f32.vlgmr.msra.gmra.mrb[218].mxu0 %vm74_vm0, %v37107_v60  ;;  %33478 = vmatmul.mubr.msk.f32.vlgmr.msra.gmra.mrb[214].mxu1 %vm74_vm0, %v37154_v45 }
0x10b0   :  { %33461 = vmatpush3.xpose.msk.msra.mxu0 %vm74_vm0, %v31046_v13  ;;  %33486 = vmatpush3.xpose.msk.msra.mxu1 %vm74_vm0, %v31043_v36 }
0x10b1   :  { %33462 = vmatprep.mubr.msk.f32.mxu0 %vm34786_vm1, %v34785_v14  ;;  %33487 = vmatprep.mubr.msk.f32.mxu1 %vm34786_vm1, %v34785_v14 }
0x10b2   :  { %33470 = vmatprep.subr.mxu0 %v34785_v14  ;;  %33495 = vmatprep.subr.mxu1 %v34785_v14 }
0x10b3   :  { %33463 = vmatmul.mubr.msk.f32.vlgmr.msra.gmra.mrb[220].mxu0 %vm74_vm0, %v37107_v60  ;;  %33488 = vmatmul.mubr.msk.f32.vlgmr.msra.gmra.mrb[216].mxu1 %vm74_vm0, %v37154_v45 }
0x10b4   :  { %33471 = vmatpush3.xpose.msk.msra.mxu0 %vm74_vm0, %v31040_v33  ;;  %33496 = vmatpush3.xpose.msk.msra.mxu1 %vm74_vm0, %v31045_v24  ;;  %v37511_v24 = vld [vmem:[%s39270_s3 + $0x1b] ss:$0 sm:$0xff] }
0x10b5   :  { %33472 = vmatprep.mubr.msk.f32.mxu0 %vm34786_vm1, %v34785_v14  ;;  %33497 = vmatprep.mubr.msk.f32.mxu1 %vm34786_vm1, %v34785_v14 }
0x10b6   :  { %33480 = vmatprep.subr.mxu0 %v34785_v14  ;;  %33505 = vmatprep.subr.mxu1 %v34785_v14 }
0x10b7   :  { %33473 = vmatmul.mubr.msk.f32.vlgmr.msra.gmra.mrb[222].mxu0 %vm74_vm0, %v37154_v45  ;;  %33498 = vmatmul.mubr.msk.f32.vlgmr.msra.gmra.mrb[218].mxu1 %vm74_vm0, %v37154_v45 }
0x10b8   :  { %33481 = vmatpush3.xpose.msk.msra.mxu0 %vm74_vm0, %v31042_v46  ;;  %33506 = vmatpush3.xpose.msk.msra.mxu1 %vm74_vm0, %v31047_v29 }
0x10b9   :  { %33482 = vmatprep.mubr.msk.f32.mxu0 %vm34786_vm1, %v34785_v14  ;;  %33507 = vmatprep.mubr.msk.f32.mxu1 %vm34786_vm1, %v34785_v14 }
0x10ba   :  { %33490 = vmatprep.subr.mxu0 %v34785_v14  ;;  %33515 = vmatprep.subr.mxu1 %v34785_v14 }
0x10bb   :  { %33483 = vmatmul.mubr.msk.f32.vlgmr.msra.gmra.mrb[224].mxu0 %vm74_vm0, %v37154_v45  ;;  %33508 = vmatmul.mubr.msk.f32.vlgmr.msra.gmra.mrb[220].mxu1 %vm74_vm0, %v37154_v45 }
0x10bc   :  { %33491 = vmatpush3.xpose.msk.msra.mxu0 %vm74_vm0, %v31044_v63  ;;  %33516 = vmatpush3.xpose.msk.msra.mxu1 %vm74_vm0, %v31049_v40 }
0x10bd   :  { %33492 = vmatprep.mubr.msk.f32.mxu0 %vm34786_vm1, %v34785_v14  ;;  %33517 = vmatprep.mubr.msk.f32.mxu1 %vm34786_vm1, %v34785_v14 }
0x10be   :  { %33500 = vmatprep.subr.mxu0 %v34785_v14  ;;  %33525 = vmatprep.subr.mxu1 %v34785_v14 }
0x10bf   :  { %33493 = vmatmul.mubr.msk.f32.vlgmr.msra.gmra.mrb[226].mxu0 %vm74_vm0, %v37154_v45  ;;  %33518 = vmatmul.mubr.msk.f32.vlgmr.msra.gmra.mrb[222].mxu1 %vm74_vm0, %v37107_v60 }
0x10c0   :  { %33501 = vmatpush3.xpose.msk.msra.mxu0 %vm74_vm0, %v31046_v13  ;;  %33526 = vmatpush3.xpose.msk.msra.mxu1 %vm74_vm0, %v31051_v53  ;;  %v37518_v13 = vld [vmem:[%s39270_s3 + $0x20] ss:$0 sm:$0xff] }
0x10c1   :  { %33502 = vmatprep.mubr.msk.f32.mxu0 %vm34786_vm1, %v34785_v14  ;;  %33527 = vmatprep.mubr.msk.f32.mxu1 %vm34786_vm1, %v34785_v14 }
0x10c2   :  { %33510 = vmatprep.subr.mxu0 %v34785_v14  ;;  %33535 = vmatprep.subr.mxu1 %v34785_v14 }
0x10c3   :  { %33503 = vmatmul.mubr.msk.f32.vlgmr.msra.gmra.mrb[228].mxu0 %vm74_vm0, %v37154_v45  ;;  %33528 = vmatmul.mubr.msk.f32.vlgmr.msra.gmra.mrb[224].mxu1 %vm74_vm0, %v37107_v60 }
0x10c4   :  { %33511 = vmatpush3.xpose.msk.msra.mxu0 %vm74_vm0, %v31048_v59  ;;  %33536 = vmatpush3.xpose.msk.msra.mxu1 %vm74_vm0, %v31053_v28 }
0x10c5   :  { %33512 = vmatprep.mubr.msk.f32.mxu0 %vm34786_vm1, %v34785_v14  ;;  %33537 = vmatprep.mubr.msk.f32.mxu1 %vm34786_vm1, %v34785_v14 }
0x10c6   :  { %33520 = vmatprep.subr.mxu0 %v34785_v14  ;;  %33545 = vmatprep.subr.mxu1 %v34785_v14 }
0x10c7   :  { %33513 = vmatmul.mubr.msk.f32.vlgmr.msra.gmra.mrb[230].mxu0 %vm74_vm0, %v37107_v60  ;;  %33538 = vmatmul.mubr.msk.f32.vlgmr.msra.gmra.mrb[226].mxu1 %vm74_vm0, %v37107_v60 }
0x10c8   :  { %33521 = vmatpush3.xpose.msk.msra.mxu0 %vm74_vm0, %v31050_v42  ;;  %33546 = vmatpush3.xpose.msk.msra.mxu1 %vm74_vm0, %v31055_v58 }
0x10c9   :  { %33522 = vmatprep.mubr.msk.f32.mxu0 %vm34786_vm1, %v34785_v14  ;;  %33547 = vmatprep.mubr.msk.f32.mxu1 %vm34786_vm1, %v34785_v14 }
0x10ca   :  { %33530 = vmatprep.subr.mxu0 %v34785_v14  ;;  %33555 = vmatprep.subr.mxu1 %v34785_v14 }
0x10cb   :  { %33523 = vmatmul.mubr.msk.f32.vlgmr.msra.gmra.mrb[232].mxu0 %vm74_vm0, %v37107_v60  ;;  %33548 = vmatmul.mubr.msk.f32.vlgmr.msra.gmra.mrb[228].mxu1 %vm74_vm0, %v37107_v60 }
0x10cc   :  { %33531 = vmatpush3.xpose.msk.msra.mxu0 %vm74_vm0, %v31052_v21  ;;  %33556 = vmatpush3.xpose.msk.msra.mxu1 %vm74_vm0, %v31049_v40  ;;  %v37523_v40 = vld [vmem:[%s39270_s3 + $0x25] ss:$0 sm:$0xff] }
0x10cd   :  { %33532 = vmatprep.mubr.msk.f32.mxu0 %vm34786_vm1, %v34785_v14  ;;  %33557 = vmatprep.mubr.msk.f32.mxu1 %vm34786_vm1, %v34785_v14 }
0x10ce   :  { %33540 = vmatprep.subr.mxu0 %v34785_v14  ;;  %33565 = vmatprep.subr.mxu1 %v34785_v14 }
0x10cf   :  { %33533 = vmatmul.mubr.msk.f32.vlgmr.msra.gmra.mrb[234].mxu0 %vm74_vm0, %v37107_v60  ;;  %33558 = vmatmul.mubr.msk.f32.vlgmr.msra.gmra.mrb[230].mxu1 %vm74_vm0, %v37154_v45 }
0x10d0   :  { %33541 = vmatpush3.xpose.msk.msra.mxu0 %vm74_vm0, %v31054_v15  ;;  %33566 = vmatpush3.xpose.msk.msra.mxu1 %vm74_vm0, %v31051_v53 }
0x10d1   :  { %33542 = vmatprep.mubr.msk.f32.mxu0 %vm34786_vm1, %v34785_v14  ;;  %33567 = vmatprep.mubr.msk.f32.mxu1 %vm34786_vm1, %v34785_v14 }
0x10d2   :  { %33550 = vmatprep.subr.mxu0 %v34785_v14  ;;  %33575 = vmatprep.subr.mxu1 %v34785_v14 }
0x10d3   :  { %33543 = vmatmul.mubr.msk.f32.vlgmr.msra.gmra.mrb[236].mxu0 %vm74_vm0, %v37107_v60  ;;  %33568 = vmatmul.mubr.msk.f32.vlgmr.msra.gmra.mrb[232].mxu1 %vm74_vm0, %v37154_v45 }
0x10d4   :  { %33551 = vmatpush3.xpose.msk.msra.mxu0 %vm74_vm0, %v31048_v59  ;;  %33576 = vmatpush3.xpose.msk.msra.mxu1 %vm74_vm0, %v31053_v28 }
0x10d5   :  { %33552 = vmatprep.mubr.msk.f32.mxu0 %vm34786_vm1, %v34785_v14  ;;  %33577 = vmatprep.mubr.msk.f32.mxu1 %vm34786_vm1, %v34785_v14 }
0x10d6   :  { %33560 = vmatprep.subr.mxu0 %v34785_v14  ;;  %33585 = vmatprep.subr.mxu1 %v34785_v14 }
0x10d7   :  { %33553 = vmatmul.mubr.msk.f32.vlgmr.msra.gmra.mrb[238].mxu0 %vm74_vm0, %v37154_v45  ;;  %33578 = vmatmul.mubr.msk.f32.vlgmr.msra.gmra.mrb[234].mxu1 %vm74_vm0, %v37154_v45 }
0x10d8   :  { %33561 = vmatpush3.xpose.msk.msra.mxu0 %vm74_vm0, %v31050_v42  ;;  %33586 = vmatpush3.xpose.msk.msra.mxu1 %vm74_vm0, %v31055_v58  ;;  %v37533_v42 = vld [vmem:[%s39270_s3 + $0x18] ss:$0 sm:$0xff]  ;;  %v37538_v58 = vld [vmem:[%s39270_s3 + $0x1d] ss:$0 sm:$0xff] }
0x10d9   :  { %33562 = vmatprep.mubr.msk.f32.mxu0 %vm34786_vm1, %v34785_v14  ;;  %33587 = vmatprep.mubr.msk.f32.mxu1 %vm34786_vm1, %v34785_v14 }
0x10da   :  { %33570 = vmatprep.subr.mxu0 %v34785_v14  ;;  %33595 = vmatprep.subr.mxu1 %v34785_v14 }
0x10db   :  { %33563 = vmatmul.mubr.msk.f32.vlgmr.msra.gmra.mrb[240].mxu0 %vm74_vm0, %v37154_v45  ;;  %33588 = vmatmul.mubr.msk.f32.vlgmr.msra.gmra.mrb[236].mxu1 %vm74_vm0, %v37154_v45 }
0x10dc   :  { %33571 = vmatpush3.xpose.msk.msra.mxu0 %vm74_vm0, %v31052_v21  ;;  %33572 = vmatprep.mubr.msk.f32.mxu0 %vm34786_vm1, %v34785_v14 }
0x10dd   :  { %33580 = vmatprep.subr.mxu0 %v34785_v14  ;;  %33597 = vmatprep.mubr.msk.f32.mxu1 %vm34786_vm1, %v34785_v14 }
0x10df   :  { %33573 = vmatmul.mubr.msk.f32.vlgmr.msra.gmra.mrb[242].mxu0 %vm74_vm0, %v37154_v45 }
0x10e0   :  { %33581 = vmatpush3.xpose.msk.msra.mxu0 %vm74_vm0, %v31054_v15  ;;  %33582 = vmatprep.mubr.msk.f32.mxu0 %vm34786_vm1, %v34785_v14 }
0x10e1   :  { %33590 = vmatprep.subr.mxu0 %v34785_v14 }
0x10e3   :  { %33583 = vmatmul.mubr.msk.f32.vlgmr.msra.gmra.mrb[244].mxu0 %vm74_vm0, %v37154_v45 }
0x10e4   :  { %33592 = vmatprep.mubr.msk.f32.mxu0 %vm34786_vm1, %v34785_v14 }
0x1156   :  { %v37463_v47 = vpop.f32.mrb[196].mxu0  ;;  %v15732_v41 = vpop.f32.mrb[192].mxu1 }
0x1157   :  { %v33354_v30 = vpop.f32.mrb[197].mxu0  ;;  %v33369_v57 = vpop.f32.mrb[193].mxu1  ;;  %v15733_v53 = vadd.f32 %v37511_v24, %v15732_v41 }
0x1158   :  { %v37546_v57 = vld [vmem:[%s39270_s3 + $0x22] ss:$0 sm:$0xff] }
0x115a   :  { %v15586_v56 = vpop.f32.mrb[198].mxu0  ;;  %v15878_v19 = vpop.f32.mrb[194].mxu1 }
0x115b   :  { %v33359_v6 = vpop.f32.mrb[199].mxu0  ;;  %v33379_v3 = vpop.f32.mrb[195].mxu1  ;;  %v15587_v48 = vadd.f32 %v37495_v20, %v15586_v56  ;;  %v37551_v56 = vld [vmem:[%s39270_s3 + $0x27] ss:$0 sm:$0xff] }
0x115c   :  { %v15514_v6 = vadd.f32 %v37533_v42, %v37463_v47  ;;  %v15879_v3 = vadd.f32 %v37538_v58, %v15878_v19 }
0x115e   :  { %v37465_v5 = vpop.f32.mrb[200].mxu0  ;;  %v37467_v34 = vpop.f32.mrb[196].mxu1 }
0x115f   :  { %v33364_v31 = vpop.f32.mrb[201].mxu0  ;;  %v33389_v39 = vpop.f32.mrb[197].mxu1 }
0x1162   :  { %v37469_v43 = vpop.f32.mrb[202].mxu0  ;;  %v37471_v61 = vpop.f32.mrb[198].mxu1 }
0x1163   :  { %v33374_v11 = vpop.f32.mrb[203].mxu0  ;;  %v33399_v22 = vpop.f32.mrb[199].mxu1 }
0x1164   :  { %v37564_v11 = vld [vmem:[%s39270_s3 + $0x1a] ss:$0 sm:$0xff]  ;;  %v37569_v22 = vld [vmem:[%s39270_s3 + $0x1f] ss:$0 sm:$0xff] }
0x1166   :  { %v37473_v2 = vpop.f32.mrb[204].mxu0  ;;  %v37475_v38 = vpop.f32.mrb[200].mxu1 }
0x1167   :  { %v33384_v18 = vpop.f32.mrb[205].mxu0  ;;  %v33409_v4 = vpop.f32.mrb[201].mxu1 }
0x116a   :  { %v37477_v62 = vpop.f32.mrb[206].mxu0  ;;  %v37479_v49 = vpop.f32.mrb[202].mxu1 }
0x116b   :  { %v33394_v55 = vpop.f32.mrb[207].mxu0  ;;  %v33419_v37 = vpop.f32.mrb[203].mxu1 }
0x116c   :  { %v37579_v55 = vld [vmem:[%s39270_s3 + $0x24] ss:$0 sm:$0xff]  ;;  %v15660_v37 = vadd.f32 %v37564_v11, %v37465_v5 }
0x116e   :  { %v37481_v51 = vpop.f32.mrb[208].mxu0  ;;  %v37483_v1 = vpop.f32.mrb[204].mxu1 }
0x116f   :  { %v33404_v17 = vpop.f32.mrb[209].mxu0  ;;  %v33429_v0 = vpop.f32.mrb[205].mxu1 }
0x1170   :  { %v16025_v17 = vadd.f32 %v37569_v22, %v37467_v34  ;;  %v37605_v34 = vld [vmem:[%s39270_s3 + $0x26] ss:$0 sm:$0xff] }
0x1172   :  { %v37490_v54 = vpop.f32.mrb[210].mxu0  ;;  %v16781_v9 = vpop.f32.mrb[206].mxu1 }
0x1173   :  { %v16782_v10 = vadd.f32 %v37488_v12, %v16781_v9  ;;  %v33414_v50 = vpop.f32.mrb[211].mxu0  ;;  %v33439_v52 = vpop.f32.mrb[207].mxu1 }
0x1175   :  { %33596 = vmatpush3.xpose.msk.msra.mxu1 %vm3756_vm2, %v16782_v10  ;;  %v37594_v10 = vld [vmem:[%s39270_s3 + $0x1c] ss:$0 sm:$0xff] }
0x1176   :  { %v37505_v36 = vpop.f32.mrb[212].mxu0  ;;  %v16927_v33 = vpop.f32.mrb[208].mxu1  ;;  %33605 = vmatprep.subr.mxu1 %v34785_v14 }
0x1177   :  { %v16928_v46 = vadd.f32 %v37501_v26, %v16927_v33  ;;  %v33424_v29 = vpop.f32.mrb[213].mxu0  ;;  %v33449_v63 = vpop.f32.mrb[209].mxu1  ;;  %v16168_v33 = vadd.f32 %v37495_v20, %v37471_v61  ;;  %v16308_v20 = vadd.f32 %v37511_v24, %v37475_v38  ;;  %v16448_v38 = vadd.f32 %v37538_v58, %v37479_v49 }
0x1178   :  { %33598 = vmatmul.mubr.msk.f32.vlgmr.msra.gmra.mrb[238].mxu1 %vm3756_vm2, %v15587_v48  ;;  %v37620_v63 = vld [vmem:[%s39270_s3 + $0x1e] ss:$0 sm:$0xff]  ;;  %v16238_v49 = vadd.f32 %v37564_v11, %v37481_v51  ;;  %v16378_v51 = vadd.f32 %v37594_v10, %v37490_v54  ;;  %v31168_v54 = vld [vmem:[%s39270_s3 + $0x28] ss:$0 sm:$0xff] }
0x1179   :  { %33606 = vmatpush3.xpose.msk.msra.mxu1 %vm3756_vm2, %v16928_v46  ;;  %33607 = vmatprep.mubr.msk.f32.mxu1 %vm34786_vm1, %v34785_v14  ;;  %v15952_v61 = vadd.f32 %v37620_v63, %v37473_v2  ;;  %v16098_v2 = vadd.f32 %v37533_v42, %v37477_v62  ;;  %v31169_v62 = vld [vmem:[%s39270_s3 + $0x29] ss:$0 sm:$0xff]  ;;  %v16588_v42 = vadd.f32 %v37569_v22, %v37483_v1 }
0x117a   :  { %v16708_v59 = vpop.f32.mrb[214].mxu0  ;;  %v17073_v28 = vpop.f32.mrb[210].mxu1  ;;  %33615 = vmatprep.subr.mxu1 %v34785_v14 }
0x117b   :  { %v16709_v21 = vadd.f32 %v37518_v13, %v16708_v59  ;;  %v17074_v15 = vadd.f32 %v37523_v40, %v17073_v28  ;;  %v33434_v30 = vpop.f32.mrb[215].mxu0  ;;  %v33459_v41 = vpop.f32.mrb[211].mxu1 }
0x117c   :  { %33608 = vmatmul.mubr.msk.f32.vlgmr.msra.gmra.mrb[240].mxu1 %vm3756_vm2, %v15733_v53 }
0x117d   :  { %33591 = vmatpush3.xpose.msk.msra.mxu0 %vm3756_vm2, %v16709_v21  ;;  %33616 = vmatpush3.xpose.msk.msra.mxu1 %vm3756_vm2, %v17074_v15 }
0x117e   :  { %v16854_v31 = vpop.f32.mrb[216].mxu0  ;;  %v17219_v39 = vpop.f32.mrb[212].mxu1  ;;  %33617 = vmatprep.mubr.msk.f32.mxu1 %vm34786_vm1, %v34785_v14  ;;  %33600 = vmatprep.subr.mxu0 %v34785_v14 }
0x117f   :  { %v16855_v47 = vadd.f32 %v37546_v57, %v16854_v31  ;;  %v17220_v19 = vadd.f32 %v37551_v56, %v17219_v39  ;;  %v33444_v18 = vpop.f32.mrb[217].mxu0  ;;  %v33469_v4 = vpop.f32.mrb[213].mxu1  ;;  %33625 = vmatprep.subr.mxu1 %v34785_v14 }
0x1180   :  { %33593 = vmatmul.mubr.msk.f32.vlgmr.msra.gmra.mrb[246].mxu0 %vm3756_vm2, %v15514_v6  ;;  %33618 = vmatmul.mubr.msk.f32.vlgmr.msra.gmra.mrb[242].mxu1 %vm3756_vm2, %v15879_v3 }
0x1181   :  { %33601 = vmatpush3.xpose.msk.msra.mxu0 %vm3756_vm2, %v16855_v47  ;;  %33626 = vmatpush3.xpose.msk.msra.mxu1 %vm3756_vm2, %v17220_v19 }
0x1182   :  { %v17000_v0 = vpop.f32.mrb[218].mxu0  ;;  %v17359_v9 = vpop.f32.mrb[214].mxu1  ;;  %33602 = vmatprep.mubr.msk.f32.mxu0 %vm34786_vm1, %v34785_v14  ;;  %33627 = vmatprep.mubr.msk.f32.mxu1 %vm34786_vm1, %v34785_v14 }
0x1183   :  { %v17001_v50 = vadd.f32 %v37579_v55, %v17000_v0  ;;  %v17360_v5 = vadd.f32 %v37488_v12, %v17359_v9  ;;  %v33454_v52 = vpop.f32.mrb[219].mxu0  ;;  %v33479_v48 = vpop.f32.mrb[215].mxu1  ;;  %33610 = vmatprep.subr.mxu0 %v34785_v14  ;;  %33635 = vmatprep.subr.mxu1 %v34785_v14  ;;  %v15806_v12 = vadd.f32 %v37594_v10, %v37469_v43 }
0x1184   :  { %33603 = vmatmul.mubr.msk.f32.vlgmr.msra.gmra.mrb[248].mxu0 %vm3756_vm2, %v15660_v37  ;;  %33628 = vmatmul.mubr.msk.f32.vlgmr.msra.gmra.mrb[244].mxu1 %vm3756_vm2, %v16025_v17  ;;  %v16518_v37 = vadd.f32 %v37620_v63, %v37505_v36 }
0x1185   :  { %33611 = vmatpush3.xpose.msk.msra.mxu0 %vm3756_vm2, %v17001_v50  ;;  %33636 = vmatpush3.xpose.msk.msra.mxu1 %vm3756_vm2, %v17360_v5 }
0x1186   :  { %v17146_v46 = vpop.f32.mrb[220].mxu0  ;;  %v17499_v29 = vpop.f32.mrb[216].mxu1  ;;  %33612 = vmatprep.mubr.msk.f32.mxu0 %vm34786_vm1, %v34785_v14  ;;  %33637 = vmatprep.mubr.msk.f32.mxu1 %vm34786_vm1, %v34785_v14 }
0x1187   :  { %v17147_v53 = vadd.f32 %v37605_v34, %v17146_v46  ;;  %v17500_v43 = vadd.f32 %v37501_v26, %v17499_v29  ;;  %v33464_v59 = vpop.f32.mrb[221].mxu0  ;;  %v33489_v28 = vpop.f32.mrb[217].mxu1  ;;  %33620 = vmatprep.subr.mxu0 %v34785_v14  ;;  %33645 = vmatprep.subr.mxu1 %v34785_v14 }
0x1188   :  { %33613 = vmatmul.mubr.msk.f32.vlgmr.msra.gmra.mrb[250].mxu0 %vm3756_vm2, %v15806_v12  ;;  %33638 = vmatmul.mubr.msk.f32.vlgmr.msra.gmra.mrb[246].mxu1 %vm3756_vm2, %v16168_v33 }
0x1189   :  { %33621 = vmatpush3.xpose.msk.msra.mxu0 %vm3756_vm2, %v17147_v53  ;;  %33646 = vmatpush3.xpose.msk.msra.mxu1 %vm3756_vm2, %v17500_v43 }
0x118a   :  { %v17289_v26 = vpop.f32.mrb[222].mxu0  ;;  %v17639_v21 = vpop.f32.mrb[218].mxu1  ;;  %33622 = vmatprep.mubr.msk.f32.mxu0 %vm34786_vm1, %v34785_v14  ;;  %33647 = vmatprep.mubr.msk.f32.mxu1 %vm34786_vm1, %v34785_v14 }
0x118b   :  { %v17290_v15 = vadd.f32 %v37518_v13, %v17289_v26  ;;  %v17640_v30 = vadd.f32 %v37523_v40, %v17639_v21  ;;  %v33474_v41 = vpop.f32.mrb[223].mxu0  ;;  %v33499_v6 = vpop.f32.mrb[219].mxu1  ;;  %33630 = vmatprep.subr.mxu0 %v34785_v14  ;;  %33655 = vmatprep.subr.mxu1 %v34785_v14 }
0x118c   :  { %33623 = vmatmul.mubr.msk.f32.vlgmr.msra.gmra.mrb[252].mxu0 %vm3756_vm2, %v15952_v61  ;;  %33648 = vmatmul.mubr.msk.f32.vlgmr.msra.gmra.mrb[248].mxu1 %vm3756_vm2, %v16308_v20 }
0x118d   :  { %33631 = vmatpush3.xpose.msk.msra.mxu0 %vm3756_vm2, %v17290_v15  ;;  %33656 = vmatpush3.xpose.msk.msra.mxu1 %vm3756_vm2, %v17640_v30 }
0x118e   :  { %v17429_v24 = vpop.f32.mrb[224].mxu0  ;;  %v17779_v13 = vpop.f32.mrb[220].mxu1  ;;  %33632 = vmatprep.mubr.msk.f32.mxu0 %vm34786_vm1, %v34785_v14  ;;  %33657 = vmatprep.mubr.msk.f32.mxu1 %vm34786_vm1, %v34785_v14 }
0x118f   :  { %v17430_v40 = vadd.f32 %v37546_v57, %v17429_v24  ;;  %v17780_v3 = vadd.f32 %v37551_v56, %v17779_v13  ;;  %v33484_v31 = vpop.f32.mrb[225].mxu0  ;;  %v33509_v39 = vpop.f32.mrb[221].mxu1  ;;  %33640 = vmatprep.subr.mxu0 %v34785_v14  ;;  %33665 = vmatprep.subr.mxu1 %v34785_v14 }
0x1190   :  { %33633 = vmatmul.mubr.msk.f32.vlgmr.msra.gmra.mrb[254].mxu0 %vm3756_vm2, %v16098_v2  ;;  %33658 = vmatmul.mubr.msk.f32.vlgmr.msra.gmra.mrb[250].mxu1 %vm3756_vm2, %v16448_v38 }
0x1191   :  { %33641 = vmatpush3.xpose.msk.msra.mxu0 %vm3756_vm2, %v17430_v40  ;;  %33666 = vmatpush3.xpose.msk.msra.mxu1 %vm3756_vm2, %v17780_v3 }
0x1192   :  { %v17569_v58 = vpop.f32.mrb[226].mxu0  ;;  %v17973_v57 = vpop.f32.mrb[222].mxu1  ;;  %33642 = vmatprep.mubr.msk.f32.mxu0 %vm34786_vm1, %v34785_v14  ;;  %33667 = vmatprep.mubr.msk.f32.mxu1 %vm34786_vm1, %v34785_v14 }
0x1193   :  { %v17570_v56 = vadd.f32 %v37579_v55, %v17569_v58  ;;  %v17974_v47 = vadd.f32 %v31169_v62, %v17973_v57  ;;  %v33494_v19 = vpop.f32.mrb[227].mxu0  ;;  %v33519_v18 = vpop.f32.mrb[223].mxu1  ;;  %33650 = vmatprep.subr.mxu0 %v34785_v14  ;;  %33675 = vmatprep.subr.mxu1 %v34785_v14 }
0x1194   :  { %33643 = vmatmul.mubr.msk.f32.vlgmr.msra.gmra.mrb[0].mxu0 %vm3756_vm2, %v16238_v49  ;;  %33668 = vmatmul.mubr.msk.f32.vlgmr.msra.gmra.mrb[252].mxu1 %vm3756_vm2, %v16588_v42 }
0x1195   :  { %33651 = vmatpush3.xpose.msk.msra.mxu0 %vm3756_vm2, %v17570_v56  ;;  %33676 = vmatpush3.msra.mxu1 %v17974_v47 }
0x1196   :  { %v17709_v1 = vpop.f32.mrb[228].mxu0  ;;  %v37681_v11 = vpop.f32.mrb[224].mxu1  ;;  %33652 = vmatprep.mubr.msk.f32.mxu0 %vm34786_vm1, %v34785_v14  ;;  %33660 = vmatprep.subr.mxu0 %v34785_v14 }
0x1197   :  { %v17710_v22 = vadd.f32 %v37605_v34, %v17709_v1  ;;  %v33504_v4 = vpop.f32.mrb[229].mxu0  ;;  %v33529_v55 = vpop.f32.mrb[225].mxu1  ;;  %33677 = vmatprep.mubr.msk.f32.mxu1 %vm34786_vm1, %v34785_v14  ;;  %33685 = vmatprep.subr.mxu1 %v34785_v14 }
0x1198   :  { %33653 = vmatmul.mubr.msk.f32.vlgmr.msra.gmra.mrb[2].mxu0 %vm3756_vm2, %v16378_v51 }
0x1199   :  { %33661 = vmatpush3.xpose.msk.msra.mxu0 %vm3756_vm2, %v17710_v22  ;;  %33662 = vmatprep.mubr.msk.f32.mxu0 %vm34786_vm1, %v34785_v14 }
0x119a   :  { %v17900_v17 = vpop.f32.mrb[230].mxu0  ;;  %v37699_v0 = vpop.f32.mrb[226].mxu1  ;;  %33670 = vmatprep.subr.mxu0 %v34785_v14 }
0x119b   :  { %v17901_v9 = vadd.f32 %v31168_v54, %v17900_v17  ;;  %v33514_v10 = vpop.f32.mrb[231].mxu0  ;;  %v33539_v50 = vpop.f32.mrb[227].mxu1 }
0x119c   :  { %33663 = vmatmul.mubr.msk.f32.vlgmr.msra.gmra.mrb[4].mxu0 %vm3756_vm2, %v16518_v37 }
0x119d   :  { %33671 = vmatpush3.msra.mxu0 %v17901_v9  ;;  %33672 = vmatprep.mubr.msk.f32.mxu0 %vm34786_vm1, %v34785_v14 }
0x119e   :  { %v37705_v5 = vpop.f32.mrb[232].mxu0  ;;  %v37707_v52 = vpop.f32.mrb[228].mxu1  ;;  %33680 = vmatprep.subr.mxu0 %v34785_v14 }
0x119f   :  { %v33524_v36 = vpop.f32.mrb[233].mxu0  ;;  %v33549_v48 = vpop.f32.mrb[229].mxu1 }
0x11a2   :  { %v37710_v34 = vpop.f32.mrb[234].mxu0  ;;  %v18551_v12 = vpop.f32.mrb[230].mxu1 }
0x11a3   :  { %v37712_v33 = vadd.f32 %v31169_v62, %v18551_v12  ;;  %v33534_v46 = vpop.f32.mrb[235].mxu0  ;;  %v33559_v29 = vpop.f32.mrb[231].mxu1 }
0x11a6   :  { %v37714_v63 = vpop.f32.mrb[236].mxu0  ;;  %v37716_v53 = vpop.f32.mrb[232].mxu1 }
0x11a7   :  { %v33544_v43 = vpop.f32.mrb[237].mxu0  ;;  %v33569_v59 = vpop.f32.mrb[233].mxu1 }
0x11aa   :  { %v18481_v28 = vpop.f32.mrb[238].mxu0  ;;  %v37718_v61 = vpop.f32.mrb[234].mxu1 }
0x11ab   :  { %v37720_v20 = vadd.f32 %v31168_v54, %v18481_v28  ;;  %v33554_v26 = vpop.f32.mrb[239].mxu0  ;;  %v33579_v21 = vpop.f32.mrb[235].mxu1 }
0x11ae   :  { %v37722_v15 = vpop.f32.mrb[240].mxu0  ;;  %v37724_v30 = vpop.f32.mrb[236].mxu1 }
0x11af   :  { %v33564_v41 = vpop.f32.mrb[241].mxu0  ;;  %v33589_v6 = vpop.f32.mrb[237].mxu1 }
0x11b2   :  { %v37726_v2 = vpop.f32.mrb[242].mxu0 }
0x11b3   :  { %v33574_v38 = vpop.f32.mrb[243].mxu0 }
0x11b6   :  { %v37728_v24 = vpop.f32.mrb[244].mxu0 }
0x11b7   :  { %v33584_v13 = vpop.f32.mrb[245].mxu0 }
0x124b   :  { %v37730_v40 = vpop.f32.mrb[238].mxu1 }
0x124c   :  { %v33599_v3 = vpop.f32.mrb[239].mxu1  ;;  %v20194_v31 = vsel %vm4973_vm3, %v37730_v40, -inf }
0x124d   :  { %20195 = vmax.xlane.f32.xlu1 %v20194_v31 }
0x124f   :  { %v37734_v39 = vpop.f32.mrb[240].mxu1 }
0x1250   :  { %v33609_v62 = vpop.f32.mrb[241].mxu1  ;;  %v20200_v49 = vsel %vm4973_vm3, %v37734_v39, -inf }
0x1251   :  { %20201 = vmax.xlane.f32.xlu1 %v20200_v49 }
0x1253   :  { %v37738_v42 = vpop.f32.mrb[246].mxu0  ;;  %v37740_v58 = vpop.f32.mrb[242].mxu1 }
0x1254   :  { %v33594_v57 = vpop.f32.mrb[247].mxu0  ;;  %v33619_v56 = vpop.f32.mrb[243].mxu1  ;;  %v20206_v47 = vsel %vm4973_vm3, %v37740_v58, -inf  ;;  %v20191_v19 = vsel %vm4973_vm3, %v37738_v42, -inf }
0x1255   :  { %20207 = vmax.xlane.f32.xlu1 %v20206_v47  ;;  %20192 = vmax.xlane.f32.xlu0 %v20191_v19 }
0x1257   :  { %v37746_v18 = vpop.f32.mrb[248].mxu0  ;;  %v37748_v51 = vpop.f32.mrb[244].mxu1 }
0x1258   :  { %v33604_v1 = vpop.f32.mrb[249].mxu0  ;;  %v33629_v22 = vpop.f32.mrb[245].mxu1  ;;  %v20212_v4 = vsel %vm4973_vm3, %v37748_v51, -inf  ;;  %v20197_v55 = vsel %vm4973_vm3, %v37746_v18, -inf }
0x1259   :  { %20213 = vmax.xlane.f32.xlu1 %v20212_v4  ;;  %20198 = vmax.xlane.f32.xlu0 %v20197_v55 }
0x125b   :  { %v37754_v54 = vpop.f32.mrb[250].mxu0  ;;  %v37756_v37 = vpop.f32.mrb[246].mxu1 }
0x125c   :  { %v33614_v17 = vpop.f32.mrb[251].mxu0  ;;  %v33639_v9 = vpop.f32.mrb[247].mxu1  ;;  %v20218_v10 = vsel %vm4973_vm3, %v37756_v37, -inf  ;;  %v20203_v50 = vsel %vm4973_vm3, %v37754_v54, -inf }
0x125d   :  { %20219 = vmax.xlane.f32.xlu1 %v20218_v10  ;;  %20204 = vmax.xlane.f32.xlu0 %v20203_v50 }
0x125f   :  { %v37762_v36 = vpop.f32.mrb[252].mxu0  ;;  %v37764_v48 = vpop.f32.mrb[248].mxu1 }
0x1260   :  { %v33624_v12 = vpop.f32.mrb[253].mxu0  ;;  %v33649_v46 = vpop.f32.mrb[249].mxu1  ;;  %v20224_v29 = vsel %vm4973_vm3, %v37764_v48, -inf  ;;  %v20209_v43 = vsel %vm4973_vm3, %v37762_v36, -inf }
0x1261   :  { %20225 = vmax.xlane.f32.xlu1 %v20224_v29  ;;  %20210 = vmax.xlane.f32.xlu0 %v20209_v43 }
0x1263   :  { %v37770_v59 = vpop.f32.mrb[254].mxu0  ;;  %v37772_v28 = vpop.f32.mrb[250].mxu1 }
0x1264   :  { %v33634_v26 = vpop.f32.mrb[255].mxu0  ;;  %v33659_v21 = vpop.f32.mrb[251].mxu1  ;;  %v20230_v41 = vsel %vm4973_vm3, %v37772_v28, -inf  ;;  %v20215_v6 = vsel %vm4973_vm3, %v37770_v59, -inf }
0x1265   :  { %20231 = vmax.xlane.f32.xlu1 %v20230_v41  ;;  %20216 = vmax.xlane.f32.xlu0 %v20215_v6 }
0x1267   :  { %v37778_v38 = vpop.f32.mrb[0].mxu0  ;;  %v37780_v13 = vpop.f32.mrb[252].mxu1 }
0x1268   :  { %v33644_v3 = vpop.f32.mrb[1].mxu0  ;;  %v33669_v31 = vpop.f32.mrb[253].mxu1  ;;  %v20236_v62 = vsel %vm4973_vm3, %v37780_v13, -inf  ;;  %v20221_v49 = vsel %vm4973_vm3, %v37778_v38, -inf }
0x1269   :  { %20237 = vmax.xlane.f32.xlu1 %v20236_v62  ;;  %20222 = vmax.xlane.f32.xlu0 %v20221_v49 }
0x126b   :  { %v37786_v57 = vpop.f32.mrb[2].mxu0 }
0x126c   :  { %v33654_v56 = vpop.f32.mrb[3].mxu0  ;;  %v20227_v47 = vsel %vm4973_vm3, %v37786_v57, -inf }
0x126d   :  { %20228 = vmax.xlane.f32.xlu0 %v20227_v47 }
0x126f   :  { %v37790_v19 = vpop.f32.mrb[4].mxu0 }
0x1270   :  { %v33664_v1 = vpop.f32.mrb[5].mxu0  ;;  %v20233_v22 = vsel %vm4973_vm3, %v37790_v19, -inf }
0x1271   :  { %20234 = vmax.xlane.f32.xlu0 %v20233_v22 }
0x12da   :  { %v20196_v4 = vpop.xlane.xlu1 %20195 }
0x12db   :  { %v20240_v55 = vsub.f32 %v37730_v40, %v20196_v4 }
0x12dd   :  { %v20257_v17 = vmul.f32 1.442695, %v20240_v55 }
0x12de   :  { %v20202_v9 = vpop.xlane.xlu1 %20201 }
0x12df   :  { %34551 = vpow2.f32 %v20257_v17  ;;  %v20242_v10 = vsub.f32 %v37734_v39, %v20202_v9 }
0x12e1   :  { %v20261_v50 = vmul.f32 1.442695, %v20242_v10 }
0x12e2   :  { %v20208_v12 = vpop.xlane.xlu1 %20207  ;;  %v20193_v46 = vpop.xlane.xlu0 %20192 }
0x12e3   :  { %34553 = vpow2.f32 %v20261_v50  ;;  %v20244_v29 = vsub.f32 %v37740_v58, %v20208_v12  ;;  %v20239_v43 = vsub.f32 %v37738_v42, %v20193_v46 }
0x12e5   :  { %v20265_v26 = vmul.f32 1.442695, %v20244_v29  ;;  %v20255_v21 = vmul.f32 1.442695, %v20239_v43 }
0x12e6   :  { %v20214_v41 = vpop.xlane.xlu1 %20213  ;;  %v20199_v6 = vpop.xlane.xlu0 %20198 }
0x12e7   :  { %34555 = vpow2.f32 %v20265_v26  ;;  %v20246_v40 = vsub.f32 %v37748_v51, %v20214_v41  ;;  %v20241_v3 = vsub.f32 %v37746_v18, %v20199_v6 }
0x12e8   :  { %34557 = vpow2.f32 %v20255_v21 }
0x12e9   :  { %v37800_v31 = vpop.eup %34551  ;;  %v20269_v39 = vmul.f32 1.442695, %v20246_v40  ;;  %v20259_v62 = vmul.f32 1.442695, %v20241_v3 }
0x12ea   :  { %v20220_v49 = vpop.xlane.xlu1 %20219  ;;  %v20205_v56 = vpop.xlane.xlu0 %20204  ;;  %v20290_v58 = vsel %vm4973_vm3, %v37800_v31, 0.0 }
0x12eb   :  { %34559 = vpow2.f32 %v20269_v39  ;;  %v20248_v42 = vsub.f32 %v37756_v37, %v20220_v49  ;;  %v20243_v47 = vsub.f32 %v37754_v54, %v20205_v56  ;;  %20291 = vadd.xlane.f32.xlu1 %v20290_v58 }
0x12ec   :  { %34561 = vpow2.f32 %v20259_v62 }
0x12ed   :  { %v37806_v51 = vpop.eup %34553  ;;  %v20273_v18 = vmul.f32 1.442695, %v20248_v42  ;;  %v20263_v1 = vmul.f32 1.442695, %v20243_v47 }
0x12ee   :  { %v20226_v22 = vpop.xlane.xlu1 %20225  ;;  %v20211_v4 = vpop.xlane.xlu0 %20210  ;;  %v20296_v55 = vsel %vm4973_vm3, %v37806_v51, 0.0 }
0x12ef   :  { %34563 = vpow2.f32 %v20273_v18  ;;  %v20250_v17 = vsub.f32 %v37764_v48, %v20226_v22  ;;  %v20245_v9 = vsub.f32 %v37762_v36, %v20211_v4  ;;  %20297 = vadd.xlane.f32.xlu1 %v20296_v55 }
0x12f0   :  { %34565 = vpow2.f32 %v20263_v1 }
0x12f1   :  { %v37812_v37 = vpop.eup %34555  ;;  %v20277_v54 = vmul.f32 1.442695, %v20250_v17  ;;  %v20267_v10 = vmul.f32 1.442695, %v20245_v9 }
0x12f2   :  { %v37814_v50 = vpop.eup %34557  ;;  %v20232_v12 = vpop.xlane.xlu1 %20231  ;;  %v20302_v29 = vsel %vm4973_vm3, %v37812_v37, 0.0 }
0x12f3   :  { %v20217_v46 = vpop.xlane.xlu0 %20216  ;;  %34567 = vpow2.f32 %v20277_v54  ;;  %v20252_v43 = vsub.f32 %v37772_v28, %v20232_v12  ;;  %20303 = vadd.xlane.f32.xlu1 %v20302_v29  ;;  %v20287_v36 = vsel %vm4973_vm3, %v37814_v50, 0.0 }
0x12f4   :  { %v20247_v48 = vsub.f32 %v37770_v59, %v20217_v46  ;;  %34569 = vpow2.f32 %v20267_v10  ;;  %20288 = vadd.xlane.f32.xlu0 %v20287_v36 }
0x12f5   :  { %v37822_v26 = vpop.eup %34559  ;;  %v20281_v21 = vmul.f32 1.442695, %v20252_v43 }
0x12f6   :  { %v20271_v41 = vmul.f32 1.442695, %v20247_v48  ;;  %v37824_v6 = vpop.eup %34561  ;;  %v20238_v40 = vpop.xlane.xlu1 %20237  ;;  %v20308_v39 = vsel %vm4973_vm3, %v37822_v26, 0.0 }
0x12f7   :  { %v20223_v3 = vpop.xlane.xlu0 %20222  ;;  %34571 = vpow2.f32 %v20281_v21  ;;  %v20254_v59 = vsub.f32 %v37780_v13, %v20238_v40  ;;  %20309 = vadd.xlane.f32.xlu1 %v20308_v39  ;;  %v20293_v62 = vsel %vm4973_vm3, %v37824_v6, 0.0 }
0x12f8   :  { %v20249_v28 = vsub.f32 %v37778_v38, %v20223_v3  ;;  %34573 = vpow2.f32 %v20271_v41  ;;  %20294 = vadd.xlane.f32.xlu0 %v20293_v62 }
0x12f9   :  { %v37832_v49 = vpop.eup %34563  ;;  %v20285_v56 = vmul.f32 1.442695, %v20254_v59 }
0x12fa   :  { %v20275_v58 = vmul.f32 1.442695, %v20249_v28  ;;  %v37834_v42 = vpop.eup %34565  ;;  %v20314_v18 = vsel %vm4973_vm3, %v37832_v49, 0.0 }
0x12fb   :  { %v20229_v47 = vpop.xlane.xlu0 %20228  ;;  %34575 = vpow2.f32 %v20285_v56  ;;  %20315 = vadd.xlane.f32.xlu1 %v20314_v18  ;;  %v20299_v38 = vsel %vm4973_vm3, %v37834_v42, 0.0  ;;  %v37877_v56 = vld [vmem:[%s39270_s3 + $0x2b] ss:$0 sm:$0xff] }
0x12fc   :  { %v20251_v13 = vsub.f32 %v37786_v57, %v20229_v47  ;;  %34577 = vpow2.f32 %v20275_v58  ;;  %20300 = vadd.xlane.f32.xlu0 %v20299_v38 }
0x12fd   :  { %v37841_v1 = vpop.eup %34567 }
0x12fe   :  { %v20279_v22 = vmul.f32 1.442695, %v20251_v13  ;;  %v37843_v4 = vpop.eup %34569  ;;  %v20320_v17 = vsel %vm4973_vm3, %v37841_v1, 0.0  ;;  %v18120_v13 = vadd.f32 %v37877_v56, %v37681_v11 }
0x12ff   :  { %v20235_v55 = vpop.xlane.xlu0 %20234  ;;  %20321 = vadd.xlane.f32.xlu1 %v20320_v17  ;;  %v20305_v57 = vsel %vm4973_vm3, %v37843_v4, 0.0 }
0x1300   :  { %34579 = vpow2.f32 %v20279_v22  ;;  %v20253_v9 = vsub.f32 %v37790_v19, %v20235_v55  ;;  %20306 = vadd.xlane.f32.xlu0 %v20305_v57  ;;  %v37885_v22 = vld [vmem:[%s39270_s3 + $0x2d] ss:$0 sm:$0xff]  ;;  %v37897_v57 = vld [vmem:[%s39270_s3 + $0x2f] ss:$0 sm:$0xff] }
0x1301   :  { %v37850_v54 = vpop.eup %34571  ;;  %v18266_v11 = vadd.f32 %v37885_v22, %v37699_v0 }
0x1302   :  { %v20283_v10 = vmul.f32 1.442695, %v20253_v9  ;;  %v37852_v12 = vpop.eup %34573  ;;  %v20326_v46 = vsel %vm4973_vm3, %v37850_v54, 0.0 }
0x1303   :  { %20327 = vadd.xlane.f32.xlu1 %v20326_v46  ;;  %v20311_v29 = vsel %vm4973_vm3, %v37852_v12, 0.0 }
0x1304   :  { %34581 = vpow2.f32 %v20283_v10  ;;  %20312 = vadd.xlane.f32.xlu0 %v20311_v29 }
0x1305   :  { %v37858_v19 = vpop.eup %34575 }
0x1306   :  { %v37860_v43 = vpop.eup %34577  ;;  %v20332_v48 = vsel %vm4973_vm3, %v37858_v19, 0.0 }
0x1307   :  { %20333 = vadd.xlane.f32.xlu1 %v20332_v48  ;;  %v20317_v36 = vsel %vm4973_vm3, %v37860_v43, 0.0  ;;  %v18412_v48 = vadd.f32 %v37897_v57, %v37707_v52 }
0x1308   :  { %20318 = vadd.xlane.f32.xlu0 %v20317_v36 }
0x130a   :  { %v37866_v21 = vpop.eup %34579 }
0x130b   :  { %v20323_v41 = vsel %vm4973_vm3, %v37866_v21, 0.0 }
0x130c   :  { %20324 = vadd.xlane.f32.xlu0 %v20323_v41 }
0x130e   :  { %v37870_v40 = vpop.eup %34581 }
0x130f   :  { %v20329_v3 = vsel %vm4973_vm3, %v37870_v40, 0.0 }
0x1310   :  { %20330 = vadd.xlane.f32.xlu0 %v20329_v3 }
0x1378   :  { %v20292_v39 = vpop.xlane.xlu1 %20291 }
0x1379   :  { %34583 = vrcp.f32 %v20292_v39 }
0x137c   :  { %v20298_v59 = vpop.xlane.xlu1 %20297 }
0x137d   :  { %34585 = vrcp.f32 %v20298_v59 }
0x1380   :  { %v20304_v28 = vpop.xlane.xlu1 %20303 }
0x1381   :  { %34587 = vrcp.f32 %v20304_v28  ;;  %v20289_v62 = vpop.xlane.xlu0 %20288 }
0x1382   :  { %34589 = vrcp.f32 %v20289_v62 }
0x1383   :  { %v34584_v58 = vpop.eup %34583 }
0x1384   :  { %v20338_v47 = vmul.f32 %v34584_v58, %v37800_v31  ;;  %v20310_v18 = vpop.xlane.xlu1 %20309 }
0x1385   :  { %34591 = vrcp.f32 %v20310_v18  ;;  %v20295_v38 = vpop.xlane.xlu0 %20294  ;;  %v18692_v18 = vadd.f32 %v37877_v56, %v37716_v53  ;;  %v18832_v56 = vadd.f32 %v37885_v22, %v37718_v61 }
0x1386   :  { %34593 = vrcp.f32 %v20295_v38  ;;  %33678 = vmatmul.mubr.msk.f32.vlgmr.msra.gmra.mrb[254].mxu1 %vm4973_vm3, %v20338_v47 }
0x1387   :  { %v34586_v55 = vpop.eup %34585  ;;  %33686 = vmatpush3.msra.mxu1 %v18120_v13  ;;  %33687 = vmatprep.mubr.msk.f32.mxu1 %vm34786_vm1, %v34785_v14 }
0x1388   :  { %v20342_v31 = vmul.f32 %v34586_v55, %v37806_v51  ;;  %v20316_v17 = vpop.xlane.xlu1 %20315  ;;  %33695 = vmatprep.subr.mxu1 %v34785_v14  ;;  %v37903_v51 = vld [vmem:[%s39270_s3 + $0x2a] ss:$0 sm:$0xff] }
0x1389   :  { %34595 = vrcp.f32 %v20316_v17  ;;  %v20301_v9 = vpop.xlane.xlu0 %20300  ;;  %v18047_v3 = vadd.f32 %v37903_v51, %v37705_v5 }
0x138a   :  { %34597 = vrcp.f32 %v20301_v9  ;;  %33688 = vmatmul.mubr.msk.f32.vlgmr.msra.gmra.mrb[0].mxu1 %vm4973_vm3, %v20342_v31 }
0x138b   :  { %v34588_v10 = vpop.eup %34587  ;;  %33696 = vmatpush3.msra.mxu1 %v18266_v11  ;;  %33697 = vmatprep.mubr.msk.f32.mxu1 %vm34786_vm1, %v34785_v14  ;;  %v18622_v11 = vadd.f32 %v37903_v51, %v37722_v15 }
0x138c   :  { %v34590_v0 = vpop.eup %34589  ;;  %v20346_v46 = vmul.f32 %v34588_v10, %v37812_v37  ;;  %v20322_v29 = vpop.xlane.xlu1 %20321  ;;  %33705 = vmatprep.subr.mxu1 %v34785_v14  ;;  %v37918_v37 = vld [vmem:[%s39270_s3 + $0x2c] ss:$0 sm:$0xff] }
0x138d   :  { %v20336_v36 = vmul.f32 %v34590_v0, %v37814_v50  ;;  %34599 = vrcp.f32 %v20322_v29  ;;  %v20307_v41 = vpop.xlane.xlu0 %20306  ;;  %v18193_v62 = vadd.f32 %v37918_v37, %v37710_v34  ;;  %v18762_v15 = vadd.f32 %v37918_v37, %v37726_v2  ;;  %v31085_v0 = vld [vmem:[%s39271_s4 + $0x34] sm:$0xf] }
0x138e   :  { %34601 = vrcp.f32 %v20307_v41  ;;  %33698 = vmatmul.mubr.msk.f32.vlgmr.msra.gmra.mrb[2].mxu1 %vm4973_vm3, %v20346_v46  ;;  %v31082_v41 = vld [vmem:[%s39271_s4 + $0x28] sm:$0xf] }
0x138f   :  { %v34592_v39 = vpop.eup %34591  ;;  %33673 = vmatmul.mubr.msk.f32.vlgmr.msra.gmra.mrb[6].mxu0 %vm4973_vm3, %v20336_v36  ;;  %33706 = vmatpush3.msra.mxu1 %v18412_v48  ;;  %v31087_v48 = vld [vmem:[%s39271_s4 + $0x3c] sm:$0xf] }
0x1390   :  { %v34594_v52 = vpop.eup %34593  ;;  %v20350_v50 = vmul.f32 %v34592_v39, %v37822_v26  ;;  %33681 = vmatpush3.msra.mxu0 %v18047_v3  ;;  %v20328_v59 = vpop.xlane.xlu1 %20327  ;;  %33682 = vmatprep.mubr.msk.f32.mxu0 %vm34786_vm1, %v34785_v14 }
0x1391   :  { %v20340_v5 = vmul.f32 %v34594_v52, %v37824_v6  ;;  %34603 = vrcp.f32 %v20328_v59  ;;  %v20313_v28 = vpop.xlane.xlu0 %20312  ;;  %33690 = vmatprep.subr.mxu0 %v34785_v14  ;;  %33707 = vmatprep.mubr.msk.f32.mxu1 %vm34786_vm1, %v34785_v14  ;;  %v37935_v6 = vld [vmem:[%s39270_s3 + $0x2e] ss:$0 sm:$0xff] }
0x1392   :  { %34605 = vrcp.f32 %v20313_v28  ;;  %33715 = vmatprep.subr.mxu1 %v34785_v14  ;;  %33708 = vmatmul.mubr.msk.f32.vlgmr.msra.gmra.mrb[4].mxu1 %vm4973_vm3, %v20350_v50  ;;  %v18902_v2 = vadd.f32 %v37935_v6, %v37728_v24  ;;  %v31081_v24 = vld [vmem:[%s39271_s4 + $0x24] sm:$0xf]  ;;  %v31084_v50 = vld [vmem:[%s39271_s4 + $0x30] sm:$0xf] }
0x1393   :  { %v34596_v26 = vpop.eup %34595  ;;  %33683 = vmatmul.mubr.msk.f32.vlgmr.msra.gmra.mrb[8].mxu0 %vm4973_vm3, %v20340_v5  ;;  %33716 = vmatpush3.msra.mxu1 %v37712_v33  ;;  %v18339_v33 = vadd.f32 %v37935_v6, %v37714_v63 }
0x1394   :  { %v34598_v58 = vpop.eup %34597  ;;  %v20354_v47 = vmul.f32 %v34596_v26, %v37832_v49  ;;  %33691 = vmatpush3.msra.mxu0 %v18193_v62  ;;  %v20334_v34 = vpop.xlane.xlu1 %20333  ;;  %33692 = vmatprep.mubr.msk.f32.mxu0 %vm34786_vm1, %v34785_v14  ;;  %v31086_v26 = vld [vmem:[%s39271_s4 + $0x38] sm:$0xf] }
0x1395   :  { %v20344_v13 = vmul.f32 %v34598_v58, %v37834_v42  ;;  %34607 = vrcp.f32 %v20334_v34  ;;  %v20319_v38 = vpop.xlane.xlu0 %20318  ;;  %33700 = vmatprep.subr.mxu0 %v34785_v14  ;;  %33717 = vmatprep.mubr.msk.f32.mxu1 %vm34786_vm1, %v34785_v14 }
0x1396   :  { %34609 = vrcp.f32 %v20319_v38  ;;  %33725 = vmatprep.subr.mxu1 %v34785_v14  ;;  %33718 = vmatmul.mubr.msk.f32.vlgmr.msra.gmra.mrb[6].mxu1 %vm4973_vm3, %v20354_v47 }
0x1397   :  { %v34600_v49 = vpop.eup %34599  ;;  %33693 = vmatmul.mubr.msk.f32.vlgmr.msra.gmra.mrb[10].mxu0 %vm4973_vm3, %v20344_v13  ;;  %33726 = vmatpush3.msra.mxu1 %v18692_v18 }
0x1398   :  { %v34602_v53 = vpop.eup %34601  ;;  %v20358_v42 = vmul.f32 %v34600_v49, %v37841_v1  ;;  %33701 = vmatpush3.msra.mxu0 %v18339_v33  ;;  %33702 = vmatprep.mubr.msk.f32.mxu0 %vm34786_vm1, %v34785_v14 }
0x1399   :  { %v20348_v63 = vmul.f32 %v34602_v53, %v37843_v4  ;;  %v20325_v55 = vpop.xlane.xlu0 %20324  ;;  %33710 = vmatprep.subr.mxu0 %v34785_v14  ;;  %33727 = vmatprep.mubr.msk.f32.mxu1 %vm34786_vm1, %v34785_v14  ;;  %v18972_v4 = vadd.f32 %v37897_v57, %v37724_v30 }
0x139a   :  { %34611 = vrcp.f32 %v20325_v55  ;;  %33735 = vmatprep.subr.mxu1 %v34785_v14  ;;  %33728 = vmatmul.mubr.msk.f32.vlgmr.msra.gmra.mrb[8].mxu1 %vm4973_vm3, %v20358_v42 }
0x139b   :  { %v34604_v1 = vpop.eup %34603  ;;  %33703 = vmatmul.mubr.msk.f32.vlgmr.msra.gmra.mrb[12].mxu0 %vm4973_vm3, %v20348_v63  ;;  %33736 = vmatpush3.msra.mxu1 %v18832_v56 }
0x139c   :  { %v34606_v31 = vpop.eup %34605  ;;  %v20362_v61 = vmul.f32 %v34604_v1, %v37850_v54  ;;  %33711 = vmatpush3.msra.mxu0 %v37720_v20  ;;  %33712 = vmatprep.mubr.msk.f32.mxu0 %vm34786_vm1, %v34785_v14 }
0x139d   :  { %v20352_v22 = vmul.f32 %v34606_v31, %v37852_v12  ;;  %v20331_v17 = vpop.xlane.xlu0 %20330  ;;  %33720 = vmatprep.subr.mxu0 %v34785_v14  ;;  %33737 = vmatprep.mubr.msk.f32.mxu1 %vm34786_vm1, %v34785_v14 }
0x139e   :  { %34613 = vrcp.f32 %v20331_v17  ;;  %33745 = vmatprep.subr.mxu1 %v34785_v14  ;;  %33738 = vmatmul.mubr.msk.f32.vlgmr.msra.gmra.mrb[10].mxu1 %vm4973_vm3, %v20362_v61 }
0x139f   :  { %v34608_v20 = vpop.eup %34607  ;;  %33713 = vmatmul.mubr.msk.f32.vlgmr.msra.gmra.mrb[14].mxu0 %vm4973_vm3, %v20352_v22  ;;  %33746 = vmatpush3.msra.mxu1 %v18972_v4 }
0x13a0   :  { %v34610_v30 = vpop.eup %34609  ;;  %v20366_v54 = vmul.f32 %v34608_v20, %v37858_v19  ;;  %33721 = vmatpush3.msra.mxu0 %v18622_v11  ;;  %33722 = vmatprep.mubr.msk.f32.mxu0 %vm34786_vm1, %v34785_v14 }
0x13a1   :  { %v20356_v12 = vmul.f32 %v34610_v30, %v37860_v43  ;;  %33730 = vmatprep.subr.mxu0 %v34785_v14  ;;  %33747 = vmatprep.mubr.msk.f32.mxu1 %vm34786_vm1, %v34785_v14 }
0x13a2   :  { %33748 = vmatmul.mubr.msk.f32.vlgmr.msra.gmra.mrb[12].mxu1 %vm4973_vm3, %v20366_v54  ;;  %33755 = vmatprep.subr.mxu1 %v34785_v14 }
0x13a3   :  { %33723 = vmatmul.mubr.msk.f32.vlgmr.msra.gmra.mrb[16].mxu0 %vm4973_vm3, %v20356_v12  ;;  %33757 = vmatprep.mubr.msk.f32.mxu1 %vm34786_vm1, %v34785_v14 }
0x13a4   :  { %v34612_v19 = vpop.eup %34611  ;;  %33731 = vmatpush3.msra.mxu0 %v18762_v15  ;;  %33732 = vmatprep.mubr.msk.f32.mxu0 %vm34786_vm1, %v34785_v14 }
0x13a5   :  { %v20360_v43 = vmul.f32 %v34612_v19, %v37866_v21  ;;  %33740 = vmatprep.subr.mxu0 %v34785_v14  ;;  %33756 = vmatpush3.msk.msra.mxu1 %vm6321_vm4, %v31081_v24  ;;  %v38016_v21 = vld [vmem:[%s39271_s4 + $0x20] sm:$0xf] }
0x13a6   :  { %33765 = vmatprep.subr.mxu1 %v34785_v14 }
0x13a7   :  { %33733 = vmatmul.mubr.msk.f32.vlgmr.msra.gmra.mrb[18].mxu0 %vm4973_vm3, %v20360_v43 }
0x13a8   :  { %v34614_v9 = vpop.eup %34613  ;;  %33741 = vmatpush3.msra.mxu0 %v18902_v2  ;;  %33742 = vmatprep.mubr.msk.f32.mxu0 %vm34786_vm1, %v34785_v14 }
0x13a9   :  { %v20364_v57 = vmul.f32 %v34614_v9, %v37870_v40  ;;  %33750 = vmatprep.subr.mxu0 %v34785_v14  ;;  %v31083_v40 = vld [vmem:[%s39271_s4 + $0x2c] sm:$0xf] }
0x13ab   :  { %33743 = vmatmul.mubr.msk.f32.vlgmr.msra.gmra.mrb[20].mxu0 %vm4973_vm3, %v20364_v57 }
0x13ac   :  { %33752 = vmatprep.mubr.msk.f32.mxu0 %vm34786_vm1, %v34785_v14  ;;  %33751 = vmatpush3.msk.msra.mxu0 %vm6321_vm4, %v38016_v21 }
0x13ad   :  { %33760 = vmatprep.subr.mxu0 %v34785_v14 }
0x1459   :  { %v20509_v10 = vpop.f32.mrb[254].mxu1 }
0x145a   :  { %v33679_v51 = vpop.f32.mrb[255].mxu1  ;;  %33758 = vmatmul.mubr.msk.f32.vlgmr.msra.gmra.mrb[14].mxu1 %vm3756_vm2, %v20509_v10 }
0x145b   :  { %33766 = vmatpush3.msk.msra.mxu1 %vm6321_vm4, %v31083_v40  ;;  %33767 = vmatprep.mubr.msk.f32.mxu1 %vm34786_vm1, %v34785_v14 }
0x145c   :  { %33775 = vmatprep.subr.mxu1 %v34785_v14 }
0x145d   :  { %v20655_v46 = vpop.f32.mrb[0].mxu1 }
0x145e   :  { %v33689_v29 = vpop.f32.mrb[1].mxu1  ;;  %33768 = vmatmul.mubr.msk.f32.vlgmr.msra.gmra.mrb[16].mxu1 %vm3756_vm2, %v20655_v46 }
0x145f   :  { %33776 = vmatpush3.msk.msra.mxu1 %vm6321_vm4, %v31085_v0  ;;  %33777 = vmatprep.mubr.msk.f32.mxu1 %vm34786_vm1, %v34785_v14 }
0x1460   :  { %33785 = vmatprep.subr.mxu1 %v34785_v14 }
0x1461   :  { %v20801_v36 = vpop.f32.mrb[2].mxu1 }
0x1462   :  { %v20436_v3 = vpop.f32.mrb[6].mxu0  ;;  %v33699_v39 = vpop.f32.mrb[3].mxu1  ;;  %33778 = vmatmul.mubr.msk.f32.vlgmr.msra.gmra.mrb[18].mxu1 %vm3756_vm2, %v20801_v36 }
0x1463   :  { %v33674_v37 = vpop.f32.mrb[7].mxu0  ;;  %33753 = vmatmul.mubr.msk.f32.vlgmr.msra.gmra.mrb[22].mxu0 %vm3756_vm2, %v20436_v3  ;;  %33786 = vmatpush3.msk.msra.mxu1 %vm6321_vm4, %v31087_v48 }
0x1464   :  { %33761 = vmatpush3.msk.msra.mxu0 %vm6321_vm4, %v31082_v41  ;;  %33762 = vmatprep.mubr.msk.f32.mxu0 %vm34786_vm1, %v34785_v14 }
0x1465   :  { %v20947_v52 = vpop.f32.mrb[4].mxu1  ;;  %33787 = vmatprep.mubr.msk.f32.mxu1 %vm34786_vm1, %v34785_v14  ;;  %33770 = vmatprep.subr.mxu0 %v34785_v14 }
0x1466   :  { %v20582_v59 = vpop.f32.mrb[8].mxu0  ;;  %v33709_v5 = vpop.f32.mrb[5].mxu1  ;;  %33788 = vmatmul.mubr.msk.f32.vlgmr.msra.gmra.mrb[20].mxu1 %vm3756_vm2, %v20947_v52  ;;  %33795 = vmatprep.subr.mxu1 %v34785_v14 }
0x1467   :  { %v33684_v28 = vpop.f32.mrb[9].mxu0  ;;  %33763 = vmatmul.mubr.msk.f32.vlgmr.msra.gmra.mrb[24].mxu0 %vm3756_vm2, %v20582_v59  ;;  %33796 = vmatpush3.msk.msra.mxu1 %vm6321_vm4, %v31081_v24 }
0x1468   :  { %33771 = vmatpush3.msk.msra.mxu0 %vm6321_vm4, %v31084_v50  ;;  %33772 = vmatprep.mubr.msk.f32.mxu0 %vm34786_vm1, %v34785_v14 }
0x1469   :  { %v21093_v62 = vpop.f32.mrb[6].mxu1  ;;  %33797 = vmatprep.mubr.msk.f32.mxu1 %vm34786_vm1, %v34785_v14  ;;  %33780 = vmatprep.subr.mxu0 %v34785_v14 }
0x146a   :  { %v20728_v6 = vpop.f32.mrb[10].mxu0  ;;  %v33719_v58 = vpop.f32.mrb[7].mxu1  ;;  %33798 = vmatmul.mubr.msk.f32.vlgmr.msra.gmra.mrb[22].mxu1 %vm3756_vm2, %v21093_v62  ;;  %33805 = vmatprep.subr.mxu1 %v34785_v14 }
0x146b   :  { %v33694_v47 = vpop.f32.mrb[11].mxu0  ;;  %33773 = vmatmul.mubr.msk.f32.vlgmr.msra.gmra.mrb[26].mxu0 %vm3756_vm2, %v20728_v6  ;;  %33806 = vmatpush3.msk.msra.mxu1 %vm6321_vm4, %v31083_v40  ;;  %v38123_v6 = vld [vmem:[#allocation5 + $0x8] sm:$0xff] }
0x146c   :  { %33781 = vmatpush3.msk.msra.mxu0 %vm6321_vm4, %v31086_v26  ;;  %33782 = vmatprep.mubr.msk.f32.mxu0 %vm34786_vm1, %v34785_v14  ;;  %v22760_v58 = vrot.slane %v38123_v6, %v35984_v44 }
0x146d   :  { %v21239_v34 = vpop.f32.mrb[8].mxu1  ;;  %33807 = vmatprep.mubr.msk.f32.mxu1 %vm34786_vm1, %v34785_v14  ;;  %33790 = vmatprep.subr.mxu0 %v34785_v14 }
0x146e   :  { %v20874_v18 = vpop.f32.mrb[12].mxu0  ;;  %v33729_v13 = vpop.f32.mrb[9].mxu1  ;;  %33808 = vmatmul.mubr.msk.f32.vlgmr.msra.gmra.mrb[24].mxu1 %vm3756_vm2, %v21239_v34  ;;  %33815 = vmatprep.subr.mxu1 %v34785_v14 }
0x146f   :  { %v33704_v38 = vpop.f32.mrb[13].mxu0  ;;  %33783 = vmatmul.mubr.msk.f32.vlgmr.msra.gmra.mrb[28].mxu0 %vm3756_vm2, %v20874_v18  ;;  %33816 = vmatpush3.msk.msra.mxu1 %vm6321_vm4, %v31085_v0 }
0x1470   :  { %33791 = vmatpush3.msk.msra.mxu0 %vm6321_vm4, %v38016_v21  ;;  %33792 = vmatprep.mubr.msk.f32.mxu0 %vm34786_vm1, %v34785_v14 }
0x1471   :  { %v21385_v33 = vpop.f32.mrb[10].mxu1  ;;  %33817 = vmatprep.mubr.msk.f32.mxu1 %vm34786_vm1, %v34785_v14  ;;  %33800 = vmatprep.subr.mxu0 %v34785_v14 }
0x1472   :  { %v21020_v49 = vpop.f32.mrb[14].mxu0  ;;  %v33739_v53 = vpop.f32.mrb[11].mxu1  ;;  %33818 = vmatmul.mubr.msk.f32.vlgmr.msra.gmra.mrb[26].mxu1 %vm3756_vm2, %v21385_v33  ;;  %33825 = vmatprep.subr.mxu1 %v34785_v14 }
0x1473   :  { %v33714_v42 = vpop.f32.mrb[15].mxu0  ;;  %33793 = vmatmul.mubr.msk.f32.vlgmr.msra.gmra.mrb[30].mxu0 %vm3756_vm2, %v21020_v49  ;;  %33826 = vmatpush3.msk.msra.mxu1 %vm6321_vm4, %v31087_v48 }
0x1474   :  { %33801 = vmatpush3.msk.msra.mxu0 %vm6321_vm4, %v31082_v41  ;;  %33802 = vmatprep.mubr.msk.f32.mxu0 %vm34786_vm1, %v34785_v14 }
0x1475   :  { %v21531_v56 = vpop.f32.mrb[12].mxu1  ;;  %33827 = vmatprep.mubr.msk.f32.mxu1 %vm34786_vm1, %v34785_v14  ;;  %33810 = vmatprep.subr.mxu0 %v34785_v14 }
0x1476   :  { %v21166_v63 = vpop.f32.mrb[16].mxu0  ;;  %v33749_v55 = vpop.f32.mrb[13].mxu1  ;;  %33828 = vmatmul.mubr.msk.f32.vlgmr.msra.gmra.mrb[28].mxu1 %vm3756_vm2, %v21531_v56  ;;  %33835 = vmatprep.subr.mxu1 %v34785_v14 }
0x1477   :  { %v33724_v1 = vpop.f32.mrb[17].mxu0  ;;  %33803 = vmatmul.mubr.msk.f32.vlgmr.msra.gmra.mrb[32].mxu0 %vm3756_vm2, %v21166_v63  ;;  %33837 = vmatprep.mubr.msk.f32.mxu1 %vm34786_vm1, %v34785_v14 }
0x1478   :  { %33811 = vmatpush3.msk.msra.mxu0 %vm6321_vm4, %v31084_v50  ;;  %33812 = vmatprep.mubr.msk.f32.mxu0 %vm34786_vm1, %v34785_v14 }
0x1479   :  { %33820 = vmatprep.subr.mxu0 %v34785_v14 }
0x147a   :  { %v21312_v31 = vpop.f32.mrb[18].mxu0 }
0x147b   :  { %v33734_v61 = vpop.f32.mrb[19].mxu0  ;;  %33813 = vmatmul.mubr.msk.f32.vlgmr.msra.gmra.mrb[34].mxu0 %vm3756_vm2, %v21312_v31 }
0x147c   :  { %33821 = vmatpush3.msk.msra.mxu0 %vm6321_vm4, %v31086_v26  ;;  %33822 = vmatprep.mubr.msk.f32.mxu0 %vm34786_vm1, %v34785_v14 }
0x147d   :  { %33830 = vmatprep.subr.mxu0 %v34785_v14 }
0x147e   :  { %v21458_v4 = vpop.f32.mrb[20].mxu0 }
0x147f   :  { %v33744_v22 = vpop.f32.mrb[21].mxu0  ;;  %33823 = vmatmul.mubr.msk.f32.vlgmr.msra.gmra.mrb[36].mxu0 %vm3756_vm2, %v21458_v4 }
0x1480   :  { %33832 = vmatprep.mubr.msk.f32.mxu0 %vm34786_vm1, %v34785_v14 }
0x152d   :  { %v21683_v17 = vpop.f32.mrb[14].mxu1 }
0x152e   :  { %v33759_v11 = vpop.f32.mrb[15].mxu1  ;;  %v22728_v19 = vsel %vm74_vm0, %v21683_v17, 0.0 }
0x1531   :  { %v21835_v20 = vpop.f32.mrb[16].mxu1 }
0x1532   :  { %v33769_v30 = vpop.f32.mrb[17].mxu1  ;;  %v22732_v0 = vsel %vm74_vm0, %v21835_v20, 0.0 }
0x1535   :  { %v21987_v54 = vpop.f32.mrb[18].mxu1 }
0x1536   :  { %v21607_v12 = vpop.f32.mrb[22].mxu0  ;;  %v33779_v15 = vpop.f32.mrb[19].mxu1  ;;  %v22736_v37 = vsel %vm74_vm0, %v21987_v54, 0.0 }
0x1537   :  { %v22727_v43 = vsel %vm74_vm0, %v21607_v12, 0.0  ;;  %v33754_v2 = vpop.f32.mrb[23].mxu0 }
0x1538   :  { %v22729_v9 = vadd.f32 %v22728_v19, %v22727_v43 }
0x1539   :  { %v22139_v57 = vpop.f32.mrb[20].mxu1 }
0x153a   :  { %v21759_v24 = vpop.f32.mrb[24].mxu0  ;;  %v33789_v21 = vpop.f32.mrb[21].mxu1  ;;  %v22740_v47 = vsel %vm74_vm0, %v22139_v57, 0.0 }
0x153b   :  { %v22730_v40 = vsel %vm74_vm0, %v21759_v24, 0.0  ;;  %v33764_v10 = vpop.f32.mrb[25].mxu0 }
0x153c   :  { %v22731_v51 = vadd.f32 %v22730_v40, %v22729_v9 }
0x153d   :  { %v22285_v46 = vpop.f32.mrb[22].mxu1 }
0x153e   :  { %v21911_v29 = vpop.f32.mrb[26].mxu0  ;;  %v22733_v48 = vadd.f32 %v22732_v0, %v22731_v51  ;;  %v33799_v36 = vpop.f32.mrb[23].mxu1  ;;  %v22743_v33 = vsel %vm74_vm0, %v22285_v46, 0.0 }
0x153f   :  { %v22734_v41 = vsel %vm74_vm0, %v21911_v29, 0.0  ;;  %v33774_v3 = vpop.f32.mrb[27].mxu0 }
0x1540   :  { %v22735_v39 = vadd.f32 %v22734_v41, %v22733_v48 }
0x1541   :  { %v22431_v52 = vpop.f32.mrb[24].mxu1 }
0x1542   :  { %v22063_v50 = vpop.f32.mrb[28].mxu0  ;;  %v22737_v59 = vadd.f32 %v22736_v37, %v22735_v39  ;;  %v33809_v5 = vpop.f32.mrb[25].mxu1  ;;  %v22747_v11 = vsel %vm74_vm0, %v22431_v52, 0.0 }
0x1543   :  { %v22738_v28 = vsel %vm74_vm0, %v22063_v50, 0.0  ;;  %v33784_v62 = vpop.f32.mrb[29].mxu0  ;;  %v38154_v50 = vld [vmem:[%s39272_s5 + $0x64] sm:$0xf] }
0x1544   :  { %v22739_v26 = vadd.f32 %v22738_v28, %v22737_v59  ;;  %33836 = vmatpush3.xpose.msk.msra.mxu1 %vm74_vm0, %v38154_v50 }
0x1545   :  { %v22577_v34 = vpop.f32.mrb[26].mxu1  ;;  %33845 = vmatprep.subr.mxu1 %v34785_v14 }
0x1546   :  { %v22741_v18 = vadd.f32 %v22740_v47, %v22739_v26  ;;  %v22212_v13 = vpop.f32.mrb[30].mxu0  ;;  %v33819_v38 = vpop.f32.mrb[27].mxu1  ;;  %v22751_v19 = vsel %vm74_vm0, %v22577_v34, 0.0 }
0x1547   :  { %v22742_v49 = vsel %vm74_vm0, %v22212_v13, 0.0  ;;  %v33794_v53 = vpop.f32.mrb[31].mxu0  ;;  %v22802_v38 = vrot.slane %v38123_v6, %v36995_v35 }
0x1548   :  { %v22761_v42 = vadd.f32 %v22760_v58, %v22741_v18  ;;  %v22744_v56 = vadd.f32 %v22743_v33, %v22742_v49  ;;  %v22814_v49 = vrot.slane %v38123_v6, %v15075_v7  ;;  %v31292_v6 = vld [vmem:[%s39272_s5 + $0x70] sm:$0xf] }
0x1549   :  { %v22723_v63 = vpop.f32.mrb[28].mxu1 }
0x154a   :  { %v22358_v55 = vpop.f32.mrb[32].mxu0  ;;  %v33829_v1 = vpop.f32.mrb[29].mxu1  ;;  %v22763_v31 = vadd.f32 %v22761_v42, %v37107_v60  ;;  %v22755_v24 = vsel %vm74_vm0, %v22723_v63, 0.0 }
0x154b   :  { %v22745_v61 = vsel %vm74_vm0, %v22358_v55, 0.0  ;;  %v33804_v4 = vpop.f32.mrb[33].mxu0 }
0x154c   :  { %v22746_v22 = vadd.f32 %v22745_v61, %v22744_v56  ;;  %v22765_v17 = vsel %vm74_vm0, %v22763_v31, 0.0  ;;  %v31290_v4 = vld [vmem:[%s39272_s5 + $0x68] sm:$0xf] }
0x154d   :  { %22766 = vadd.xlane.f32.xlu0 %v22765_v17  ;;  %v31293_v17 = vld [vmem:[%s39272_s5 + $0x74] sm:$0xf] }
0x154e   :  { %v22504_v20 = vpop.f32.mrb[34].mxu0  ;;  %v22748_v30 = vadd.f32 %v22747_v11, %v22746_v22  ;;  %v31291_v22 = vld [vmem:[%s39272_s5 + $0x6c] sm:$0xf]  ;;  %v31294_v11 = vld [vmem:[%s39272_s5 + $0x78] sm:$0xf] }
0x154f   :  { %v22749_v54 = vsel %vm74_vm0, %v22504_v20, 0.0  ;;  %v33814_v12 = vpop.f32.mrb[35].mxu0  ;;  %v31295_v20 = vld [vmem:[%s39272_s5 + $0x7c] sm:$0xf] }
0x1550   :  { %v22750_v15 = vadd.f32 %v22749_v54, %v22748_v30 }
0x1552   :  { %v22650_v43 = vpop.f32.mrb[36].mxu0  ;;  %v22752_v2 = vadd.f32 %v22751_v19, %v22750_v15  ;;  %v31296_v19 = vld [vmem:[%s39272_s5 + $0x80] sm:$0xf] }
0x1553   :  { %v22753_v60 = vsel %vm74_vm0, %v22650_v43, 0.0  ;;  %v33824_v9 = vpop.f32.mrb[37].mxu0  ;;  %v31297_v43 = vld [vmem:[%s39272_s5 + $0x84] sm:$0xf] }
0x1554   :  { %v22754_v57 = vadd.f32 %v22753_v60, %v22752_v2  ;;  %v31298_v2 = vld [vmem:[%s39272_s5 + $0x88] sm:$0xf]  ;;  %v31299_v60 = vld [vmem:[%s39272_s5 + $0x8c] sm:$0xf]  ;;  %v38300_v9 = vld [vmem:[#allocation2] sm:$0xff] }
0x1556   :  { %v22756_v21 = vadd.f32 %v22755_v24, %v22754_v57  ;;  %v31300_v57 = vld [vmem:[%s39272_s5 + $0x90] sm:$0xf]  ;;  %v31301_v24 = vld [vmem:[%s39272_s5 + $0x94] sm:$0xf] }
0x1558   :  { %v22762_v40 = vadd.f32 %v22760_v58, %v22756_v21  ;;  %v31302_v21 = vld [vmem:[%s39272_s5 + $0x98] sm:$0xf] }
0x155a   :  { %v22764_v10 = vadd.f32 %v22762_v40, %v37154_v45  ;;  %v38149_v45 = vld [vmem:[%s39272_s5 + $0x60] sm:$0xf]  ;;  %v31303_v40 = vld [vmem:[%s39272_s5 + $0x9c] sm:$0xf] }
0x155b   :  { %33831 = vmatpush3.xpose.msk.msra.mxu0 %vm74_vm0, %v38149_v45 }
0x155c   :  { %v22768_v51 = vsel %vm74_vm0, %v22764_v10, 0.0  ;;  %33840 = vmatprep.subr.mxu0 %v34785_v14 }
0x155d   :  { %22769 = vadd.xlane.f32.xlu1 %v22768_v51  ;;  %v31304_v51 = vld [vmem:[%s39272_s5 + $0xa0] sm:$0xf] }
0x15da   :  { %v22767_v0 = vpop.xlane.xlu0 %22766 }
0x15db   :  { %v22771_v46 = vmul.f32 0.03125, %v22767_v0  ;;  %v31305_v0 = vld [vmem:[%s39272_s5 + $0xa4] sm:$0xf] }
0x15dd   :  { %v22773_v29 = vsub.f32 %v22763_v31, %v22771_v46  ;;  %v31306_v46 = vld [vmem:[%s39272_s5 + $0xa8] sm:$0xf] }
0x15df   :  { %v22775_v48 = vmul.f32 %v22773_v29, %v22773_v29  ;;  %v22803_v53 = vmul.f32 %v22802_v38, %v22773_v29  ;;  %v31307_v29 = vld [vmem:[%s39272_s5 + $0xac] sm:$0xf] }
0x15e1   :  { %v22777_v36 = vsel %vm74_vm0, %v22775_v48, 0.0  ;;  %v31308_v48 = vld [vmem:[%s39272_s5 + $0xb0] sm:$0xf] }
0x15e2   :  { %22778 = vadd.xlane.f32.xlu0 %v22777_v36  ;;  %v31309_v36 = vld [vmem:[%s39272_s5 + $0xb4] sm:$0xf] }
0x15ea   :  { %v22770_v41 = vpop.xlane.xlu1 %22769 }
0x15eb   :  { %v22772_v3 = vmul.f32 0.03125, %v22770_v41  ;;  %v31310_v41 = vld [vmem:[%s39272_s5 + $0xb8] sm:$0xf] }
0x15ed   :  { %v38141_v39 = vsub.f32 %v22764_v10, %v22772_v3  ;;  %v38362_v10 = vld [vmem:[#allocation2 + $0x8] sm:$0xff]  ;;  %v31311_v3 = vld [vmem:[%s39272_s5 + $0xbc] sm:$0xf] }
0x15ef   :  { %v22776_v37 = vmul.f32 %v38141_v39, %v38141_v39  ;;  %v22804_v30 = vmul.f32 %v22802_v38, %v38141_v39 }
0x15f1   :  { %v22780_v52 = vsel %vm74_vm0, %v22776_v37, 0.0 }
0x15f2   :  { %22781 = vadd.xlane.f32.xlu1 %v22780_v52 }
0x166f   :  { %v22779_v59 = vpop.xlane.xlu0 %22778 }
0x1670   :  { %v22783_v5 = vmul.f32 0.032258064, %v22779_v59 }
0x1672   :  { %34615 = vrsqrt.f32 %v22783_v5  ;;  %vm22787_vm7 = vcmp.eq.f32.partialorder %v22783_v5, inf  ;;  %v22790_v26 = vand.u32 2147483648, %v22783_v5  ;;  %vm22789_vm8 = vcmp.eq.f32.partialorder %v22783_v5, 0.0 }
0x167c   :  { %v34616_v28 = vpop.eup %34615 }
0x167d   :  { %v22786_v62 = vmul.f32 %v34616_v28, %v22783_v5 }
0x167f   :  { %v22788_v58 = vsel %vm22787_vm7, %v22783_v5, %v22786_v62  ;;  %v22782_v47 = vpop.xlane.xlu1 %22781 }
0x1680   :  { %v22791_v34 = vsel %vm22789_vm8, %v22790_v26, %v22788_v58  ;;  %v22784_v18 = vmul.f32 0.032258064, %v22782_v47 }
0x1681   :  { %v22805_v13 = vadd.f32 1e-06, %v22791_v34 }
0x1682   :  { %34617 = vrsqrt.f32 %v22784_v18  ;;  %vm22794_vm9 = vcmp.eq.f32.partialorder %v22784_v18, inf  ;;  %v22797_v55 = vand.u32 2147483648, %v22784_v18  ;;  %vm22796_vm10 = vcmp.eq.f32.partialorder %v22784_v18, 0.0 }
0x1683   :  { %34619 = vrcp.f32 %v22805_v13 }
0x168c   :  { %v34618_v33 = vpop.eup %34617 }
0x168d   :  { %v34620_v42 = vpop.eup %34619  ;;  %v22793_v56 = vmul.f32 %v34618_v33, %v22784_v18 }
0x168e   :  { %v22808_v63 = vmul.f32 %v34620_v42, %v22803_v53 }
0x168f   :  { %v22795_v1 = vsel %vm22794_vm9, %v22784_v18, %v22793_v56 }
0x1690   :  { %v38167_v31 = vadd.f32 %v22814_v49, %v22808_v63  ;;  %v22798_v61 = vsel %vm22796_vm10, %v22797_v55, %v22795_v1 }
0x1691   :  { %v22806_v7 = vadd.f32 1e-06, %v22798_v61 }
0x1692   :  { %33833 = vmatmul.mubr.msk.f32.vlgmr.msra.gmra.mrb[38].mxu0 %vm74_vm0, %v38167_v31  ;;  %33838 = vmatmul.mubr.msk.f32.vlgmr.msra.gmra.mrb[30].mxu1 %vm74_vm0, %v38167_v31 }
0x1693   :  { %34621 = vrcp.f32 %v22806_v7  ;;  %33841 = vmatpush3.xpose.msk.msra.mxu0 %vm74_vm0, %v31290_v4  ;;  %33846 = vmatpush3.xpose.msk.msra.mxu1 %vm74_vm0, %v31291_v22 }
0x1694   :  { %33842 = vmatprep.mubr.msk.f32.mxu0 %vm34786_vm1, %v34785_v14  ;;  %33847 = vmatprep.mubr.msk.f32.mxu1 %vm34786_vm1, %v34785_v14 }
0x1695   :  { %33850 = vmatprep.subr.mxu0 %v34785_v14  ;;  %33855 = vmatprep.subr.mxu1 %v34785_v14 }
0x1696   :  { %33843 = vmatmul.mubr.msk.f32.vlgmr.msra.gmra.mrb[40].mxu0 %vm74_vm0, %v38167_v31  ;;  %33848 = vmatmul.mubr.msk.f32.vlgmr.msra.gmra.mrb[32].mxu1 %vm74_vm0, %v38167_v31 }
0x1697   :  { %33851 = vmatpush3.xpose.msk.msra.mxu0 %vm74_vm0, %v31292_v6  ;;  %33856 = vmatpush3.xpose.msk.msra.mxu1 %vm74_vm0, %v31293_v17 }
0x1698   :  { %33852 = vmatprep.mubr.msk.f32.mxu0 %vm34786_vm1, %v34785_v14  ;;  %33857 = vmatprep.mubr.msk.f32.mxu1 %vm34786_vm1, %v34785_v14 }
0x1699   :  { %33860 = vmatprep.subr.mxu0 %v34785_v14  ;;  %33865 = vmatprep.subr.mxu1 %v34785_v14 }
0x169a   :  { %33853 = vmatmul.mubr.msk.f32.vlgmr.msra.gmra.mrb[42].mxu0 %vm74_vm0, %v38167_v31  ;;  %33858 = vmatmul.mubr.msk.f32.vlgmr.msra.gmra.mrb[34].mxu1 %vm74_vm0, %v38167_v31 }
0x169b   :  { %33861 = vmatpush3.xpose.msk.msra.mxu0 %vm74_vm0, %v31294_v11  ;;  %33866 = vmatpush3.xpose.msk.msra.mxu1 %vm74_vm0, %v31295_v20 }
0x169c   :  { %33862 = vmatprep.mubr.msk.f32.mxu0 %vm34786_vm1, %v34785_v14  ;;  %33867 = vmatprep.mubr.msk.f32.mxu1 %vm34786_vm1, %v34785_v14 }
0x169d   :  { %v34622_v54 = vpop.eup %34621  ;;  %33870 = vmatprep.subr.mxu0 %v34785_v14  ;;  %33875 = vmatprep.subr.mxu1 %v34785_v14 }
0x169e   :  { %v22810_v12 = vmul.f32 %v34622_v54, %v22804_v30  ;;  %33863 = vmatmul.mubr.msk.f32.vlgmr.msra.gmra.mrb[44].mxu0 %vm74_vm0, %v38167_v31  ;;  %33868 = vmatmul.mubr.msk.f32.vlgmr.msra.gmra.mrb[36].mxu1 %vm74_vm0, %v38167_v31  ;;  %v38555_v30 = vld [vmem:[%s39273_s6 + $0x20] ss:$0 sm:$0xff]  ;;  %v38560_v54 = vld [vmem:[%s39273_s6 + $0x21] ss:$0 sm:$0xff] }
0x169f   :  { %33871 = vmatpush3.xpose.msk.msra.mxu0 %vm74_vm0, %v38149_v45  ;;  %33876 = vmatpush3.xpose.msk.msra.mxu1 %vm74_vm0, %v38154_v50 }
0x16a0   :  { %v38232_v15 = vadd.f32 %v22814_v49, %v22810_v12  ;;  %33872 = vmatprep.mubr.msk.f32.mxu0 %vm34786_vm1, %v34785_v14  ;;  %33877 = vmatprep.mubr.msk.f32.mxu1 %vm34786_vm1, %v34785_v14 }
0x16a1   :  { %33880 = vmatprep.subr.mxu0 %v34785_v14  ;;  %33885 = vmatprep.subr.mxu1 %v34785_v14 }
0x16a2   :  { %33873 = vmatmul.mubr.msk.f32.vlgmr.msra.gmra.mrb[46].mxu0 %vm74_vm0, %v38232_v15  ;;  %33878 = vmatmul.mubr.msk.f32.vlgmr.msra.gmra.mrb[38].mxu1 %vm74_vm0, %v38232_v15 }
0x16a3   :  { %33881 = vmatpush3.xpose.msk.msra.mxu0 %vm74_vm0, %v31290_v4  ;;  %33886 = vmatpush3.xpose.msk.msra.mxu1 %vm74_vm0, %v31291_v22 }
0x16a4   :  { %33882 = vmatprep.mubr.msk.f32.mxu0 %vm34786_vm1, %v34785_v14  ;;  %33887 = vmatprep.mubr.msk.f32.mxu1 %vm34786_vm1, %v34785_v14 }
0x16a5   :  { %33890 = vmatprep.subr.mxu0 %v34785_v14  ;;  %33895 = vmatprep.subr.mxu1 %v34785_v14 }
0x16a6   :  { %33883 = vmatmul.mubr.msk.f32.vlgmr.msra.gmra.mrb[48].mxu0 %vm74_vm0, %v38232_v15  ;;  %33888 = vmatmul.mubr.msk.f32.vlgmr.msra.gmra.mrb[40].mxu1 %vm74_vm0, %v38232_v15 }
0x16a7   :  { %33891 = vmatpush3.xpose.msk.msra.mxu0 %vm74_vm0, %v31292_v6  ;;  %33896 = vmatpush3.xpose.msk.msra.mxu1 %vm74_vm0, %v31293_v17 }
0x16a8   :  { %33892 = vmatprep.mubr.msk.f32.mxu0 %vm34786_vm1, %v34785_v14  ;;  %33897 = vmatprep.mubr.msk.f32.mxu1 %vm34786_vm1, %v34785_v14 }
0x16a9   :  { %33900 = vmatprep.subr.mxu0 %v34785_v14  ;;  %33905 = vmatprep.subr.mxu1 %v34785_v14 }
0x16aa   :  { %33893 = vmatmul.mubr.msk.f32.vlgmr.msra.gmra.mrb[50].mxu0 %vm74_vm0, %v38232_v15  ;;  %33898 = vmatmul.mubr.msk.f32.vlgmr.msra.gmra.mrb[42].mxu1 %vm74_vm0, %v38232_v15 }
0x16ab   :  { %33901 = vmatpush3.xpose.msk.msra.mxu0 %vm74_vm0, %v31294_v11  ;;  %33906 = vmatpush3.xpose.msk.msra.mxu1 %vm74_vm0, %v31295_v20 }
0x16ac   :  { %33902 = vmatprep.mubr.msk.f32.mxu0 %vm34786_vm1, %v34785_v14  ;;  %33907 = vmatprep.mubr.msk.f32.mxu1 %vm34786_vm1, %v34785_v14 }
0x16ad   :  { %33910 = vmatprep.subr.mxu0 %v34785_v14  ;;  %33915 = vmatprep.subr.mxu1 %v34785_v14 }
0x16ae   :  { %33903 = vmatmul.mubr.msk.f32.vlgmr.msra.gmra.mrb[52].mxu0 %vm74_vm0, %v38232_v15  ;;  %33908 = vmatmul.mubr.msk.f32.vlgmr.msra.gmra.mrb[44].mxu1 %vm74_vm0, %v38232_v15 }
0x16af   :  { %33911 = vmatpush3.xpose.msk.msra.mxu0 %vm74_vm0, %v31296_v19  ;;  %33916 = vmatpush3.xpose.msk.msra.mxu1 %vm74_vm0, %v31297_v43 }
0x16b0   :  { %33912 = vmatprep.mubr.msk.f32.mxu0 %vm34786_vm1, %v34785_v14  ;;  %33917 = vmatprep.mubr.msk.f32.mxu1 %vm34786_vm1, %v34785_v14 }
0x16b1   :  { %33920 = vmatprep.subr.mxu0 %v34785_v14  ;;  %33925 = vmatprep.subr.mxu1 %v34785_v14 }
0x16b2   :  { %33913 = vmatmul.mubr.msk.f32.vlgmr.msra.gmra.mrb[54].mxu0 %vm74_vm0, %v38300_v9  ;;  %33918 = vmatmul.mubr.msk.f32.vlgmr.msra.gmra.mrb[46].mxu1 %vm74_vm0, %v38300_v9 }
0x16b3   :  { %33921 = vmatpush3.xpose.msk.msra.mxu0 %vm74_vm0, %v31298_v2  ;;  %33926 = vmatpush3.xpose.msk.msra.mxu1 %vm74_vm0, %v31299_v60 }
0x16b4   :  { %33922 = vmatprep.mubr.msk.f32.mxu0 %vm34786_vm1, %v34785_v14  ;;  %33927 = vmatprep.mubr.msk.f32.mxu1 %vm34786_vm1, %v34785_v14 }
0x16b5   :  { %33930 = vmatprep.subr.mxu0 %v34785_v14  ;;  %33935 = vmatprep.subr.mxu1 %v34785_v14 }
0x16b6   :  { %33923 = vmatmul.mubr.msk.f32.vlgmr.msra.gmra.mrb[56].mxu0 %vm74_vm0, %v38300_v9  ;;  %33928 = vmatmul.mubr.msk.f32.vlgmr.msra.gmra.mrb[48].mxu1 %vm74_vm0, %v38300_v9 }
0x16b7   :  { %33931 = vmatpush3.xpose.msk.msra.mxu0 %vm74_vm0, %v31300_v57  ;;  %33936 = vmatpush3.xpose.msk.msra.mxu1 %vm74_vm0, %v31301_v24 }
0x16b8   :  { %33932 = vmatprep.mubr.msk.f32.mxu0 %vm34786_vm1, %v34785_v14  ;;  %33937 = vmatprep.mubr.msk.f32.mxu1 %vm34786_vm1, %v34785_v14 }
0x16b9   :  { %33940 = vmatprep.subr.mxu0 %v34785_v14  ;;  %33945 = vmatprep.subr.mxu1 %v34785_v14 }
0x16ba   :  { %33933 = vmatmul.mubr.msk.f32.vlgmr.msra.gmra.mrb[58].mxu0 %vm74_vm0, %v38300_v9  ;;  %33938 = vmatmul.mubr.msk.f32.vlgmr.msra.gmra.mrb[50].mxu1 %vm74_vm0, %v38300_v9 }
0x16bb   :  { %33941 = vmatpush3.xpose.msk.msra.mxu0 %vm74_vm0, %v31302_v21  ;;  %33946 = vmatpush3.xpose.msk.msra.mxu1 %vm74_vm0, %v31303_v40 }
0x16bc   :  { %33942 = vmatprep.mubr.msk.f32.mxu0 %vm34786_vm1, %v34785_v14  ;;  %33947 = vmatprep.mubr.msk.f32.mxu1 %vm34786_vm1, %v34785_v14 }
0x16bd   :  { %33950 = vmatprep.subr.mxu0 %v34785_v14  ;;  %33955 = vmatprep.subr.mxu1 %v34785_v14 }
0x16be   :  { %33943 = vmatmul.mubr.msk.f32.vlgmr.msra.gmra.mrb[60].mxu0 %vm74_vm0, %v38300_v9  ;;  %33948 = vmatmul.mubr.msk.f32.vlgmr.msra.gmra.mrb[52].mxu1 %vm74_vm0, %v38300_v9 }
0x16bf   :  { %33951 = vmatpush3.xpose.msk.msra.mxu0 %vm74_vm0, %v31296_v19  ;;  %33956 = vmatpush3.xpose.msk.msra.mxu1 %vm74_vm0, %v31297_v43  ;;  %v38565_v43 = vld [vmem:[%s39273_s6 + $0x18] ss:$0 sm:$0xff] }
0x16c0   :  { %33952 = vmatprep.mubr.msk.f32.mxu0 %vm34786_vm1, %v34785_v14  ;;  %33957 = vmatprep.mubr.msk.f32.mxu1 %vm34786_vm1, %v34785_v14 }
0x16c1   :  { %33960 = vmatprep.subr.mxu0 %v34785_v14  ;;  %33965 = vmatprep.subr.mxu1 %v34785_v14 }
0x16c2   :  { %33953 = vmatmul.mubr.msk.f32.vlgmr.msra.gmra.mrb[62].mxu0 %vm74_vm0, %v38362_v10  ;;  %33958 = vmatmul.mubr.msk.f32.vlgmr.msra.gmra.mrb[54].mxu1 %vm74_vm0, %v38362_v10 }
0x16c3   :  { %33961 = vmatpush3.xpose.msk.msra.mxu0 %vm74_vm0, %v31298_v2  ;;  %33966 = vmatpush3.xpose.msk.msra.mxu1 %vm74_vm0, %v31299_v60  ;;  %v38570_v2 = vld [vmem:[%s39273_s6 + $0x19] ss:$0 sm:$0xff] }
0x16c4   :  { %33962 = vmatprep.mubr.msk.f32.mxu0 %vm34786_vm1, %v34785_v14  ;;  %33967 = vmatprep.mubr.msk.f32.mxu1 %vm34786_vm1, %v34785_v14 }
0x16c5   :  { %33970 = vmatprep.subr.mxu0 %v34785_v14  ;;  %33975 = vmatprep.subr.mxu1 %v34785_v14 }
0x16c6   :  { %33963 = vmatmul.mubr.msk.f32.vlgmr.msra.gmra.mrb[64].mxu0 %vm74_vm0, %v38362_v10  ;;  %33968 = vmatmul.mubr.msk.f32.vlgmr.msra.gmra.mrb[56].mxu1 %vm74_vm0, %v38362_v10 }
0x16c7   :  { %33971 = vmatpush3.xpose.msk.msra.mxu0 %vm74_vm0, %v31300_v57  ;;  %33976 = vmatpush3.xpose.msk.msra.mxu1 %vm74_vm0, %v31301_v24 }
0x16c8   :  { %33972 = vmatprep.mubr.msk.f32.mxu0 %vm34786_vm1, %v34785_v14  ;;  %33977 = vmatprep.mubr.msk.f32.mxu1 %vm34786_vm1, %v34785_v14 }
0x16c9   :  { %33980 = vmatprep.subr.mxu0 %v34785_v14  ;;  %33985 = vmatprep.subr.mxu1 %v34785_v14 }
0x16ca   :  { %33973 = vmatmul.mubr.msk.f32.vlgmr.msra.gmra.mrb[66].mxu0 %vm74_vm0, %v38362_v10  ;;  %33978 = vmatmul.mubr.msk.f32.vlgmr.msra.gmra.mrb[58].mxu1 %vm74_vm0, %v38362_v10 }
0x16cb   :  { %33981 = vmatpush3.xpose.msk.msra.mxu0 %vm74_vm0, %v31302_v21  ;;  %33986 = vmatpush3.xpose.msk.msra.mxu1 %vm74_vm0, %v31303_v40  ;;  %v38577_v21 = vld [vmem:[%s39273_s6 + $0x22] ss:$0 sm:$0xff]  ;;  %v38582_v40 = vld [vmem:[%s39273_s6 + $0x23] ss:$0 sm:$0xff] }
0x16cc   :  { %33982 = vmatprep.mubr.msk.f32.mxu0 %vm34786_vm1, %v34785_v14  ;;  %33987 = vmatprep.mubr.msk.f32.mxu1 %vm34786_vm1, %v34785_v14 }
0x16cd   :  { %33990 = vmatprep.subr.mxu0 %v34785_v14  ;;  %33995 = vmatprep.subr.mxu1 %v34785_v14 }
0x16ce   :  { %33983 = vmatmul.mubr.msk.f32.vlgmr.msra.gmra.mrb[68].mxu0 %vm74_vm0, %v38362_v10  ;;  %33988 = vmatmul.mubr.msk.f32.vlgmr.msra.gmra.mrb[60].mxu1 %vm74_vm0, %v38362_v10 }
0x16cf   :  { %33992 = vmatprep.mubr.msk.f32.mxu0 %vm34786_vm1, %v34785_v14  ;;  %33997 = vmatprep.mubr.msk.f32.mxu1 %vm34786_vm1, %v34785_v14 }
0x16d0   :  { %33991 = vmatpush3.xpose.msk.msra.mxu0 %vm74_vm0, %v31304_v51  ;;  %33996 = vmatpush3.xpose.msk.msra.mxu1 %vm74_vm0, %v31305_v0 }
0x16d1   :  { %34000 = vmatprep.subr.mxu0 %v34785_v14  ;;  %34005 = vmatprep.subr.mxu1 %v34785_v14 }
0x16d3   :  { %33993 = vmatmul.mubr.msk.f32.vlgmr.msra.gmra.mrb[70].mxu0 %vm74_vm0, %v38300_v9  ;;  %33998 = vmatmul.mubr.msk.f32.vlgmr.msra.gmra.mrb[62].mxu1 %vm74_vm0, %v38300_v9 }
0x16d4   :  { %34001 = vmatpush3.xpose.msk.msra.mxu0 %vm74_vm0, %v31306_v46  ;;  %34006 = vmatpush3.xpose.msk.msra.mxu1 %vm74_vm0, %v31307_v29 }
0x16d5   :  { %34002 = vmatprep.mubr.msk.f32.mxu0 %vm34786_vm1, %v34785_v14  ;;  %34007 = vmatprep.mubr.msk.f32.mxu1 %vm34786_vm1, %v34785_v14 }
0x16d6   :  { %34010 = vmatprep.subr.mxu0 %v34785_v14  ;;  %34015 = vmatprep.subr.mxu1 %v34785_v14 }
0x16d7   :  { %34003 = vmatmul.mubr.msk.f32.vlgmr.msra.gmra.mrb[72].mxu0 %vm74_vm0, %v38300_v9  ;;  %34008 = vmatmul.mubr.msk.f32.vlgmr.msra.gmra.mrb[64].mxu1 %vm74_vm0, %v38300_v9 }
0x16d8   :  { %34011 = vmatpush3.xpose.msk.msra.mxu0 %vm74_vm0, %v31308_v48  ;;  %34016 = vmatpush3.xpose.msk.msra.mxu1 %vm74_vm0, %v31309_v36 }
0x16d9   :  { %34012 = vmatprep.mubr.msk.f32.mxu0 %vm34786_vm1, %v34785_v14  ;;  %34017 = vmatprep.mubr.msk.f32.mxu1 %vm34786_vm1, %v34785_v14 }
0x16da   :  { %34020 = vmatprep.subr.mxu0 %v34785_v14  ;;  %34025 = vmatprep.subr.mxu1 %v34785_v14 }
0x16db   :  { %34013 = vmatmul.mubr.msk.f32.vlgmr.msra.gmra.mrb[74].mxu0 %vm74_vm0, %v38300_v9  ;;  %34018 = vmatmul.mubr.msk.f32.vlgmr.msra.gmra.mrb[66].mxu1 %vm74_vm0, %v38300_v9 }
0x16dc   :  { %34021 = vmatpush3.xpose.msk.msra.mxu0 %vm74_vm0, %v31310_v41  ;;  %34026 = vmatpush3.xpose.msk.msra.mxu1 %vm74_vm0, %v31311_v3 }
0x16dd   :  { %34022 = vmatprep.mubr.msk.f32.mxu0 %vm34786_vm1, %v34785_v14  ;;  %34027 = vmatprep.mubr.msk.f32.mxu1 %vm34786_vm1, %v34785_v14 }
0x16de   :  { %34030 = vmatprep.subr.mxu0 %v34785_v14  ;;  %34035 = vmatprep.subr.mxu1 %v34785_v14 }
0x16df   :  { %34023 = vmatmul.mubr.msk.f32.vlgmr.msra.gmra.mrb[76].mxu0 %vm74_vm0, %v38300_v9  ;;  %34028 = vmatmul.mubr.msk.f32.vlgmr.msra.gmra.mrb[68].mxu1 %vm74_vm0, %v38300_v9 }
0x16e0   :  { %34031 = vmatpush3.xpose.msk.msra.mxu0 %vm74_vm0, %v31304_v51  ;;  %34036 = vmatpush3.xpose.msk.msra.mxu1 %vm74_vm0, %v31305_v0 }
0x16e1   :  { %34032 = vmatprep.mubr.msk.f32.mxu0 %vm34786_vm1, %v34785_v14  ;;  %34037 = vmatprep.mubr.msk.f32.mxu1 %vm34786_vm1, %v34785_v14 }
0x16e2   :  { %34040 = vmatprep.subr.mxu0 %v34785_v14  ;;  %34045 = vmatprep.subr.mxu1 %v34785_v14 }
0x16e3   :  { %34033 = vmatmul.mubr.msk.f32.vlgmr.msra.gmra.mrb[78].mxu0 %vm74_vm0, %v38362_v10  ;;  %34038 = vmatmul.mubr.msk.f32.vlgmr.msra.gmra.mrb[70].mxu1 %vm74_vm0, %v38362_v10 }
0x16e4   :  { %34041 = vmatpush3.xpose.msk.msra.mxu0 %vm74_vm0, %v31306_v46  ;;  %34046 = vmatpush3.xpose.msk.msra.mxu1 %vm74_vm0, %v31307_v29  ;;  %v38593_v29 = vld [vmem:[%s39273_s6 + $0x1a] ss:$0 sm:$0xff] }
0x16e5   :  { %34042 = vmatprep.mubr.msk.f32.mxu0 %vm34786_vm1, %v34785_v14  ;;  %34047 = vmatprep.mubr.msk.f32.mxu1 %vm34786_vm1, %v34785_v14 }
0x16e6   :  { %34050 = vmatprep.subr.mxu0 %v34785_v14  ;;  %34055 = vmatprep.subr.mxu1 %v34785_v14 }
0x16e7   :  { %34043 = vmatmul.mubr.msk.f32.vlgmr.msra.gmra.mrb[80].mxu0 %vm74_vm0, %v38362_v10  ;;  %34048 = vmatmul.mubr.msk.f32.vlgmr.msra.gmra.mrb[72].mxu1 %vm74_vm0, %v38362_v10 }
0x16e8   :  { %34051 = vmatpush3.xpose.msk.msra.mxu0 %vm74_vm0, %v31308_v48  ;;  %34056 = vmatpush3.xpose.msk.msra.mxu1 %vm74_vm0, %v31309_v36  ;;  %v38598_v48 = vld [vmem:[%s39273_s6 + $0x1b] ss:$0 sm:$0xff] }
0x16e9   :  { %34052 = vmatprep.mubr.msk.f32.mxu0 %vm34786_vm1, %v34785_v14  ;;  %34057 = vmatprep.mubr.msk.f32.mxu1 %vm34786_vm1, %v34785_v14 }
0x16ea   :  { %34060 = vmatprep.subr.mxu0 %v34785_v14  ;;  %34065 = vmatprep.subr.mxu1 %v34785_v14 }
0x16eb   :  { %34053 = vmatmul.mubr.msk.f32.vlgmr.msra.gmra.mrb[82].mxu0 %vm74_vm0, %v38362_v10  ;;  %34058 = vmatmul.mubr.msk.f32.vlgmr.msra.gmra.mrb[74].mxu1 %vm74_vm0, %v38362_v10 }
0x16ec   :  { %34061 = vmatpush3.xpose.msk.msra.mxu0 %vm74_vm0, %v31310_v41  ;;  %34066 = vmatpush3.xpose.msk.msra.mxu1 %vm74_vm0, %v31311_v3 }
0x16ed   :  { %34062 = vmatprep.mubr.msk.f32.mxu0 %vm34786_vm1, %v34785_v14  ;;  %34067 = vmatprep.mubr.msk.f32.mxu1 %vm34786_vm1, %v34785_v14 }
0x16ee   :  { %34070 = vmatprep.subr.mxu0 %v34785_v14  ;;  %34075 = vmatprep.subr.mxu1 %v34785_v14 }
0x16ef   :  { %34063 = vmatmul.mubr.msk.f32.vlgmr.msra.gmra.mrb[84].mxu0 %vm74_vm0, %v38362_v10  ;;  %34068 = vmatmul.mubr.msk.f32.vlgmr.msra.gmra.mrb[76].mxu1 %vm74_vm0, %v38362_v10 }
0x16f0   :  { %34072 = vmatprep.mubr.msk.f32.mxu0 %vm34786_vm1, %v34785_v14  ;;  %34077 = vmatprep.mubr.msk.f32.mxu1 %vm34786_vm1, %v34785_v14 }
0x1765   :  { %v23000_v39 = vpop.f32.mrb[38].mxu0  ;;  %v23073_v37 = vpop.f32.mrb[30].mxu1 }
0x1766   :  { %v33834_v52 = vpop.f32.mrb[39].mxu0  ;;  %v33839_v45 = vpop.f32.mrb[31].mxu1  ;;  %v23001_v10 = vadd.f32 %v38565_v43, %v23000_v39  ;;  %v23074_v51 = vadd.f32 %v38570_v2, %v23073_v37  ;;  %v38607_v37 = vld [vmem:[%s39273_s6 + $0x24] ss:$0 sm:$0xff] }
0x1767   :  { %v38612_v52 = vld [vmem:[%s39273_s6 + $0x25] ss:$0 sm:$0xff] }
0x1769   :  { %v23146_v50 = vpop.f32.mrb[40].mxu0  ;;  %v23219_v59 = vpop.f32.mrb[32].mxu1 }
0x176a   :  { %v33844_v5 = vpop.f32.mrb[41].mxu0  ;;  %v33849_v28 = vpop.f32.mrb[33].mxu1  ;;  %v23147_v45 = vadd.f32 %v38593_v29, %v23146_v50 }
0x176b   :  { %v23220_v5 = vadd.f32 %v38598_v48, %v23219_v59 }
0x176d   :  { %v38528_v62 = vpop.f32.mrb[42].mxu0  ;;  %v38530_v26 = vpop.f32.mrb[34].mxu1 }
0x176e   :  { %v33854_v58 = vpop.f32.mrb[43].mxu0  ;;  %v33859_v47 = vpop.f32.mrb[35].mxu1 }
0x176f   :  { %v38625_v47 = vld [vmem:[%s39273_s6 + $0x1c] ss:$0 sm:$0xff] }
0x1771   :  { %v38532_v34 = vpop.f32.mrb[44].mxu0  ;;  %v38534_v18 = vpop.f32.mrb[36].mxu1 }
0x1772   :  { %v33864_v13 = vpop.f32.mrb[45].mxu0  ;;  %v33869_v38 = vpop.f32.mrb[37].mxu1 }
0x1773   :  { %v38630_v13 = vld [vmem:[%s39273_s6 + $0x1d] ss:$0 sm:$0xff] }
0x1775   :  { %v38536_v33 = vpop.f32.mrb[46].mxu0  ;;  %v38538_v49 = vpop.f32.mrb[38].mxu1 }
0x1776   :  { %v33874_v53 = vpop.f32.mrb[47].mxu0  ;;  %v33879_v42 = vpop.f32.mrb[39].mxu1 }
0x1777   :  { %v38641_v42 = vld [vmem:[%s39273_s6 + $0x26] ss:$0 sm:$0xff] }
0x1779   :  { %v38540_v56 = vpop.f32.mrb[48].mxu0  ;;  %v38542_v63 = vpop.f32.mrb[40].mxu1 }
0x177a   :  { %v33884_v55 = vpop.f32.mrb[49].mxu0  ;;  %v33889_v1 = vpop.f32.mrb[41].mxu1 }
0x177b   :  { %v38646_v55 = vld [vmem:[%s39273_s6 + $0x27] ss:$0 sm:$0xff]  ;;  %v23293_v1 = vadd.f32 %v38625_v47, %v38528_v62  ;;  %v38666_v62 = vld [vmem:[%s39273_s6 + $0x1f] ss:$0 sm:$0xff] }
0x177d   :  { %v38544_v61 = vpop.f32.mrb[50].mxu0  ;;  %v38546_v4 = vpop.f32.mrb[42].mxu1 }
0x177e   :  { %v33894_v22 = vpop.f32.mrb[51].mxu0  ;;  %v33899_v7 = vpop.f32.mrb[43].mxu1 }
0x177f   :  { %v23366_v22 = vadd.f32 %v38630_v13, %v38530_v26 }
0x1781   :  { %v38548_v6 = vpop.f32.mrb[52].mxu0  ;;  %v38550_v17 = vpop.f32.mrb[44].mxu1 }
0x1782   :  { %v33904_v11 = vpop.f32.mrb[53].mxu0  ;;  %v33909_v20 = vpop.f32.mrb[45].mxu1 }
0x1783   :  { %v38661_v20 = vld [vmem:[%s39273_s6 + $0x1e] ss:$0 sm:$0xff] }
0x1785   :  { %v24195_v12 = vpop.f32.mrb[54].mxu0  ;;  %v24268_v19 = vpop.f32.mrb[46].mxu1 }
0x1786   :  { %v24196_v60 = vadd.f32 %v38555_v30, %v24195_v12  ;;  %v24269_v9 = vadd.f32 %v38560_v54, %v24268_v19  ;;  %v33914_v57 = vpop.f32.mrb[55].mxu0  ;;  %v33919_v24 = vpop.f32.mrb[47].mxu1 }
0x1787   :  { %v23512_v57 = vadd.f32 %v38666_v62, %v38534_v18  ;;  %v23655_v18 = vadd.f32 %v38570_v2, %v38538_v49  ;;  %v23795_v49 = vadd.f32 %v38598_v48, %v38542_v63  ;;  %v23935_v63 = vadd.f32 %v38630_v13, %v38546_v4 }
0x1788   :  { %34071 = vmatpush3.xpose.msk.msra.mxu0 %vm3756_vm2, %v24196_v60  ;;  %34076 = vmatpush3.xpose.msk.msra.mxu1 %vm3756_vm2, %v24269_v9  ;;  %v23439_v9 = vadd.f32 %v38661_v20, %v38532_v34  ;;  %v23585_v34 = vadd.f32 %v38565_v43, %v38536_v33  ;;  %v23725_v33 = vadd.f32 %v38593_v29, %v38540_v56 }
0x1789   :  { %v24341_v0 = vpop.f32.mrb[56].mxu0  ;;  %v24414_v46 = vpop.f32.mrb[48].mxu1  ;;  %34080 = vmatprep.subr.mxu0 %v34785_v14  ;;  %34085 = vmatprep.subr.mxu1 %v34785_v14  ;;  %v23865_v56 = vadd.f32 %v38625_v47, %v38544_v61  ;;  %v24005_v61 = vadd.f32 %v38661_v20, %v38548_v6  ;;  %v24075_v4 = vadd.f32 %v38666_v62, %v38550_v17  ;;  %v31424_v6 = vld [vmem:[%s39273_s6 + $0x28] ss:$0 sm:$0xff]  ;;  %v31425_v17 = vld [vmem:[%s39273_s6 + $0x29] ss:$0 sm:$0xff] }
0x178a   :  { %v24342_v36 = vadd.f32 %v38577_v21, %v24341_v0  ;;  %v24415_v41 = vadd.f32 %v38582_v40, %v24414_v46  ;;  %v33924_v3 = vpop.f32.mrb[57].mxu0  ;;  %v33929_v39 = vpop.f32.mrb[49].mxu1 }
0x178b   :  { %34073 = vmatmul.mubr.msk.f32.vlgmr.msra.gmra.mrb[86].mxu0 %vm3756_vm2, %v23001_v10  ;;  %34078 = vmatmul.mubr.msk.f32.vlgmr.msra.gmra.mrb[78].mxu1 %vm3756_vm2, %v23074_v51 }
0x178c   :  { %34081 = vmatpush3.xpose.msk.msra.mxu0 %vm3756_vm2, %v24342_v36  ;;  %34086 = vmatpush3.xpose.msk.msra.mxu1 %vm3756_vm2, %v24415_v41 }
0x178d   :  { %v24487_v28 = vpop.f32.mrb[58].mxu0  ;;  %v24560_v58 = vpop.f32.mrb[50].mxu1  ;;  %34082 = vmatprep.mubr.msk.f32.mxu0 %vm34786_vm1, %v34785_v14  ;;  %34087 = vmatprep.mubr.msk.f32.mxu1 %vm34786_vm1, %v34785_v14 }
0x178e   :  { %v24488_v50 = vadd.f32 %v38607_v37, %v24487_v28  ;;  %v24561_v59 = vadd.f32 %v38612_v52, %v24560_v58  ;;  %v33934_v38 = vpop.f32.mrb[59].mxu0  ;;  %v33939_v53 = vpop.f32.mrb[51].mxu1  ;;  %34090 = vmatprep.subr.mxu0 %v34785_v14  ;;  %34095 = vmatprep.subr.mxu1 %v34785_v14 }
0x178f   :  { %34083 = vmatmul.mubr.msk.f32.vlgmr.msra.gmra.mrb[88].mxu0 %vm3756_vm2, %v23147_v45  ;;  %34088 = vmatmul.mubr.msk.f32.vlgmr.msra.gmra.mrb[80].mxu1 %vm3756_vm2, %v23220_v5 }
0x1790   :  { %34091 = vmatpush3.xpose.msk.msra.mxu0 %vm3756_vm2, %v24488_v50  ;;  %34096 = vmatpush3.xpose.msk.msra.mxu1 %vm3756_vm2, %v24561_v59 }
0x1791   :  { %v24633_v7 = vpop.f32.mrb[60].mxu0  ;;  %v24706_v11 = vpop.f32.mrb[52].mxu1  ;;  %34092 = vmatprep.mubr.msk.f32.mxu0 %vm34786_vm1, %v34785_v14  ;;  %34097 = vmatprep.mubr.msk.f32.mxu1 %vm34786_vm1, %v34785_v14 }
0x1792   :  { %v24634_v26 = vadd.f32 %v38641_v42, %v24633_v7  ;;  %v24707_v12 = vadd.f32 %v38646_v55, %v24706_v11  ;;  %v33944_v19 = vpop.f32.mrb[61].mxu0  ;;  %v33949_v60 = vpop.f32.mrb[53].mxu1  ;;  %34100 = vmatprep.subr.mxu0 %v34785_v14  ;;  %34105 = vmatprep.subr.mxu1 %v34785_v14 }
0x1793   :  { %34093 = vmatmul.mubr.msk.f32.vlgmr.msra.gmra.mrb[90].mxu0 %vm3756_vm2, %v23293_v1  ;;  %34098 = vmatmul.mubr.msk.f32.vlgmr.msra.gmra.mrb[82].mxu1 %vm3756_vm2, %v23366_v22 }
0x1794   :  { %34101 = vmatpush3.xpose.msk.msra.mxu0 %vm3756_vm2, %v24634_v26  ;;  %34106 = vmatpush3.xpose.msk.msra.mxu1 %vm3756_vm2, %v24707_v12 }
0x1795   :  { %v24776_v24 = vpop.f32.mrb[62].mxu0  ;;  %v24846_v10 = vpop.f32.mrb[54].mxu1  ;;  %34102 = vmatprep.mubr.msk.f32.mxu0 %vm34786_vm1, %v34785_v14  ;;  %34107 = vmatprep.mubr.msk.f32.mxu1 %vm34786_vm1, %v34785_v14 }
0x1796   :  { %v24777_v51 = vadd.f32 %v38555_v30, %v24776_v24  ;;  %v24847_v0 = vadd.f32 %v38560_v54, %v24846_v10  ;;  %v33954_v46 = vpop.f32.mrb[63].mxu0  ;;  %v33959_v36 = vpop.f32.mrb[55].mxu1  ;;  %34110 = vmatprep.subr.mxu0 %v34785_v14  ;;  %34115 = vmatprep.subr.mxu1 %v34785_v14 }
0x1797   :  { %34103 = vmatmul.mubr.msk.f32.vlgmr.msra.gmra.mrb[92].mxu0 %vm3756_vm2, %v23439_v9  ;;  %34108 = vmatmul.mubr.msk.f32.vlgmr.msra.gmra.mrb[84].mxu1 %vm3756_vm2, %v23512_v57 }
0x1798   :  { %34111 = vmatpush3.xpose.msk.msra.mxu0 %vm3756_vm2, %v24777_v51  ;;  %34116 = vmatpush3.xpose.msk.msra.mxu1 %vm3756_vm2, %v24847_v0 }
0x1799   :  { %v24916_v30 = vpop.f32.mrb[64].mxu0  ;;  %v24986_v54 = vpop.f32.mrb[56].mxu1  ;;  %34112 = vmatprep.mubr.msk.f32.mxu0 %vm34786_vm1, %v34785_v14  ;;  %34117 = vmatprep.mubr.msk.f32.mxu1 %vm34786_vm1, %v34785_v14 }
0x179a   :  { %v24917_v41 = vadd.f32 %v38577_v21, %v24916_v30  ;;  %v24987_v3 = vadd.f32 %v38582_v40, %v24986_v54  ;;  %v33964_v39 = vpop.f32.mrb[65].mxu0  ;;  %v33969_v45 = vpop.f32.mrb[57].mxu1  ;;  %34120 = vmatprep.subr.mxu0 %v34785_v14  ;;  %34125 = vmatprep.subr.mxu1 %v34785_v14 }
0x179b   :  { %34113 = vmatmul.mubr.msk.f32.vlgmr.msra.gmra.mrb[94].mxu0 %vm3756_vm2, %v23585_v34  ;;  %34118 = vmatmul.mubr.msk.f32.vlgmr.msra.gmra.mrb[86].mxu1 %vm3756_vm2, %v23655_v18 }
0x179c   :  { %34121 = vmatpush3.xpose.msk.msra.mxu0 %vm3756_vm2, %v24917_v41  ;;  %34126 = vmatpush3.xpose.msk.msra.mxu1 %vm3756_vm2, %v24987_v3 }
0x179d   :  { %v25056_v43 = vpop.f32.mrb[66].mxu0  ;;  %v25126_v2 = vpop.f32.mrb[58].mxu1  ;;  %34122 = vmatprep.mubr.msk.f32.mxu0 %vm34786_vm1, %v34785_v14  ;;  %34127 = vmatprep.mubr.msk.f32.mxu1 %vm34786_vm1, %v34785_v14 }
0x179e   :  { %v25057_v21 = vadd.f32 %v38607_v37, %v25056_v43  ;;  %v25127_v40 = vadd.f32 %v38612_v52, %v25126_v2  ;;  %v33974_v5 = vpop.f32.mrb[67].mxu0  ;;  %v33979_v28 = vpop.f32.mrb[59].mxu1  ;;  %34130 = vmatprep.subr.mxu0 %v34785_v14  ;;  %34135 = vmatprep.subr.mxu1 %v34785_v14 }
0x179f   :  { %34123 = vmatmul.mubr.msk.f32.vlgmr.msra.gmra.mrb[96].mxu0 %vm3756_vm2, %v23725_v33  ;;  %34128 = vmatmul.mubr.msk.f32.vlgmr.msra.gmra.mrb[88].mxu1 %vm3756_vm2, %v23795_v49 }
0x17a0   :  { %34131 = vmatpush3.xpose.msk.msra.mxu0 %vm3756_vm2, %v25057_v21  ;;  %34136 = vmatpush3.xpose.msk.msra.mxu1 %vm3756_vm2, %v25127_v40 }
0x17a1   :  { %v25196_v29 = vpop.f32.mrb[68].mxu0  ;;  %v25266_v48 = vpop.f32.mrb[60].mxu1  ;;  %34132 = vmatprep.mubr.msk.f32.mxu0 %vm34786_vm1, %v34785_v14  ;;  %34137 = vmatprep.mubr.msk.f32.mxu1 %vm34786_vm1, %v34785_v14 }
0x17a2   :  { %v25197_v37 = vadd.f32 %v38641_v42, %v25196_v29  ;;  %v25267_v52 = vadd.f32 %v38646_v55, %v25266_v48  ;;  %v33984_v58 = vpop.f32.mrb[69].mxu0  ;;  %v33989_v50 = vpop.f32.mrb[61].mxu1  ;;  %34140 = vmatprep.subr.mxu0 %v34785_v14  ;;  %34145 = vmatprep.subr.mxu1 %v34785_v14 }
0x17a3   :  { %34133 = vmatmul.mubr.msk.f32.vlgmr.msra.gmra.mrb[98].mxu0 %vm3756_vm2, %v23865_v56  ;;  %34138 = vmatmul.mubr.msk.f32.vlgmr.msra.gmra.mrb[90].mxu1 %vm3756_vm2, %v23935_v63 }
0x17a4   :  { %34141 = vmatpush3.xpose.msk.msra.mxu0 %vm3756_vm2, %v25197_v37  ;;  %34146 = vmatpush3.xpose.msk.msra.mxu1 %vm3756_vm2, %v25267_v52 }
0x17a5   :  { %34142 = vmatprep.mubr.msk.f32.mxu0 %vm34786_vm1, %v34785_v14  ;;  %34147 = vmatprep.mubr.msk.f32.mxu1 %vm34786_vm1, %v34785_v14 }
0x17a6   :  { %34150 = vmatprep.subr.mxu0 %v34785_v14  ;;  %34155 = vmatprep.subr.mxu1 %v34785_v14  ;;  %v25387_v47 = vpop.f32.mrb[70].mxu0  ;;  %v25460_v13 = vpop.f32.mrb[62].mxu1 }
0x17a7   :  { %34143 = vmatmul.mubr.msk.f32.vlgmr.msra.gmra.mrb[100].mxu0 %vm3756_vm2, %v24005_v61  ;;  %34148 = vmatmul.mubr.msk.f32.vlgmr.msra.gmra.mrb[92].mxu1 %vm3756_vm2, %v24075_v4  ;;  %v25388_v59 = vadd.f32 %v31424_v6, %v25387_v47  ;;  %v33994_v38 = vpop.f32.mrb[71].mxu0  ;;  %v25461_v53 = vadd.f32 %v31425_v17, %v25460_v13  ;;  %v33999_v42 = vpop.f32.mrb[63].mxu1 }
0x17a8   :  { %34152 = vmatprep.mubr.msk.f32.mxu0 %vm34786_vm1, %v34785_v14  ;;  %34157 = vmatprep.mubr.msk.f32.mxu1 %vm34786_vm1, %v34785_v14 }
0x17a9   :  { %34151 = vmatpush3.msra.mxu0 %v25388_v59  ;;  %34156 = vmatpush3.msra.mxu1 %v25461_v53 }
0x17aa   :  { %v38762_v55 = vpop.f32.mrb[72].mxu0  ;;  %v38764_v1 = vpop.f32.mrb[64].mxu1  ;;  %34160 = vmatprep.subr.mxu0 %v34785_v14  ;;  %34165 = vmatprep.subr.mxu1 %v34785_v14 }
0x17ab   :  { %v34004_v22 = vpop.f32.mrb[73].mxu0  ;;  %v34009_v7 = vpop.f32.mrb[65].mxu1 }
0x17ae   :  { %v38768_v11 = vpop.f32.mrb[74].mxu0  ;;  %v38770_v20 = vpop.f32.mrb[66].mxu1 }
0x17af   :  { %v34014_v62 = vpop.f32.mrb[75].mxu0  ;;  %v34019_v26 = vpop.f32.mrb[67].mxu1 }
0x17b2   :  { %v38772_v12 = vpop.f32.mrb[76].mxu0  ;;  %v38774_v19 = vpop.f32.mrb[68].mxu1 }
0x17b3   :  { %v34024_v60 = vpop.f32.mrb[77].mxu0  ;;  %v34029_v9 = vpop.f32.mrb[69].mxu1 }
0x17b6   :  { %v25968_v57 = vpop.f32.mrb[78].mxu0  ;;  %v26038_v24 = vpop.f32.mrb[70].mxu1 }
0x17b7   :  { %v38776_v10 = vadd.f32 %v31424_v6, %v25968_v57  ;;  %v34034_v51 = vpop.f32.mrb[79].mxu0  ;;  %v38778_v0 = vadd.f32 %v31425_v17, %v26038_v24  ;;  %v34039_v46 = vpop.f32.mrb[71].mxu1 }
0x17ba   :  { %v38780_v36 = vpop.f32.mrb[80].mxu0  ;;  %v38782_v34 = vpop.f32.mrb[72].mxu1 }
0x17bb   :  { %v34044_v18 = vpop.f32.mrb[81].mxu0  ;;  %v34049_v30 = vpop.f32.mrb[73].mxu1 }
0x17be   :  { %v38784_v54 = vpop.f32.mrb[82].mxu0  ;;  %v38786_v41 = vpop.f32.mrb[74].mxu1 }
0x17bf   :  { %v34054_v3 = vpop.f32.mrb[83].mxu0  ;;  %v34059_v39 = vpop.f32.mrb[75].mxu1 }
0x17c2   :  { %v38788_v45 = vpop.f32.mrb[84].mxu0  ;;  %v38790_v33 = vpop.f32.mrb[76].mxu1 }
0x17c3   :  { %v34064_v49 = vpop.f32.mrb[85].mxu0  ;;  %v34069_v43 = vpop.f32.mrb[77].mxu1 }
0x185e   :  { %v38792_v2 = vpop.f32.mrb[86].mxu0  ;;  %v38794_v21 = vpop.f32.mrb[78].mxu1 }
0x185f   :  { %v34074_v40 = vpop.f32.mrb[87].mxu0  ;;  %v34079_v5 = vpop.f32.mrb[79].mxu1  ;;  %v27681_v28 = vsel %vm4973_vm3, %v38794_v21, -inf  ;;  %v27678_v56 = vsel %vm4973_vm3, %v38792_v2, -inf }
0x1860   :  { %27682 = vmax.xlane.f32.xlu1 %v27681_v28  ;;  %27679 = vmax.xlane.f32.xlu0 %v27678_v56 }
0x1862   :  { %v38800_v63 = vpop.f32.mrb[88].mxu0  ;;  %v38802_v29 = vpop.f32.mrb[80].mxu1 }
0x1863   :  { %v34084_v48 = vpop.f32.mrb[89].mxu0  ;;  %v34089_v37 = vpop.f32.mrb[81].mxu1  ;;  %v27687_v52 = vsel %vm4973_vm3, %v38802_v29, -inf  ;;  %v27684_v58 = vsel %vm4973_vm3, %v38800_v63, -inf }
0x1864   :  { %27688 = vmax.xlane.f32.xlu1 %v27687_v52  ;;  %27685 = vmax.xlane.f32.xlu0 %v27684_v58 }
0x1866   :  { %v38808_v50 = vpop.f32.mrb[90].mxu0  ;;  %v38810_v61 = vpop.f32.mrb[82].mxu1 }
0x1867   :  { %v34094_v4 = vpop.f32.mrb[91].mxu0  ;;  %v34099_v6 = vpop.f32.mrb[83].mxu1  ;;  %v27693_v17 = vsel %vm4973_vm3, %v38810_v61, -inf  ;;  %v27690_v47 = vsel %vm4973_vm3, %v38808_v50, -inf }
0x1868   :  { %27694 = vmax.xlane.f32.xlu1 %v27693_v17  ;;  %27691 = vmax.xlane.f32.xlu0 %v27690_v47 }
0x186a   :  { %v38816_v13 = vpop.f32.mrb[92].mxu0  ;;  %v38818_v59 = vpop.f32.mrb[84].mxu1 }
0x186b   :  { %v34104_v38 = vpop.f32.mrb[93].mxu0  ;;  %v34109_v53 = vpop.f32.mrb[85].mxu1  ;;  %v27699_v42 = vsel %vm4973_vm3, %v38818_v59, -inf  ;;  %v27696_v22 = vsel %vm4973_vm3, %v38816_v13, -inf }
0x186c   :  { %27700 = vmax.xlane.f32.xlu1 %v27699_v42  ;;  %27697 = vmax.xlane.f32.xlu0 %v27696_v22 }
0x186e   :  { %v38824_v7 = vpop.f32.mrb[94].mxu0  ;;  %v38826_v62 = vpop.f32.mrb[86].mxu1 }
0x186f   :  { %v34114_v26 = vpop.f32.mrb[95].mxu0  ;;  %v34119_v60 = vpop.f32.mrb[87].mxu1  ;;  %v27705_v9 = vsel %vm4973_vm3, %v38826_v62, -inf  ;;  %v27702_v57 = vsel %vm4973_vm3, %v38824_v7, -inf }
0x1870   :  { %27706 = vmax.xlane.f32.xlu1 %v27705_v9  ;;  %27703 = vmax.xlane.f32.xlu0 %v27702_v57 }
0x1872   :  { %v38832_v24 = vpop.f32.mrb[96].mxu0  ;;  %v38834_v51 = vpop.f32.mrb[88].mxu1 }
0x1873   :  { %v34124_v46 = vpop.f32.mrb[97].mxu0  ;;  %v34129_v18 = vpop.f32.mrb[89].mxu1  ;;  %v27711_v30 = vsel %vm4973_vm3, %v38834_v51, -inf  ;;  %v27708_v3 = vsel %vm4973_vm3, %v38832_v24, -inf }
0x1874   :  { %27712 = vmax.xlane.f32.xlu1 %v27711_v30  ;;  %27709 = vmax.xlane.f32.xlu0 %v27708_v3 }
0x1876   :  { %v38840_v39 = vpop.f32.mrb[98].mxu0  ;;  %v38842_v49 = vpop.f32.mrb[90].mxu1 }
0x1877   :  { %v34134_v43 = vpop.f32.mrb[99].mxu0  ;;  %v34139_v40 = vpop.f32.mrb[91].mxu1  ;;  %v27717_v5 = vsel %vm4973_vm3, %v38842_v49, -inf  ;;  %v27714_v28 = vsel %vm4973_vm3, %v38840_v39, -inf }
0x1878   :  { %27718 = vmax.xlane.f32.xlu1 %v27717_v5  ;;  %27715 = vmax.xlane.f32.xlu0 %v27714_v28 }
0x187a   :  { %v38848_v56 = vpop.f32.mrb[100].mxu0  ;;  %v38850_v48 = vpop.f32.mrb[92].mxu1 }
0x187b   :  { %v34144_v37 = vpop.f32.mrb[101].mxu0  ;;  %v34149_v52 = vpop.f32.mrb[93].mxu1  ;;  %v27723_v58 = vsel %vm4973_vm3, %v38850_v48, -inf  ;;  %v27720_v4 = vsel %vm4973_vm3, %v38848_v56, -inf }
0x187c   :  { %27724 = vmax.xlane.f32.xlu1 %v27723_v58  ;;  %27721 = vmax.xlane.f32.xlu0 %v27720_v4 }
0x18ed   :  { %v27683_v6 = vpop.xlane.xlu1 %27682  ;;  %v27680_v17 = vpop.xlane.xlu0 %27679 }
0x18ee   :  { %v27727_v47 = vsub.f32 %v38794_v21, %v27683_v6  ;;  %v27726_v38 = vsub.f32 %v38792_v2, %v27680_v17 }
0x18f0   :  { %v27744_v53 = vmul.f32 1.442695, %v27727_v47  ;;  %v27742_v42 = vmul.f32 1.442695, %v27726_v38 }
0x18f1   :  { %v27689_v22 = vpop.xlane.xlu1 %27688  ;;  %v27686_v26 = vpop.xlane.xlu0 %27685 }
0x18f2   :  { %34623 = vpow2.f32 %v27744_v53  ;;  %v27729_v60 = vsub.f32 %v38802_v29, %v27689_v22  ;;  %v27728_v9 = vsub.f32 %v38800_v63, %v27686_v26 }
0x18f3   :  { %34625 = vpow2.f32 %v27742_v42 }
0x18f4   :  { %v27748_v57 = vmul.f32 1.442695, %v27729_v60  ;;  %v27746_v46 = vmul.f32 1.442695, %v27728_v9 }
0x18f5   :  { %v27695_v18 = vpop.xlane.xlu1 %27694  ;;  %v27692_v30 = vpop.xlane.xlu0 %27691 }
0x18f6   :  { %34627 = vpow2.f32 %v27748_v57  ;;  %v27731_v3 = vsub.f32 %v38810_v61, %v27695_v18  ;;  %v27730_v21 = vsub.f32 %v38808_v50, %v27692_v30 }
0x18f7   :  { %34629 = vpow2.f32 %v27746_v46 }
0x18f8   :  { %v27752_v2 = vmul.f32 1.442695, %v27731_v3  ;;  %v27750_v43 = vmul.f32 1.442695, %v27730_v21 }
0x18f9   :  { %v27701_v40 = vpop.xlane.xlu1 %27700  ;;  %v27698_v5 = vpop.xlane.xlu0 %27697 }
0x18fa   :  { %34631 = vpow2.f32 %v27752_v2  ;;  %v27733_v29 = vsub.f32 %v38818_v59, %v27701_v40  ;;  %v27732_v63 = vsub.f32 %v38816_v13, %v27698_v5 }
0x18fb   :  { %34633 = vpow2.f32 %v27750_v43 }
0x18fc   :  { %v38864_v28 = vpop.eup %34623  ;;  %v27756_v37 = vmul.f32 1.442695, %v27733_v29  ;;  %v27754_v52 = vmul.f32 1.442695, %v27732_v63 }
0x18fd   :  { %v38866_v58 = vpop.eup %34625  ;;  %v27707_v61 = vpop.xlane.xlu1 %27706  ;;  %v27777_v50 = vsel %vm4973_vm3, %v38864_v28, 0.0 }
0x18fe   :  { %v27704_v4 = vpop.xlane.xlu0 %27703  ;;  %34635 = vpow2.f32 %v27756_v37  ;;  %v27735_v6 = vsub.f32 %v38826_v62, %v27707_v61  ;;  %27778 = vadd.xlane.f32.xlu1 %v27777_v50  ;;  %v27774_v13 = vsel %vm4973_vm3, %v38866_v58, 0.0 }
0x18ff   :  { %v27734_v17 = vsub.f32 %v38824_v7, %v27704_v4  ;;  %34637 = vpow2.f32 %v27754_v52  ;;  %27775 = vadd.xlane.f32.xlu0 %v27774_v13 }
0x1900   :  { %v38874_v59 = vpop.eup %34627  ;;  %v27760_v47 = vmul.f32 1.442695, %v27735_v6 }
0x1901   :  { %v27758_v38 = vmul.f32 1.442695, %v27734_v17  ;;  %v38876_v53 = vpop.eup %34629  ;;  %v27713_v42 = vpop.xlane.xlu1 %27712  ;;  %v27783_v26 = vsel %vm4973_vm3, %v38874_v59, 0.0 }
0x1902   :  { %v27710_v22 = vpop.xlane.xlu0 %27709  ;;  %34639 = vpow2.f32 %v27760_v47  ;;  %v27737_v7 = vsub.f32 %v38834_v51, %v27713_v42  ;;  %27784 = vadd.xlane.f32.xlu1 %v27783_v26  ;;  %v27780_v60 = vsel %vm4973_vm3, %v38876_v53, 0.0 }
0x1903   :  { %v27736_v62 = vsub.f32 %v38832_v24, %v27710_v22  ;;  %34641 = vpow2.f32 %v27758_v38  ;;  %27781 = vadd.xlane.f32.xlu0 %v27780_v60 }
0x1904   :  { %v38884_v9 = vpop.eup %34631  ;;  %v27764_v57 = vmul.f32 1.442695, %v27737_v7 }
0x1905   :  { %v27762_v46 = vmul.f32 1.442695, %v27736_v62  ;;  %v38886_v18 = vpop.eup %34633  ;;  %v27719_v30 = vpop.xlane.xlu1 %27718  ;;  %v27789_v21 = vsel %vm4973_vm3, %v38884_v9, 0.0 }
0x1906   :  { %v27716_v3 = vpop.xlane.xlu0 %27715  ;;  %34643 = vpow2.f32 %v27764_v57  ;;  %v27739_v24 = vsub.f32 %v38842_v49, %v27719_v30  ;;  %27790 = vadd.xlane.f32.xlu1 %v27789_v21  ;;  %v27786_v2 = vsel %vm4973_vm3, %v38886_v18, 0.0 }
0x1907   :  { %v27738_v51 = vsub.f32 %v38840_v39, %v27716_v3  ;;  %34645 = vpow2.f32 %v27762_v46  ;;  %27787 = vadd.xlane.f32.xlu0 %v27786_v2 }
0x1908   :  { %v38894_v43 = vpop.eup %34635  ;;  %v27768_v40 = vmul.f32 1.442695, %v27739_v24 }
0x1909   :  { %v27766_v5 = vmul.f32 1.442695, %v27738_v51  ;;  %v38896_v29 = vpop.eup %34637  ;;  %v27725_v63 = vpop.xlane.xlu1 %27724  ;;  %v27795_v52 = vsel %vm4973_vm3, %v38894_v43, 0.0 }
0x190a   :  { %v27722_v37 = vpop.xlane.xlu0 %27721  ;;  %34647 = vpow2.f32 %v27768_v40  ;;  %v27741_v39 = vsub.f32 %v38850_v48, %v27725_v63  ;;  %27796 = vadd.xlane.f32.xlu1 %v27795_v52  ;;  %v27792_v61 = vsel %vm4973_vm3, %v38896_v29, 0.0 }
0x190b   :  { %v27740_v49 = vsub.f32 %v38848_v56, %v27722_v37  ;;  %34649 = vpow2.f32 %v27766_v5  ;;  %27793 = vadd.xlane.f32.xlu0 %v27792_v61  ;;  %v38939_v5 = vld [vmem:[%s39273_s6 + $0x2b] ss:$0 sm:$0xff]  ;;  %v38944_v37 = vld [vmem:[%s39273_s6 + $0x2a] ss:$0 sm:$0xff] }
0x190c   :  { %v38904_v4 = vpop.eup %34639  ;;  %v27772_v50 = vmul.f32 1.442695, %v27741_v39  ;;  %v25607_v61 = vadd.f32 %v38939_v5, %v38764_v1  ;;  %v38961_v1 = vld [vmem:[%s39273_s6 + $0x2c] ss:$0 sm:$0xff] }
0x190d   :  { %v27770_v6 = vmul.f32 1.442695, %v27740_v49  ;;  %v38906_v17 = vpop.eup %34641  ;;  %v27801_v13 = vsel %vm4973_vm3, %v38904_v4, 0.0 }
0x190e   :  { %34651 = vpow2.f32 %v27772_v50  ;;  %27802 = vadd.xlane.f32.xlu1 %v27801_v13  ;;  %v27798_v56 = vsel %vm4973_vm3, %v38906_v17, 0.0  ;;  %v25534_v13 = vadd.f32 %v38944_v37, %v38762_v55 }
0x190f   :  { %34653 = vpow2.f32 %v27770_v6  ;;  %27799 = vadd.xlane.f32.xlu0 %v27798_v56  ;;  %v38955_v56 = vld [vmem:[%s39273_s6 + $0x2d] ss:$0 sm:$0xff] }
0x1910   :  { %v38912_v48 = vpop.eup %34643 }
0x1911   :  { %v38914_v47 = vpop.eup %34645  ;;  %v27807_v38 = vsel %vm4973_vm3, %v38912_v48, 0.0 }
0x1912   :  { %27808 = vadd.xlane.f32.xlu1 %v27807_v38  ;;  %v27804_v42 = vsel %vm4973_vm3, %v38914_v47, 0.0 }
0x1913   :  { %27805 = vadd.xlane.f32.xlu0 %v27804_v42  ;;  %v25753_v42 = vadd.f32 %v38955_v56, %v38770_v20 }
0x1914   :  { %v38920_v22 = vpop.eup %34647 }
0x1915   :  { %v38922_v26 = vpop.eup %34649  ;;  %v27813_v7 = vsel %vm4973_vm3, %v38920_v22, 0.0 }
0x1916   :  { %27814 = vadd.xlane.f32.xlu1 %v27813_v7  ;;  %v27810_v62 = vsel %vm4973_vm3, %v38922_v26, 0.0 }
0x1917   :  { %27811 = vadd.xlane.f32.xlu0 %v27810_v62 }
0x1918   :  { %v38928_v60 = vpop.eup %34651 }
0x1919   :  { %v38930_v57 = vpop.eup %34653  ;;  %v27819_v46 = vsel %vm4973_vm3, %v38928_v60, 0.0 }
0x191a   :  { %27820 = vadd.xlane.f32.xlu1 %v27819_v46  ;;  %v27816_v30 = vsel %vm4973_vm3, %v38930_v57, 0.0  ;;  %v38978_v46 = vld [vmem:[%s39273_s6 + $0x2f] ss:$0 sm:$0xff] }
0x191b   :  { %27817 = vadd.xlane.f32.xlu0 %v27816_v30 }
0x198b   :  { %v27779_v3 = vpop.xlane.xlu1 %27778 }
0x198c   :  { %34655 = vrcp.f32 %v27779_v3  ;;  %v27776_v21 = vpop.xlane.xlu0 %27775 }
0x198d   :  { %34657 = vrcp.f32 %v27776_v21  ;;  %v25899_v21 = vadd.f32 %v38978_v46, %v38774_v19 }
0x198f   :  { %v27785_v24 = vpop.xlane.xlu1 %27784 }
0x1990   :  { %34659 = vrcp.f32 %v27785_v24  ;;  %v27782_v51 = vpop.xlane.xlu0 %27781 }
0x1991   :  { %34661 = vrcp.f32 %v27782_v51 }
0x1993   :  { %v27791_v2 = vpop.xlane.xlu1 %27790 }
0x1994   :  { %34663 = vrcp.f32 %v27791_v2  ;;  %v27788_v40 = vpop.xlane.xlu0 %27787 }
0x1995   :  { %34665 = vrcp.f32 %v27788_v40 }
0x1996   :  { %v34656_v63 = vpop.eup %34655 }
0x1997   :  { %v34658_v52 = vpop.eup %34657  ;;  %v27825_v39 = vmul.f32 %v34656_v63, %v38864_v28  ;;  %v27797_v49 = vpop.xlane.xlu1 %27796 }
0x1998   :  { %v27823_v50 = vmul.f32 %v34658_v52, %v38866_v58  ;;  %34667 = vrcp.f32 %v27797_v49  ;;  %v27794_v6 = vpop.xlane.xlu0 %27793  ;;  %v26179_v49 = vadd.f32 %v38939_v5, %v38782_v34  ;;  %v26249_v5 = vadd.f32 %v38961_v1, %v38784_v54 }
0x1999   :  { %34669 = vrcp.f32 %v27794_v6  ;;  %34158 = vmatmul.mubr.msk.f32.vlgmr.msra.gmra.mrb[94].mxu1 %vm4973_vm3, %v27825_v39 }
0x199a   :  { %v34660_v28 = vpop.eup %34659  ;;  %34153 = vmatmul.mubr.msk.f32.vlgmr.msra.gmra.mrb[102].mxu0 %vm4973_vm3, %v27823_v50  ;;  %34166 = vmatpush3.msra.mxu1 %v25607_v61 }
0x199b   :  { %v34662_v58 = vpop.eup %34661  ;;  %v27829_v55 = vmul.f32 %v34660_v28, %v38874_v59  ;;  %34161 = vmatpush3.msra.mxu0 %v25534_v13  ;;  %v27803_v38 = vpop.xlane.xlu1 %27802  ;;  %34162 = vmatprep.mubr.msk.f32.mxu0 %vm34786_vm1, %v34785_v14  ;;  %v25680_v59 = vadd.f32 %v38961_v1, %v38768_v11  ;;  %v31338_v28 = vld [vmem:[%s39274_s7 + $0x28] sm:$0xf] }
0x199c   :  { %v27827_v7 = vmul.f32 %v34662_v58, %v38876_v53  ;;  %34671 = vrcp.f32 %v27803_v38  ;;  %v27800_v62 = vpop.xlane.xlu0 %27799  ;;  %34167 = vmatprep.mubr.msk.f32.mxu1 %vm34786_vm1, %v34785_v14  ;;  %34170 = vmatprep.subr.mxu0 %v34785_v14  ;;  %v38985_v53 = vld [vmem:[%s39273_s6 + $0x2e] ss:$0 sm:$0xff]  ;;  %v31341_v38 = vld [vmem:[%s39274_s7 + $0x34] sm:$0xf] }
0x199d   :  { %34673 = vrcp.f32 %v27800_v62  ;;  %34175 = vmatprep.subr.mxu1 %v34785_v14  ;;  %34168 = vmatmul.mubr.msk.f32.vlgmr.msra.gmra.mrb[96].mxu1 %vm4973_vm3, %v27829_v55  ;;  %v26389_v6 = vadd.f32 %v38985_v53, %v38788_v45  ;;  %v31336_v45 = vld [vmem:[%s39274_s7 + $0x20] sm:$0xf] }
0x199e   :  { %v34664_v20 = vpop.eup %34663  ;;  %34163 = vmatmul.mubr.msk.f32.vlgmr.msra.gmra.mrb[104].mxu0 %vm4973_vm3, %v27827_v7  ;;  %34176 = vmatpush3.msra.mxu1 %v25753_v42  ;;  %v31340_v7 = vld [vmem:[%s39274_s7 + $0x30] sm:$0xf] }
0x199f   :  { %v34666_v11 = vpop.eup %34665  ;;  %v27833_v30 = vmul.f32 %v34664_v20, %v38884_v9  ;;  %34171 = vmatpush3.msra.mxu0 %v25680_v59  ;;  %v27809_v3 = vpop.xlane.xlu1 %27808  ;;  %34172 = vmatprep.mubr.msk.f32.mxu0 %vm34786_vm1, %v34785_v14  ;;  %v25826_v9 = vadd.f32 %v38985_v53, %v38772_v12  ;;  %v31343_v20 = vld [vmem:[%s39274_s7 + $0x3c] sm:$0xf] }
0x19a0   :  { %v27831_v24 = vmul.f32 %v34666_v11, %v38886_v18  ;;  %34675 = vrcp.f32 %v27809_v3  ;;  %v27806_v51 = vpop.xlane.xlu0 %27805  ;;  %34177 = vmatprep.mubr.msk.f32.mxu1 %vm34786_vm1, %v34785_v14  ;;  %34180 = vmatprep.subr.mxu0 %v34785_v14  ;;  %v31342_v11 = vld [vmem:[%s39274_s7 + $0x38] sm:$0xf] }
0x19a1   :  { %34677 = vrcp.f32 %v27806_v51  ;;  %34185 = vmatprep.subr.mxu1 %v34785_v14  ;;  %34178 = vmatmul.mubr.msk.f32.vlgmr.msra.gmra.mrb[98].mxu1 %vm4973_vm3, %v27833_v30 }
0x19a2   :  { %v34668_v2 = vpop.eup %34667  ;;  %34173 = vmatmul.mubr.msk.f32.vlgmr.msra.gmra.mrb[106].mxu0 %vm4973_vm3, %v27831_v24  ;;  %34186 = vmatpush3.msra.mxu1 %v25899_v21 }
0x19a3   :  { %v34670_v19 = vpop.eup %34669  ;;  %v27837_v18 = vmul.f32 %v34668_v2, %v38894_v43  ;;  %34181 = vmatpush3.msra.mxu0 %v25826_v9  ;;  %v27815_v40 = vpop.xlane.xlu1 %27814  ;;  %34182 = vmatprep.mubr.msk.f32.mxu0 %vm34786_vm1, %v34785_v14 }
0x19a4   :  { %v27835_v63 = vmul.f32 %v34670_v19, %v38896_v29  ;;  %34679 = vrcp.f32 %v27815_v40  ;;  %v27812_v12 = vpop.xlane.xlu0 %27811  ;;  %34187 = vmatprep.mubr.msk.f32.mxu1 %vm34786_vm1, %v34785_v14  ;;  %34190 = vmatprep.subr.mxu0 %v34785_v14 }
0x19a5   :  { %34681 = vrcp.f32 %v27812_v12  ;;  %34195 = vmatprep.subr.mxu1 %v34785_v14  ;;  %34188 = vmatmul.mubr.msk.f32.vlgmr.msra.gmra.mrb[100].mxu1 %vm4973_vm3, %v27837_v18 }
0x19a6   :  { %v34672_v43 = vpop.eup %34671  ;;  %34183 = vmatmul.mubr.msk.f32.vlgmr.msra.gmra.mrb[108].mxu0 %vm4973_vm3, %v27835_v63  ;;  %34196 = vmatpush3.msra.mxu1 %v38778_v0  ;;  %v26109_v0 = vadd.f32 %v38944_v37, %v38780_v36 }
0x19a7   :  { %v34674_v52 = vpop.eup %34673  ;;  %v27841_v29 = vmul.f32 %v34672_v43, %v38904_v4  ;;  %34191 = vmatpush3.msra.mxu0 %v38776_v10  ;;  %v27821_v39 = vpop.xlane.xlu1 %27820  ;;  %34192 = vmatprep.mubr.msk.f32.mxu0 %vm34786_vm1, %v34785_v14 }
0x19a8   :  { %v27839_v61 = vmul.f32 %v34674_v52, %v38906_v17  ;;  %34683 = vrcp.f32 %v27821_v39  ;;  %v27818_v50 = vpop.xlane.xlu0 %27817  ;;  %34197 = vmatprep.mubr.msk.f32.mxu1 %vm34786_vm1, %v34785_v14  ;;  %34200 = vmatprep.subr.mxu0 %v34785_v14  ;;  %v26319_v17 = vadd.f32 %v38955_v56, %v38786_v41 }
0x19a9   :  { %34685 = vrcp.f32 %v27818_v50  ;;  %34205 = vmatprep.subr.mxu1 %v34785_v14  ;;  %34198 = vmatmul.mubr.msk.f32.vlgmr.msra.gmra.mrb[102].mxu1 %vm4973_vm3, %v27841_v29 }
0x19aa   :  { %v34676_v10 = vpop.eup %34675  ;;  %34193 = vmatmul.mubr.msk.f32.vlgmr.msra.gmra.mrb[110].mxu0 %vm4973_vm3, %v27839_v61  ;;  %34206 = vmatpush3.msra.mxu1 %v26179_v49 }
0x19ab   :  { %v34678_v34 = vpop.eup %34677  ;;  %v27845_v4 = vmul.f32 %v34676_v10, %v38912_v48  ;;  %34201 = vmatpush3.msra.mxu0 %v26109_v0  ;;  %34202 = vmatprep.mubr.msk.f32.mxu0 %vm34786_vm1, %v34785_v14 }
0x19ac   :  { %v27843_v36 = vmul.f32 %v34678_v34, %v38914_v47  ;;  %34207 = vmatprep.mubr.msk.f32.mxu1 %vm34786_vm1, %v34785_v14  ;;  %34210 = vmatprep.subr.mxu0 %v34785_v14  ;;  %v26459_v47 = vadd.f32 %v38978_v46, %v38790_v33 }
0x19ad   :  { %34215 = vmatprep.subr.mxu1 %v34785_v14  ;;  %34208 = vmatmul.mubr.msk.f32.vlgmr.msra.gmra.mrb[104].mxu1 %vm4973_vm3, %v27845_v4 }
0x19ae   :  { %v34680_v48 = vpop.eup %34679  ;;  %34203 = vmatmul.mubr.msk.f32.vlgmr.msra.gmra.mrb[112].mxu0 %vm4973_vm3, %v27843_v36  ;;  %34216 = vmatpush3.msra.mxu1 %v26319_v17 }
0x19af   :  { %v34682_v37 = vpop.eup %34681  ;;  %v27849_v41 = vmul.f32 %v34680_v48, %v38920_v22  ;;  %34211 = vmatpush3.msra.mxu0 %v26249_v5  ;;  %34212 = vmatprep.mubr.msk.f32.mxu0 %vm34786_vm1, %v34785_v14 }
0x19b0   :  { %v27847_v54 = vmul.f32 %v34682_v37, %v38922_v26  ;;  %34217 = vmatprep.mubr.msk.f32.mxu1 %vm34786_vm1, %v34785_v14  ;;  %34220 = vmatprep.subr.mxu0 %v34785_v14 }
0x19b1   :  { %34225 = vmatprep.subr.mxu1 %v34785_v14  ;;  %34218 = vmatmul.mubr.msk.f32.vlgmr.msra.gmra.mrb[106].mxu1 %vm4973_vm3, %v27849_v41 }
0x19b2   :  { %v34684_v22 = vpop.eup %34683  ;;  %34213 = vmatmul.mubr.msk.f32.vlgmr.msra.gmra.mrb[114].mxu0 %vm4973_vm3, %v27847_v54  ;;  %34226 = vmatpush3.msra.mxu1 %v26459_v47 }
0x19b3   :  { %v34686_v13 = vpop.eup %34685  ;;  %v27853_v33 = vmul.f32 %v34684_v22, %v38928_v60  ;;  %34221 = vmatpush3.msra.mxu0 %v26389_v6  ;;  %34222 = vmatprep.mubr.msk.f32.mxu0 %vm34786_vm1, %v34785_v14  ;;  %v31337_v60 = vld [vmem:[%s39274_s7 + $0x24] sm:$0xf] }
0x19b4   :  { %v27851_v26 = vmul.f32 %v34686_v13, %v38930_v57  ;;  %34227 = vmatprep.mubr.msk.f32.mxu1 %vm34786_vm1, %v34785_v14  ;;  %34230 = vmatprep.subr.mxu0 %v34785_v14  ;;  %v31339_v57 = vld [vmem:[%s39274_s7 + $0x2c] sm:$0xf] }
0x19b5   :  { %34228 = vmatmul.mubr.msk.f32.vlgmr.msra.gmra.mrb[108].mxu1 %vm4973_vm3, %v27853_v33  ;;  %34235 = vmatprep.subr.mxu1 %v34785_v14 }
0x19b6   :  { %34223 = vmatmul.mubr.msk.f32.vlgmr.msra.gmra.mrb[116].mxu0 %vm4973_vm3, %v27851_v26  ;;  %34237 = vmatprep.mubr.msk.f32.mxu1 %vm34786_vm1, %v34785_v14 }
0x19b7   :  { %34231 = vmatpush3.msk.msra.mxu0 %vm6321_vm4, %v31336_v45  ;;  %34232 = vmatprep.mubr.msk.f32.mxu0 %vm34786_vm1, %v34785_v14 }
0x19b8   :  { %34240 = vmatprep.subr.mxu0 %v34785_v14  ;;  %34236 = vmatpush3.msk.msra.mxu1 %vm6321_vm4, %v31337_v60 }
0x19b9   :  { %34245 = vmatprep.subr.mxu1 %v34785_v14 }
0x1a6c   :  { %v27996_v56 = vpop.f32.mrb[94].mxu1 }
0x1a6d   :  { %v27923_v1 = vpop.f32.mrb[102].mxu0  ;;  %v34159_v58 = vpop.f32.mrb[95].mxu1  ;;  %34238 = vmatmul.mubr.msk.f32.vlgmr.msra.gmra.mrb[110].mxu1 %vm3756_vm2, %v27996_v56 }
0x1a6e   :  { %v34154_v55 = vpop.f32.mrb[103].mxu0  ;;  %34233 = vmatmul.mubr.msk.f32.vlgmr.msra.gmra.mrb[118].mxu0 %vm3756_vm2, %v27923_v1  ;;  %34246 = vmatpush3.msk.msra.mxu1 %vm6321_vm4, %v31339_v57 }
0x1a6f   :  { %34241 = vmatpush3.msk.msra.mxu0 %vm6321_vm4, %v31338_v28  ;;  %34242 = vmatprep.mubr.msk.f32.mxu0 %vm34786_vm1, %v34785_v14 }
0x1a70   :  { %v28142_v42 = vpop.f32.mrb[96].mxu1  ;;  %34247 = vmatprep.mubr.msk.f32.mxu1 %vm34786_vm1, %v34785_v14  ;;  %34250 = vmatprep.subr.mxu0 %v34785_v14 }
0x1a71   :  { %v28069_v62 = vpop.f32.mrb[104].mxu0  ;;  %v34169_v59 = vpop.f32.mrb[97].mxu1  ;;  %34248 = vmatmul.mubr.msk.f32.vlgmr.msra.gmra.mrb[112].mxu1 %vm3756_vm2, %v28142_v42  ;;  %34255 = vmatprep.subr.mxu1 %v34785_v14 }
0x1a72   :  { %v34164_v46 = vpop.f32.mrb[105].mxu0  ;;  %34243 = vmatmul.mubr.msk.f32.vlgmr.msra.gmra.mrb[120].mxu0 %vm3756_vm2, %v28069_v62  ;;  %34256 = vmatpush3.msk.msra.mxu1 %vm6321_vm4, %v31341_v38 }
0x1a73   :  { %34251 = vmatpush3.msk.msra.mxu0 %vm6321_vm4, %v31340_v7  ;;  %34252 = vmatprep.mubr.msk.f32.mxu0 %vm34786_vm1, %v34785_v14 }
0x1a74   :  { %v28288_v53 = vpop.f32.mrb[98].mxu1  ;;  %34257 = vmatprep.mubr.msk.f32.mxu1 %vm34786_vm1, %v34785_v14  ;;  %34260 = vmatprep.subr.mxu0 %v34785_v14 }
0x1a75   :  { %v28215_v30 = vpop.f32.mrb[106].mxu0  ;;  %v34179_v3 = vpop.f32.mrb[99].mxu1  ;;  %34258 = vmatmul.mubr.msk.f32.vlgmr.msra.gmra.mrb[114].mxu1 %vm3756_vm2, %v28288_v53  ;;  %34265 = vmatprep.subr.mxu1 %v34785_v14  ;;  %v34708_v53 = vld [vmem:[#allocation5 + $0x8] sm:$0xff] }
0x1a76   :  { %v34174_v21 = vpop.f32.mrb[107].mxu0  ;;  %34253 = vmatmul.mubr.msk.f32.vlgmr.msra.gmra.mrb[122].mxu0 %vm3756_vm2, %v28215_v30  ;;  %34266 = vmatpush3.msk.msra.mxu1 %vm6321_vm4, %v31343_v20 }
0x1a77   :  { %34261 = vmatpush3.msk.msra.mxu0 %vm6321_vm4, %v31342_v11  ;;  %34262 = vmatprep.mubr.msk.f32.mxu0 %vm34786_vm1, %v34785_v14 }
0x1a78   :  { %v28434_v24 = vpop.f32.mrb[100].mxu1  ;;  %34267 = vmatprep.mubr.msk.f32.mxu1 %vm34786_vm1, %v34785_v14  ;;  %34270 = vmatprep.subr.mxu0 %v34785_v14 }
0x1a79   :  { %v28361_v51 = vpop.f32.mrb[108].mxu0  ;;  %v34189_v9 = vpop.f32.mrb[101].mxu1  ;;  %34268 = vmatmul.mubr.msk.f32.vlgmr.msra.gmra.mrb[116].mxu1 %vm3756_vm2, %v28434_v24  ;;  %34275 = vmatprep.subr.mxu1 %v34785_v14 }
0x1a7a   :  { %v34184_v2 = vpop.f32.mrb[109].mxu0  ;;  %34263 = vmatmul.mubr.msk.f32.vlgmr.msra.gmra.mrb[124].mxu0 %vm3756_vm2, %v28361_v51  ;;  %34276 = vmatpush3.msk.msra.mxu1 %vm6321_vm4, %v31337_v60 }
0x1a7b   :  { %34271 = vmatpush3.msk.msra.mxu0 %vm6321_vm4, %v31336_v45  ;;  %34272 = vmatprep.mubr.msk.f32.mxu0 %vm34786_vm1, %v34785_v14 }
0x1a7c   :  { %v28580_v19 = vpop.f32.mrb[102].mxu1  ;;  %34277 = vmatprep.mubr.msk.f32.mxu1 %vm34786_vm1, %v34785_v14  ;;  %34280 = vmatprep.subr.mxu0 %v34785_v14 }
0x1a7d   :  { %v28507_v18 = vpop.f32.mrb[110].mxu0  ;;  %v34199_v40 = vpop.f32.mrb[103].mxu1  ;;  %34278 = vmatmul.mubr.msk.f32.vlgmr.msra.gmra.mrb[118].mxu1 %vm3756_vm2, %v28580_v19  ;;  %34285 = vmatprep.subr.mxu1 %v34785_v14 }
0x1a7e   :  { %v34194_v63 = vpop.f32.mrb[111].mxu0  ;;  %34273 = vmatmul.mubr.msk.f32.vlgmr.msra.gmra.mrb[126].mxu0 %vm3756_vm2, %v28507_v18  ;;  %34286 = vmatpush3.msk.msra.mxu1 %vm6321_vm4, %v31339_v57 }
0x1a7f   :  { %34281 = vmatpush3.msk.msra.mxu0 %vm6321_vm4, %v31338_v28  ;;  %34282 = vmatprep.mubr.msk.f32.mxu0 %vm34786_vm1, %v34785_v14 }
0x1a80   :  { %v28726_v12 = vpop.f32.mrb[104].mxu1  ;;  %34287 = vmatprep.mubr.msk.f32.mxu1 %vm34786_vm1, %v34785_v14  ;;  %34290 = vmatprep.subr.mxu0 %v34785_v14 }
0x1a81   :  { %v28653_v43 = vpop.f32.mrb[112].mxu0  ;;  %v34209_v52 = vpop.f32.mrb[105].mxu1  ;;  %34288 = vmatmul.mubr.msk.f32.vlgmr.msra.gmra.mrb[120].mxu1 %vm3756_vm2, %v28726_v12  ;;  %34295 = vmatprep.subr.mxu1 %v34785_v14 }
0x1a82   :  { %v34204_v29 = vpop.f32.mrb[113].mxu0  ;;  %34283 = vmatmul.mubr.msk.f32.vlgmr.msra.gmra.mrb[128].mxu0 %vm3756_vm2, %v28653_v43  ;;  %34296 = vmatpush3.msk.msra.mxu1 %vm6321_vm4, %v31341_v38 }
0x1a83   :  { %34291 = vmatpush3.msk.msra.mxu0 %vm6321_vm4, %v31340_v7  ;;  %34292 = vmatprep.mubr.msk.f32.mxu0 %vm34786_vm1, %v34785_v14 }
0x1a84   :  { %v28872_v39 = vpop.f32.mrb[106].mxu1  ;;  %34297 = vmatprep.mubr.msk.f32.mxu1 %vm34786_vm1, %v34785_v14  ;;  %34300 = vmatprep.subr.mxu0 %v34785_v14 }
0x1a85   :  { %v28799_v49 = vpop.f32.mrb[114].mxu0  ;;  %v34219_v61 = vpop.f32.mrb[107].mxu1  ;;  %34298 = vmatmul.mubr.msk.f32.vlgmr.msra.gmra.mrb[122].mxu1 %vm3756_vm2, %v28872_v39  ;;  %34305 = vmatprep.subr.mxu1 %v34785_v14 }
0x1a86   :  { %v34214_v50 = vpop.f32.mrb[115].mxu0  ;;  %34293 = vmatmul.mubr.msk.f32.vlgmr.msra.gmra.mrb[130].mxu0 %vm3756_vm2, %v28799_v49  ;;  %34306 = vmatpush3.msk.msra.mxu1 %vm6321_vm4, %v31343_v20 }
0x1a87   :  { %34301 = vmatpush3.msk.msra.mxu0 %vm6321_vm4, %v31342_v11  ;;  %34302 = vmatprep.mubr.msk.f32.mxu0 %vm34786_vm1, %v34785_v14  ;;  %v30247_v11 = vrot.slane %v34708_v53, %v15087_v32  ;;  %v31549_v53 = vld [vmem:[%s39276_s9 + $0x48] sm:$0xff] }
0x1a88   :  { %v29018_v0 = vpop.f32.mrb[108].mxu1  ;;  %34307 = vmatprep.mubr.msk.f32.mxu1 %vm34786_vm1, %v34785_v14 }
0x1a89   :  { %v28945_v10 = vpop.f32.mrb[116].mxu0  ;;  %v34229_v34 = vpop.f32.mrb[109].mxu1  ;;  %34308 = vmatmul.mubr.msk.f32.vlgmr.msra.gmra.mrb[124].mxu1 %vm3756_vm2, %v29018_v0 }
0x1a8a   :  { %v34224_v4 = vpop.f32.mrb[117].mxu0  ;;  %34303 = vmatmul.mubr.msk.f32.vlgmr.msra.gmra.mrb[132].mxu0 %vm3756_vm2, %v28945_v10 }
0x1b40   :  { %v29170_v17 = vpop.f32.mrb[110].mxu1 }
0x1b41   :  { %v29094_v36 = vpop.f32.mrb[118].mxu0  ;;  %v30215_v5 = vsel %vm74_vm0, %v29170_v17, 0.0  ;;  %v34239_v48 = vpop.f32.mrb[111].mxu1 }
0x1b42   :  { %v30214_v37 = vsel %vm74_vm0, %v29094_v36, 0.0  ;;  %v34234_v41 = vpop.f32.mrb[119].mxu0 }
0x1b43   :  { %v30216_v47 = vadd.f32 %v30215_v5, %v30214_v37 }
0x1b44   :  { %v29322_v54 = vpop.f32.mrb[112].mxu1 }
0x1b45   :  { %v29246_v6 = vpop.f32.mrb[120].mxu0  ;;  %v34249_v22 = vpop.f32.mrb[113].mxu1  ;;  %v30219_v26 = vsel %vm74_vm0, %v29322_v54, 0.0 }
0x1b46   :  { %v30217_v14 = vsel %vm74_vm0, %v29246_v6, 0.0  ;;  %v34244_v13 = vpop.f32.mrb[121].mxu0 }
0x1b47   :  { %v30218_v33 = vadd.f32 %v30217_v14, %v30216_v47 }
0x1b48   :  { %v29474_v45 = vpop.f32.mrb[114].mxu1 }
0x1b49   :  { %v30220_v60 = vadd.f32 %v30219_v26, %v30218_v33  ;;  %v29398_v57 = vpop.f32.mrb[122].mxu0  ;;  %v34259_v56 = vpop.f32.mrb[115].mxu1  ;;  %v30223_v55 = vsel %vm74_vm0, %v29474_v45, 0.0 }
0x1b4a   :  { %v30221_v28 = vsel %vm74_vm0, %v29398_v57, 0.0  ;;  %v34254_v1 = vpop.f32.mrb[123].mxu0 }
0x1b4b   :  { %v30222_v58 = vadd.f32 %v30221_v28, %v30220_v60 }
0x1b4c   :  { %v29626_v38 = vpop.f32.mrb[116].mxu1 }
0x1b4d   :  { %v30224_v42 = vadd.f32 %v30223_v55, %v30222_v58  ;;  %v29550_v7 = vpop.f32.mrb[124].mxu0  ;;  %v34269_v62 = vpop.f32.mrb[117].mxu1  ;;  %v30227_v30 = vsel %vm74_vm0, %v29626_v38, 0.0 }
0x1b4e   :  { %v30225_v59 = vsel %vm74_vm0, %v29550_v7, 0.0  ;;  %v34264_v46 = vpop.f32.mrb[125].mxu0  ;;  %v31546_v62 = vld [vmem:[%s39275_s8 + $0x30] sm:$0xff] }
0x1b4f   :  { %v30226_v20 = vadd.f32 %v30225_v59, %v30224_v42  ;;  %v31545_v42 = vld [vmem:[%s39275_s8 + $0x28] sm:$0xff]  ;;  %v31547_v59 = vld [vmem:[%s39275_s8 + $0x38] sm:$0xff] }
0x1b50   :  { %v29772_v3 = vpop.f32.mrb[118].mxu1  ;;  %v34368_v46 = vpack.c.bf16 %v31547_v59, %v31546_v62 }
0x1b51   :  { %v30228_v21 = vadd.f32 %v30227_v30, %v30226_v20  ;;  %v29699_v24 = vpop.f32.mrb[126].mxu0  ;;  %v30230_v51 = vsel %vm74_vm0, %v29772_v3, 0.0  ;;  %v34279_v9 = vpop.f32.mrb[119].mxu1  ;;  %v31548_v20 = vld [vmem:[%s39276_s9 + $0x40] sm:$0xff]  ;;  %v31551_v3 = vld [vmem:[%s39276_s9 + $0x58] sm:$0xff] }
0x1b52   :  { %v30229_v2 = vsel %vm74_vm0, %v29699_v24, 0.0  ;;  %v34274_v19 = vpop.f32.mrb[127].mxu0  ;;  %v34372_v30 = vpack.c.bf16 %v31549_v53, %v31548_v20  ;;  %v31552_v24 = vld [vmem:[%s39276_s9 + $0x60] sm:$0xff] }
0x1b53   :  { %v30248_v18 = vadd.f32 %v30247_v11, %v30228_v21  ;;  %v30231_v40 = vadd.f32 %v30230_v51, %v30229_v2  ;;  %v31553_v51 = vld [vmem:[%s39276_s9 + $0x68] sm:$0xff] }
0x1b54   :  { %v29918_v63 = vpop.f32.mrb[120].mxu1  ;;  %34373 = vmatprep.subr.bf16.mxu1 %v34372_v30  ;;  %v34380_v9 = vpack.c.bf16 %v31553_v51, %v31552_v24 }
0x1b55   :  { %v29845_v12 = vpop.f32.mrb[128].mxu0  ;;  %v34289_v43 = vpop.f32.mrb[121].mxu1  ;;  %v30250_v52 = vadd.f32 %v30248_v18, %v38167_v31  ;;  %v30234_v49 = vsel %vm74_vm0, %v29918_v63, 0.0  ;;  %34375 = vmatpush3.bf16.msra.mxu1 %v34372_v30 }
0x1b56   :  { %v30232_v23 = vsel %vm74_vm0, %v29845_v12, 0.0  ;;  %v34284_v32 = vpop.f32.mrb[129].mxu0 }
0x1b57   :  { %v30233_v29 = vadd.f32 %v30232_v23, %v30231_v40  ;;  %v30252_v39 = vsel %vm74_vm0, %v30250_v52, 0.0 }
0x1b58   :  { %30253 = vadd.xlane.f32.xlu0 %v30252_v39  ;;  %v30064_v61 = vpop.f32.mrb[122].mxu1 }
0x1b59   :  { %v30235_v50 = vadd.f32 %v30234_v49, %v30233_v29  ;;  %v29991_v0 = vpop.f32.mrb[130].mxu0  ;;  %v34299_v10 = vpop.f32.mrb[123].mxu1  ;;  %v30238_v36 = vsel %vm74_vm0, %v30064_v61, 0.0  ;;  %v39222_v29 = vld [vmem:[#allocation5 + $0x10] sm:$0x3f] }
0x1b5a   :  { %v30236_v34 = vsel %vm74_vm0, %v29991_v0, 0.0  ;;  %v34294_v4 = vpop.f32.mrb[131].mxu0  ;;  %v30289_v39 = vrot.slane %v39222_v29, %v34913_v25 }
0x1b5b   :  { %v30237_v17 = vadd.f32 %v30236_v34, %v30235_v50  ;;  %v30301_v50 = vrot.slane %v39222_v29, %v34916_v27  ;;  %v31554_v27 = vld [vmem:[%s39276_s9 + $0x70] sm:$0xff] }
0x1b5c   :  { %v30210_v31 = vpop.f32.mrb[124].mxu1 }
0x1b5d   :  { %v30239_v5 = vadd.f32 %v30238_v36, %v30237_v17  ;;  %v30137_v48 = vpop.f32.mrb[132].mxu0  ;;  %v34309_v37 = vpop.f32.mrb[125].mxu1  ;;  %v30242_v6 = vsel %vm74_vm0, %v30210_v31, 0.0 }
0x1b5e   :  { %v30240_v41 = vsel %vm74_vm0, %v30137_v48, 0.0  ;;  %v34304_v47 = vpop.f32.mrb[133].mxu0 }
0x1b5f   :  { %v30241_v54 = vadd.f32 %v30240_v41, %v30239_v5  ;;  %v31555_v47 = vld [vmem:[%s39276_s9 + $0x78] sm:$0xff] }
0x1b61   :  { %v30243_v22 = vadd.f32 %v30242_v6, %v30241_v54  ;;  %v34384_v54 = vpack.c.bf16 %v31555_v47, %v31554_v27  ;;  %v30321_v6 = vrot.slane %v39222_v29, %v35935_v16 }
0x1b63   :  { %v30249_v14 = vadd.f32 %v30247_v11, %v30243_v22  ;;  %v31550_v11 = vld [vmem:[%s39276_s9 + $0x50] sm:$0xff]  ;;  %s34787_s9 = smov [#allocation7]  }
0x1b64   :  { %v34376_v21 = vpack.c.bf16 %v31551_v3, %v31550_v11  ;;  %s30551_s14 = sshll.u32 %s34787_s9, 4  ;;  %s30552_s14 = int_to_ptr.vmem [resolvable:$true] %s30551_s14 }
0x1b65   :  { %v30251_v13 = vadd.f32 %v30249_v14, %v38232_v15  ;;  %v31544_v15 = vld [vmem:[%s39275_s8 + $0x20] sm:$0xff]  ;;  %s34753_s15 = scalar_lea.vmem %s30552_s14, 256  ;;  %p34758_p3 = scmp.lt.s32.totalorder %s30552_s14, %s30552_s14 }
0x1b66   :  { %v34364_v7 = vpack.c.bf16 %v31545_v42, %v31544_v15  ;;  %34377 = vmatprep.subr.bf16.mxu1 %v34376_v21  ;;  %p34754_p2 = scmp.ne.s32.totalorder %s30552_s14, %s34753_s15  ;;  %p34759_p4 = scmp.lt.s32.totalorder %s34753_s15, %s34753_s15 }
0x1b67   :  { %v30255_v33 = vsel %vm74_vm0, %v30251_v13, 0.0  ;;  %34379 = vmatpush3.bf16.msra.mxu1 %v34376_v21 }
0x1b68   :  { %30256 = vadd.xlane.f32.xlu1 %v30255_v33  ;;  %34365 = vmatprep.subr.bf16.mxu0 %v34364_v7  ;;  %p34760_p5 = por %p34759_p4, %p34758_p3 }
0x1b69   :  { %34367 = vmatpush3.bf16.msra.mxu0 %v34364_v7  ;;  %34381 = vmatprep.subr.bf16.mxu1 %v34380_v9 }
0x1b6a   :  { %34369 = vmatprep.subr.bf16.mxu0 %v34368_v46  ;;  %p34761_p6 = pnand %p34760_p5, %p34754_p2 }
0x1b6b   :  { %34383 = vmatpush3.bf16.msra.mxu1 %v34380_v9 }
0x1b6c   :  { %34385 = vmatprep.subr.bf16.mxu1 %v34384_v54 }
0x1b6d   :  { %34371 = vmatpush3.bf16.msra.mxu0 %v34368_v46 }
0x1b6f   :  { %34387 = vmatpush3.bf16.msra.mxu1 %v34384_v54 }
0x1be5   :  { %v30254_v26 = vpop.xlane.xlu0 %30253 }
0x1be6   :  { %v30258_v45 = vmul.f32 0.03125, %v30254_v26 }
0x1be8   :  { %v30260_v60 = vsub.f32 %v30250_v52, %v30258_v45 }
0x1bea   :  { %v30262_v57 = vmul.f32 %v30260_v60, %v30260_v60  ;;  %v30290_v61 = vmul.f32 %v30289_v39, %v30260_v60  ;;  %v30408_v60 = vrot.slane %v39222_v29, %v35979_v8 }
0x1bec   :  { %v30264_v56 = vsel %vm74_vm0, %v30262_v57, 0.0 }
0x1bed   :  { %30265 = vadd.xlane.f32.xlu0 %v30264_v56 }
0x1bf5   :  { %v30257_v28 = vpop.xlane.xlu1 %30256 }
0x1bf6   :  { %v30259_v1 = vmul.f32 0.03125, %v30257_v28 }
0x1bf8   :  { %v30261_v58 = vsub.f32 %v30251_v13, %v30259_v1 }
0x1bfa   :  { %v30263_v55 = vmul.f32 %v30261_v58, %v30261_v58  ;;  %v30291_v48 = vmul.f32 %v30289_v39, %v30261_v58  ;;  %v30529_v39 = vrot.slane %v39222_v29, %v35984_v44 }
0x1bfc   :  { %v30267_v38 = vsel %vm74_vm0, %v30263_v55, 0.0 }
0x1bfd   :  { %30268 = vadd.xlane.f32.xlu1 %v30267_v38 }
0x1c7a   :  { %v30266_v2 = vpop.xlane.xlu0 %30265 }
0x1c7b   :  { %v30270_v19 = vmul.f32 0.032258064, %v30266_v2 }
0x1c7d   :  { %34687 = vrsqrt.f32 %v30270_v19  ;;  %vm30274_vm1 = vcmp.eq.f32.partialorder %v30270_v19, inf  ;;  %v30277_v63 = vand.u32 2147483648, %v30270_v19  ;;  %vm30276_vm2 = vcmp.eq.f32.partialorder %v30270_v19, 0.0 }
0x1c87   :  { %v34688_v18 = vpop.eup %34687 }
0x1c88   :  { %v30273_v40 = vmul.f32 %v34688_v18, %v30270_v19 }
0x1c8a   :  { %v30275_v12 = vsel %vm30274_vm1, %v30270_v19, %v30273_v40  ;;  %v30269_v43 = vpop.xlane.xlu1 %30268 }
0x1c8b   :  { %v30278_v52 = vsel %vm30276_vm2, %v30277_v63, %v30275_v12  ;;  %v30271_v23 = vmul.f32 0.032258064, %v30269_v43 }
0x1c8c   :  { %v30292_v32 = vadd.f32 1e-06, %v30278_v52 }
0x1c8d   :  { %34689 = vrsqrt.f32 %v30271_v23  ;;  %vm30281_vm3 = vcmp.eq.f32.partialorder %v30271_v23, inf  ;;  %v30284_v34 = vand.u32 2147483648, %v30271_v23  ;;  %vm30283_vm4 = vcmp.eq.f32.partialorder %v30271_v23, 0.0 }
0x1c8e   :  { %34691 = vrcp.f32 %v30292_v32 }
0x1c97   :  { %v34690_v49 = vpop.eup %34689 }
0x1c98   :  { %v34692_v0 = vpop.eup %34691  ;;  %v30280_v10 = vmul.f32 %v34690_v49, %v30271_v23 }
0x1c99   :  { %v30295_v4 = vmul.f32 %v34692_v0, %v30290_v61  ;;  %v30541_v61 = vrot.slane %v39222_v29, %v36995_v35 }
0x1c9a   :  { %v30282_v17 = vsel %vm30281_vm3, %v30271_v23, %v30280_v10 }
0x1c9b   :  { %v30285_v36 = vsel %vm30283_vm4, %v30284_v34, %v30282_v17  ;;  %v30302_v31 = vadd.f32 %v30301_v50, %v30295_v4 }
0x1c9c   :  { %v30293_v5 = vadd.f32 1e-06, %v30285_v36 }
0x1c9d   :  { %34318 = vmatprep.mubr.msk.f32.mxu0 %vm74_vm0, %v30302_v31 }
0x1c9e   :  { %34693 = vrcp.f32 %v30293_v5 }
0x1ca8   :  { %v34694_v25 = vpop.eup %34693 }
0x1ca9   :  { %v30297_v37 = vmul.f32 %v34694_v25, %v30291_v48 }
0x1cab   :  { %v30303_v41 = vadd.f32 %v30301_v50, %v30297_v37 }
0x1cad   :  { %34319 = vmatmul.mubr.msk.f32.vlgmr.msra.gmra.mrb[134].mxu0 %vm74_vm0, %v30303_v41 }
0x1d80   :  { %v34320_v22 = vpop.f32.mrb[134].mxu0 }
0x1d81   :  { %v30400_v14 = vadd.f32 %v34320_v22, %v30321_v6  ;;  %v30394_v13 = vpop.f32.mrb[135].mxu0 }
0x1d82   :  { %v30395_v33 = vadd.f32 %v30394_v13, %v30321_v6 }
0x1d83   :  { %v30404_v45 = vmax.f32 %v30400_v14, 0.0 }
0x1d84   :  { %v30403_v26 = vmax.f32 %v30395_v33, 0.0 }
0x1d86   :  { %34337 = vmatprep.mubr.msk.f32.mxu1 %vm15194_vm13, %v30403_v26 }
0x1d87   :  { %34338 = vmatmul.mubr.msk.f32.vlgmr.msra.gmra.mrb[126].mxu1 %vm15194_vm13, %v30404_v45 }
0x1e5a   :  { %v34339_v57 = vpop.f32.mrb[126].mxu1 }
0x1e5b   :  { %v30487_v56 = vadd.f32 %v34339_v57, %v30408_v60  ;;  %v30481_v28 = vpop.f32.mrb[127].mxu1 }
0x1e5c   :  { %v30482_v1 = vadd.f32 %v30481_v28, %v30408_v60 }
0x1e5d   :  { %v30491_v58 = vadd.f32 %v30487_v56, %v30303_v41 }
0x1e5e   :  { %v30490_v55 = vadd.f32 %v30482_v1, %v30302_v31 }
0x1e5f   :  { %v30495_v16 = vsel %vm74_vm0, %v30491_v58, 0.0 }
0x1e60   :  { %30496 = vadd.xlane.f32.xlu1 %v30495_v16  ;;  %v30492_v38 = vsel %vm74_vm0, %v30490_v55, 0.0 }
0x1e61   :  { %30493 = vadd.xlane.f32.xlu0 %v30492_v38 }
0x1eed   :  { %v30497_v15 = vpop.xlane.xlu1 %30496 }
0x1eee   :  { %v30499_v42 = vmul.f32 0.03125, %v30497_v15  ;;  %v30494_v7 = vpop.xlane.xlu0 %30493 }
0x1eef   :  { %v30498_v62 = vmul.f32 0.03125, %v30494_v7 }
0x1ef0   :  { %v30501_v59 = vsub.f32 %v30491_v58, %v30499_v42 }
0x1ef1   :  { %v30500_v46 = vsub.f32 %v30490_v55, %v30498_v62 }
0x1ef2   :  { %v30503_v20 = vmul.f32 %v30501_v59, %v30501_v59  ;;  %v30531_v49 = vmul.f32 %v30529_v39, %v30501_v59 }
0x1ef3   :  { %v30502_v8 = vmul.f32 %v30500_v46, %v30500_v46  ;;  %v30530_v0 = vmul.f32 %v30529_v39, %v30500_v46 }
0x1ef4   :  { %v30507_v53 = vsel %vm74_vm0, %v30503_v20, 0.0 }
0x1ef5   :  { %30508 = vadd.xlane.f32.xlu1 %v30507_v53  ;;  %v30504_v11 = vsel %vm74_vm0, %v30502_v8, 0.0 }
0x1ef6   :  { %30505 = vadd.xlane.f32.xlu0 %v30504_v11 }
0x1f82   :  { %v30509_v30 = vpop.xlane.xlu1 %30508 }
0x1f83   :  { %v30511_v3 = vmul.f32 0.032258064, %v30509_v30  ;;  %v30506_v21 = vpop.xlane.xlu0 %30505 }
0x1f84   :  { %v30510_v24 = vmul.f32 0.032258064, %v30506_v21 }
0x1f85   :  { %34695 = vrsqrt.f32 %v30511_v3  ;;  %vm30521_vm11 = vcmp.eq.f32.partialorder %v30511_v3, inf  ;;  %v30524_v19 = vand.u32 2147483648, %v30511_v3  ;;  %vm30523_vm12 = vcmp.eq.f32.partialorder %v30511_v3, 0.0 }
0x1f86   :  { %34697 = vrsqrt.f32 %v30510_v24  ;;  %vm30514_vm13 = vcmp.eq.f32.partialorder %v30510_v24, inf  ;;  %v30517_v63 = vand.u32 2147483648, %v30510_v24  ;;  %vm30516_vm14 = vcmp.eq.f32.partialorder %v30510_v24, 0.0 }
0x1f8f   :  { %v34696_v51 = vpop.eup %34695 }
0x1f90   :  { %v34698_v9 = vpop.eup %34697  ;;  %v30520_v2 = vmul.f32 %v34696_v51, %v30511_v3 }
0x1f91   :  { %v30513_v18 = vmul.f32 %v34698_v9, %v30510_v24 }
0x1f92   :  { %v30522_v40 = vsel %vm30521_vm11, %v30511_v3, %v30520_v2 }
0x1f93   :  { %v30525_v12 = vsel %vm30523_vm12, %v30524_v19, %v30522_v40  ;;  %v30515_v43 = vsel %vm30514_vm13, %v30510_v24, %v30513_v18 }
0x1f94   :  { %v30533_v52 = vadd.f32 1e-06, %v30525_v12  ;;  %v30518_v23 = vsel %vm30516_vm14, %v30517_v63, %v30515_v43 }
0x1f95   :  { %v30532_v32 = vadd.f32 1e-06, %v30518_v23 }
0x1f96   :  { %34699 = vrcp.f32 %v30533_v52 }
0x1f97   :  { %34701 = vrcp.f32 %v30532_v32 }
0x1fa0   :  { %v34700_v50 = vpop.eup %34699 }
0x1fa1   :  { %v34702_v10 = vpop.eup %34701  ;;  %v30537_v34 = vmul.f32 %v34700_v50, %v30531_v49 }
0x1fa2   :  { %v30535_v4 = vmul.f32 %v34702_v10, %v30530_v0 }
0x1fa3   :  { %v30543_v17 = vadd.f32 %v30541_v61, %v30537_v34 }
0x1fa4   :  { %v30542_v36 = vadd.f32 %v30541_v61, %v30535_v4 }
0x1fa5   :  { %30545 = vst.msk [vmem:[#allocation7 + $0x8] sm:$0xff] %vm74_vm0, %v30543_v17 }
0x1fa6   :  { %30544 = vst.msk [vmem:[#allocation7] sm:$0xff] %vm74_vm0, %v30542_v36 }
0x1fa7   :  { %34764 = shalt.err (!%p34761_p6)
}
0x1fa8   :  { %s34765_s17 = scalar_lea.hbm %s39278_s11, 256 }
0x1fa9   :  { %p34766_p7 = scmp.ne.s32.totalorder %s39278_s11, %s34765_s17  ;;  %p34769_p8 = scmp.lt.u32.totalorder %s34765_s17, %s39278_s11 }
0x1fab   :  { %p34771_p9 = pnand %p34769_p8, %p34766_p7 }
0x1fad   :  { %34774 = shalt.err (!%p34771_p9)
}
0x1fae   :  { %30557 = dma.vmem_to_hbm [thread:$0]  %s30552_s14, 256, %s39278_s11, [#allocation4], %s34782_s27, %s34782_s27, %s34783_s28  }
0x1faf   :  { %34779 = dma.done.wait [#allocation4], 256  }
0x1fb0   :  { %34780 = vsyncadd [#allocation4], 4294967040 }
0x1fb1   :  { %30561 = vsyncpa [#allocation3], 1 }
0x1fb2   :  { %30562 = vsyncpa [#allocation6], 1 }
0x1fb3   :  { %30563 = vsyncpa [#allocation4], 1 }

</bundles_post_ra>
